<compile_context>
chip_gen: v7x
topology: tpu7x:2x2x1
jax: 0.10.0
libtpu: 0.0.40
codegen_flags: <defaults>
</compile_context>

<pallas_src>
import math
import functools

import jax
import jax.numpy as jnp
from jax import lax
from jax.experimental import pallas as pl
from jax.experimental.pallas import tpu as pltpu

H_IN = 768      # hidden size
H_MID = 3072    # intermediate size
LN_EPS = 1e-5
CHUNK = 1024    # H_MID streamed in H_MID // CHUNK chunks (grid axis 1)
_INV_SQRT2 = 1.0 / math.sqrt(2.0)


def _ffn_kernel(x_ref, w1_ref, b1_ref, w2_ref, b2_ref, o_ref, xn_ref, acc_ref):
    """One (row-tile, weight-chunk) grid step.

    x_ref  : (tm, H_IN)    input rows (f32), resident across the chunk axis
    w1_ref : (H_IN, CHUNK) bf16, LN-affine folded
    b1_ref : (1, CHUNK)    f32, LN-affine folded
    w2_ref : (CHUNK, H_IN) bf16
    b2_ref : (1, H_IN)     f32
    o_ref  : (tm, H_IN)    output rows
    xn_ref : (tm, H_IN)    bf16 scratch holding LayerNorm'd rows
    acc_ref: (tm, H_IN)    f32 accumulator scratch
    """
    c = pl.program_id(1)
    last = pl.num_programs(1) - 1

    # ---- LayerNorm only once per row tile (affine folded into W1/b1) ----
    @pl.when(c == 0)
    def _():
        x = x_ref[...].astype(jnp.float32)
        mean = jnp.mean(x, axis=-1, keepdims=True)
        xc = x - mean
        var = jnp.mean(xc * xc, axis=-1, keepdims=True)
        xn_ref[...] = (xc * lax.rsqrt(var + LN_EPS)).astype(jnp.bfloat16)

    # ---- Linear1 chunk -> GELU -> Linear2 chunk (bf16 operands, f32 acc) ----
    h = jnp.dot(xn_ref[...], w1_ref[...], preferred_element_type=jnp.float32)
    h = h + b1_ref[...].astype(jnp.float32)
    # GELU (exact, erf-based — matches torch._C._nn.gelu default), in f32.
    g = 0.5 * h * (1.0 + lax.erf(h * _INV_SQRT2))
    part = jnp.dot(g.astype(jnp.bfloat16), w2_ref[...],
                   preferred_element_type=jnp.float32)

    @pl.when(c == 0)
    def _():
        acc_ref[...] = part          # init from first chunk (no zero-fill + add)

    @pl.when(c != 0)
    def _():
        acc_ref[...] = acc_ref[...] + part

    # ---- finalize: add output bias, Dropout(eval) = identity, store ----
    @pl.when(c == last)
    def _():
        y = acc_ref[...] + b2_ref[...].astype(jnp.float32)
        o_ref[...] = y.astype(o_ref.dtype)


def _pick_tm(M):
    """Row tile: multiple of 8 dividing M; prefer an even row-grid (v7x megacore
    balance) with enough grid depth, else the largest workable tile."""
    preferred = (128, 96, 64, 192, 256, 48, 32, 24, 16, 8)
    for t in preferred:                      # even number of row tiles
        if M % t == 0 and (M // t) >= 2 and (M // t) % 2 == 0:
            return t
    for t in preferred:                      # any grid >= 2
        if M % t == 0 and (M // t) >= 2:
            return t
    for t in preferred:                      # single tile fallback
        if M % t == 0:
            return t
    raise ValueError(f"number of rows ({M}) must be a multiple of 8")


def prepare_params(gamma, beta, w1, b1, w2, b2):
    """Fold the LayerNorm affine into the first linear and cast weights to bf16.

      (xn*gamma + beta) @ W1 + b1 = xn @ (gamma[:,None]*W1) + (beta @ W1 + b1)
    """
    w1_folded = (gamma[:, None] * w1).astype(jnp.bfloat16)
    b1_folded = (b1 + beta @ w1).astype(jnp.float32)
    return w1_folded, b1_folded, w2.astype(jnp.bfloat16), b2.astype(jnp.float32)


@functools.partial(jax.jit, static_argnames=("tm",))
def layernorm_ffn(x, w1b, b1f, w2b, b2, tm=None):
    """x: (B, S, H_IN) -> (B, S, H_IN). Weights already prepared via prepare_params."""
    B, S, H = x.shape
    assert H == H_IN
    M = B * S
    if tm is None:
        tm = _pick_tm(M)
    assert M % tm == 0, "rows must be divisible by tile size"
    assert H_MID % CHUNK == 0
    x2d = x.reshape(M, H)

    grid = (M // tm, H_MID // CHUNK)
    out2d = pl.pallas_call(
        _ffn_kernel,
        out_shape=jax.ShapeDtypeStruct((M, H_IN), x.dtype),
        grid_spec=pltpu.PrefetchScalarGridSpec(
            num_scalar_prefetch=0,
            grid=grid,
            in_specs=[
                pl.BlockSpec((tm, H_IN), lambda i, c: (i, 0)),     # x rows (resident over c)
                pl.BlockSpec((H_IN, CHUNK), lambda i, c: (0, c)),  # W1 chunk (bf16, LN-folded)
                pl.BlockSpec((1, CHUNK), lambda i, c: (0, c)),     # b1 chunk (f32, LN-folded)
                pl.BlockSpec((CHUNK, H_IN), lambda i, c: (c, 0)),  # W2 chunk (bf16)
                pl.BlockSpec((1, H_IN), lambda i, c: (0, 0)),      # b2 (f32)
            ],
            out_specs=pl.BlockSpec((tm, H_IN), lambda i, c: (i, 0)),
            scratch_shapes=[
                pltpu.VMEM((tm, H_IN), jnp.bfloat16),   # LayerNorm'd rows
                pltpu.VMEM((tm, H_IN), jnp.float32),    # output accumulator
            ],
        ),
        compiler_params=pltpu.CompilerParams(
            dimension_semantics=("parallel", "arbitrary"),
            vmem_limit_bytes=32 << 20,
        ),
    )(x2d, w1b, b1f.reshape(1, H_MID), w2b, b2.reshape(1, H_IN))

    return out2d.reshape(B, S, H)


def _init_params(key):
    """Deterministic parameter init mimicking PyTorch defaults."""
    k1, k2, k3, k4 = jax.random.split(key, 4)
    # LayerNorm: weight = 1, bias = 0
    gamma = jnp.ones((H_IN,), jnp.float32)
    beta = jnp.zeros((H_IN,), jnp.float32)
    # Linear: U(-1/sqrt(fan_in), 1/sqrt(fan_in)); stored as (in, out) = W^T
    bound1 = 1.0 / math.sqrt(H_IN)
    w1 = jax.random.uniform(k1, (H_IN, H_MID), jnp.float32, -bound1, bound1)
    b1 = jax.random.uniform(k2, (H_MID,), jnp.float32, -bound1, bound1)
    bound2 = 1.0 / math.sqrt(H_MID)
    w2 = jax.random.uniform(k3, (H_MID, H_IN), jnp.float32, -bound2, bound2)
    b2 = jax.random.uniform(k4, (H_IN,), jnp.float32, -bound2, bound2)
    return gamma, beta, w1, b1, w2, b2


def _reference(x, gamma, beta, w1, b1, w2, b2):
    """Pure f32 reference matching the PyTorch module (dropout = eval identity)."""
    mean = jnp.mean(x, axis=-1, keepdims=True)
    var = jnp.mean((x - mean) ** 2, axis=-1, keepdims=True)
    xn = (x - mean) / jnp.sqrt(var + LN_EPS) * gamma + beta
    h = xn @ w1 + b1
    h = 0.5 * h * (1.0 + lax.erf(h / math.sqrt(2.0)))
    y = h @ w2 + b2
    return y


if __name__ == "__main__":
    key = jax.random.PRNGKey(0)
    kx, kp = jax.random.split(key)

    # Shape from the module spec: (B=1, S=384, H=768)
    x = jax.random.normal(kx, (1, 384, H_IN), jnp.float32)
    gamma, beta, w1, b1, w2, b2 = _init_params(kp)

    # One-time weight preparation (LN-affine folding + bf16 cast).
    w1b, b1f, w2b, b2f = prepare_params(gamma, beta, w1, b1, w2, b2)

    out = layernorm_ffn(x, w1b, b1f, w2b, b2f)
    out = jax.block_until_ready(out)

    ref = _reference(x, gamma, beta, w1, b1, w2, b2)
    assert out.shape == x.shape
    # bf16 matmul operands with f32 accumulation vs. a pure-f32 reference:
    # observed error ~1e-3, tolerance loosened accordingly.
    assert jnp.allclose(out, ref, atol=2e-2, rtol=2e-2), (
        float(jnp.max(jnp.abs(out - ref))))

    print("KERNEL_OK")
</pallas_src>

<mosaic_0001>
module attributes {stable_mosaic.version = 11 : i64} {
  func.func @_ffn_kernel(%arg0: i32, %arg1: i32, %arg2: memref<96x768xf32, #tpu.memory_space<vmem>>, %arg3: memref<768x1024xbf16, #tpu.memory_space<vmem>>, %arg4: memref<1x1024xf32, #tpu.memory_space<vmem>>, %arg5: memref<1024x768xbf16, #tpu.memory_space<vmem>>, %arg6: memref<1x768xf32, #tpu.memory_space<vmem>>, %arg7: memref<96x768xf32, #tpu.memory_space<vmem>>, %arg8: memref<96x768xbf16, #tpu.memory_space<vmem>>, %arg9: memref<96x768xf32, #tpu.memory_space<vmem>>) attributes {dimension_semantics = [#tpu.dimension_semantics<parallel>, #tpu.dimension_semantics<arbitrary>], iteration_bounds = array<i64: 4, 3>, scalar_prefetch = 0 : i64, scratch_operands = 2 : i64, tpu.core_type = #tpu.core_type<tc>, window_params = [{transform_indices = @transform_0, window_bounds = array<i64: 96, 768>}, {transform_indices = @transform_1, window_bounds = array<i64: 768, 1024>}, {transform_indices = @transform_2, window_bounds = array<i64: 1, 1024>}, {transform_indices = @transform_3, window_bounds = array<i64: 1024, 768>}, {pipeline_mode = #tpu.pipeline_mode<synchronous>, transform_indices = @transform_4, window_bounds = array<i64: 1, 768>}, {transform_indices = @transform_5, window_bounds = array<i64: 96, 768>}]} {
    %c0_i32 = arith.constant 0 : i32
    %0 = arith.cmpi eq, %arg1, %c0_i32 : i32
    %1 = arith.extui %0 : i1 to i32
    %c0_i32_0 = arith.constant 0 : i32
    %2 = arith.cmpi ne, %1, %c0_i32_0 : i32
    scf.if %2 {
      %c0_17 = arith.constant 0 : index
      %c0_18 = arith.constant 0 : index
      %29 = vector.load %arg2[%c0_17, %c0_18] : memref<96x768xf32, #tpu.memory_space<vmem>>, vector<96x768xf32>
      %cst_19 = arith.constant dense<0.000000e+00> : vector<96xf32>
      %30 = vector.multi_reduction <add>, %29, %cst_19 [1] : vector<96x768xf32> to vector<96xf32>
      %31 = vector.shape_cast %30 : vector<96xf32> to vector<96x1xf32>
      %cst_20 = arith.constant 7.680000e+02 : f32
      %32 = vector.broadcast %cst_20 : f32 to vector<96x1xf32>
      %33 = arith.divf %31, %32 : vector<96x1xf32>
      %34 = vector.broadcast %33 : vector<96x1xf32> to vector<96x768xf32>
      %35 = arith.subf %29, %34 : vector<96x768xf32>
      %36 = arith.mulf %35, %35 : vector<96x768xf32>
      %cst_21 = arith.constant dense<0.000000e+00> : vector<96xf32>
      %37 = vector.multi_reduction <add>, %36, %cst_21 [1] : vector<96x768xf32> to vector<96xf32>
      %38 = vector.shape_cast %37 : vector<96xf32> to vector<96x1xf32>
      %cst_22 = arith.constant 7.680000e+02 : f32
      %39 = vector.broadcast %cst_22 : f32 to vector<96x1xf32>
      %40 = arith.divf %38, %39 : vector<96x1xf32>
      %cst_23 = arith.constant 9.99999974E-6 : f32
      %41 = vector.broadcast %cst_23 : f32 to vector<96x1xf32>
      %42 = arith.addf %40, %41 : vector<96x1xf32>
      %43 = math.rsqrt %42 : vector<96x1xf32>
      %44 = vector.broadcast %43 : vector<96x1xf32> to vector<96x768xf32>
      %45 = arith.mulf %35, %44 : vector<96x768xf32>
      %46 = arith.truncf %45 : vector<96x768xf32> to vector<96x768xbf16>
      %c0_24 = arith.constant 0 : index
      %c0_25 = arith.constant 0 : index
      %47 = vector.load %arg8[%c0_24, %c0_25] : memref<96x768xbf16, #tpu.memory_space<vmem>>, vector<96x768xbf16>
      tpu.vector_store %arg8[%c0_24, %c0_25], %46 {strides = array<i32>} : memref<96x768xbf16, #tpu.memory_space<vmem>>, vector<96x768xbf16>,
    } else {
    }
    %c0 = arith.constant 0 : index
    %c0_1 = arith.constant 0 : index
    %3 = vector.load %arg8[%c0, %c0_1] : memref<96x768xbf16, #tpu.memory_space<vmem>>, vector<96x768xbf16>
    %c0_2 = arith.constant 0 : index
    %c0_3 = arith.constant 0 : index
    %4 = vector.load %arg3[%c0_2, %c0_3] : memref<768x1024xbf16, #tpu.memory_space<vmem>>, vector<768x1024xbf16>
    %cst = arith.constant dense<0.000000e+00> : vector<96x1024xf32>
    %5 = tpu.matmul %3, %4, %cst {dimension_numbers = #tpu.dot_dimension_numbers<[1], [0], [0], [1], [0, 0, 1, 1], [], []>} : vector<96x768xbf16>, vector<768x1024xbf16>, vector<96x1024xf32> -> vector<96x1024xf32>
    %c0_4 = arith.constant 0 : index
    %c0_5 = arith.constant 0 : index
    %6 = vector.load %arg4[%c0_4, %c0_5] : memref<1x1024xf32, #tpu.memory_space<vmem>>, vector<1x1024xf32>
    %7 = vector.broadcast %6 : vector<1x1024xf32> to vector<96x1024xf32>
    %8 = arith.addf %5, %7 : vector<96x1024xf32>
    %cst_6 = arith.constant 5.000000e-01 : f32
    %9 = vector.broadcast %cst_6 : f32 to vector<96x1024xf32>
    %10 = arith.mulf %9, %8 : vector<96x1024xf32>
    %cst_7 = arith.constant 0.707106769 : f32
    %11 = vector.broadcast %cst_7 : f32 to vector<96x1024xf32>
    %12 = arith.mulf %8, %11 : vector<96x1024xf32>
    %13 = math.erf %12 : vector<96x1024xf32>
    %cst_8 = arith.constant 1.000000e+00 : f32
    %14 = vector.broadcast %cst_8 : f32 to vector<96x1024xf32>
    %15 = arith.addf %14, %13 : vector<96x1024xf32>
    %16 = arith.mulf %10, %15 : vector<96x1024xf32>
    %17 = arith.truncf %16 : vector<96x1024xf32> to vector<96x1024xbf16>
    %c0_9 = arith.constant 0 : index
    %c0_10 = arith.constant 0 : index
    %18 = vector.load %arg5[%c0_9, %c0_10] : memref<1024x768xbf16, #tpu.memory_space<vmem>>, vector<1024x768xbf16>
    %cst_11 = arith.constant dense<0.000000e+00> : vector<96x768xf32>
    %19 = tpu.matmul %17, %18, %cst_11 {dimension_numbers = #tpu.dot_dimension_numbers<[1], [0], [0], [1], [0, 0, 1, 1], [], []>} : vector<96x1024xbf16>, vector<1024x768xbf16>, vector<96x768xf32> -> vector<96x768xf32>
    %c0_i32_12 = arith.constant 0 : i32
    %20 = arith.cmpi eq, %arg1, %c0_i32_12 : i32
    %21 = arith.extui %20 : i1 to i32
    %c0_i32_13 = arith.constant 0 : i32
    %22 = arith.cmpi ne, %21, %c0_i32_13 : i32
    scf.if %22 {
      %c0_17 = arith.constant 0 : index
      %c0_18 = arith.constant 0 : index
      %29 = vector.load %arg9[%c0_17, %c0_18] : memref<96x768xf32, #tpu.memory_space<vmem>>, vector<96x768xf32>
      tpu.vector_store %arg9[%c0_17, %c0_18], %19 {strides = array<i32>} : memref<96x768xf32, #tpu.memory_space<vmem>>, vector<96x768xf32>,
    } else {
    }
    %c0_i32_14 = arith.constant 0 : i32
    %23 = arith.cmpi ne, %arg1, %c0_i32_14 : i32
    %24 = arith.extui %23 : i1 to i32
    %c0_i32_15 = arith.constant 0 : i32
    %25 = arith.cmpi ne, %24, %c0_i32_15 : i32
    scf.if %25 {
      %c0_17 = arith.constant 0 : index
      %c0_18 = arith.constant 0 : index
      %29 = vector.load %arg9[%c0_17, %c0_18] : memref<96x768xf32, #tpu.memory_space<vmem>>, vector<96x768xf32>
      %30 = arith.addf %29, %19 : vector<96x768xf32>
      %c0_19 = arith.constant 0 : index
      %c0_20 = arith.constant 0 : index
      %31 = vector.load %arg9[%c0_19, %c0_20] : memref<96x768xf32, #tpu.memory_space<vmem>>, vector<96x768xf32>
      tpu.vector_store %arg9[%c0_19, %c0_20], %30 {strides = array<i32>} : memref<96x768xf32, #tpu.memory_space<vmem>>, vector<96x768xf32>,
    } else {
    }
    %c2_i32 = arith.constant 2 : i32
    %26 = arith.cmpi eq, %arg1, %c2_i32 : i32
    %27 = arith.extui %26 : i1 to i32
    %c0_i32_16 = arith.constant 0 : i32
    %28 = arith.cmpi ne, %27, %c0_i32_16 : i32
    scf.if %28 {
      %c0_17 = arith.constant 0 : index
      %c0_18 = arith.constant 0 : index
      %29 = vector.load %arg9[%c0_17, %c0_18] : memref<96x768xf32, #tpu.memory_space<vmem>>, vector<96x768xf32>
      %c0_19 = arith.constant 0 : index
      %c0_20 = arith.constant 0 : index
      %30 = vector.load %arg6[%c0_19, %c0_20] : memref<1x768xf32, #tpu.memory_space<vmem>>, vector<1x768xf32>
      %31 = vector.broadcast %30 : vector<1x768xf32> to vector<96x768xf32>
      %32 = arith.addf %29, %31 : vector<96x768xf32>
      %c0_21 = arith.constant 0 : index
      %c0_22 = arith.constant 0 : index
      %33 = vector.load %arg7[%c0_21, %c0_22] : memref<96x768xf32, #tpu.memory_space<vmem>>, vector<96x768xf32>
      tpu.vector_store %arg7[%c0_21, %c0_22], %32 {strides = array<i32>} : memref<96x768xf32, #tpu.memory_space<vmem>>, vector<96x768xf32>,
    } else {
    }
    return
  }
  func.func @transform_0(%arg0: i32, %arg1: i32) -> (i32, i32) {
    %c0_i32 = arith.constant 0 : i32
    %c0_i32_0 = arith.constant 0 : i32
    return %arg0, %c0_i32 : i32, i32
  }
  func.func @transform_1(%arg0: i32, %arg1: i32) -> (i32, i32) {
    %c0_i32 = arith.constant 0 : i32
    %c0_i32_0 = arith.constant 0 : i32
    return %c0_i32, %arg1 : i32, i32
  }
  func.func @transform_2(%arg0: i32, %arg1: i32) -> (i32, i32) {
    %c0_i32 = arith.constant 0 : i32
    %c0_i32_0 = arith.constant 0 : i32
    return %c0_i32, %arg1 : i32, i32
  }
  func.func @transform_3(%arg0: i32, %arg1: i32) -> (i32, i32) {
    %c0_i32 = arith.constant 0 : i32
    %c0_i32_0 = arith.constant 0 : i32
    return %arg1, %c0_i32 : i32, i32
  }
  func.func @transform_4(%arg0: i32, %arg1: i32) -> (i32, i32) {
    %c0_i32 = arith.constant 0 : i32
    %c0_i32_0 = arith.constant 0 : i32
    %c0_i32_1 = arith.constant 0 : i32
    return %c0_i32, %c0_i32_0 : i32, i32
  }
  func.func @transform_5(%arg0: i32, %arg1: i32) -> (i32, i32) {
    %c0_i32 = arith.constant 0 : i32
    %c0_i32_0 = arith.constant 0 : i32
    return %arg0, %c0_i32 : i32, i32
  }
}

</mosaic_0001>

<bundles_post_ra>
// kernel: layernorm_ffn.1
= control target key start
LH: loop header
LB: loop body
LE: loop exit
PB: predicated region body
PF: predicated region fallthrough
CT: control target
= control target key end

     0   :  { %s15170_s0 = inlined_call_operand.hbm [shape: f32[384,768], index: 0, kind: input, shape index: {}]   ;;  %s15171_s1 = inlined_call_operand.hbm [shape: bf16[768,3072], index: 1, kind: input, shape index: {}]   ;;  %s15172_s2 = inlined_call_operand.hbm [shape: f32[1,3072], index: 2, kind: input, shape index: {}]   ;;  %s15173_s3 = inlined_call_operand.hbm [shape: bf16[3072,768], index: 3, kind: input, shape index: {}]   ;;  %s15174_s4 = inlined_call_operand.vmem [shape: f32[1,768], index: 4, kind: input, shape index: {}]   ;;  %s15175_s5 = inlined_call_operand.hbm [shape: f32[384,768], index: 5, kind: output, shape index: {}]  }
   0x1   :  { %15280 = sst [smem:[#allocation87_spill]] %s15170_s0 }
   0x2   :  { %15281 = sst [smem:[#allocation88_spill]] %s15171_s1 }
   0x3   :  { %15282 = sst [smem:[#allocation89_spill]] %s15175_s5 }
   0x4   :  { %10 = vsyncpa [#allocation5], 0 }
   0x5   :  { %12 = vsyncpa [#allocation5 + $0x1], 0 }
   0x6   :  { %13 = vsyncpa [#allocation8], 0 }
   0x7   :  { %15 = vsyncpa [#allocation8 + $0x1], 0 }
   0x8   :  { %16 = vsyncpa [#allocation11], 0 }
   0x9   :  { %18 = vsyncpa [#allocation11 + $0x1], 0 }
   0xa   :  { %19 = vsyncpa [#allocation6], 0 }
   0xb   :  { %21 = vsyncpa [#allocation6 + $0x1], 0  ;;  %s11710_s18 = smov 0   ;;  %s11712_s19 = smov 0  }
   0xc   :  { %s11714_s20 = smov 0   ;;  %s11716_s21 = smov 0  }
   0xd   :  { %s11718_s22 = smov 0   ;;  %s11720_s23 = smov 0  }
   0xe   :  { %s11722_s24 = smov 0   ;;  %s11724_s25 = smov 0  }
   0xf   :  { %s11726_s26 = smov 0   ;;  %s11728_s27 = smov 0  }
  0x10   :  { %s11730_s28 = smov 0  }
  0x11 LB: > { %15283 = sst [smem:[#allocation17_spill]] %s11632_s20  ;;  %s36_s29 = sadd.s32 1, %s11656_s26  ;;  %s11664_s28 = sphi %s11730_s28, %s27_s28   ;;  %s11660_s27 = sphi %s11728_s27, %s15518_s27   ;;  %s11656_s26 = sphi %s11726_s26, %s15525_s26   ;;  %s11652_s25 = sphi %s11724_s25, %s15524_s25   ;;  %s11648_s24 = sphi %s11722_s24, %s15523_s24   ;;  %s11644_s23 = sphi %s11720_s23, %s15515_s23   ;;  %s11640_s22 = sphi %s11718_s22, %s15522_s22   ;;  %s11636_s21 = sphi %s11716_s21, %s15521_s21   ;;  %s11632_s20 = sphi %s11714_s20, %s15513_s20   ;;  %s11628_s19 = sphi %s11712_s19, %s15520_s19   ;;  %s11624_s18 = sphi %s11710_s18, %s15519_s18  }
  0x12   : > { %15284 = sst [smem:[#allocation18_spill]] %s11636_s21  ;;  %p15179_p0 = scmp.eq.s32.totalorder %s11664_s28, 0 }
  0x13   : > { %15285 = sst [smem:[#allocation19_spill]] %s11644_s23  ;;  %p11767_p1 = scmp.ge.s32.totalorder %s36_s29, 3 }
  0x14   : > { %15286 = sst [smem:[#allocation20_spill]] %s11652_s25  ;;  %s72_s6 = sadd.s32 1, %s11632_s20 }
  0x15   : > { %15287 = sst [smem:[#allocation21_spill]] %s11660_s27  ;;  %p79_p2 = scmp.ne.s32.totalorder %s11632_s20, %s11628_s19 }
  0x16   : > { %s15288_s30 = scalar_select %p11767_p1, 1, 0 }
  0x17   : > { %s15527_s29 = smov (%p11767_p1, %s36_s29), 0  ;;  %p81_p4 = por %p79_p2, %p15179_p0 }
  0x18   : > { %15289 = sst [smem:[#allocation22_spill]] %s15527_s29  ;;  %s69_s7 = ssub.s32 %s11656_s26, %s15527_s29 }
  0x19   : > { %p15178_p5 = scmp.lt.s32.totalorder %s11664_s28, 12  ;;  %p70_p6 = scmp.eq.s32.totalorder %s69_s7, 0 }
  0x1a   : > { %s233_s8 = sand.u32 1, %s11664_s28   ;;  %s11787_s9 = sand.u32 1, %s11632_s20  }
  0x1b   : > { %s11790_s10 = scalar_select %p70_p6, %s11632_s20, %s72_s6  }
  0x1c   : > { %s15177_s11 = smul.u32 3072, %s11787_s9  ;;  %s9906_s12 = sshll.u32 %s11656_s26, 9 }
  0x1d   : > { %15290 = sst [smem:[#allocation23_spill]] %s11790_s10  ;;  %s15291_s1 = sld [smem:[#allocation88_spill]] }
  0x1e   : > { %p11801_p7 = pnand %p15178_p5, %p81_p4  ;;  %s237_s17 = scalar_lea.vmem [#allocation7], %s15177_s11 }
  0x1f   : > { %s244_s6 = sshll.u32 %s237_s17, 4  ;;  %s11810_s7 = scalar_lea.sflag [#allocation8], %s233_s8  ;;  %s11807_s6 = int_to_ptr.vmem [resolvable:$true] %s244_s6 }
  0x20   : > { %s15292_s16 = scalar_select %p11801_p7, 1, 0 }
  0x21   : > { %p11816_p10 = pneg %p11801_p7 }
  0x23   : > { %s11797_s15 = scalar_lea.hbm %s15291_s1, %s9906_s12  ;;  %s11419_s17 = scalar_lea.hbm %s15291_s1, 147456 }
  0x24   : > { %s11414_s12 = scalar_lea.hbm %s11797_s15, 49152  ;;  %p11420_p13 = scmp.lt.u32.totalorder %s11797_s15, %s15291_s1 }
  0x25   : > { %p11415_p9 = scmp.ne.s32.totalorder %s11797_s15, %s11414_s12  ;;  %p11421_p2 = scmp.lt.u32.totalorder %s11419_s17, %s11414_s12 }
  0x26   : > { %p11423_p6 = scmp.lt.u32.totalorder %s11414_s12, %s11797_s15 }
  0x27   : > { %p11417_p11 = pnand %p11816_p10, %p11415_p9  ;;  %p11422_p4 = por %p11421_p2, %p11420_p13 }
  0x29   : > { %p11418_p12 = pneg %p11417_p11  ;;  %p11424_p5 = por %p11423_p6, %p11422_p4 }
  0x2b   : > { %p11425_p3 = pnand %p11424_p5, %p11418_p12 }
  0x2d   : > { %11428 = shalt.err (!%p11425_p3)
}
  0x2e   : > { %s11429_s8 = scalar_lea.vmem %s11807_s6, 49152  ;;  %s11666_s29 = smov [#allocation7]  }
  0x2f   : > { %p11430_p9 = scmp.ne.s32.totalorder %s11807_s6, %s11429_s8  ;;  %s11434_s14 = sshll.u32 %s11666_s29, 4  ;;  %s11435_s14 = int_to_ptr.vmem [resolvable:$false] %s11434_s14 }
  0x30   : > { %s11436_s10 = scalar_lea.vmem %s11435_s14, 98304  ;;  %p11437_p8 = scmp.lt.s32.totalorder %s11807_s6, %s11435_s14 }
  0x31   : > { %p11432_p11 = pnand %p11430_p9, %p11816_p10  ;;  %p11438_p1 = scmp.lt.s32.totalorder %s11436_s10, %s11429_s8 }
  0x33   : > { %p11433_p0 = pneg %p11432_p11  ;;  %p11439_p13 = por %p11438_p1, %p11437_p8 }
  0x35   : > { %p11440_p2 = pnand %p11439_p13, %p11433_p0 }
  0x37   : > { %11443 = shalt.err (!%p11440_p2)
}
  0x38   : > { %s11667_s11 = smov 1536   ;;  %s11668_s12 = smov 512  }
  0x39   : > { %s11669_s17 = smov 32   ;;  %p293_p0 = scmp.lt.s32.totalorder %s11664_s28, 13 }
  0x3a   : > { %10436 = dma.hbm_to_vmem [thread:$0]  (!%p11801_p7), %s11797_s15, 49152, %s11807_s6, %s11810_s7, %s11667_s11, %s11668_s12, %s11669_s17  }
  0x3b   : > { %p15294_p1 = scmp.ge.s32.totalorder %s11664_s28, 1  ;;  %s11848_s29 = sadd.s32 4294967295, %s11664_s28  }
  0x3c   : > { %s9117_s14 = sadd.s32 4294967294, %s11664_s28   ;;  %s39_s10 = sadd.s32 1, %s11660_s27 }
  0x3d   : > { %p11843_p3 = pnand %p15294_p1, %p293_p0  ;;  %s46_s1 = sadd.s32 1, %s11644_s23 }
  0x3e   : > { %p15296_p5 = scmp.ne.s32.totalorder %s15288_s30, 0  ;;  %p53_p8 = scmp.ne.s32.totalorder %s11644_s23, %s11640_s22 }
  0x3f   : > { %s15295_s8 = scalar_select %p11843_p3, 1, 0 }
  0x40   : > { %s15529_s10 = smov (!%p15296_p5, %s39_s10), %s11660_s27  ;;  %p59_p12 = scmp.ne.s32.totalorder %s11640_s22, %s11636_s21 }
  0x41   : > { %p41_p4 = scmp.ge.s32.totalorder %s15529_s10, 4  ;;  %p60_p6 = scmp.eq.s32.totalorder %s11848_s29, 0 }
  0x42   : > { %p15297_p9 = scmp.eq.s32.totalorder %s11664_s28, 0  ;;  %p182_p13 = scmp.eq.s32.totalorder %s11848_s29, 11 }
  0x43   : > { %s15531_s10 = smov (%p41_p4, %s15529_s10), 0  ;;  %p11873_p2 = por %p60_p6, %p59_p12 }
  0x44   : > { %p11863_p11 = por %p15297_p9, %p53_p8  ;;  %15299 = sst [smem:[#allocation24_spill]] %s15531_s10 }
  0x45   : > { %s15300_s30 = scalar_select %p11873_p2, 1, 0 }
  0x46   : > { %p15301_p0 = scmp.ne.s32.totalorder %s11628_s19, %s11624_s18  ;;  %s43_s11 = ssub.s32 %s11660_s27, %s15531_s10 }
  0x47   : > { %p11886_p5 = por %p182_p13, %p53_p8  ;;  %p44_p9 = scmp.eq.s32.totalorder %s43_s11, 0 }
  0x48   : > { %p11880_p1 = por %p15301_p0, %p60_p6  ;;  %p188_p3 = scmp.eq.s32.totalorder %s9117_s14, 11 }
  0x49   : > { %s15303_s12 = scalar_select %p11886_p5, 1, 0 }
  0x4a   : > { %s15302_s6 = scalar_select %p11880_p1, 1, 0 }
  0x4b   : > { %s211_s17 = sand.u32 1, %s11644_s23   ;;  %p11897_p4 = por %p188_p3, %p59_p12 }
  0x4c   : > { %s11892_s20 = scalar_select %p44_p9, %s11644_s23, %s46_s1  }
  0x4d   : > { %s15305_s5 = scalar_select %p11897_p4, 1, 0 }
  0x4e   : > { %15304 = sst [smem:[#allocation25_spill]] %s11892_s20  ;;  %s10412_s18 = smul.u32 576, %s211_s17 }
  0x4f   : > { %15306 = sst [smem:[#allocation26_spill]] %s15305_s5  ;;  %p15307_p6 = scmp.lt.s32.totalorder %s11664_s28, 12 }
  0x50   : > { %s10448_s10 = smul.u32 9216, %s11660_s27  ;;  %s15309_s0 = sld [smem:[#allocation87_spill]] }
  0x51   : > { %p11905_p0 = pnand %p15307_p6, %p11863_p11  ;;  %s215_s20 = scalar_lea.vmem [#allocation4], %s10412_s18 }
  0x52   : > { %s223_s23 = sshll.u32 %s215_s20, 4  ;;  %s11917_s15 = scalar_lea.sflag [#allocation5], %s211_s17  ;;  %s11915_s23 = int_to_ptr.vmem [resolvable:$true] %s223_s23 }
  0x53   : > { %p11446_p8 = pneg %p11905_p0 }
  0x56   : > { %s11913_s1 = scalar_lea.hbm %s15309_s0, %s10448_s10  ;;  %s11449_s14 = scalar_lea.hbm %s15309_s0, 36864 }
  0x57   : > { %s11444_s5 = scalar_lea.hbm %s11913_s1, 9216  ;;  %p11450_p13 = scmp.lt.u32.totalorder %s11913_s1, %s15309_s0 }
  0x58   : > { %p11445_p3 = scmp.ne.s32.totalorder %s11913_s1, %s11444_s5  ;;  %p11451_p9 = scmp.lt.u32.totalorder %s11449_s14, %s11444_s5 }
  0x59   : > { %p11453_p4 = scmp.lt.u32.totalorder %s11444_s5, %s11913_s1 }
  0x5a   : > { %p11447_p12 = pnand %p11446_p8, %p11445_p3  ;;  %p11452_p6 = por %p11451_p9, %p11450_p13 }
  0x5c   : > { %p11448_p11 = pneg %p11447_p12  ;;  %p11454_p5 = por %p11453_p4, %p11452_p6 }
  0x5e   : > { %p11455_p1 = pnand %p11454_p5, %p11448_p11 }
  0x60   : > { %11458 = shalt.err (!%p11455_p1)
}
  0x61   : > { %s11459_s20 = scalar_lea.vmem %s11915_s23, 9216  ;;  %s11670_s17 = smov [#allocation4]  }
  0x62   : > { %p11460_p3 = scmp.ne.s32.totalorder %s11915_s23, %s11459_s20  ;;  %s11464_s18 = sshll.u32 %s11670_s17, 4  ;;  %s11465_s18 = int_to_ptr.vmem [resolvable:$false] %s11464_s18 }
  0x63   : > { %s11466_s21 = scalar_lea.vmem %s11465_s18, 18432  ;;  %p11467_p7 = scmp.lt.s32.totalorder %s11915_s23, %s11465_s18 }
  0x64   : > { %p11462_p12 = pnand %p11460_p3, %p11446_p8  ;;  %p11468_p13 = scmp.lt.s32.totalorder %s11466_s21, %s11459_s20 }
  0x66   : > { %p11463_p2 = pneg %p11462_p12  ;;  %p11469_p9 = por %p11468_p13, %p11467_p7 }
  0x68   : > { %p11470_p4 = pnand %p11469_p9, %p11463_p2 }
  0x6a   : > { %11473 = shalt.err (!%p11470_p4)
}
  0x6b   : > { %s11671_s5 = smov 768   ;;  %s11672_s27 = smov 48  }
  0x6c   : > { %10433 = dma.hbm_to_vmem [thread:$0]  (!%p11905_p0), %s11913_s1, 9216, %s11915_s23, %s11917_s15, %s11671_s5, %s11671_s5, %s11672_s27  }
  0x6d   : > { %s9123_s10 = sshll.u32 %s11787_s9, 3  ;;  %s9907_s11 = sshll.u32 %s11656_s26, 7 }
  0x6e   : > { %s11950_s20 = scalar_lea.hbm %s15172_s2, %s9907_s11  ;;  %s258_s18 = scalar_lea.vmem [#allocation9], %s9123_s10 }
  0x6f   : > { %s266_s21 = sshll.u32 %s258_s18, 4  ;;  %s11474_s0 = scalar_lea.hbm %s11950_s20, 128  ;;  %s267_s21 = int_to_ptr.vmem [resolvable:$true] %s266_s21 }
  0x70   : > { %p11475_p7 = scmp.ne.s32.totalorder %s11950_s20, %s11474_s0  ;;  %s11479_s1 = scalar_lea.hbm %s15172_s2, 384 }
  0x71   : > { %p11480_p5 = scmp.lt.u32.totalorder %s11950_s20, %s15172_s2  ;;  %p11481_p0 = scmp.lt.u32.totalorder %s11479_s1, %s11474_s0 }
  0x72   : > { %p11477_p2 = pnand %p11475_p7, %p11816_p10  ;;  %p11483_p11 = scmp.lt.u32.totalorder %s11474_s0, %s11950_s20 }
  0x73   : > { %p11482_p8 = por %p11481_p0, %p11480_p5 }
  0x74   : > { %p11478_p1 = pneg %p11477_p2 }
  0x75   : > { %p11484_p6 = por %p11483_p11, %p11482_p8 }
  0x77   : > { %p11485_p3 = pnand %p11484_p6, %p11478_p1 }
  0x79   : > { %11488 = shalt.err (!%p11485_p3)
}
  0x7a   : > { %s11489_s27 = scalar_lea.vmem %s267_s21, 128  ;;  %s11673_s10 = smov [#allocation9]  }
  0x7b   : > { %p11490_p12 = scmp.ne.s32.totalorder %s267_s21, %s11489_s27  ;;  %s11494_s11 = sshll.u32 %s11673_s10, 4  ;;  %s11495_s11 = int_to_ptr.vmem [resolvable:$false] %s11494_s11 }
  0x7c   : > { %s11496_s14 = scalar_lea.vmem %s11495_s11, 256  ;;  %p11497_p4 = scmp.lt.s32.totalorder %s267_s21, %s11495_s11 }
  0x7d   : > { %p11492_p13 = pnand %p11490_p12, %p11816_p10  ;;  %p11498_p7 = scmp.lt.s32.totalorder %s11496_s14, %s11489_s27 }
  0x7f   : > { %p11493_p9 = pneg %p11492_p13  ;;  %p11499_p2 = por %p11498_p7, %p11497_p4 }
  0x81   : > { %p11500_p0 = pnand %p11499_p2, %p11493_p9 }
  0x83   : > { %11503 = shalt.err (!%p11500_p0)
}
  0x84   : > { %p15310_p5 = scmp.ne.s32.totalorder %s15292_s16, 0  ;;  %s10416_s0 = smul.u32 49152, %s11656_s26 }
  0x85   : > { %s15311_s17 = smul.u32 3072, %s11787_s9  ;;  %s274_s5 = scalar_lea.sflag [#allocation11], %s11787_s9 }
  0x86   : > { %10439 = dma.hbm_to_vmem [thread:$0]  (!%p15310_p5), %s11950_s20, 128, %s267_s21, %s11810_s7  }
  0x87   : > { %s277_s18 = scalar_lea.vmem [#allocation10], %s15311_s17  ;;  %s11978_s15 = scalar_lea.hbm %s15173_s3, %s10416_s0 }
  0x88   : > { %s285_s23 = sshll.u32 %s277_s18, 4  ;;  %s11504_s27 = scalar_lea.hbm %s11978_s15, 49152  ;;  %s11973_s23 = int_to_ptr.vmem [resolvable:$true] %s285_s23 }
  0x89   : > { %p11505_p1 = scmp.ne.s32.totalorder %s11978_s15, %s11504_s27  ;;  %s11509_s21 = scalar_lea.hbm %s15173_s3, 147456 }
  0x8a   : > { %p11510_p6 = scmp.lt.u32.totalorder %s11978_s15, %s15173_s3  ;;  %p11511_p3 = scmp.lt.u32.totalorder %s11509_s21, %s11504_s27 }
  0x8b   : > { %p11507_p8 = pnand %p11505_p1, %p11816_p10  ;;  %p11513_p13 = scmp.lt.u32.totalorder %s11504_s27, %s11978_s15 }
  0x8c   : > { %p11512_p12 = por %p11511_p3, %p11510_p6 }
  0x8d   : > { %p11508_p11 = pneg %p11507_p8 }
  0x8e   : > { %p11514_p9 = por %p11513_p13, %p11512_p12 }
  0x90   : > { %p11515_p4 = pnand %p11514_p9, %p11508_p11 }
  0x92   : > { %11518 = shalt.err (!%p11515_p4)
}
  0x93   : > { %s11519_s14 = scalar_lea.vmem %s11973_s23, 49152  ;;  %s11674_s0 = smov [#allocation10]  }
  0x94   : > { %p11520_p7 = scmp.ne.s32.totalorder %s11973_s23, %s11519_s14  ;;  %s11524_s17 = sshll.u32 %s11674_s0, 4  ;;  %s11525_s17 = int_to_ptr.vmem [resolvable:$false] %s11524_s17 }
  0x95   : > { %s11526_s18 = scalar_lea.vmem %s11525_s17, 98304  ;;  %p11527_p1 = scmp.lt.s32.totalorder %s11973_s23, %s11525_s17 }
  0x96   : > { %p11522_p2 = pnand %p11520_p7, %p11816_p10  ;;  %p11528_p8 = scmp.lt.s32.totalorder %s11526_s18, %s11519_s14 }
  0x98   : > { %p11523_p0 = pneg %p11522_p2  ;;  %p11529_p6 = por %p11528_p8, %p11527_p1 }
  0x9a   : > { %p11530_p3 = pnand %p11529_p6, %p11523_p0 }
  0x9c   : > { %11533 = shalt.err (!%p11530_p3)
}
  0x9d   : > { %s11675_s25 = smov 384   ;;  %s11676_s1 = smov 24  }
  0x9e   : > { %10442 = dma.hbm_to_vmem [thread:$0]  (!%p15310_p5), %s11978_s15, 49152, %s11973_s23, %s274_s5, %s11675_s25, %s11675_s25, %s11676_s1  }
  0x9f   : > { %p15312_p10 = scmp.ne.s32.totalorder %s15295_s8, 0 }
  0xa1   : > { %297 = sbr.rel (%p15312_p10) target bundleno = 1956 (0x7a4), region = 40 }
  0xa8   : > { %s12007_s13 = sand.u32 1, %s11640_s22   ;;  %p15313_p11 = scmp.ne.s32.totalorder %s15300_s30, 0 }
  0xa9   : > { %s10417_s27 = smul.u32 576, %s12007_s13  ;;  %s300_s7 = scalar_lea.sflag [#allocation5], %s12007_s13 }
  0xab   : > { %s12011_s20 = scalar_lea.vmem [#allocation4], %s10417_s27 }
  0xac   : > { %11607 = dma.done.wait (%p15313_p11), %s300_s7, 9216  }
  0xad   : > { %11609 = vsyncadd (%p15313_p11), %s300_s7, 4294958080  ;;  %s308_s9 = sand.u32 1, %s11848_s29   ;;  %s310_s16 = sand.u32 1, %s11628_s19  }
  0xae   : > { %s10418_s8 = smul.u32 3072, %s310_s16  ;;  %s309_s23 = scalar_lea.sflag [#allocation8], %s308_s9 }
  0xaf   : > { %p15314_p5 = scmp.ne.s32.totalorder %s15302_s6, 0 }
  0xb0   : > { %s12019_s15 = scalar_lea.vmem [#allocation7], %s10418_s8 }
  0xb1   : > { %11611 = dma.done.wait (%p15314_p5), %s309_s23, 49280  }
  0xb2   : > { %11613 = vsyncadd (%p15314_p5), %s309_s23, 4294918016  ;;  %s9130_s5 = sshll.u32 %s310_s16, 3  ;;  %s327_s30 = scalar_lea.sflag [#allocation11], %s310_s16 }
  0xb3   : > { %s12025_s21 = scalar_lea.vmem [#allocation9], %s9130_s5  ;;  %s12027_s10 = scalar_lea.vmem [#allocation10], %s10418_s8 }
  0xb4   : > { %11615 = dma.done.wait (%p15314_p5), %s327_s30, 49152  }
  0xb5   : > { %11617 = vsyncadd (%p15314_p5), %s327_s30, 4294918144  ;;  %s12033_s29 = scalar_lea.vmem [#allocation12], %s10417_s27  ;;  %p9131_p12 = scmp.ne.s32.totalorder %s11648_s24, 0 }
  0xb7   : > { %380 = sbr.rel (%p9131_p12) target bundleno = 572 (0x23c), region = 60 }
  0xbe   : > { %v12039_v0 = vld [vmem:[%s12011_s20 + $0x60] sm:$0xff]  ;;  %v12042_v1 = vld [vmem:[%s12011_s20 + $0x68] sm:$0xff]  ;;  %v12045_v2 = vld [vmem:[%s12011_s20 + $0x70] sm:$0xff] }
  0xbf   : > { %v12048_v3 = vld [vmem:[%s12011_s20 + $0x78] sm:$0xff]  ;;  %v467_v4 = vadd.f32 %v12042_v1, %v12039_v0  ;;  %v12053_v5 = vld [vmem:[%s12011_s20] sm:$0xff]  ;;  %v12056_v6 = vld [vmem:[%s12011_s20 + $0x8] sm:$0xff] }
  0xc0   : > { %v12059_v7 = vld [vmem:[%s12011_s20 + $0x10] sm:$0xff]  ;;  %v12062_v8 = vld [vmem:[%s12011_s20 + $0x80] sm:$0xff]  ;;  %v12066_v10 = vld [vmem:[%s12011_s20 + $0x18] sm:$0xff]  ;;  %v453_v11 = vadd.f32 %v12056_v6, %v12053_v5 }
  0xc1   : > { %v468_v9 = vadd.f32 %v467_v4, %v12045_v2  ;;  %v12071_v12 = vld [vmem:[%s12011_s20 + $0x90] sm:$0xff]  ;;  %v12074_v13 = vld [vmem:[%s12011_s20 + $0x98] sm:$0xff]  ;;  %v12077_v14 = vld [vmem:[%s12011_s20 + $0xa0] sm:$0xff] }
  0xc2   : > { %v12080_v15 = vld [vmem:[%s12011_s20 + $0x88] sm:$0xff]  ;;  %v12084_v17 = vld [vmem:[%s12011_s20 + $0x20] sm:$0xff]  ;;  %v454_v18 = vadd.f32 %v453_v11, %v12059_v7  ;;  %v474_v20 = vadd.f32 %v12074_v13, %v12071_v12  ;;  %v12093_v21 = vld [vmem:[%s12011_s20 + $0x30] sm:$0xff] }
  0xc3   : > { %v469_v16 = vadd.f32 %v468_v9, %v12048_v3  ;;  %v12088_v19 = vld [vmem:[%s12011_s20 + $0xa8] sm:$0xff]  ;;  %v12096_v22 = vld [vmem:[%s12011_s20 + $0x38] sm:$0xff]  ;;  %v12099_v23 = vld [vmem:[%s12011_s20 + $0x40] sm:$0xff] }
  0xc4   : > { %v12103_v25 = vld [vmem:[%s12011_s20 + $0x28] sm:$0xff]  ;;  %v455_v26 = vadd.f32 %v454_v18, %v12066_v10  ;;  %v12107_v27 = vld [vmem:[%s12011_s20 + $0xb0] sm:$0xff]  ;;  %v475_v28 = vadd.f32 %v474_v20, %v12077_v14  ;;  %v460_v29 = vadd.f32 %v12096_v22, %v12093_v21  ;;  %v12119_v32 = vld [vmem:[%s12011_s20 + $0xf8] sm:$0xff] }
  0xc5   : > { %v470_v24 = vadd.f32 %v469_v16, %v12062_v8  ;;  %v12113_v30 = vld [vmem:[%s12011_s20 + $0x48] sm:$0xff]  ;;  %v12116_v31 = vld [vmem:[%s12011_s20 + $0xf0] sm:$0xff]  ;;  %v12124_v35 = vld [vmem:[%s12011_s20 + $0xb8] sm:$0xff] }
  0xc6   : > { %v456_v34 = vadd.f32 %v455_v26, %v12084_v17  ;;  %v476_v36 = vadd.f32 %v475_v28, %v12088_v19  ;;  %v12128_v37 = vld [vmem:[%s12011_s20 + $0x50] sm:$0xff]  ;;  %v461_v38 = vadd.f32 %v460_v29, %v12099_v23  ;;  %v12132_v39 = vld [vmem:[%s12011_s20 + $0x100] sm:$0xff]  ;;  %v12135_v40 = vld [vmem:[%s12011_s20 + $0x58] sm:$0xff]  ;;  %v488_v41 = vadd.f32 %v12119_v32, %v12116_v31 }
  0xc7   : > { %v471_v33 = vadd.f32 %v470_v24, %v12080_v15  ;;  %v12140_v42 = vld [vmem:[%s12011_s20 + $0xc0] sm:$0xff]  ;;  %v12143_v43 = vld [vmem:[%s12011_s20 + $0xc8] sm:$0xff]  ;;  %v12146_v44 = vld [vmem:[%s12011_s20 + $0xd0] sm:$0xff] }
  0xc8   : > { %v457_v45 = vadd.f32 %v456_v34, %v12103_v25  ;;  %v477_v46 = vadd.f32 %v476_v36, %v12107_v27  ;;  %v462_v47 = vadd.f32 %v461_v38, %v12113_v30  ;;  %v12152_v48 = vld [vmem:[%s12011_s20 + $0x108] sm:$0xff]  ;;  %v12155_v49 = vld [vmem:[%s12011_s20 + $0x110] sm:$0xff]  ;;  %v12158_v50 = vld [vmem:[%s12011_s20 + $0xd8] sm:$0xff]  ;;  %v481_v51 = vadd.f32 %v12143_v43, %v12140_v42 }
  0xc9   : > { %472 = vadd.xlane.f32.xlu1 %v471_v33  ;;  %v489_v52 = vadd.f32 %v488_v41, %v12132_v39  ;;  %v12164_v53 = vld [vmem:[%s12011_s20 + $0x150] sm:$0xff]  ;;  %v12167_v54 = vld [vmem:[%s12011_s20 + $0x158] sm:$0xff]  ;;  %v12170_v55 = vld [vmem:[%s12011_s20 + $0x160] sm:$0xff] }
  0xca   : > { %15315 = vst [vmem:[#allocation27_spill] sm:$0xff] %v12167_v54  ;;  %15316 = vst [vmem:[#allocation28_spill] sm:$0xff] %v12170_v55  ;;  %458 = vadd.xlane.f32.xlu0 %v457_v45  ;;  %v478_v56 = vadd.f32 %v477_v46, %v12124_v35  ;;  %v463_v57 = vadd.f32 %v462_v47, %v12128_v37  ;;  %v12175_v58 = vld [vmem:[%s12011_s20 + $0x118] sm:$0xff]  ;;  %v12178_v59 = vld [vmem:[%s12011_s20 + $0xe0] sm:$0xff]  ;;  %v482_v60 = vadd.f32 %v481_v51, %v12146_v44 }
  0xcb   : > { %v12182_v61 = vld [vmem:[%s12011_s20 + $0x168] sm:$0xff]  ;;  %v502_v62 = vadd.f32 %v12167_v54, %v12164_v53  ;;  %v490_v63 = vadd.f32 %v489_v52, %v12152_v48  ;;  %v12188_v4 = vld [vmem:[%s12011_s20 + $0x120] sm:$0xff]  ;;  %v12194_v11 = vld [vmem:[%s12011_s20 + $0x130] sm:$0xff] }
  0xcc   : > { %15317 = vst [vmem:[#allocation29_spill] sm:$0xff] %v12182_v61  ;;  %v12191_v9 = vld [vmem:[%s12011_s20 + $0x128] sm:$0xff]  ;;  %v464_v16 = vadd.f32 %v463_v57, %v12135_v40  ;;  %v483_v20 = vadd.f32 %v482_v60, %v12158_v50  ;;  %v12202_v24 = vld [vmem:[%s12011_s20 + $0x170] sm:$0xff]  ;;  %v12206_v28 = vld [vmem:[%s12011_s20 + $0x138] sm:$0xff] }
  0xcd   : > { %479 = vadd.xlane.f32.xlu1 %v478_v56  ;;  %v12198_v18 = vld [vmem:[%s12011_s20 + $0xe8] sm:$0xff]  ;;  %15318 = vst [vmem:[#allocation30_spill] sm:$0xff] %v12202_v24  ;;  %v503_v26 = vadd.f32 %v502_v62, %v12170_v55  ;;  %v495_v29 = vadd.f32 %v12191_v9, %v12188_v4  ;;  %v491_v33 = vadd.f32 %v490_v63, %v12155_v49  ;;  %v12212_v34 = vld [vmem:[%s12011_s20 + $0x1b0] sm:$0xff]  ;;  %v12215_v36 = vld [vmem:[%s12011_s20 + $0x1b8] sm:$0xff] }
  0xce   : > { %15319 = vst [vmem:[#allocation31_spill] sm:$0xff] %v12212_v34  ;;  %15320 = vst [vmem:[#allocation32_spill] sm:$0xff] %v12215_v36  ;;  %v12218_v38 = vld [vmem:[%s12011_s20 + $0x1c0] sm:$0xff]  ;;  %465 = vadd.xlane.f32.xlu0 %v464_v16  ;;  %v484_v41 = vadd.f32 %v483_v20, %v12178_v59  ;;  %v12222_v45 = vld [vmem:[%s12011_s20 + $0x178] sm:$0xff]  ;;  %v516_v52 = vadd.f32 %v12215_v36, %v12212_v34 }
  0xcf   : > { %15321 = vst [vmem:[#allocation33_spill] sm:$0xff] %v12218_v38  ;;  %15322 = vst [vmem:[#allocation34_spill] sm:$0xff] %v12222_v45  ;;  %v504_v46 = vadd.f32 %v503_v26, %v12182_v61  ;;  %v12226_v47 = vld [vmem:[%s12011_s20 + $0x140] sm:$0xff]  ;;  %v496_v51 = vadd.f32 %v495_v29, %v12194_v11  ;;  %v492_v56 = vadd.f32 %v491_v33, %v12175_v58  ;;  %v12233_v57 = vld [vmem:[%s12011_s20 + $0x1c8] sm:$0xff] }
  0xd0   : > { %15323 = vst [vmem:[#allocation35_spill] sm:$0xff] %v12233_v57  ;;  %v12236_v60 = vld [vmem:[%s12011_s20 + $0x180] sm:$0xff]  ;;  %v12239_v62 = vld [vmem:[%s12011_s20 + $0x188] sm:$0xff]  ;;  %v485_v63 = vadd.f32 %v484_v41, %v12198_v18  ;;  %v12248_v29 = vld [vmem:[%s12011_s20 + $0x1d0] sm:$0xff]  ;;  %v517_v33 = vadd.f32 %v516_v52, %v12218_v38 }
  0xd1   : > { %15324 = vst [vmem:[#allocation36_spill] sm:$0xff] %v12236_v60  ;;  %15325 = vst [vmem:[#allocation37_spill] sm:$0xff] %v12239_v62  ;;  %v505_v16 = vadd.f32 %v504_v46, %v12202_v24  ;;  %v12244_v20 = vld [vmem:[%s12011_s20 + $0x148] sm:$0xff]  ;;  %v497_v26 = vadd.f32 %v496_v51, %v12206_v28  ;;  %v12252_v36 = vld [vmem:[%s12011_s20 + $0x190] sm:$0xff]  ;;  %493 = vadd.xlane.f32.xlu1 %v492_v56  ;;  %v509_v41 = vadd.f32 %v12239_v62, %v12236_v60 }
  0xd2   : > { %15326 = vst [vmem:[#allocation38_spill] sm:$0xff] %v12244_v20  ;;  %15327 = vst [vmem:[#allocation39_spill] sm:$0xff] %v12252_v36  ;;  %v12257_v46 = vld [vmem:[%s12011_s20 + $0x210] sm:$0xff]  ;;  %v12260_v34 = vld [vmem:[%s12011_s20 + $0x218] sm:$0xff]  ;;  %486 = vadd.xlane.f32.xlu0 %v485_v63  ;;  %v518_v56 = vadd.f32 %v517_v33, %v12233_v57 }
  0xd3   : > { %15328 = vst [vmem:[#allocation40_spill] sm:$0xff] %v12257_v46  ;;  %15329 = vst [vmem:[#allocation41_spill] sm:$0xff] %v12260_v34  ;;  %v12263_v24 = vld [vmem:[%s12011_s20 + $0x220] sm:$0xff]  ;;  %v506_v51 = vadd.f32 %v505_v16, %v12222_v45  ;;  %v498_v52 = vadd.f32 %v497_v26, %v12226_v47  ;;  %v12268_v38 = vld [vmem:[%s12011_s20 + $0x1d8] sm:$0xff]  ;;  %v530_v60 = vadd.f32 %v12260_v34, %v12257_v46 }
  0xd4   : > { %15330 = vst [vmem:[#allocation42_spill] sm:$0xff] %v12263_v24  ;;  %15331 = vst [vmem:[#allocation43_spill] sm:$0xff] %v12268_v38  ;;  %v12272_v61 = vld [vmem:[%s12011_s20 + $0x198] sm:$0xff]  ;;  %v12275_v62 = vld [vmem:[%s12011_s20 + $0x228] sm:$0xff]  ;;  %v510_v63 = vadd.f32 %v509_v41, %v12252_v36  ;;  %v519_v57 = vadd.f32 %v518_v56, %v12248_v29 }
  0xd5   : > { %15332 = vst [vmem:[#allocation44_spill] sm:$0xff] %v12275_v62  ;;  %v12281_v55 = vld [vmem:[%s12011_s20 + $0x1e0] sm:$0xff]  ;;  %v12284_v16 = vld [vmem:[%s12011_s20 + $0x1e8] sm:$0xff]  ;;  %v12287_v26 = vld [vmem:[%s12011_s20 + $0x1f0] sm:$0xff]  ;;  %v499_v33 = vadd.f32 %v498_v52, %v12244_v20  ;;  %v531_v54 = vadd.f32 %v530_v60, %v12263_v24  ;;  %507 = vadd.xlane.f32.xlu1 %v506_v51 }
  0xd6   : > { %15333 = vst [vmem:[#allocation45_spill] sm:$0xff] %v12281_v55  ;;  %15334 = vst [vmem:[#allocation46_spill] sm:$0xff] %v12284_v16  ;;  %v12292_v45 = vld [vmem:[%s12011_s20 + $0x1a0] sm:$0xff]  ;;  %v523_v34 = vadd.f32 %v12284_v16, %v12281_v55  ;;  %v511_v41 = vadd.f32 %v510_v63, %v12272_v61  ;;  %v12299_v46 = vld [vmem:[%s12011_s20 + $0x230] sm:$0xff]  ;;  %v520_v52 = vadd.f32 %v519_v57, %v12268_v38 }
  0xd7   : > { %15335 = vst [vmem:[#allocation47_spill] sm:$0xff] %v12287_v26  ;;  %v12302_v36 = vld [vmem:[%s12011_s20 + $0x1f8] sm:$0xff]  ;;  %500 = vadd.xlane.f32.xlu0 %v499_v33  ;;  %v12306_v20 = vld [vmem:[%s12011_s20 + $0x1a8] sm:$0xff]  ;;  %v532_v56 = vadd.f32 %v531_v54, %v12275_v62  ;;  %v12315_v51 = vld [vmem:[%s12011_s20 + $0x200] sm:$0xff] }
  0xd8   : > { %v524_v60 = vadd.f32 %v523_v34, %v12287_v26  ;;  %v512_v24 = vadd.f32 %v511_v41, %v12292_v45  ;;  %v12312_v16 = vld [vmem:[%s12011_s20 + $0x238] sm:$0xff]  ;;  %v12321_v57 = vld [vmem:[%s12011_s20 + $0x208] sm:$0xff] }
  0xd9   : > { %v533_v63 = vadd.f32 %v532_v56, %v12299_v46  ;;  %521 = vadd.xlane.f32.xlu1 %v520_v52 }
  0xda   : > { %v525_v55 = vadd.f32 %v524_v60, %v12302_v36  ;;  %v513_v33 = vadd.f32 %v512_v24, %v12306_v20 }
  0xdb   : > { %v534_v38 = vadd.f32 %v533_v63, %v12312_v16 }
  0xdc   : > { %v526_v54 = vadd.f32 %v525_v55, %v12315_v51  ;;  %514 = vadd.xlane.f32.xlu0 %v513_v33 }
  0xdd   : > { %535 = vadd.xlane.f32.xlu1 %v534_v38 }
  0xde   : > { %v527_v34 = vadd.f32 %v526_v54, %v12321_v57 }
  0xe0   : > { %528 = vadd.xlane.f32.xlu0 %v527_v34 }
 0x156   : > { %v473_v41 = vpop.xlane.xlu1 %472 }
 0x157   : > { %v540_v62 = vmul.f32 0.0013020834, %v473_v41  ;;  %v459_v26 = vpop.xlane.xlu0 %458 }
 0x158   : > { %v538_v56 = vmul.f32 0.0013020834, %v459_v26 }
 0x159   : > { %v12327_v60 = vsub.f32 %v12039_v0, %v540_v62  ;;  %v12330_v24 = vsub.f32 %v12042_v1, %v540_v62  ;;  %v12342_v33 = vsub.f32 %v12045_v2, %v540_v62  ;;  %v12351_v1 = vsub.f32 %v12048_v3, %v540_v62 }
 0x15a   : > { %v480_v52 = vpop.xlane.xlu1 %479  ;;  %v12333_v63 = vsub.f32 %v12053_v5, %v538_v56  ;;  %v12336_v55 = vsub.f32 %v12056_v6, %v538_v56  ;;  %v12339_v38 = vsub.f32 %v12059_v7, %v538_v56  ;;  %v12345_v0 = vsub.f32 %v12066_v10, %v538_v56 }
 0x15b   : > { %15336 = vst [vmem:[#allocation48_spill] sm:$0xff] %v12327_v60  ;;  %15337 = vst [vmem:[#allocation49_spill] sm:$0xff] %v12330_v24  ;;  %v466_v26 = vpop.xlane.xlu0 %465  ;;  %v12348_v54 = vsub.f32 %v12084_v17, %v538_v56  ;;  %v634_v5 = vmul.f32 %v12327_v60, %v12327_v60  ;;  %v12356_v7 = vsub.f32 %v12103_v25, %v538_v56  ;;  %v541_v34 = vmul.f32 0.0013020834, %v480_v52 }
 0x15c   : > { %15338 = vst [vmem:[#allocation50_spill] sm:$0xff] %v12333_v63  ;;  %15339 = vst [vmem:[#allocation51_spill] sm:$0xff] %v12336_v55  ;;  %v539_v6 = vmul.f32 0.0013020834, %v466_v26  ;;  %v622_v2 = vmul.f32 %v12333_v63, %v12333_v63  ;;  %v623_v10 = vmul.f32 %v12336_v55, %v12336_v55  ;;  %v12363_v17 = vsub.f32 %v12062_v8, %v540_v62 }
 0x15d   : > { %15340 = vst [vmem:[#allocation52_spill] sm:$0xff] %v12339_v38  ;;  %15341 = vst [vmem:[#allocation53_spill] sm:$0xff] %v12342_v33  ;;  %v12366_v3 = vsub.f32 %v12080_v15, %v540_v62  ;;  %v635_v41 = vmul.f32 %v12330_v24, %v12330_v24  ;;  %v624_v25 = vmul.f32 %v12339_v38, %v12339_v38 }
 0x15e   : > { %15342 = vst [vmem:[#allocation54_spill] sm:$0xff] %v12348_v54  ;;  %15343 = vst [vmem:[#allocation55_spill] sm:$0xff] %v12351_v1  ;;  %v494_v26 = vpop.xlane.xlu1 %493  ;;  %v625_v56 = vmul.f32 %v12345_v0, %v12345_v0  ;;  %v694_v60 = vadd.f32 %v623_v10, %v622_v2  ;;  %v636_v52 = vmul.f32 %v12342_v33, %v12342_v33 }
 0x15f   : > { %15344 = vst [vmem:[#allocation56_spill] sm:$0xff] %v12356_v7  ;;  %15345 = vst [vmem:[#allocation57_spill] sm:$0xff] %v12363_v17  ;;  %v487_v55 = vpop.xlane.xlu0 %486  ;;  %v626_v8 = vmul.f32 %v12348_v54, %v12348_v54  ;;  %v637_v15 = vmul.f32 %v12351_v1, %v12351_v1  ;;  %v708_v62 = vadd.f32 %v635_v41, %v634_v5  ;;  %v12391_v33 = vmul.f32 0.0013020834, %v494_v26 }
 0x160   : > { %15346 = vst [vmem:[#allocation58_spill] sm:$0xff] %v12366_v3  ;;  %v12381_v24 = vsub.f32 %v12093_v21, %v539_v6  ;;  %v627_v38 = vmul.f32 %v12356_v7, %v12356_v7  ;;  %v695_v63 = vadd.f32 %v694_v60, %v624_v25  ;;  %v12386_v2 = vsub.f32 %v12096_v22, %v539_v6 }
 0x161   : > { %v12389_v10 = vsub.f32 %v12099_v23, %v539_v6  ;;  %v638_v54 = vmul.f32 %v12363_v17, %v12363_v17  ;;  %v639_v5 = vmul.f32 %v12366_v3, %v12366_v3  ;;  %v709_v21 = vadd.f32 %v708_v62, %v636_v52 }
 0x162   : > { %15347 = vst [vmem:[#allocation59_spill] sm:$0xff] %v12381_v24  ;;  %v508_v41 = vpop.xlane.xlu1 %507  ;;  %v696_v1 = vadd.f32 %v695_v63, %v625_v56  ;;  %v12398_v7 = vsub.f32 %v12113_v30, %v539_v6  ;;  %v628_v22 = vmul.f32 %v12381_v24, %v12381_v24  ;;  %v629_v23 = vmul.f32 %v12386_v2, %v12386_v2 }
 0x163   : > { %v542_v60 = vmul.f32 0.0013020834, %v487_v55  ;;  %v710_v25 = vadd.f32 %v709_v21, %v637_v15  ;;  %v12405_v17 = vsub.f32 %v12128_v37, %v539_v6  ;;  %v12408_v3 = vsub.f32 %v12135_v40, %v539_v6 }
 0x164   : > { %v501_v26 = vpop.xlane.xlu0 %500  ;;  %v12410_v52 = vmul.f32 0.0013020834, %v508_v41  ;;  %v697_v63 = vadd.f32 %v696_v1, %v626_v8  ;;  %v630_v30 = vmul.f32 %v12389_v10, %v12389_v10  ;;  %v701_v56 = vadd.f32 %v629_v23, %v628_v22 }
 0x165   : > { %v711_v62 = vadd.f32 %v710_v25, %v638_v54  ;;  %v12415_v24 = vsub.f32 %v12071_v12, %v541_v34  ;;  %v12418_v55 = vsub.f32 %v12074_v13, %v541_v34  ;;  %v12421_v37 = vsub.f32 %v12077_v14, %v541_v34 }
 0x166   : > { %v522_v15 = vpop.xlane.xlu1 %521  ;;  %v698_v40 = vadd.f32 %v697_v63, %v627_v38  ;;  %v631_v6 = vmul.f32 %v12398_v7, %v12398_v7  ;;  %v702_v1 = vadd.f32 %v701_v56, %v630_v30  ;;  %v12426_v8 = vsub.f32 %v12088_v19, %v541_v34 }
 0x167   : > { %v12428_v21 = vmul.f32 0.0013020834, %v501_v26  ;;  %v632_v12 = vmul.f32 %v12405_v17, %v12405_v17  ;;  %v12433_v13 = vsub.f32 %v12107_v27, %v541_v34  ;;  %v640_v14 = vmul.f32 %v12415_v24, %v12415_v24 }
 0x168   : > { %699 = vadd.xlane.f32.xlu0 %v698_v40  ;;  %v633_v38 = vmul.f32 %v12408_v3, %v12408_v3  ;;  %v703_v41 = vadd.f32 %v702_v1, %v631_v6  ;;  %v641_v19 = vmul.f32 %v12418_v55, %v12418_v55  ;;  %v642_v22 = vmul.f32 %v12421_v37, %v12421_v37 }
 0x169   : > { %v515_v54 = vpop.xlane.xlu0 %514  ;;  %v712_v23 = vadd.f32 %v711_v62, %v639_v5  ;;  %v12444_v26 = vsub.f32 %v12124_v35, %v541_v34  ;;  %v643_v27 = vmul.f32 %v12426_v8, %v12426_v8  ;;  %v12449_v25 = vsub.f32 %v12140_v42, %v542_v60 }
 0x16a   : > { %v536_v63 = vpop.xlane.xlu1 %535  ;;  %v704_v30 = vadd.f32 %v703_v41, %v632_v12  ;;  %v715_v56 = vadd.f32 %v641_v19, %v640_v14  ;;  %v12452_v40 = vsub.f32 %v12143_v43, %v542_v60  ;;  %v12455_v6 = vsub.f32 %v12146_v44, %v542_v60 }
 0x16b   : > { %v12457_v1 = vmul.f32 0.0013020834, %v522_v15  ;;  %v12459_v5 = vmul.f32 0.0013020834, %v515_v54  ;;  %v644_v35 = vmul.f32 %v12433_v13, %v12433_v13  ;;  %v12464_v34 = vsub.f32 %v12158_v50, %v542_v60 }
 0x16c   : > { %713 = vadd.xlane.f32.xlu0 %v712_v23  ;;  %v705_v42 = vadd.f32 %v704_v30, %v633_v38  ;;  %v716_v62 = vadd.f32 %v715_v56, %v642_v22  ;;  %v646_v43 = vmul.f32 %v12449_v25, %v12449_v25  ;;  %v647_v44 = vmul.f32 %v12452_v40, %v12452_v40 }
 0x16d   : > { %v12470_v12 = vmul.f32 0.0013020834, %v536_v63  ;;  %v529_v15 = vpop.xlane.xlu0 %528  ;;  %v645_v14 = vmul.f32 %v12444_v26, %v12444_v26  ;;  %v12475_v54 = vsub.f32 %v12178_v59, %v542_v60  ;;  %v648_v50 = vmul.f32 %v12455_v6, %v12455_v6 }
 0x16e   : > { %706 = vadd.xlane.f32.xlu1 %v705_v42  ;;  %v717_v38 = vadd.f32 %v716_v62, %v643_v27  ;;  %v649_v41 = vmul.f32 %v12464_v34, %v12464_v34  ;;  %v722_v19 = vadd.f32 %v647_v44, %v646_v43  ;;  %v12483_v22 = vsub.f32 %v12116_v31, %v12391_v33 }
 0x16f   : > { %v12486_v23 = vsub.f32 %v12198_v18, %v542_v60  ;;  %v12490_v59 = vsub.f32 %v12119_v32, %v12391_v33  ;;  %v12494_v63 = vsub.f32 %v12132_v39, %v12391_v33  ;;  %v12498_v27 = vsub.f32 %v12152_v48, %v12391_v33 }
 0x170   : > { %v12500_v30 = vmul.f32 0.0013020834, %v529_v15  ;;  %v718_v56 = vadd.f32 %v717_v38, %v644_v35  ;;  %v723_v31 = vadd.f32 %v722_v19, %v648_v50  ;;  %v652_v18 = vmul.f32 %v12483_v22, %v12483_v22 }
 0x171   : > { %v650_v60 = vmul.f32 %v12475_v54, %v12475_v54  ;;  %v12508_v32 = vsub.f32 %v12155_v49, %v12391_v33  ;;  %v653_v39 = vmul.f32 %v12490_v59, %v12490_v59  ;;  %v654_v48 = vmul.f32 %v12494_v63, %v12494_v63 }
 0x172   : > { %v719_v42 = vadd.f32 %v718_v56, %v645_v14  ;;  %v724_v62 = vadd.f32 %v723_v31, %v649_v41  ;;  %v655_v35 = vmul.f32 %v12498_v27, %v12498_v27  ;;  %v12518_v43 = vsub.f32 %v12188_v4, %v12428_v21 }
 0x173   : > { %v729_v44 = vadd.f32 %v653_v39, %v652_v18  ;;  %v12522_v49 = vsub.f32 %v12191_v9, %v12428_v21  ;;  %v12526_v15 = vsub.f32 %v12194_v11, %v12428_v21  ;;  %v12530_v14 = vsub.f32 %v12206_v28, %v12428_v21  ;;  %v15351_v39 = vld [vmem:[#allocation27_spill] sm:$0xff] }
 0x174   : > { %720 = vadd.xlane.f32.xlu1 %v719_v42  ;;  %v651_v50 = vmul.f32 %v12486_v23, %v12486_v23  ;;  %v725_v38 = vadd.f32 %v724_v62, %v650_v60  ;;  %v12536_v4 = vsub.f32 %v12175_v58, %v12391_v33  ;;  %v658_v9 = vmul.f32 %v12518_v43, %v12518_v43  ;;  %v15353_v42 = vld [vmem:[#allocation28_spill] sm:$0xff] }
 0x175   : > { %15348 = vst [vmem:[#allocation60_spill] sm:$0xff] %v12530_v14  ;;  %v656_v11 = vmul.f32 %v12508_v32, %v12508_v32  ;;  %v730_v41 = vadd.f32 %v729_v44, %v654_v48  ;;  %v659_v28 = vmul.f32 %v12522_v49, %v12522_v49  ;;  %v660_v19 = vmul.f32 %v12526_v15, %v12526_v15  ;;  %v15355_v44 = vld [vmem:[#allocation38_spill] sm:$0xff] }
 0x176   : > { %v726_v56 = vadd.f32 %v725_v38, %v651_v50  ;;  %v12548_v31 = vsub.f32 %v12226_v47, %v12428_v21  ;;  %v661_v58 = vmul.f32 %v12530_v14, %v12530_v14  ;;  %v12554_v33 = vsub.f32 %v12164_v53, %v12410_v52  ;;  %v15356_v53 = vld [vmem:[#allocation29_spill] sm:$0xff] }
 0x177   : > { %v731_v18 = vadd.f32 %v730_v41, %v655_v35  ;;  %v736_v60 = vadd.f32 %v659_v28, %v658_v9  ;;  %v12558_v48 = vsub.f32 %v15351_v39, %v12410_v52  ;;  %v12562_v62 = vsub.f32 %v15353_v42, %v12410_v52 }
 0x178   : > { %15349 = vst [vmem:[#allocation61_spill] sm:$0xff] %v12548_v31  ;;  %15350 = vst [vmem:[#allocation62_spill] sm:$0xff] %v12554_v33  ;;  %727 = vadd.xlane.f32.xlu0 %v726_v56  ;;  %v657_v47 = vmul.f32 %v12536_v4, %v12536_v4  ;;  %v12568_v50 = vsub.f32 %v15355_v44, %v12428_v21  ;;  %v12572_v35 = vsub.f32 %v15356_v53, %v12410_v52  ;;  %v15358_v21 = vld [vmem:[#allocation30_spill] sm:$0xff]  ;;  %v15359_v53 = vld [vmem:[#allocation36_spill] sm:$0xff] }
 0x179   : > { %15352 = vst [vmem:[#allocation27_spill] sm:$0xff] %v12558_v48  ;;  %15354 = vst [vmem:[#allocation28_spill] sm:$0xff] %v12562_v62  ;;  %v664_v38 = vmul.f32 %v12554_v33, %v12554_v33  ;;  %v732_v9 = vadd.f32 %v731_v18, %v656_v11  ;;  %v737_v41 = vadd.f32 %v736_v60, %v660_v19 }
 0x17a   : > { %15357 = vst [vmem:[#allocation38_spill] sm:$0xff] %v12572_v35  ;;  %v665_v28 = vmul.f32 %v12558_v48, %v12558_v48  ;;  %v666_v56 = vmul.f32 %v12562_v62, %v12562_v62  ;;  %v662_v39 = vmul.f32 %v12548_v31, %v12548_v31  ;;  %v12584_v42 = vsub.f32 %v15358_v21, %v12410_v52  ;;  %v15360_v48 = vld [vmem:[#allocation37_spill] sm:$0xff]  ;;  %v15361_v21 = vld [vmem:[#allocation34_spill] sm:$0xff] }
 0x17b   : > { %v667_v44 = vmul.f32 %v12572_v35, %v12572_v35  ;;  %v12590_v11 = vsub.f32 %v15359_v53, %v12459_v5  ;;  %v733_v19 = vadd.f32 %v732_v9, %v657_v47  ;;  %v738_v18 = vadd.f32 %v737_v41, %v661_v58  ;;  %v15362_v35 = vld [vmem:[#allocation39_spill] sm:$0xff] }
 0x17c   : > { %v743_v60 = vadd.f32 %v665_v28, %v664_v38  ;;  %v12594_v62 = vsub.f32 %v15360_v48, %v12459_v5  ;;  %v663_v33 = vmul.f32 %v12568_v50, %v12568_v50  ;;  %v12600_v31 = vsub.f32 %v15361_v21, %v12410_v52  ;;  %v15366_v53 = vld [vmem:[#allocation31_spill] sm:$0xff]  ;;  %v15368_v21 = vld [vmem:[#allocation33_spill] sm:$0xff] }
 0x17d   : > { %v12604_v14 = vsub.f32 %v15362_v35, %v12459_v5  ;;  %v12608_v47 = vsub.f32 %v12272_v61, %v12459_v5  ;;  %734 = vadd.xlane.f32.xlu1 %v733_v19  ;;  %v739_v58 = vadd.f32 %v738_v18, %v662_v39  ;;  %v670_v48 = vmul.f32 %v12590_v11, %v12590_v11 }
 0x17e   : > { %v744_v38 = vadd.f32 %v743_v60, %v666_v56  ;;  %v671_v9 = vmul.f32 %v12594_v62, %v12594_v62  ;;  %v668_v52 = vmul.f32 %v12584_v42, %v12584_v42  ;;  %v12618_v35 = vsub.f32 %v12292_v45, %v12459_v5  ;;  %v15367_v60 = vld [vmem:[#allocation32_spill] sm:$0xff] }
 0x17f   : > { %15363 = vst [vmem:[#allocation29_spill] sm:$0xff] %v12604_v14  ;;  %15364 = vst [vmem:[#allocation30_spill] sm:$0xff] %v12608_v47  ;;  %v672_v61 = vmul.f32 %v12604_v14, %v12604_v14  ;;  %v673_v41 = vmul.f32 %v12608_v47, %v12608_v47  ;;  %v740_v28 = vadd.f32 %v739_v58, %v663_v33  ;;  %v15369_v47 = vld [vmem:[#allocation35_spill] sm:$0xff] }
 0x180   : > { %15365 = vst [vmem:[#allocation36_spill] sm:$0xff] %v12618_v35  ;;  %v745_v56 = vadd.f32 %v744_v38, %v667_v44  ;;  %v750_v39 = vadd.f32 %v671_v9, %v670_v48  ;;  %v12626_v19 = vsub.f32 %v15366_v53, %v12457_v1  ;;  %v669_v18 = vmul.f32 %v12600_v31, %v12600_v31 }
 0x181   : > { %v12632_v45 = vsub.f32 %v15367_v60, %v12457_v1  ;;  %v12636_v14 = vsub.f32 %v15368_v21, %v12457_v1  ;;  %v12640_v33 = vsub.f32 %v15369_v47, %v12457_v1  ;;  %741 = vadd.xlane.f32.xlu0 %v740_v28  ;;  %v12644_v58 = vsub.f32 %v12306_v20, %v12459_v5  ;;  %v15372_v60 = vld [vmem:[#allocation46_spill] sm:$0xff]  ;;  %v15374_v21 = vld [vmem:[#allocation47_spill] sm:$0xff] }
 0x182   : > { %v746_v44 = vadd.f32 %v745_v56, %v668_v52  ;;  %v751_v38 = vadd.f32 %v750_v39, %v672_v61  ;;  %v676_v48 = vmul.f32 %v12626_v19, %v12626_v19  ;;  %v674_v9 = vmul.f32 %v12618_v35, %v12618_v35  ;;  %v15370_v61 = vld [vmem:[#allocation45_spill] sm:$0xff] }
 0x183   : > { %v12652_v53 = vsub.f32 %v12248_v29, %v12457_v1  ;;  %v677_v47 = vmul.f32 %v12632_v45, %v12632_v45  ;;  %v678_v52 = vmul.f32 %v12636_v14, %v12636_v14  ;;  %v679_v5 = vmul.f32 %v12640_v33, %v12640_v33 }
 0x184   : > { %v747_v28 = vadd.f32 %v746_v44, %v669_v18  ;;  %v752_v20 = vadd.f32 %v751_v38, %v673_v41  ;;  %v12662_v56 = vsub.f32 %v15370_v61, %v12500_v30  ;;  %v12666_v29 = vsub.f32 %v15372_v60, %v12500_v30  ;;  %v15377_v38 = vld [vmem:[#allocation43_spill] sm:$0xff] }
 0x185   : > { %v757_v39 = vadd.f32 %v677_v47, %v676_v48  ;;  %v12670_v35 = vsub.f32 %v15374_v21, %v12500_v30  ;;  %v12674_v18 = vsub.f32 %v12302_v36, %v12500_v30  ;;  %v675_v41 = vmul.f32 %v12644_v58, %v12644_v58 }
 0x186   : > { %15371 = vst [vmem:[#allocation37_spill] sm:$0xff] %v12662_v56  ;;  %15373 = vst [vmem:[#allocation34_spill] sm:$0xff] %v12666_v29  ;;  %748 = vadd.xlane.f32.xlu1 %v747_v28  ;;  %v753_v44 = vadd.f32 %v752_v20, %v674_v9  ;;  %v12680_v48 = vsub.f32 %v15377_v38, %v12457_v1  ;;  %v682_v47 = vmul.f32 %v12662_v56, %v12662_v56  ;;  %v15379_v20 = vld [vmem:[#allocation40_spill] sm:$0xff] }
 0x187   : > { %15375 = vst [vmem:[#allocation39_spill] sm:$0xff] %v12670_v35  ;;  %15376 = vst [vmem:[#allocation31_spill] sm:$0xff] %v12674_v18  ;;  %v680_v61 = vmul.f32 %v12652_v53, %v12652_v53  ;;  %v758_v60 = vadd.f32 %v757_v39, %v678_v52  ;;  %v683_v36 = vmul.f32 %v12666_v29, %v12666_v29  ;;  %v15381_v39 = vld [vmem:[#allocation41_spill] sm:$0xff] }
 0x188   : > { %v684_v28 = vmul.f32 %v12670_v35, %v12670_v35  ;;  %v754_v21 = vadd.f32 %v753_v44, %v675_v41  ;;  %v12692_v9 = vsub.f32 %v12315_v51, %v12500_v30  ;;  %v685_v1 = vmul.f32 %v12674_v18, %v12674_v18  ;;  %v15383_v35 = vld [vmem:[#allocation42_spill] sm:$0xff] }
 0x189   : > { %v12698_v38 = vsub.f32 %v15379_v20, %v12470_v12  ;;  %v759_v56 = vadd.f32 %v758_v60, %v679_v5  ;;  %v764_v52 = vadd.f32 %v683_v36, %v682_v47  ;;  %v12702_v29 = vsub.f32 %v15381_v39, %v12470_v12  ;;  %v15386_v20 = vld [vmem:[#allocation44_spill] sm:$0xff] }
 0x18a   : > { %15378 = vst [vmem:[#allocation32_spill] sm:$0xff] %v12692_v9  ;;  %v12706_v41 = vsub.f32 %v15383_v35, %v12470_v12  ;;  %755 = vadd.xlane.f32.xlu0 %v754_v21  ;;  %v681_v51 = vmul.f32 %v12680_v48, %v12680_v48  ;;  %v12712_v44 = vsub.f32 %v12321_v57, %v12500_v30 }
 0x18b   : > { %15380 = vst [vmem:[#allocation33_spill] sm:$0xff] %v12698_v38  ;;  %15382 = vst [vmem:[#allocation35_spill] sm:$0xff] %v12702_v29  ;;  %v12716_v5 = vsub.f32 %v15386_v20, %v12470_v12  ;;  %v688_v47 = vmul.f32 %v12698_v38, %v12698_v38  ;;  %v760_v60 = vadd.f32 %v759_v56, %v680_v61 }
 0x18c   : > { %15384 = vst [vmem:[#allocation45_spill] sm:$0xff] %v12706_v41  ;;  %15385 = vst [vmem:[#allocation46_spill] sm:$0xff] %v12712_v44  ;;  %v765_v36 = vadd.f32 %v764_v52, %v684_v28  ;;  %v689_v35 = vmul.f32 %v12702_v29, %v12702_v29  ;;  %v690_v21 = vmul.f32 %v12706_v41, %v12706_v41 }
 0x18d   : > { %15387 = vst [vmem:[#allocation47_spill] sm:$0xff] %v12716_v5  ;;  %v686_v39 = vmul.f32 %v12692_v9, %v12692_v9  ;;  %v12728_v57 = vsub.f32 %v12299_v46, %v12470_v12  ;;  %v761_v30 = vadd.f32 %v760_v60, %v681_v51  ;;  %v691_v38 = vmul.f32 %v12716_v5, %v12716_v5 }
 0x18e   : > { %v766_v20 = vadd.f32 %v765_v36, %v685_v1  ;;  %v771_v56 = vadd.f32 %v689_v35, %v688_v47  ;;  %v687_v61 = vmul.f32 %v12712_v44, %v12712_v44  ;;  %v12736_v52 = vsub.f32 %v12312_v16, %v12470_v12 }
 0x18f   : > { %15388 = vst [vmem:[#allocation43_spill] sm:$0xff] %v12728_v57  ;;  %762 = vadd.xlane.f32.xlu1 %v761_v30  ;;  %v692_v46 = vmul.f32 %v12728_v57, %v12728_v57 }
 0x190   : > { %v767_v28 = vadd.f32 %v766_v20, %v686_v39  ;;  %15389 = vst [vmem:[#allocation40_spill] sm:$0xff] %v12736_v52  ;;  %v772_v9 = vadd.f32 %v771_v56, %v690_v21  ;;  %v693_v1 = vmul.f32 %v12736_v52, %v12736_v52 }
 0x192   : > { %v768_v41 = vadd.f32 %v767_v28, %v687_v61  ;;  %v773_v51 = vadd.f32 %v772_v9, %v691_v38 }
 0x194   : > { %769 = vadd.xlane.f32.xlu0 %v768_v41  ;;  %v774_v47 = vadd.f32 %v773_v51, %v692_v46 }
 0x196   : > { %v775_v60 = vadd.f32 %v774_v47, %v693_v1  ;;  %v15390_v1 = vld [vmem:[#allocation50_spill] sm:$0xff] }
 0x198   : > { %776 = vadd.xlane.f32.xlu1 %v775_v60  ;;  %v15391_v60 = vld [vmem:[#allocation51_spill] sm:$0xff] }
 0x1f5   : > { %v700_v36 = vpop.xlane.xlu0 %699 }
 0x1f6   : > { %v778_v35 = vmul.f32 0.0013020834, %v700_v36 }
 0x1f8   : > { %v790_v39 = vadd.f32 1e-05, %v778_v35 }
 0x1f9   : > { %v714_v30 = vpop.xlane.xlu0 %713 }
 0x1fa   : > { %v780_v20 = vmul.f32 0.0013020834, %v714_v30  ;;  %10548 = vrsqrt.f32 %v790_v39  ;;  %v15392_v30 = vld [vmem:[#allocation52_spill] sm:$0xff] }
 0x1fb   : > { %v707_v16 = vpop.xlane.xlu1 %706 }
 0x1fc   : > { %v779_v12 = vmul.f32 0.0013020834, %v707_v16  ;;  %v792_v56 = vadd.f32 1e-05, %v780_v20  ;;  %v15393_v20 = vld [vmem:[#allocation54_spill] sm:$0xff] }
 0x1fe   : > { %v791_v21 = vadd.f32 1e-05, %v779_v12 }
 0x200   : > { %10550 = vrsqrt.f32 %v791_v21  ;;  %v15394_v21 = vld [vmem:[#allocation56_spill] sm:$0xff] }
 0x201   : > { %v721_v61 = vpop.xlane.xlu1 %720  ;;  %10552 = vrsqrt.f32 %v792_v56 }
 0x202   : > { %v781_v9 = vmul.f32 0.0013020834, %v721_v61 }
 0x204   : > { %v793_v38 = vadd.f32 1e-05, %v781_v9  ;;  %v10549_v28 = vpop.eup %10548  ;;  %v15395_v9 = vld [vmem:[#allocation59_spill] sm:$0xff] }
 0x205   : > { %v728_v41 = vpop.xlane.xlu0 %727  ;;  %v814_v47 = vmul.f32 %v10549_v28, %v15390_v1  ;;  %v815_v36 = vmul.f32 %v10549_v28, %v15391_v60  ;;  %v816_v39 = vmul.f32 %v10549_v28, %v15392_v30  ;;  %v817_v16 = vmul.f32 %v10549_v28, %v12345_v0 }
 0x206   : > { %10554 = vrsqrt.f32 %v793_v38  ;;  %v782_v46 = vmul.f32 0.0013020834, %v728_v41  ;;  %v818_v12 = vmul.f32 %v10549_v28, %v15393_v20  ;;  %v819_v56 = vmul.f32 %v10549_v28, %v15394_v21 }
 0x208   : > { %v794_v51 = vadd.f32 1e-05, %v782_v46 }
 0x20a   : > { %v10551_v35 = vpop.eup %10550  ;;  %v735_v61 = vpop.xlane.xlu1 %734  ;;  %10556 = vrsqrt.f32 %v794_v51 }
 0x20b   : > { %v820_v52 = vmul.f32 %v10551_v35, %v15395_v9  ;;  %v821_v38 = vmul.f32 %v10551_v35, %v12386_v2  ;;  %v822_v41 = vmul.f32 %v10551_v35, %v12389_v10  ;;  %v823_v46 = vmul.f32 %v10551_v35, %v12398_v7  ;;  %v10553_v1 = vpop.eup %10552  ;;  %v15396_v7 = vld [vmem:[#allocation48_spill] sm:$0xff]  ;;  %v15397_v10 = vld [vmem:[#allocation49_spill] sm:$0xff] }
 0x20c   : > { %v824_v60 = vmul.f32 %v10551_v35, %v12405_v17  ;;  %v825_v30 = vmul.f32 %v10551_v35, %v12408_v3  ;;  %v783_v0 = vmul.f32 0.0013020834, %v735_v61  ;;  %v826_v2 = vmul.f32 %v10553_v1, %v15396_v7  ;;  %v15400_v35 = vld [vmem:[#allocation57_spill] sm:$0xff] }
 0x20d   : > { %v886_v57 = vpack.c.bf16 %v820_v52, %v814_v47  ;;  %v887_v20 = vpack.c.bf16 %v821_v38, %v815_v36  ;;  %v888_v44 = vpack.c.bf16 %v822_v41, %v816_v39  ;;  %v889_v28 = vpack.c.bf16 %v823_v46, %v817_v16  ;;  %v15398_v52 = vld [vmem:[#allocation53_spill] sm:$0xff]  ;;  %v15399_v47 = vld [vmem:[#allocation55_spill] sm:$0xff] }
 0x20e   : > { %v890_v21 = vpack.c.bf16 %v824_v60, %v818_v12  ;;  %v891_v5 = vpack.c.bf16 %v825_v30, %v819_v56  ;;  %v795_v9 = vadd.f32 1e-05, %v783_v0  ;;  %v742_v29 = vpop.xlane.xlu0 %741  ;;  %v827_v17 = vmul.f32 %v10553_v1, %v15397_v10  ;;  %v15401_v56 = vld [vmem:[#allocation58_spill] sm:$0xff] }
 0x20f   : > { %922 = vst [vmem:[#allocation2] sm:$0xff] %v886_v57  ;;  %923 = vst [vmem:[#allocation2 + $0x8] sm:$0xff] %v887_v20  ;;  %v784_v18 = vmul.f32 0.0013020834, %v742_v29  ;;  %v828_v51 = vmul.f32 %v10553_v1, %v15398_v52  ;;  %v829_v36 = vmul.f32 %v10553_v1, %v15399_v47  ;;  %v830_v39 = vmul.f32 %v10553_v1, %v15400_v35 }
 0x210   : > { %924 = vst [vmem:[#allocation2 + $0x10] sm:$0xff] %v888_v44  ;;  %925 = vst [vmem:[#allocation2 + $0x18] sm:$0xff] %v889_v28  ;;  %v10555_v3 = vpop.eup %10554  ;;  %10558 = vrsqrt.f32 %v795_v9  ;;  %v831_v29 = vmul.f32 %v10553_v1, %v15401_v56  ;;  %v15403_v56 = vld [vmem:[#allocation61_spill] sm:$0xff] }
 0x211   : > { %926 = vst [vmem:[#allocation2 + $0x20] sm:$0xff] %v890_v21  ;;  %927 = vst [vmem:[#allocation2 + $0x28] sm:$0xff] %v891_v5  ;;  %v832_v57 = vmul.f32 %v10555_v3, %v12415_v24  ;;  %v833_v44 = vmul.f32 %v10555_v3, %v12418_v55  ;;  %v834_v16 = vmul.f32 %v10555_v3, %v12421_v37  ;;  %v796_v38 = vadd.f32 1e-05, %v784_v18 }
 0x212   : > { %v835_v12 = vmul.f32 %v10555_v3, %v12426_v8  ;;  %v836_v61 = vmul.f32 %v10555_v3, %v12433_v13  ;;  %v837_v5 = vmul.f32 %v10555_v3, %v12444_v26 }
 0x213   : > { %v749_v41 = vpop.xlane.xlu1 %748  ;;  %v892_v46 = vpack.c.bf16 %v832_v57, %v826_v2  ;;  %v893_v60 = vpack.c.bf16 %v833_v44, %v827_v17  ;;  %v894_v30 = vpack.c.bf16 %v834_v16, %v828_v51  ;;  %10560 = vrsqrt.f32 %v796_v38  ;;  %v15402_v16 = vld [vmem:[#allocation60_spill] sm:$0xff]  ;;  %v15404_v38 = vld [vmem:[#allocation62_spill] sm:$0xff] }
 0x214   : > { %v895_v0 = vpack.c.bf16 %v835_v12, %v829_v36  ;;  %v896_v20 = vpack.c.bf16 %v836_v61, %v830_v39  ;;  %v897_v24 = vpack.c.bf16 %v837_v5, %v831_v29  ;;  %v785_v55 = vmul.f32 0.0013020834, %v749_v41  ;;  %v10557_v37 = vpop.eup %10556 }
 0x215   : > { %928 = vst [vmem:[#allocation2 + $0x30] sm:$0xff] %v892_v46  ;;  %929 = vst [vmem:[#allocation2 + $0x38] sm:$0xff] %v893_v60  ;;  %v838_v18 = vmul.f32 %v10557_v37, %v12449_v25  ;;  %v839_v1 = vmul.f32 %v10557_v37, %v12452_v40  ;;  %v840_v9 = vmul.f32 %v10557_v37, %v12455_v6  ;;  %v15405_v46 = vld [vmem:[#allocation27_spill] sm:$0xff] }
 0x216   : > { %930 = vst [vmem:[#allocation2 + $0x40] sm:$0xff] %v894_v30  ;;  %931 = vst [vmem:[#allocation2 + $0x48] sm:$0xff] %v895_v0  ;;  %v797_v8 = vadd.f32 1e-05, %v785_v55  ;;  %v841_v7 = vmul.f32 %v10557_v37, %v12464_v34  ;;  %v842_v2 = vmul.f32 %v10557_v37, %v12475_v54  ;;  %v843_v10 = vmul.f32 %v10557_v37, %v12486_v23  ;;  %v15406_v30 = vld [vmem:[#allocation28_spill] sm:$0xff] }
 0x217   : > { %932 = vst [vmem:[#allocation2 + $0x50] sm:$0xff] %v896_v20  ;;  %933 = vst [vmem:[#allocation2 + $0x58] sm:$0xff] %v897_v24  ;;  %v756_v13 = vpop.xlane.xlu0 %755  ;;  %v15407_v20 = vld [vmem:[#allocation38_spill] sm:$0xff] }
 0x218   : > { %v786_v26 = vmul.f32 0.0013020834, %v756_v13  ;;  %10562 = vrsqrt.f32 %v797_v8 }
 0x21a   : > { %v798_v28 = vadd.f32 1e-05, %v786_v26  ;;  %v10559_v21 = vpop.eup %10558 }
 0x21b   : > { %v844_v17 = vmul.f32 %v10559_v21, %v12483_v22  ;;  %v845_v3 = vmul.f32 %v10559_v21, %v12490_v59  ;;  %v846_v52 = vmul.f32 %v10559_v21, %v12494_v63  ;;  %v847_v25 = vmul.f32 %v10559_v21, %v12498_v27 }
 0x21c   : > { %v763_v51 = vpop.xlane.xlu1 %762  ;;  %v848_v40 = vmul.f32 %v10559_v21, %v12508_v32  ;;  %v849_v47 = vmul.f32 %v10559_v21, %v12536_v4  ;;  %10564 = vrsqrt.f32 %v798_v28 }
 0x21d   : > { %v787_v6 = vmul.f32 0.0013020834, %v763_v51  ;;  %v898_v34 = vpack.c.bf16 %v844_v17, %v838_v18  ;;  %v899_v36 = vpack.c.bf16 %v845_v3, %v839_v1  ;;  %v900_v54 = vpack.c.bf16 %v846_v52, %v840_v9  ;;  %v10561_v23 = vpop.eup %10560  ;;  %v15408_v9 = vld [vmem:[#allocation29_spill] sm:$0xff]  ;;  %v15410_v51 = vld [vmem:[#allocation36_spill] sm:$0xff] }
 0x21e   : > { %v901_v35 = vpack.c.bf16 %v847_v25, %v841_v7  ;;  %v902_v39 = vpack.c.bf16 %v848_v40, %v842_v2  ;;  %v903_v22 = vpack.c.bf16 %v849_v47, %v843_v10  ;;  %v850_v27 = vmul.f32 %v10561_v23, %v12518_v43  ;;  %v15409_v2 = vld [vmem:[#allocation30_spill] sm:$0xff] }
 0x21f   : > { %v799_v57 = vadd.f32 1e-05, %v787_v6  ;;  %934 = vst [vmem:[#allocation2 + $0x60] sm:$0xff] %v898_v34  ;;  %935 = vst [vmem:[#allocation2 + $0x68] sm:$0xff] %v899_v36  ;;  %v851_v32 = vmul.f32 %v10561_v23, %v12522_v49  ;;  %v852_v4 = vmul.f32 %v10561_v23, %v12526_v15  ;;  %v853_v12 = vmul.f32 %v10561_v23, %v15402_v16  ;;  %v15418_v16 = vld [vmem:[#allocation47_spill] sm:$0xff] }
 0x220   : > { %936 = vst [vmem:[#allocation2 + $0x70] sm:$0xff] %v900_v54  ;;  %937 = vst [vmem:[#allocation2 + $0x78] sm:$0xff] %v901_v35  ;;  %v854_v29 = vmul.f32 %v10561_v23, %v15403_v56  ;;  %v855_v61 = vmul.f32 %v10561_v23, %v12568_v50  ;;  %v15419_v56 = vld [vmem:[#allocation32_spill] sm:$0xff] }
 0x221   : > { %v770_v59 = vpop.xlane.xlu0 %769  ;;  %938 = vst [vmem:[#allocation2 + $0x80] sm:$0xff] %v902_v39  ;;  %939 = vst [vmem:[#allocation2 + $0x88] sm:$0xff] %v903_v22  ;;  %10566 = vrsqrt.f32 %v799_v57  ;;  %v15413_v39 = vld [vmem:[#allocation39_spill] sm:$0xff] }
 0x222   : > { %v788_v63 = vmul.f32 0.0013020834, %v770_v59  ;;  %v10563_v44 = vpop.eup %10562  ;;  %v15414_v22 = vld [vmem:[#allocation31_spill] sm:$0xff]  ;;  %v15415_v59 = vld [vmem:[#allocation33_spill] sm:$0xff] }
 0x223   : > { %v856_v41 = vmul.f32 %v10563_v44, %v15404_v38  ;;  %v857_v60 = vmul.f32 %v10563_v44, %v15405_v46  ;;  %v858_v0 = vmul.f32 %v10563_v44, %v15406_v30  ;;  %v859_v43 = vmul.f32 %v10563_v44, %v15407_v20  ;;  %v15421_v38 = vld [vmem:[#allocation43_spill] sm:$0xff]  ;;  %v15422_v46 = vld [vmem:[#allocation40_spill] sm:$0xff] }
 0x224   : > { %v800_v5 = vadd.f32 1e-05, %v788_v63  ;;  %v860_v49 = vmul.f32 %v10563_v44, %v12584_v42  ;;  %v861_v15 = vmul.f32 %v10563_v44, %v12600_v31 }
 0x225   : > { %v777_v24 = vpop.xlane.xlu1 %776  ;;  %v904_v37 = vpack.c.bf16 %v856_v41, %v850_v27  ;;  %v905_v8 = vpack.c.bf16 %v857_v60, %v851_v32  ;;  %v906_v13 = vpack.c.bf16 %v858_v0, %v852_v4  ;;  %v907_v50 = vpack.c.bf16 %v859_v43, %v853_v12  ;;  %v15416_v27 = vld [vmem:[#allocation35_spill] sm:$0xff]  ;;  %v15417_v4 = vld [vmem:[#allocation45_spill] sm:$0xff] }
 0x226   : > { %10568 = vrsqrt.f32 %v800_v5  ;;  %v789_v55 = vmul.f32 0.0013020834, %v777_v24  ;;  %v10565_v26 = vpop.eup %10564  ;;  %v908_v18 = vpack.c.bf16 %v860_v49, %v854_v29  ;;  %v909_v1 = vpack.c.bf16 %v861_v15, %v855_v61  ;;  %v15420_v61 = vld [vmem:[#allocation46_spill] sm:$0xff] }
 0x227   : > { %940 = vst [vmem:[#allocation2 + $0x90] sm:$0xff] %v904_v37  ;;  %941 = vst [vmem:[#allocation2 + $0x98] sm:$0xff] %v905_v8  ;;  %v862_v31 = vmul.f32 %v10565_v26, %v12590_v11  ;;  %v863_v21 = vmul.f32 %v10565_v26, %v12594_v62  ;;  %v864_v7 = vmul.f32 %v10565_v26, %v15408_v9 }
 0x228   : > { %v801_v28 = vadd.f32 1e-05, %v789_v55  ;;  %942 = vst [vmem:[#allocation2 + $0xa0] sm:$0xff] %v906_v13  ;;  %943 = vst [vmem:[#allocation2 + $0xa8] sm:$0xff] %v907_v50  ;;  %v865_v10 = vmul.f32 %v10565_v26, %v15409_v2  ;;  %v866_v40 = vmul.f32 %v10565_v26, %v15410_v51  ;;  %v867_v47 = vmul.f32 %v10565_v26, %v12644_v58  ;;  %v15412_v58 = vld [vmem:[#allocation34_spill] sm:$0xff] }
 0x229   : > { %944 = vst [vmem:[#allocation2 + $0xb0] sm:$0xff] %v908_v18  ;;  %945 = vst [vmem:[#allocation2 + $0xb8] sm:$0xff] %v909_v1 }
 0x22a   : > { %10570 = vrsqrt.f32 %v801_v28 }
 0x22b   : > { %v10567_v42 = vpop.eup %10566 }
 0x22c   : > { %v868_v17 = vmul.f32 %v10567_v42, %v12626_v19  ;;  %v869_v3 = vmul.f32 %v10567_v42, %v12632_v45  ;;  %v870_v52 = vmul.f32 %v10567_v42, %v12636_v14  ;;  %v871_v25 = vmul.f32 %v10567_v42, %v12640_v33  ;;  %v15411_v45 = vld [vmem:[#allocation37_spill] sm:$0xff] }
 0x22d   : > { %v872_v11 = vmul.f32 %v10567_v42, %v12652_v53  ;;  %v873_v62 = vmul.f32 %v10567_v42, %v12680_v48 }
 0x22e   : > { %v910_v6 = vpack.c.bf16 %v868_v17, %v862_v31  ;;  %v911_v34 = vpack.c.bf16 %v869_v3, %v863_v21  ;;  %v912_v36 = vpack.c.bf16 %v870_v52, %v864_v7  ;;  %v913_v54 = vpack.c.bf16 %v871_v25, %v865_v10 }
 0x22f   : > { %v914_v19 = vpack.c.bf16 %v872_v11, %v866_v40  ;;  %v915_v23 = vpack.c.bf16 %v873_v62, %v867_v47 }
 0x230   : > { %v10569_v35 = vpop.eup %10568  ;;  %946 = vst [vmem:[#allocation2 + $0xc0] sm:$0xff] %v910_v6  ;;  %947 = vst [vmem:[#allocation2 + $0xc8] sm:$0xff] %v911_v34 }
 0x231   : > { %948 = vst [vmem:[#allocation2 + $0xd0] sm:$0xff] %v912_v36  ;;  %949 = vst [vmem:[#allocation2 + $0xd8] sm:$0xff] %v913_v54  ;;  %v874_v33 = vmul.f32 %v10569_v35, %v15411_v45  ;;  %v875_v53 = vmul.f32 %v10569_v35, %v15412_v58  ;;  %v876_v48 = vmul.f32 %v10569_v35, %v15413_v39 }
 0x232   : > { %950 = vst [vmem:[#allocation2 + $0xe0] sm:$0xff] %v914_v19  ;;  %951 = vst [vmem:[#allocation2 + $0xe8] sm:$0xff] %v915_v23  ;;  %v877_v57 = vmul.f32 %v10569_v35, %v15414_v22  ;;  %v878_v29 = vmul.f32 %v10569_v35, %v15419_v56  ;;  %v879_v5 = vmul.f32 %v10569_v35, %v15420_v61 }
 0x234   : > { %v10571_v14 = vpop.eup %10570 }
 0x235   : > { %v880_v63 = vmul.f32 %v10571_v14, %v15415_v59  ;;  %v881_v32 = vmul.f32 %v10571_v14, %v15416_v27  ;;  %v882_v44 = vmul.f32 %v10571_v14, %v15417_v4  ;;  %v883_v12 = vmul.f32 %v10571_v14, %v15418_v16 }
 0x236   : > { %v884_v41 = vmul.f32 %v10571_v14, %v15421_v38  ;;  %v885_v60 = vmul.f32 %v10571_v14, %v15422_v46 }
 0x237   : > { %v916_v30 = vpack.c.bf16 %v880_v63, %v874_v33  ;;  %v917_v0 = vpack.c.bf16 %v881_v32, %v875_v53  ;;  %v918_v20 = vpack.c.bf16 %v882_v44, %v876_v48  ;;  %v919_v43 = vpack.c.bf16 %v883_v12, %v877_v57 }
 0x238   : > { %v920_v24 = vpack.c.bf16 %v884_v41, %v878_v29  ;;  %v921_v49 = vpack.c.bf16 %v885_v60, %v879_v5 }
 0x239   : > { %952 = vst [vmem:[#allocation2 + $0xf0] sm:$0xff] %v916_v30  ;;  %953 = vst [vmem:[#allocation2 + $0xf8] sm:$0xff] %v917_v0 }
 0x23a   : > { %954 = vst [vmem:[#allocation2 + $0x100] sm:$0xff] %v918_v20  ;;  %955 = vst [vmem:[#allocation2 + $0x108] sm:$0xff] %v919_v43 }
 0x23b   : > { %956 = vst [vmem:[#allocation2 + $0x110] sm:$0xff] %v920_v24  ;;  %957 = vst [vmem:[#allocation2 + $0x118] sm:$0xff] %v921_v49 }
 0x23c PF: > { %v994_v15 = vld [vmem:[%s12019_s15] sm:$0xff]  ;;  %v12834_v45 = vld [vmem:[#allocation2 + $0x8] sm:$0xff] }
 0x23d   : > { %v998_v55 = vld [vmem:[%s12019_s15 + $0x20] sm:$0xff]  ;;  %3372 = vmatprep.mubr.bf16.mxu1 %v12834_v45 }
 0x23e   : > { %v1002_v37 = vld [vmem:[%s12019_s15 + $0x40] sm:$0xff]  ;;  %v9133_v8 = vcombine.high %v994_v15, %v998_v55  ;;  %v9132_v13 = vcombine.low %v994_v15, %v998_v55 }
 0x23f   : > { %v1006_v50 = vld [vmem:[%s12019_s15 + $0x60] sm:$0xff] }
 0x240   : > { %v9141_v26 = vcombine.high %v1002_v37, %v1006_v50  ;;  %v1010_v18 = vld [vmem:[%s12019_s15 + $0x80] sm:$0xff]  ;;  %3340 = vmatprep.subr.bf16.mxu1 %v9133_v8  ;;  %v9140_v28 = vcombine.low %v1002_v37, %v1006_v50  ;;  %v963_v50 = vld [vmem:[#allocation2 + $0x28] sm:$0xff] }
 0x241   : > { %v1014_v1 = vld [vmem:[%s12019_s15 + $0xa0] sm:$0xff]  ;;  %3341 = vmatpush1.bf16.msra.mxu1 %v9132_v13  ;;  %3558 = vmatprep.mubr.bf16.mxu0 %v963_v50 }
 0x242   : > { %3342 = vmatprep.subr.bf16.mxu1 %v9141_v26  ;;  %v9149_v42 = vcombine.high %v1010_v18, %v1014_v1  ;;  %v1018_v31 = vld [vmem:[%s12019_s15 + $0xc0] sm:$0xff]  ;;  %v9148_v9 = vcombine.low %v1010_v18, %v1014_v1 }
 0x243   : > { %v1022_v21 = vld [vmem:[%s12019_s15 + $0xe0] sm:$0xff] }
 0x244   : > { %v1250_v7 = vld [vmem:[%s12019_s15 + $0x800] sm:$0xff]  ;;  %v9157_v10 = vcombine.high %v1018_v31, %v1022_v21  ;;  %v9156_v6 = vcombine.low %v1018_v31, %v1022_v21 }
 0x245   : > { %3343 = vmatpush1.bf16.msra.mxu1 %v9140_v28  ;;  %v1254_v2 = vld [vmem:[%s12019_s15 + $0x820] sm:$0xff] }
 0x246   : > { %3344 = vmatprep.subr.bf16.mxu1 %v9149_v42  ;;  %v9389_v17 = vcombine.high %v1250_v7, %v1254_v2  ;;  %v9388_v3 = vcombine.low %v1250_v7, %v1254_v2  ;;  %v1258_v52 = vld [vmem:[%s12019_s15 + $0x840] sm:$0xff] }
 0x247   : > { %v1262_v25 = vld [vmem:[%s12019_s15 + $0x860] sm:$0xff] }
 0x248   : > { %v1026_v51 = vld [vmem:[%s12019_s15 + $0x100] sm:$0xff]  ;;  %v9397_v47 = vcombine.high %v1258_v52, %v1262_v25  ;;  %3526 = vmatprep.subr.bf16.mxu0 %v9389_v17  ;;  %v9396_v34 = vcombine.low %v1258_v52, %v1262_v25 }
 0x249   : > { %v1030_v40 = vld [vmem:[%s12019_s15 + $0x120] sm:$0xff]  ;;  %3345 = vmatpush1.bf16.msra.mxu1 %v9148_v9  ;;  %3527 = vmatpush1.bf16.msra.mxu0 %v9388_v3 }
 0x24a   : > { %v1266_v11 = vld [vmem:[%s12019_s15 + $0x880] sm:$0xff]  ;;  %3346 = vmatprep.subr.bf16.mxu1 %v9157_v10  ;;  %v9165_v36 = vcombine.high %v1026_v51, %v1030_v40  ;;  %3528 = vmatprep.subr.bf16.mxu0 %v9397_v47  ;;  %v9164_v33 = vcombine.low %v1026_v51, %v1030_v40 }
 0x24b   : > { %v1270_v62 = vld [vmem:[%s12019_s15 + $0x8a0] sm:$0xff] }
 0x24c   : > { %v1034_v54 = vld [vmem:[%s12019_s15 + $0x140] sm:$0xff]  ;;  %v9405_v19 = vcombine.high %v1266_v11, %v1270_v62  ;;  %v9404_v58 = vcombine.low %v1266_v11, %v1270_v62 }
 0x24d   : > { %v1038_v35 = vld [vmem:[%s12019_s15 + $0x160] sm:$0xff]  ;;  %3347 = vmatpush1.bf16.msra.mxu1 %v9156_v6  ;;  %3529 = vmatpush1.bf16.msra.mxu0 %v9396_v34 }
 0x24e   : > { %v1274_v23 = vld [vmem:[%s12019_s15 + $0x8c0] sm:$0xff]  ;;  %3348 = vmatprep.subr.bf16.mxu1 %v9165_v36  ;;  %v9173_v53 = vcombine.high %v1034_v54, %v1038_v35  ;;  %3530 = vmatprep.subr.bf16.mxu0 %v9405_v19  ;;  %v9172_v63 = vcombine.low %v1034_v54, %v1038_v35 }
 0x24f   : > { %v1278_v14 = vld [vmem:[%s12019_s15 + $0x8e0] sm:$0xff] }
 0x250   : > { %v1042_v39 = vld [vmem:[%s12019_s15 + $0x180] sm:$0xff]  ;;  %v9413_v48 = vcombine.high %v1274_v23, %v1278_v14  ;;  %v9412_v27 = vcombine.low %v1274_v23, %v1278_v14 }
 0x251   : > { %v1046_v22 = vld [vmem:[%s12019_s15 + $0x1a0] sm:$0xff]  ;;  %3349 = vmatpush1.bf16.msra.mxu1 %v9164_v33  ;;  %3531 = vmatpush1.bf16.msra.mxu0 %v9404_v58 }
 0x252   : > { %v1282_v57 = vld [vmem:[%s12019_s15 + $0x900] sm:$0xff]  ;;  %3350 = vmatprep.subr.bf16.mxu1 %v9173_v53  ;;  %v9181_v32 = vcombine.high %v1042_v39, %v1046_v22  ;;  %3532 = vmatprep.subr.bf16.mxu0 %v9413_v48  ;;  %v9180_v29 = vcombine.low %v1042_v39, %v1046_v22 }
 0x253   : > { %v1286_v59 = vld [vmem:[%s12019_s15 + $0x920] sm:$0xff] }
 0x254   : > { %v1050_v4 = vld [vmem:[%s12019_s15 + $0x1c0] sm:$0xff]  ;;  %v9421_v44 = vcombine.high %v1282_v57, %v1286_v59  ;;  %v9420_v61 = vcombine.low %v1282_v57, %v1286_v59 }
 0x255   : > { %v1054_v16 = vld [vmem:[%s12019_s15 + $0x1e0] sm:$0xff]  ;;  %3351 = vmatpush1.bf16.msra.mxu1 %v9172_v63  ;;  %3533 = vmatpush1.bf16.msra.mxu0 %v9412_v27 }
 0x256   : > { %v1290_v12 = vld [vmem:[%s12019_s15 + $0x940] sm:$0xff]  ;;  %3352 = vmatprep.subr.bf16.mxu1 %v9181_v32  ;;  %v9189_v5 = vcombine.high %v1050_v4, %v1054_v16  ;;  %3534 = vmatprep.subr.bf16.mxu0 %v9421_v44  ;;  %v9188_v0 = vcombine.low %v1050_v4, %v1054_v16 }
 0x257   : > { %v1294_v56 = vld [vmem:[%s12019_s15 + $0x960] sm:$0xff] }
 0x258   : > { %v1058_v38 = vld [vmem:[%s12019_s15 + $0x200] sm:$0xff]  ;;  %v9429_v41 = vcombine.high %v1290_v12, %v1294_v56  ;;  %v9428_v20 = vcombine.low %v1290_v12, %v1294_v56 }
 0x259   : > { %v1062_v46 = vld [vmem:[%s12019_s15 + $0x220] sm:$0xff]  ;;  %3353 = vmatpush1.bf16.msra.mxu1 %v9180_v29  ;;  %3535 = vmatpush1.bf16.msra.mxu0 %v9420_v61 }
 0x25a   : > { %v1298_v60 = vld [vmem:[%s12019_s15 + $0x980] sm:$0xff]  ;;  %3354 = vmatprep.subr.bf16.mxu1 %v9189_v5  ;;  %v9197_v43 = vcombine.high %v1058_v38, %v1062_v46  ;;  %3536 = vmatprep.subr.bf16.mxu0 %v9429_v41  ;;  %v9196_v8 = vcombine.low %v1058_v38, %v1062_v46 }
 0x25b   : > { %v1302_v30 = vld [vmem:[%s12019_s15 + $0x9a0] sm:$0xff] }
 0x25c   : > { %v1066_v24 = vld [vmem:[%s12019_s15 + $0x240] sm:$0xff]  ;;  %v9437_v49 = vcombine.high %v1298_v60, %v1302_v30  ;;  %v9436_v13 = vcombine.low %v1298_v60, %v1302_v30 }
 0x25d   : > { %v1070_v15 = vld [vmem:[%s12019_s15 + $0x260] sm:$0xff]  ;;  %3355 = vmatpush1.bf16.msra.mxu1 %v9188_v0  ;;  %3537 = vmatpush1.bf16.msra.mxu0 %v9428_v20 }
 0x25e   : > { %v1306_v55 = vld [vmem:[%s12019_s15 + $0x9c0] sm:$0xff]  ;;  %3356 = vmatprep.subr.bf16.mxu1 %v9197_v43  ;;  %v9205_v26 = vcombine.high %v1066_v24, %v1070_v15  ;;  %3538 = vmatprep.subr.bf16.mxu0 %v9437_v49  ;;  %v9204_v21 = vcombine.low %v1066_v24, %v1070_v15 }
 0x25f   : > { %v1310_v37 = vld [vmem:[%s12019_s15 + $0x9e0] sm:$0xff] }
 0x260   : > { %v1074_v18 = vld [vmem:[%s12019_s15 + $0x280] sm:$0xff]  ;;  %v9445_v1 = vcombine.high %v1306_v55, %v1310_v37  ;;  %v9444_v9 = vcombine.low %v1306_v55, %v1310_v37 }
 0x261   : > { %v1078_v28 = vld [vmem:[%s12019_s15 + $0x2a0] sm:$0xff]  ;;  %3357 = vmatpush1.bf16.msra.mxu1 %v9196_v8  ;;  %3539 = vmatpush1.bf16.msra.mxu0 %v9436_v13 }
 0x262   : > { %v1314_v42 = vld [vmem:[%s12019_s15 + $0xa00] sm:$0xff]  ;;  %3358 = vmatprep.subr.bf16.mxu1 %v9205_v26  ;;  %v9213_v7 = vcombine.high %v1074_v18, %v1078_v28  ;;  %3540 = vmatprep.subr.bf16.mxu0 %v9445_v1  ;;  %v9212_v25 = vcombine.low %v1074_v18, %v1078_v28  ;;  %v12887_v1 = vld [vmem:[#allocation2 + $0x38] sm:$0xff] }
 0x263   : > { %v1318_v31 = vld [vmem:[%s12019_s15 + $0xa20] sm:$0xff] }
 0x264   : > { %v1082_v2 = vld [vmem:[%s12019_s15 + $0x2c0] sm:$0xff]  ;;  %v9453_v10 = vcombine.high %v1314_v42, %v1318_v31  ;;  %v9452_v51 = vcombine.low %v1314_v42, %v1318_v31 }
 0x265   : > { %v1086_v17 = vld [vmem:[%s12019_s15 + $0x2e0] sm:$0xff]  ;;  %3359 = vmatpush1.bf16.msra.mxu1 %v9204_v21  ;;  %3541 = vmatpush1.bf16.msra.mxu0 %v9444_v9  ;;  %v996_v9 = vld [vmem:[%s12019_s15 + $0x10] sm:$0xff] }
 0x266   : > { %v1322_v3 = vld [vmem:[%s12019_s15 + $0xa40] sm:$0xff]  ;;  %3360 = vmatprep.subr.bf16.mxu1 %v9213_v7  ;;  %v9221_v40 = vcombine.high %v1082_v2, %v1086_v17  ;;  %3542 = vmatprep.subr.bf16.mxu0 %v9453_v10  ;;  %v9220_v36 = vcombine.low %v1082_v2, %v1086_v17  ;;  %v1000_v7 = vld [vmem:[%s12019_s15 + $0x30] sm:$0xff] }
 0x267   : > { %v1326_v52 = vld [vmem:[%s12019_s15 + $0xa60] sm:$0xff] }
 0x268   : > { %v1090_v47 = vld [vmem:[%s12019_s15 + $0x300] sm:$0xff]  ;;  %v9461_v11 = vcombine.high %v1322_v3, %v1326_v52  ;;  %v9460_v54 = vcombine.low %v1322_v3, %v1326_v52 }
 0x269   : > { %v1094_v62 = vld [vmem:[%s12019_s15 + $0x320] sm:$0xff]  ;;  %3361 = vmatpush1.bf16.msra.mxu1 %v9212_v25  ;;  %3543 = vmatpush1.bf16.msra.mxu0 %v9452_v51  ;;  %v9137_v25 = vcombine.high %v996_v9, %v1000_v7  ;;  %v12897_v51 = vld [vmem:[#allocation2 + $0x30] sm:$0xff] }
 0x26a   : > { %v1330_v6 = vld [vmem:[%s12019_s15 + $0xa80] sm:$0xff]  ;;  %3362 = vmatprep.subr.bf16.mxu1 %v9221_v40  ;;  %v9229_v35 = vcombine.high %v1090_v47, %v1094_v62  ;;  %3544 = vmatprep.subr.bf16.mxu0 %v9461_v11  ;;  %v9228_v53 = vcombine.low %v1090_v47, %v1094_v62  ;;  %v12899_v40 = vld [vmem:[#allocation2 + $0x68] sm:$0xff] }
 0x26b   : > { %v1334_v34 = vld [vmem:[%s12019_s15 + $0xaa0] sm:$0xff] }
 0x26c   : > { %v1098_v19 = vld [vmem:[%s12019_s15 + $0x340] sm:$0xff]  ;;  %v9469_v23 = vcombine.high %v1330_v6, %v1334_v34  ;;  %v9468_v39 = vcombine.low %v1330_v6, %v1334_v34  ;;  %v1004_v34 = vld [vmem:[%s12019_s15 + $0x50] sm:$0xff] }
 0x26d   : > { %v1102_v14 = vld [vmem:[%s12019_s15 + $0x360] sm:$0xff]  ;;  %3363 = vmatpush1.bf16.msra.mxu1 %v9220_v36  ;;  %3545 = vmatpush1.bf16.msra.mxu0 %v9460_v54  ;;  %v1008_v36 = vld [vmem:[%s12019_s15 + $0x70] sm:$0xff] }
 0x26e   : > { %v1338_v33 = vld [vmem:[%s12019_s15 + $0xac0] sm:$0xff]  ;;  %3364 = vmatprep.subr.bf16.mxu1 %v9229_v35  ;;  %v9237_v48 = vcombine.high %v1098_v19, %v1102_v14  ;;  %3546 = vmatprep.subr.bf16.mxu0 %v9469_v23  ;;  %v9236_v32 = vcombine.low %v1098_v19, %v1102_v14  ;;  %v9136_v35 = vcombine.low %v996_v9, %v1000_v7  ;;  %v969_v23 = vld [vmem:[#allocation2 + $0x58] sm:$0xff] }
 0x26f   : > { %v1342_v58 = vld [vmem:[%s12019_s15 + $0xae0] sm:$0xff]  ;;  %v9145_v19 = vcombine.high %v1004_v34, %v1008_v36 }
 0x270   : > { %v1106_v22 = vld [vmem:[%s12019_s15 + $0x380] sm:$0xff]  ;;  %v9477_v57 = vcombine.high %v1338_v33, %v1342_v58  ;;  %v9476_v4 = vcombine.low %v1338_v33, %v1342_v58 }
 0x271   : > { %v1110_v59 = vld [vmem:[%s12019_s15 + $0x3a0] sm:$0xff]  ;;  %3365 = vmatpush1.bf16.msra.mxu1 %v9228_v53  ;;  %3547 = vmatpush1.bf16.msra.mxu0 %v9468_v39  ;;  %v1012_v53 = vld [vmem:[%s12019_s15 + $0x90] sm:$0xff] }
 0x272   : > { %v1346_v63 = vld [vmem:[%s12019_s15 + $0xb00] sm:$0xff]  ;;  %3366 = vmatprep.subr.bf16.mxu1 %v9237_v48  ;;  %v9245_v44 = vcombine.high %v1106_v22, %v1110_v59  ;;  %3548 = vmatprep.subr.bf16.mxu0 %v9477_v57  ;;  %v9244_v5 = vcombine.low %v1106_v22, %v1110_v59  ;;  %v1016_v39 = vld [vmem:[%s12019_s15 + $0xb0] sm:$0xff]  ;;  %v9144_v57 = vcombine.low %v1004_v34, %v1008_v36  ;;  %v12913_v59 = vld [vmem:[#allocation2 + $0x98] sm:$0xff] }
 0x273   : > { %v1350_v27 = vld [vmem:[%s12019_s15 + $0xb20] sm:$0xff]  ;;  %v1056_v36 = vld [vmem:[%s12019_s15 + $0x1f0] sm:$0xff] }
 0x274   : > { %v1114_v16 = vld [vmem:[%s12019_s15 + $0x3c0] sm:$0xff]  ;;  %v9485_v12 = vcombine.high %v1346_v63, %v1350_v27  ;;  %v9484_v38 = vcombine.low %v1346_v63, %v1350_v27  ;;  %v9153_v63 = vcombine.high %v1012_v53, %v1016_v39  ;;  %v1020_v27 = vld [vmem:[%s12019_s15 + $0xd0] sm:$0xff] }
 0x275   : > { %v1118_v56 = vld [vmem:[%s12019_s15 + $0x3e0] sm:$0xff]  ;;  %3367 = vmatpush1.bf16.msra.mxu1 %v9236_v32  ;;  %3549 = vmatpush1.bf16.msra.mxu0 %v9476_v4 }
 0x276   : > { %v1354_v29 = vld [vmem:[%s12019_s15 + $0xb40] sm:$0xff]  ;;  %3368 = vmatprep.subr.bf16.mxu1 %v9245_v44  ;;  %v9253_v41 = vcombine.high %v1114_v16, %v1118_v56  ;;  %3550 = vmatprep.subr.bf16.mxu0 %v9485_v12  ;;  %v9252_v43 = vcombine.low %v1114_v16, %v1118_v56  ;;  %v1024_v16 = vld [vmem:[%s12019_s15 + $0xf0] sm:$0xff] }
 0x277   : > { %v1358_v61 = vld [vmem:[%s12019_s15 + $0xb60] sm:$0xff]  ;;  %v968_v12 = vld [vmem:[#allocation2 + $0x50] sm:$0xff] }
 0x278   : > { %v1122_v46 = vld [vmem:[%s12019_s15 + $0x400] sm:$0xff]  ;;  %v9493_v60 = vcombine.high %v1354_v29, %v1358_v61  ;;  %v9492_v24 = vcombine.low %v1354_v29, %v1358_v61  ;;  %v9152_v29 = vcombine.low %v1012_v53, %v1016_v39  ;;  %v9161_v61 = vcombine.high %v1020_v27, %v1024_v16  ;;  %v1060_v39 = vld [vmem:[%s12019_s15 + $0x210] sm:$0xff] }
 0x279   : > { %v1126_v30 = vld [vmem:[%s12019_s15 + $0x420] sm:$0xff]  ;;  %3369 = vmatpush1.bf16.msra.mxu1 %v9244_v5  ;;  %3551 = vmatpush1.bf16.msra.mxu0 %v9484_v38  ;;  %v975_v5 = vld [vmem:[#allocation2 + $0x88] sm:$0xff] }
 0x27a   : > { %v1362_v0 = vld [vmem:[%s12019_s15 + $0xb80] sm:$0xff]  ;;  %3370 = vmatprep.subr.bf16.mxu1 %v9253_v41  ;;  %v9261_v49 = vcombine.high %v1122_v46, %v1126_v30  ;;  %3552 = vmatprep.subr.bf16.mxu0 %v9493_v60  ;;  %v9260_v50 = vcombine.low %v1122_v46, %v1126_v30  ;;  %v1028_v60 = vld [vmem:[%s12019_s15 + $0x110] sm:$0xff] }
 0x27b   : > { %v1366_v20 = vld [vmem:[%s12019_s15 + $0xba0] sm:$0xff]  ;;  %v1032_v30 = vld [vmem:[%s12019_s15 + $0x130] sm:$0xff] }
 0x27c   : > { %v9501_v15 = vcombine.high %v1362_v0, %v1366_v20  ;;  %v1130_v55 = vld [vmem:[%s12019_s15 + $0x440] sm:$0xff]  ;;  %v9500_v28 = vcombine.low %v1362_v0, %v1366_v20  ;;  %v12925_v20 = vld [vmem:[#allocation2 + $0x90] sm:$0xff] }
 0x27d   : > { %v1134_v37 = vld [vmem:[%s12019_s15 + $0x460] sm:$0xff]  ;;  %3371 = vmatpush1.bf16.msra.mxu1 %v9252_v43  ;;  %3553 = vmatpush1.bf16.msra.mxu0 %v9492_v24  ;;  %v9160_v43 = vcombine.low %v1020_v27, %v1024_v16  ;;  %v12927_v24 = vld [vmem:[#allocation2 + $0xc8] sm:$0xff] }
 0x27e   : > { %v1370_v8 = vld [vmem:[%s12019_s15 + $0xbc0] sm:$0xff]  ;;  %3433 = vmatprep.subr.bf16.mxu1 %v9261_v49  ;;  %v9269_v18 = vcombine.high %v1130_v55, %v1134_v37  ;;  %3554 = vmatprep.subr.bf16.mxu0 %v9501_v15  ;;  %v9268_v2 = vcombine.low %v1130_v55, %v1134_v37  ;;  %v9169_v49 = vcombine.high %v1028_v60, %v1032_v30  ;;  %v1036_v15 = vld [vmem:[%s12019_s15 + $0x150] sm:$0xff] }
 0x27f   : > { %v1374_v13 = vld [vmem:[%s12019_s15 + $0xbe0] sm:$0xff] }
 0x280   : > { %v12885_v26 = vld [vmem:[#allocation2] sm:$0xff]  ;;  %v9509_v21 = vcombine.high %v1370_v8, %v1374_v13  ;;  %v9508_v17 = vcombine.low %v1370_v8, %v1374_v13  ;;  %v1040_v13 = vld [vmem:[%s12019_s15 + $0x170] sm:$0xff] }
 0x281   : > { %v1138_v42 = vld [vmem:[%s12019_s15 + $0x480] sm:$0xff]  ;;  %3373 = vmatmul.mubr.bf16.vlgmr.msra.gmra.mrb[0].mxu1 %v12885_v26  ;;  %3555 = vmatpush1.bf16.msra.mxu0 %v9500_v28  ;;  %v9168_v28 = vcombine.low %v1028_v60, %v1032_v30 }
 0x282   : > { %v1142_v31 = vld [vmem:[%s12019_s15 + $0x4a0] sm:$0xff]  ;;  %3434 = vmatpush1.bf16.msra.mxu1 %v9260_v50  ;;  %3382 = vmatprep.mubr.bf16.mxu1 %v12887_v1 }
 0x283   : > { %3435 = vmatprep.subr.bf16.mxu1 %v9269_v18  ;;  %v9277_v10 = vcombine.high %v1138_v42, %v1142_v31  ;;  %v1146_v3 = vld [vmem:[%s12019_s15 + $0x4c0] sm:$0xff]  ;;  %3556 = vmatprep.subr.bf16.mxu0 %v9509_v21  ;;  %v9276_v47 = vcombine.low %v1138_v42, %v1142_v31  ;;  %v9177_v42 = vcombine.high %v1036_v15, %v1040_v13  ;;  %v981_v31 = vld [vmem:[#allocation2 + $0xb8] sm:$0xff] }
 0x284   : > { %v1150_v52 = vld [vmem:[%s12019_s15 + $0x4e0] sm:$0xff] }
 0x285   : > { %v1154_v11 = vld [vmem:[%s12019_s15 + $0x500] sm:$0xff]  ;;  %v9285_v54 = vcombine.high %v1146_v3, %v1150_v52  ;;  %3557 = vmatpush1.bf16.msra.mxu0 %v9508_v17  ;;  %v9284_v14 = vcombine.low %v1146_v3, %v1150_v52  ;;  %v9176_v52 = vcombine.low %v1036_v15, %v1040_v13 }
 0x286   : > { %3436 = vmatpush1.bf16.msra.mxu1 %v9268_v2  ;;  %v1158_v62 = vld [vmem:[%s12019_s15 + $0x520] sm:$0xff]  ;;  %3898 = vmatprep.subr.bf16.mxu0 %v9137_v25  ;;  %v1044_v2 = vld [vmem:[%s12019_s15 + $0x190] sm:$0xff]  ;;  %v12941_v25 = vld [vmem:[#allocation2 + $0xf8] sm:$0xff] }
 0x287   : > { %v962_v6 = vld [vmem:[#allocation2 + $0x20] sm:$0xff]  ;;  %3437 = vmatprep.subr.bf16.mxu1 %v9277_v10  ;;  %v9293_v48 = vcombine.high %v1154_v11, %v1158_v62  ;;  %v9292_v32 = vcombine.low %v1154_v11, %v1158_v62  ;;  %v1048_v10 = vld [vmem:[%s12019_s15 + $0x1b0] sm:$0xff] }
 0x288   : > { %v1162_v33 = vld [vmem:[%s12019_s15 + $0x540] sm:$0xff]  ;;  %3559 = vmatmul.mubr.bf16.vlgmr.msra.gmra.mrb[0].mxu0 %v962_v6  ;;  %v1052_v11 = vld [vmem:[%s12019_s15 + $0x1d0] sm:$0xff] }
 0x289   : > { %3383 = vmatmul.mubr.bf16.gmra.mrb[4].mxu1 %v12897_v51  ;;  %v1166_v58 = vld [vmem:[%s12019_s15 + $0x560] sm:$0xff]  ;;  %3899 = vmatpush1.bf16.msra.mxu0 %v9136_v35  ;;  %v9192_v27 = vcombine.low %v1052_v11, %v1056_v36 }
 0x28a   : > { %3438 = vmatpush1.bf16.msra.mxu1 %v9276_v47  ;;  %3392 = vmatprep.mubr.bf16.mxu1 %v12899_v40  ;;  %v12911_v22 = vld [vmem:[#allocation2 + $0x60] sm:$0xff]  ;;  %v9301_v56 = vcombine.high %v1162_v33, %v1166_v58  ;;  %v9300_v38 = vcombine.low %v1162_v33, %v1166_v58  ;;  %v9185_v47 = vcombine.high %v1044_v2, %v1048_v10 }
 0x28b   : > { %3439 = vmatprep.subr.bf16.mxu1 %v9285_v54  ;;  %3568 = vmatprep.mubr.bf16.mxu0 %v969_v23  ;;  %v1170_v4 = vld [vmem:[%s12019_s15 + $0x580] sm:$0xff]  ;;  %v980_v54 = vld [vmem:[#allocation2 + $0xb0] sm:$0xff]  ;;  %v9193_v23 = vcombine.high %v1052_v11, %v1056_v36  ;;  %v999_v36 = vld [vmem:[%s12019_s15 + $0x28] sm:$0xff] }
 0x28c   : > { %3900 = vmatprep.subr.bf16.mxu0 %v9145_v19  ;;  %v1174_v44 = vld [vmem:[%s12019_s15 + $0x5a0] sm:$0xff]  ;;  %v9184_v19 = vcombine.low %v1044_v2, %v1048_v10 }
 0x28d   : > { %3901 = vmatpush1.bf16.msra.mxu0 %v9144_v57  ;;  %v1178_v41 = vld [vmem:[%s12019_s15 + $0x5c0] sm:$0xff]  ;;  %v9309_v0 = vcombine.high %v1170_v4, %v1174_v44  ;;  %v9308_v55 = vcombine.low %v1170_v4, %v1174_v44  ;;  %v1068_v44 = vld [vmem:[%s12019_s15 + $0x250] sm:$0xff] }
 0x28e   : > { %3440 = vmatpush1.bf16.msra.mxu1 %v9284_v14  ;;  %3902 = vmatprep.subr.bf16.mxu0 %v9153_v63  ;;  %v1182_v46 = vld [vmem:[%s12019_s15 + $0x5e0] sm:$0xff]  ;;  %v987_v14 = vld [vmem:[#allocation2 + $0xe8] sm:$0xff]  ;;  %v12953_v63 = vld [vmem:[#allocation2 + $0xf0] sm:$0xff] }
 0x28f   : > { %3441 = vmatprep.subr.bf16.mxu1 %v9293_v48  ;;  %v1186_v37 = vld [vmem:[%s12019_s15 + $0x600] sm:$0xff]  ;;  %v9317_v18 = vcombine.high %v1178_v41, %v1182_v46  ;;  %v9316_v21 = vcombine.low %v1178_v41, %v1182_v46  ;;  %v1064_v48 = vld [vmem:[%s12019_s15 + $0x230] sm:$0xff]  ;;  %v993_v46 = vld [vmem:[#allocation2 + $0x118] sm:$0xff] }
 0x290   : > { %3569 = vmatmul.mubr.bf16.gmra.mrb[4].mxu0 %v968_v12  ;;  %v1190_v8 = vld [vmem:[%s12019_s15 + $0x620] sm:$0xff]  ;;  %v9201_v4 = vcombine.high %v1060_v39, %v1064_v48 }
 0x291   : > { %3393 = vmatmul.mubr.bf16.gmra.mrb[8].mxu1 %v12911_v22  ;;  %3903 = vmatpush1.bf16.msra.mxu0 %v9152_v29  ;;  %v974_v50 = vld [vmem:[#allocation2 + $0x80] sm:$0xff]  ;;  %v9325_v17 = vcombine.high %v1186_v37, %v1190_v8  ;;  %v9324_v62 = vcombine.low %v1186_v37, %v1190_v8  ;;  %v1072_v29 = vld [vmem:[%s12019_s15 + $0x270] sm:$0xff] }
 0x292   : > { %3442 = vmatpush1.bf16.msra.mxu1 %v9292_v32  ;;  %3402 = vmatprep.mubr.bf16.mxu1 %v12913_v59  ;;  %v1194_v9 = vld [vmem:[%s12019_s15 + $0x640] sm:$0xff]  ;;  %v12955_v32 = vld [vmem:[#allocation2 + $0x18] sm:$0xff]  ;;  %v9209_v41 = vcombine.high %v1068_v44, %v1072_v29  ;;  %v1084_v8 = vld [vmem:[%s12019_s15 + $0x2d0] sm:$0xff] }
 0x293   : > { %3443 = vmatprep.subr.bf16.mxu1 %v9301_v56  ;;  %3578 = vmatprep.mubr.bf16.mxu0 %v975_v5  ;;  %v1198_v7 = vld [vmem:[%s12019_s15 + $0x660] sm:$0xff] }
 0x294   : > { %3904 = vmatprep.subr.bf16.mxu0 %v9161_v61  ;;  %v12939_v3 = vld [vmem:[#allocation2 + $0xc0] sm:$0xff]  ;;  %v9333_v35 = vcombine.high %v1194_v9, %v1198_v7  ;;  %v9332_v33 = vcombine.low %v1194_v9, %v1198_v7 }
 0x295   : > { %3905 = vmatpush1.bf16.msra.mxu0 %v9160_v43  ;;  %v1202_v6 = vld [vmem:[%s12019_s15 + $0x680] sm:$0xff]  ;;  %v1076_v43 = vld [vmem:[%s12019_s15 + $0x290] sm:$0xff] }
 0x296   : > { %3444 = vmatpush1.bf16.msra.mxu1 %v9300_v38  ;;  %3906 = vmatprep.subr.bf16.mxu0 %v9169_v49  ;;  %v1206_v34 = vld [vmem:[%s12019_s15 + $0x6a0] sm:$0xff]  ;;  %v9200_v38 = vcombine.low %v1060_v39, %v1064_v48  ;;  %v1080_v49 = vld [vmem:[%s12019_s15 + $0x2b0] sm:$0xff] }
 0x297   : > { %3445 = vmatprep.subr.bf16.mxu1 %v9309_v0  ;;  %v1210_v58 = vld [vmem:[%s12019_s15 + $0x6c0] sm:$0xff]  ;;  %v9341_v57 = vcombine.high %v1202_v6, %v1206_v34  ;;  %v9340_v16 = vcombine.low %v1202_v6, %v1206_v34  ;;  %v9217_v37 = vcombine.high %v1076_v43, %v1080_v49  ;;  %v995_v34 = vld [vmem:[%s12019_s15 + $0x8] sm:$0xff]  ;;  %v1112_v39 = vld [vmem:[%s12019_s15 + $0x3b0] sm:$0xff] }
 0x298   : > { %3579 = vmatmul.mubr.bf16.gmra.mrb[8].mxu0 %v974_v50  ;;  %v1214_v53 = vld [vmem:[%s12019_s15 + $0x6e0] sm:$0xff]  ;;  %v9135_v48 = vcombine.high %v995_v34, %v999_v36 }
 0x299   : > { %3403 = vmatmul.mubr.bf16.gmra.mrb[12].mxu1 %v12925_v20  ;;  %3907 = vmatpush1.bf16.msra.mxu0 %v9168_v28  ;;  %v1218_v12 = vld [vmem:[%s12019_s15 + $0x700] sm:$0xff]  ;;  %v9349_v5 = vcombine.high %v1210_v58, %v1214_v53  ;;  %v9348_v60 = vcombine.low %v1210_v58, %v1214_v53  ;;  %v1088_v28 = vld [vmem:[%s12019_s15 + $0x2f0] sm:$0xff]  ;;  %v1007_v58 = vld [vmem:[%s12019_s15 + $0x68] sm:$0xff] }
 0x29a   : > { %3446 = vmatpush1.bf16.msra.mxu1 %v9308_v55  ;;  %3412 = vmatprep.mubr.bf16.mxu1 %v12927_v24  ;;  %v1222_v56 = vld [vmem:[%s12019_s15 + $0x720] sm:$0xff]  ;;  %v9208_v55 = vcombine.low %v1068_v44, %v1072_v29  ;;  %v9225_v9 = vcombine.high %v1084_v8, %v1088_v28  ;;  %v9224_v11 = vcombine.low %v1084_v8, %v1088_v28  ;;  %v1108_v53 = vld [vmem:[%s12019_s15 + $0x390] sm:$0xff] }
 0x29b   : > { %3447 = vmatprep.subr.bf16.mxu1 %v9317_v18  ;;  %3588 = vmatprep.mubr.bf16.mxu0 %v981_v31  ;;  %v986_v61 = vld [vmem:[#allocation2 + $0xe0] sm:$0xff]  ;;  %v9357_v15 = vcombine.high %v1218_v12, %v1222_v56  ;;  %v9356_v13 = vcombine.low %v1218_v12, %v1222_v56  ;;  %v9249_v44 = vcombine.high %v1108_v53, %v1112_v39  ;;  %v1011_v12 = vld [vmem:[%s12019_s15 + $0x88] sm:$0xff]  ;;  %v1116_v29 = vld [vmem:[%s12019_s15 + $0x3d0] sm:$0xff] }
 0x29c   : > { %3908 = vmatprep.subr.bf16.mxu0 %v9177_v42  ;;  %v1226_v30 = vld [vmem:[%s12019_s15 + $0x740] sm:$0xff]  ;;  %v992_v42 = vld [vmem:[#allocation2 + $0x110] sm:$0xff]  ;;  %v1015_v56 = vld [vmem:[%s12019_s15 + $0xa8] sm:$0xff] }
 0x29d   : > { %3909 = vmatpush1.bf16.msra.mxu0 %v9176_v52  ;;  %v1230_v0 = vld [vmem:[%s12019_s15 + $0x760] sm:$0xff]  ;;  %v1096_v52 = vld [vmem:[%s12019_s15 + $0x330] sm:$0xff] }
 0x29e   : > { %3448 = vmatpush1.bf16.msra.mxu1 %v9316_v21  ;;  %3910 = vmatprep.subr.bf16.mxu0 %v9185_v47  ;;  %v1234_v50 = vld [vmem:[%s12019_s15 + $0x780] sm:$0xff]  ;;  %v9365_v31 = vcombine.high %v1226_v30, %v1230_v0  ;;  %v9216_v21 = vcombine.low %v1076_v43, %v1080_v49  ;;  %v9364_v7 = vcombine.low %v1226_v30, %v1230_v0  ;;  %v1023_v30 = vld [vmem:[%s12019_s15 + $0xe8] sm:$0xff]  ;;  %v1124_v0 = vld [vmem:[%s12019_s15 + $0x410] sm:$0xff] }
 0x29f   : > { %3449 = vmatprep.subr.bf16.mxu1 %v9325_v17  ;;  %v1238_v18 = vld [vmem:[%s12019_s15 + $0x7a0] sm:$0xff]  ;;  %v1092_v17 = vld [vmem:[%s12019_s15 + $0x310] sm:$0xff]  ;;  %v9151_v49 = vcombine.high %v1011_v12, %v1015_v56 }
 0x2a0   : > { %3589 = vmatmul.mubr.bf16.gmra.mrb[12].mxu0 %v980_v54  ;;  %v1242_v2 = vld [vmem:[%s12019_s15 + $0x7c0] sm:$0xff]  ;;  %v9373_v47 = vcombine.high %v1234_v50, %v1238_v18  ;;  %v9372_v6 = vcombine.low %v1234_v50, %v1238_v18  ;;  %v1100_v54 = vld [vmem:[%s12019_s15 + $0x350] sm:$0xff]  ;;  %v1027_v50 = vld [vmem:[%s12019_s15 + $0x108] sm:$0xff] }
 0x2a1   : > { %3413 = vmatmul.mubr.bf16.gmra.mrb[16].mxu1 %v12939_v3  ;;  %3911 = vmatpush1.bf16.msra.mxu0 %v9184_v19  ;;  %v1246_v10 = vld [vmem:[%s12019_s15 + $0x7e0] sm:$0xff]  ;;  %v1128_v43 = vld [vmem:[%s12019_s15 + $0x430] sm:$0xff]  ;;  %v1031_v18 = vld [vmem:[%s12019_s15 + $0x128] sm:$0xff] }
 0x2a2   : > { %3450 = vmatpush1.bf16.msra.mxu1 %v9324_v62  ;;  %3422 = vmatprep.mubr.bf16.mxu1 %v12941_v25  ;;  %v9233_v62 = vcombine.high %v1092_v17, %v1096_v52  ;;  %v9381_v19 = vcombine.high %v1242_v2, %v1246_v10  ;;  %v9265_v8 = vcombine.high %v1124_v0, %v1128_v43  ;;  %v1132_v28 = vld [vmem:[%s12019_s15 + $0x450] sm:$0xff] }
 0x2a3   : > { %3451 = vmatprep.subr.bf16.mxu1 %v9333_v35  ;;  %3598 = vmatprep.mubr.bf16.mxu0 %v987_v14  ;;  %v1104_v35 = vld [vmem:[%s12019_s15 + $0x370] sm:$0xff] }
 0x2a4   : > { %3912 = vmatprep.subr.bf16.mxu0 %v9193_v23  ;;  %v9232_v23 = vcombine.low %v1092_v17, %v1096_v52  ;;  %v9241_v14 = vcombine.high %v1100_v54, %v1104_v35  ;;  %v1140_v17 = vld [vmem:[%s12019_s15 + $0x490] sm:$0xff] }
 0x2a5   : > { %3913 = vmatpush1.bf16.msra.mxu0 %v9192_v27  ;;  %v12984_v27 = vld [vmem:[#allocation2 + $0x10] sm:$0xff] }
 0x2a6   : > { %3452 = vmatpush1.bf16.msra.mxu1 %v9332_v33  ;;  %3914 = vmatprep.subr.bf16.mxu0 %v9201_v4  ;;  %v1003_v33 = vld [vmem:[%s12019_s15 + $0x48] sm:$0xff]  ;;  %v1144_v52 = vld [vmem:[%s12019_s15 + $0x4b0] sm:$0xff] }
 0x2a7   : > { %3453 = vmatprep.subr.bf16.mxu1 %v9341_v57  ;;  %v9240_v57 = vcombine.low %v1100_v54, %v1104_v35  ;;  %v12986_v4 = vld [vmem:[#allocation2 + $0x48] sm:$0xff] }
 0x2a8   : > { %3599 = vmatmul.mubr.bf16.gmra.mrb[16].mxu0 %v986_v61  ;;  %v1120_v61 = vld [vmem:[%s12019_s15 + $0x3f0] sm:$0xff]  ;;  %v1043_v54 = vld [vmem:[%s12019_s15 + $0x188] sm:$0xff] }
 0x2a9   : > { %3423 = vmatmul.mubr.bf16.gmra.mrb[20].mxu1 %v12953_v63  ;;  %3915 = vmatpush1.bf16.msra.mxu0 %v9200_v38  ;;  %v9248_v38 = vcombine.low %v1108_v53, %v1112_v39  ;;  %v1047_v35 = vld [vmem:[%s12019_s15 + $0x1a8] sm:$0xff]  ;;  %v1156_v53 = vld [vmem:[%s12019_s15 + $0x510] sm:$0xff] }
 0x2aa   : > { %3454 = vmatpush1.bf16.msra.mxu1 %v9340_v16  ;;  %3465 = vmatprep.mubr.bf16.mxu1 %v12955_v32  ;;  %v9134_v16 = vcombine.low %v995_v34, %v999_v36  ;;  %v9281_v34 = vcombine.high %v1140_v17, %v1144_v52  ;;  %v9166_v36 = vcombine.low %v1027_v50, %v1031_v18  ;;  %v1160_v39 = vld [vmem:[%s12019_s15 + $0x530] sm:$0xff] }
 0x2ab   : > { %3455 = vmatprep.subr.bf16.mxu1 %v9349_v5  ;;  %3608 = vmatprep.mubr.bf16.mxu0 %v993_v46  ;;  %v9143_v5 = vcombine.high %v1003_v33, %v1007_v58  ;;  %v9142_v46 = vcombine.low %v1003_v33, %v1007_v58  ;;  %v1051_v33 = vld [vmem:[%s12019_s15 + $0x1c8] sm:$0xff] }
 0x2ac   : > { %3916 = vmatprep.subr.bf16.mxu0 %v9209_v41  ;;  %v9257_v41 = vcombine.high %v1116_v29, %v1120_v61  ;;  %v1055_v58 = vld [vmem:[%s12019_s15 + $0x1e8] sm:$0xff] }
 0x2ad   : > { %3917 = vmatpush1.bf16.msra.mxu0 %v9208_v55  ;;  %v12998_v55 = vld [vmem:[#allocation2 + $0x40] sm:$0xff] }
 0x2ae   : > { %3456 = vmatpush1.bf16.msra.mxu1 %v9348_v60  ;;  %3918 = vmatprep.subr.bf16.mxu0 %v9217_v37  ;;  %v1019_v60 = vld [vmem:[%s12019_s15 + $0xc8] sm:$0xff]  ;;  %v13000_v37 = vld [vmem:[#allocation2 + $0x78] sm:$0xff] }
 0x2af   : > { %3457 = vmatprep.subr.bf16.mxu1 %v9357_v15  ;;  %v9256_v15 = vcombine.low %v1116_v29, %v1120_v61  ;;  %v1059_v29 = vld [vmem:[%s12019_s15 + $0x208] sm:$0xff] }
 0x2b0   : > { %3609 = vmatmul.mubr.bf16.gmra.mrb[20].mxu0 %v992_v42  ;;  %v1136_v42 = vld [vmem:[%s12019_s15 + $0x470] sm:$0xff]  ;;  %v1063_v61 = vld [vmem:[%s12019_s15 + $0x228] sm:$0xff] }
 0x2b1   : > { %3919 = vmatpush1.bf16.msra.mxu0 %v9216_v21  ;;  %3930 = vmatprep.mubr.bf16.mxu0 %v12834_v45  ;;  %v9380_v45 = vcombine.low %v1242_v2, %v1246_v10  ;;  %v9264_v21 = vcombine.low %v1124_v0, %v1128_v43  ;;  %v1035_v2 = vld [vmem:[%s12019_s15 + $0x148] sm:$0xff]  ;;  %v1172_v0 = vld [vmem:[%s12019_s15 + $0x590] sm:$0xff] }
 0x2b2   : > { %3458 = vmatpush1.bf16.msra.mxu1 %v9356_v13  ;;  %3920 = vmatprep.subr.bf16.mxu0 %v9225_v9  ;;  %v9150_v13 = vcombine.low %v1011_v12, %v1015_v56  ;;  %v9273_v9 = vcombine.high %v1132_v28, %v1136_v42  ;;  %v1039_v10 = vld [vmem:[%s12019_s15 + $0x168] sm:$0xff]  ;;  %v9297_v12 = vcombine.high %v1156_v53, %v1160_v39  ;;  %v1176_v43 = vld [vmem:[%s12019_s15 + $0x5b0] sm:$0xff] }
 0x2b3   : > { %3459 = vmatprep.subr.bf16.mxu1 %v9365_v31  ;;  %v9159_v31 = vcombine.high %v1019_v60, %v1023_v30  ;;  %v9182_v56 = vcombine.low %v1043_v54, %v1047_v35 }
 0x2b5   : > { %3921 = vmatpush1.bf16.msra.mxu0 %v9224_v11  ;;  %v9272_v11 = vcombine.low %v1132_v28, %v1136_v42  ;;  %v1075_v28 = vld [vmem:[%s12019_s15 + $0x288] sm:$0xff] }
 0x2b6   : > { %3460 = vmatpush1.bf16.msra.mxu1 %v9364_v7  ;;  %3922 = vmatprep.subr.bf16.mxu0 %v9233_v62  ;;  %v9158_v7 = vcombine.low %v1019_v60, %v1023_v30  ;;  %v13014_v62 = vld [vmem:[#allocation2 + $0x70] sm:$0xff]  ;;  %v1067_v60 = vld [vmem:[%s12019_s15 + $0x248] sm:$0xff] }
 0x2b7   : > { %3461 = vmatprep.subr.bf16.mxu1 %v9373_v47  ;;  %v9167_v47 = vcombine.high %v1027_v50, %v1031_v18  ;;  %v1071_v30 = vld [vmem:[%s12019_s15 + $0x268] sm:$0xff]  ;;  %v9313_v50 = vcombine.high %v1172_v0, %v1176_v43  ;;  %v9198_v18 = vcombine.low %v1059_v29, %v1063_v61 }
 0x2b8   : > { %v1079_v42 = vld [vmem:[%s12019_s15 + $0x2a8] sm:$0xff] }
 0x2b9   : > { %3923 = vmatpush1.bf16.msra.mxu0 %v9232_v23  ;;  %v9175_v23 = vcombine.high %v1035_v2, %v1039_v10 }
 0x2ba   : > { %3462 = vmatpush1.bf16.msra.mxu1 %v9372_v6  ;;  %3924 = vmatprep.subr.bf16.mxu0 %v9241_v14  ;;  %v13016_v6 = vld [vmem:[#allocation2 + $0xa8] sm:$0xff] }
 0x2bb   : > { %3463 = vmatprep.subr.bf16.mxu1 %v9381_v19  ;;  %v1148_v19 = vld [vmem:[%s12019_s15 + $0x4d0] sm:$0xff] }
 0x2bd   : > { %3925 = vmatpush1.bf16.msra.mxu0 %v9240_v57 }
 0x2be   : > { %3464 = vmatpush1.bf16.msra.mxu1 %v9380_v45  ;;  %3926 = vmatprep.subr.bf16.mxu0 %v9249_v44  ;;  %v9174_v45 = vcombine.low %v1035_v2, %v1039_v10  ;;  %v13030_v44 = vld [vmem:[#allocation2 + $0xa0] sm:$0xff]  ;;  %v1083_v2 = vld [vmem:[%s12019_s15 + $0x2c8] sm:$0xff] }
 0x2bf   : > { %3619 = vmatprep.subr.bf16.mxu1 %v9135_v48  ;;  %v9183_v48 = vcombine.high %v1043_v54, %v1047_v35  ;;  %v1087_v10 = vld [vmem:[%s12019_s15 + $0x2e8] sm:$0xff]  ;;  %v9214_v54 = vcombine.low %v1075_v28, %v1079_v42 }
 0x2c0   : > { %v1091_v35 = vld [vmem:[%s12019_s15 + $0x308] sm:$0xff] }
 0x2c1   : > { %3466 = vmatmul.mubr.bf16.vlgmr.msra.gmra.mrb[0].mxu1 %v12984_v27  ;;  %3927 = vmatpush1.bf16.msra.mxu0 %v9248_v38  ;;  %v9191_v38 = vcombine.high %v1051_v33, %v1055_v58 }
 0x2c2   : > { %3620 = vmatpush1.bf16.msra.mxu1 %v9134_v16  ;;  %3475 = vmatprep.mubr.bf16.mxu1 %v12986_v4  ;;  %v13032_v16 = vld [vmem:[#allocation2 + $0xd8] sm:$0xff] }
 0x2c3   : > { %3621 = vmatprep.subr.bf16.mxu1 %v9143_v5  ;;  %3928 = vmatprep.subr.bf16.mxu0 %v9257_v41  ;;  %v1164_v5 = vld [vmem:[%s12019_s15 + $0x550] sm:$0xff] }
 0x2c5   : > { %3929 = vmatpush1.bf16.msra.mxu0 %v9256_v15 }
 0x2c6   : > { %3622 = vmatpush1.bf16.msra.mxu1 %v9142_v46  ;;  %3991 = vmatprep.subr.bf16.mxu0 %v9265_v8  ;;  %v9190_v46 = vcombine.low %v1051_v33, %v1055_v58  ;;  %v13046_v8 = vld [vmem:[#allocation2 + $0xd0] sm:$0xff]  ;;  %v1103_v33 = vld [vmem:[%s12019_s15 + $0x368] sm:$0xff] }
 0x2c7   : > { %3623 = vmatprep.subr.bf16.mxu1 %v9151_v49  ;;  %v9199_v49 = vcombine.high %v1059_v29, %v1063_v61  ;;  %v11340_v58 = vld [vmem:[#allocation2 + $0x8] sm:$0xff]  ;;  %v1212_v61 = vld [vmem:[%s12019_s15 + $0x6d0] sm:$0xff] }
 0x2c8   : > { %3931 = vmatmul.mubr.bf16.vlgmr.msra.gmra.mrb[24].mxu0 %v12885_v26  ;;  %v1152_v26 = vld [vmem:[%s12019_s15 + $0x4f0] sm:$0xff]  ;;  %v1107_v29 = vld [vmem:[%s12019_s15 + $0x388] sm:$0xff] }
 0x2c9   : > { %3476 = vmatmul.mubr.bf16.gmra.mrb[4].mxu1 %v12998_v55  ;;  %3992 = vmatpush1.bf16.msra.mxu0 %v9264_v21  ;;  %v9289_v14 = vcombine.high %v1148_v19, %v1152_v26  ;;  %v9288_v57 = vcombine.low %v1148_v19, %v1152_v26  ;;  %v9207_v21 = vcombine.high %v1067_v60, %v1071_v30  ;;  %v1095_v19 = vld [vmem:[%s12019_s15 + $0x328] sm:$0xff]  ;;  %v1196_v26 = vld [vmem:[%s12019_s15 + $0x650] sm:$0xff] }
 0x2ca   : > { %3624 = vmatpush1.bf16.msra.mxu1 %v9150_v13  ;;  %3485 = vmatprep.mubr.bf16.mxu1 %v13000_v37  ;;  %v13048_v13 = vld [vmem:[#allocation2 + $0x108] sm:$0xff] }
 0x2cb   : > { %3625 = vmatprep.subr.bf16.mxu1 %v9159_v31  ;;  %3940 = vmatprep.mubr.bf16.mxu0 %v12887_v1  ;;  %v9280_v1 = vcombine.low %v1140_v17, %v1144_v52  ;;  %v1180_v31 = vld [vmem:[%s12019_s15 + $0x5d0] sm:$0xff] }
 0x2cc   : > { %3993 = vmatprep.subr.bf16.mxu0 %v9273_v9  ;;  %v1188_v17 = vld [vmem:[%s12019_s15 + $0x610] sm:$0xff] }
 0x2cd   : > { %3994 = vmatpush1.bf16.msra.mxu0 %v9272_v11  ;;  %v1192_v52 = vld [vmem:[%s12019_s15 + $0x630] sm:$0xff] }
 0x2ce   : > { %3626 = vmatpush1.bf16.msra.mxu1 %v9158_v7  ;;  %3995 = vmatprep.subr.bf16.mxu0 %v9281_v34  ;;  %v9206_v7 = vcombine.low %v1067_v60, %v1071_v30  ;;  %v13062_v34 = vld [vmem:[#allocation2 + $0x100] sm:$0xff]  ;;  %v1224_v60 = vld [vmem:[%s12019_s15 + $0x730] sm:$0xff] }
 0x2cf   : > { %3627 = vmatprep.subr.bf16.mxu1 %v9167_v47  ;;  %v9215_v47 = vcombine.high %v1075_v28, %v1079_v42  ;;  %v1232_v28 = vld [vmem:[%s12019_s15 + $0x770] sm:$0xff] }
 0x2d0   : > { %3941 = vmatmul.mubr.bf16.gmra.mrb[28].mxu0 %v12897_v51  ;;  %v1168_v51 = vld [vmem:[%s12019_s15 + $0x570] sm:$0xff] }
 0x2d1   : > { %3486 = vmatmul.mubr.bf16.gmra.mrb[8].mxu1 %v13014_v62  ;;  %3996 = vmatpush1.bf16.msra.mxu0 %v9280_v1  ;;  %v9305_v41 = vcombine.high %v1164_v5, %v1168_v51  ;;  %v9304_v15 = vcombine.low %v1164_v5, %v1168_v51  ;;  %v9328_v1 = vcombine.low %v1188_v17, %v1192_v52  ;;  %v1216_v5 = vld [vmem:[%s12019_s15 + $0x6f0] sm:$0xff] }
 0x2d2   : > { %3628 = vmatpush1.bf16.msra.mxu1 %v9166_v36  ;;  %3495 = vmatprep.mubr.bf16.mxu1 %v13016_v6  ;;  %v9329_v36 = vcombine.high %v1188_v17, %v1192_v52 }
 0x2d3   : > { %3629 = vmatprep.subr.bf16.mxu1 %v9175_v23  ;;  %3950 = vmatprep.mubr.bf16.mxu0 %v12899_v40  ;;  %v9296_v40 = vcombine.low %v1156_v53, %v1160_v39  ;;  %v1200_v23 = vld [vmem:[%s12019_s15 + $0x670] sm:$0xff] }
 0x2d4   : > { %3997 = vmatprep.subr.bf16.mxu0 %v9289_v14  ;;  %v9222_v14 = vcombine.low %v1083_v2, %v1087_v10  ;;  %v1204_v53 = vld [vmem:[%s12019_s15 + $0x690] sm:$0xff] }
 0x2d5   : > { %3998 = vmatpush1.bf16.msra.mxu0 %v9288_v57  ;;  %v1208_v39 = vld [vmem:[%s12019_s15 + $0x6b0] sm:$0xff]  ;;  %v9336_v57 = vcombine.low %v1196_v26, %v1200_v23 }
 0x2d6   : > { %3630 = vmatpush1.bf16.msra.mxu1 %v9174_v45  ;;  %3999 = vmatprep.subr.bf16.mxu0 %v9297_v12  ;;  %v1099_v45 = vld [vmem:[%s12019_s15 + $0x348] sm:$0xff]  ;;  %v9345_v12 = vcombine.high %v1204_v53, %v1208_v39 }
 0x2d7   : > { %3631 = vmatprep.subr.bf16.mxu1 %v9183_v48  ;;  %v9231_v48 = vcombine.high %v1091_v35, %v1095_v19  ;;  %v9239_v51 = vcombine.high %v1099_v45, %v1103_v33 }
 0x2d8   : > { %3951 = vmatmul.mubr.bf16.gmra.mrb[32].mxu0 %v12911_v22  ;;  %v1184_v22 = vld [vmem:[%s12019_s15 + $0x5f0] sm:$0xff] }
 0x2d9   : > { %3496 = vmatmul.mubr.bf16.gmra.mrb[12].mxu1 %v13030_v44  ;;  %4000 = vmatpush1.bf16.msra.mxu0 %v9296_v40  ;;  %v9321_v9 = vcombine.high %v1180_v31, %v1184_v22  ;;  %v9320_v11 = vcombine.low %v1180_v31, %v1184_v22  ;;  %v9353_v40 = vcombine.high %v1212_v61, %v1216_v5  ;;  %v1127_v31 = vld [vmem:[%s12019_s15 + $0x428] sm:$0xff] }
 0x2da   : > { %3632 = vmatpush1.bf16.msra.mxu1 %v9182_v56  ;;  %3505 = vmatprep.mubr.bf16.mxu1 %v13032_v16  ;;  %v9230_v56 = vcombine.low %v1091_v35, %v1095_v19  ;;  %v1143_v35 = vld [vmem:[%s12019_s15 + $0x4a8] sm:$0xff] }
 0x2db   : > { %3633 = vmatprep.subr.bf16.mxu1 %v9191_v38  ;;  %3960 = vmatprep.mubr.bf16.mxu0 %v12913_v59  ;;  %v9312_v59 = vcombine.low %v1172_v0, %v1176_v43  ;;  %v1111_v38 = vld [vmem:[%s12019_s15 + $0x3a8] sm:$0xff]  ;;  %v9352_v43 = vcombine.low %v1212_v61, %v1216_v5 }
 0x2dc   : > { %4001 = vmatprep.subr.bf16.mxu0 %v9305_v41  ;;  %v1115_v41 = vld [vmem:[%s12019_s15 + $0x3c8] sm:$0xff]  ;;  %v9247_v30 = vcombine.high %v1107_v29, %v1111_v38 }
 0x2dd   : > { %4002 = vmatpush1.bf16.msra.mxu0 %v9304_v15  ;;  %v1119_v0 = vld [vmem:[%s12019_s15 + $0x3e8] sm:$0xff]  ;;  %v9246_v15 = vcombine.low %v1107_v29, %v1111_v38 }
 0x2de   : > { %3634 = vmatpush1.bf16.msra.mxu1 %v9190_v46  ;;  %4003 = vmatprep.subr.bf16.mxu0 %v9313_v50  ;;  %v1220_v46 = vld [vmem:[%s12019_s15 + $0x710] sm:$0xff]  ;;  %v1123_v50 = vld [vmem:[%s12019_s15 + $0x408] sm:$0xff]  ;;  %v9255_v42 = vcombine.high %v1115_v41, %v1119_v0 }
 0x2df   : > { %3635 = vmatprep.subr.bf16.mxu1 %v9199_v49  ;;  %v9361_v49 = vcombine.high %v1220_v46, %v1224_v60  ;;  %v9262_v52 = vcombine.low %v1123_v50, %v1127_v31  ;;  %v1159_v61 = vld [vmem:[%s12019_s15 + $0x528] sm:$0xff] }
 0x2e0   : > { %3961 = vmatmul.mubr.bf16.gmra.mrb[36].mxu0 %v12925_v20  ;;  %v9223_v20 = vcombine.high %v1083_v2, %v1087_v10  ;;  %v1135_v2 = vld [vmem:[%s12019_s15 + $0x468] sm:$0xff] }
 0x2e1   : > { %3506 = vmatmul.mubr.bf16.gmra.mrb[16].mxu1 %v13046_v8  ;;  %4004 = vmatpush1.bf16.msra.mxu0 %v9312_v59  ;;  %v1236_v59 = vld [vmem:[%s12019_s15 + $0x790] sm:$0xff] }
 0x2e2   : > { %3636 = vmatpush1.bf16.msra.mxu1 %v9198_v18  ;;  %3515 = vmatprep.mubr.bf16.mxu1 %v13048_v13  ;;  %v1228_v18 = vld [vmem:[%s12019_s15 + $0x750] sm:$0xff] }
 0x2e3   : > { %3637 = vmatprep.subr.bf16.mxu1 %v9207_v21  ;;  %3970 = vmatprep.mubr.bf16.mxu0 %v12927_v24  ;;  %v9337_v24 = vcombine.high %v1196_v26, %v1200_v23  ;;  %v9369_v22 = vcombine.high %v1228_v18, %v1232_v28  ;;  %v1131_v21 = vld [vmem:[%s12019_s15 + $0x448] sm:$0xff]  ;;  %v9368_v10 = vcombine.low %v1228_v18, %v1232_v28  ;;  %v11341_v26 = vld [vmem:[#allocation2] sm:$0xff]  ;;  %v1280_v18 = vld [vmem:[%s12019_s15 + $0x8f0] sm:$0xff] }
 0x2e4   : > { %4005 = vmatprep.subr.bf16.mxu0 %v9321_v9  ;;  %v1240_v9 = vld [vmem:[%s12019_s15 + $0x7b0] sm:$0xff] }
 0x2e5   : > { %4006 = vmatpush1.bf16.msra.mxu0 %v9320_v11  ;;  %v9377_v17 = vcombine.high %v1236_v59, %v1240_v9  ;;  %v1244_v11 = vld [vmem:[%s12019_s15 + $0x7d0] sm:$0xff]  ;;  %v9376_v19 = vcombine.low %v1236_v59, %v1240_v9  ;;  %v1179_v9 = vld [vmem:[%s12019_s15 + $0x5c8] sm:$0xff] }
 0x2e6   : > { %3638 = vmatpush1.bf16.msra.mxu1 %v9206_v7  ;;  %4007 = vmatprep.subr.bf16.mxu0 %v9329_v36  ;;  %v9263_v7 = vcombine.high %v1123_v50, %v1127_v31  ;;  %v1248_v36 = vld [vmem:[%s12019_s15 + $0x7f0] sm:$0xff]  ;;  %v11345_v31 = vld [vmem:[#allocation2 + $0x60] sm:$0xff] }
 0x2e7   : > { %3639 = vmatprep.subr.bf16.mxu1 %v9215_v47  ;;  %v1139_v47 = vld [vmem:[%s12019_s15 + $0x488] sm:$0xff]  ;;  %v9385_v23 = vcombine.high %v1244_v11, %v1248_v36  ;;  %v1276_v50 = vld [vmem:[%s12019_s15 + $0x8d0] sm:$0xff] }
 0x2e8   : > { %3971 = vmatmul.mubr.bf16.gmra.mrb[40].mxu0 %v12939_v3  ;;  %v9344_v3 = vcombine.low %v1204_v53, %v1208_v39  ;;  %v9384_v53 = vcombine.low %v1244_v11, %v1248_v36  ;;  %v1296_v11 = vld [vmem:[%s12019_s15 + $0x970] sm:$0xff] }
 0x2e9   : > { %3516 = vmatmul.mubr.bf16.gmra.mrb[20].mxu1 %v13062_v34  ;;  %4008 = vmatpush1.bf16.msra.mxu0 %v9328_v1  ;;  %v1147_v1 = vld [vmem:[%s12019_s15 + $0x4c8] sm:$0xff] }
 0x2ea   : > { %3640 = vmatpush1.bf16.msra.mxu1 %v9214_v54  ;;  %3651 = vmatprep.mubr.bf16.mxu1 %v11340_v58  ;;  %v9271_v54 = vcombine.high %v1131_v21, %v1135_v2  ;;  %v1151_v58 = vld [vmem:[%s12019_s15 + $0x4e8] sm:$0xff] }
 0x2eb   : > { %3641 = vmatprep.subr.bf16.mxu1 %v9223_v20  ;;  %3980 = vmatprep.mubr.bf16.mxu0 %v12941_v25  ;;  %v9238_v25 = vcombine.low %v1099_v45, %v1103_v33  ;;  %v9270_v20 = vcombine.low %v1131_v21, %v1135_v2  ;;  %v1256_v45 = vld [vmem:[%s12019_s15 + $0x830] sm:$0xff]  ;;  %v9279_v33 = vcombine.high %v1139_v47, %v1143_v35 }
 0x2ec   : > { %4009 = vmatprep.subr.bf16.mxu0 %v9337_v24  ;;  %v11342_v24 = vld [vmem:[#allocation2 + $0x38] sm:$0xff]  ;;  %v9287_v29 = vcombine.high %v1147_v1, %v1151_v58  ;;  %v1288_v21 = vld [vmem:[%s12019_s15 + $0x930] sm:$0xff]  ;;  %v9416_v2 = vcombine.low %v1276_v50, %v1280_v18 }
 0x2ed   : > { %4010 = vmatpush1.bf16.msra.mxu0 %v9336_v57  ;;  %v1155_v57 = vld [vmem:[%s12019_s15 + $0x508] sm:$0xff] }
 0x2ee   : > { %3642 = vmatpush1.bf16.msra.mxu1 %v9222_v14  ;;  %4011 = vmatprep.subr.bf16.mxu0 %v9345_v12  ;;  %v1252_v14 = vld [vmem:[%s12019_s15 + $0x810] sm:$0xff] }
 0x2ef   : > { %3643 = vmatprep.subr.bf16.mxu1 %v9231_v48  ;;  %v9393_v39 = vcombine.high %v1252_v14, %v1256_v45  ;;  %v9278_v48 = vcombine.low %v1139_v47, %v1143_v35  ;;  %v1260_v12 = vld [vmem:[%s12019_s15 + $0x850] sm:$0xff]  ;;  %v9392_v5 = vcombine.low %v1252_v14, %v1256_v45  ;;  %v1199_v14 = vld [vmem:[%s12019_s15 + $0x668] sm:$0xff] }
 0x2f0   : > { %3981 = vmatmul.mubr.bf16.gmra.mrb[44].mxu0 %v12953_v63  ;;  %v9360_v63 = vcombine.low %v1220_v46, %v1224_v60  ;;  %v1272_v46 = vld [vmem:[%s12019_s15 + $0x8b0] sm:$0xff]  ;;  %v9295_v60 = vcombine.high %v1155_v57, %v1159_v61 }
 0x2f1   : > { %4012 = vmatpush1.bf16.msra.mxu0 %v9344_v3  ;;  %4023 = vmatprep.mubr.bf16.mxu0 %v12955_v32  ;;  %v9254_v32 = vcombine.low %v1115_v41, %v1119_v0  ;;  %v9286_v3 = vcombine.low %v1147_v1, %v1151_v58  ;;  %v1268_v41 = vld [vmem:[%s12019_s15 + $0x890] sm:$0xff] }
 0x2f2   : > { %3644 = vmatpush1.bf16.msra.mxu1 %v9230_v56  ;;  %4013 = vmatprep.subr.bf16.mxu0 %v9353_v40  ;;  %v1264_v56 = vld [vmem:[%s12019_s15 + $0x870] sm:$0xff]  ;;  %v1163_v40 = vld [vmem:[%s12019_s15 + $0x548] sm:$0xff] }
 0x2f3   : > { %3645 = vmatprep.subr.bf16.mxu1 %v9239_v51  ;;  %v11343_v51 = vld [vmem:[#allocation2 + $0x30] sm:$0xff]  ;;  %v9401_v38 = vcombine.high %v1260_v12, %v1264_v56  ;;  %v9400_v0 = vcombine.low %v1260_v12, %v1264_v56  ;;  %v1207_v12 = vld [vmem:[%s12019_s15 + $0x6a8] sm:$0xff]  ;;  %v11349_v56 = vld [vmem:[#allocation2 + $0xc0] sm:$0xff] }
 0x2f4   : > { %v1292_v47 = vld [vmem:[%s12019_s15 + $0x950] sm:$0xff] }
 0x2f5   : > { %4014 = vmatpush1.bf16.msra.mxu0 %v9352_v43  ;;  %v9409_v43 = vcombine.high %v1268_v41, %v1272_v46  ;;  %v11347_v35 = vld [vmem:[#allocation2 + $0x90] sm:$0xff]  ;;  %v9432_v45 = vcombine.low %v1292_v47, %v1296_v11 }
 0x2f6   : > { %3646 = vmatpush1.bf16.msra.mxu1 %v9238_v25  ;;  %4015 = vmatprep.subr.bf16.mxu0 %v9361_v49  ;;  %v11344_v25 = vld [vmem:[#allocation2 + $0x68] sm:$0xff]  ;;  %v9294_v49 = vcombine.low %v1155_v57, %v1159_v61  ;;  %v1304_v1 = vld [vmem:[%s12019_s15 + $0x9b0] sm:$0xff] }
 0x2f7   : > { %3647 = vmatprep.subr.bf16.mxu1 %v9247_v30  ;;  %v1167_v30 = vld [vmem:[%s12019_s15 + $0x568] sm:$0xff] }
 0x2f8   : > { %v9303_v28 = vcombine.high %v1163_v40, %v1167_v30  ;;  %v1211_v61 = vld [vmem:[%s12019_s15 + $0x6c8] sm:$0xff] }
 0x2f9   : > { %4016 = vmatpush1.bf16.msra.mxu0 %v9360_v63  ;;  %v9302_v63 = vcombine.low %v1163_v40, %v1167_v30  ;;  %v1215_v40 = vld [vmem:[%s12019_s15 + $0x6e8] sm:$0xff] }
 0x2fa   : > { %3648 = vmatpush1.bf16.msra.mxu1 %v9246_v15  ;;  %4017 = vmatprep.subr.bf16.mxu0 %v9369_v22  ;;  %v1171_v15 = vld [vmem:[%s12019_s15 + $0x588] sm:$0xff]  ;;  %v11346_v22 = vld [vmem:[#allocation2 + $0x98] sm:$0xff] }
 0x2fb   : > { %3649 = vmatprep.subr.bf16.mxu1 %v9255_v42  ;;  %v1175_v42 = vld [vmem:[%s12019_s15 + $0x5a8] sm:$0xff] }
 0x2fc   : > { %v9311_v59 = vcombine.high %v1171_v15, %v1175_v42 }
 0x2fd   : > { %4018 = vmatpush1.bf16.msra.mxu0 %v9368_v10 }
 0x2fe   : > { %3650 = vmatpush1.bf16.msra.mxu1 %v9254_v32  ;;  %4019 = vmatprep.subr.bf16.mxu0 %v9377_v17  ;;  %v1284_v32 = vld [vmem:[%s12019_s15 + $0x910] sm:$0xff]  ;;  %v9310_v17 = vcombine.low %v1171_v15, %v1175_v42  ;;  %v11352_v42 = vld [vmem:[#allocation2 + $0x18] sm:$0xff] }
 0x2ff   : > { %3712 = vmatprep.subr.bf16.mxu1 %v9263_v7  ;;  %v1183_v7 = vld [vmem:[%s12019_s15 + $0x5e8] sm:$0xff]  ;;  %v9425_v10 = vcombine.high %v1284_v32, %v1288_v21  ;;  %v1332_v15 = vld [vmem:[%s12019_s15 + $0xa90] sm:$0xff] }
 0x300   : > { %v9319_v36 = vcombine.high %v1179_v9, %v1183_v7 }
 0x301   : > { %3652 = vmatmul.mubr.bf16.vlgmr.msra.gmra.mrb[24].mxu1 %v11341_v26  ;;  %4020 = vmatpush1.bf16.msra.mxu0 %v9376_v19  ;;  %v9318_v19 = vcombine.low %v1179_v9, %v1183_v7  ;;  %v1195_v26 = vld [vmem:[%s12019_s15 + $0x648] sm:$0xff] }
 0x302   : > { %3713 = vmatpush1.bf16.msra.mxu1 %v9262_v52  ;;  %3661 = vmatprep.mubr.bf16.mxu1 %v11342_v24  ;;  %v1187_v52 = vld [vmem:[%s12019_s15 + $0x608] sm:$0xff]  ;;  %v9335_v57 = vcombine.high %v1195_v26, %v1199_v14 }
 0x303   : > { %3714 = vmatprep.subr.bf16.mxu1 %v9271_v54  ;;  %4021 = vmatprep.subr.bf16.mxu0 %v9385_v23  ;;  %v1191_v54 = vld [vmem:[%s12019_s15 + $0x628] sm:$0xff] }
 0x304   : > { %v11348_v23 = vld [vmem:[#allocation2 + $0xc8] sm:$0xff]  ;;  %v9327_v24 = vcombine.high %v1187_v52, %v1191_v54  ;;  %v9326_v58 = vcombine.low %v1187_v52, %v1191_v54 }
 0x305   : > { %4022 = vmatpush1.bf16.msra.mxu0 %v9384_v53  ;;  %v1203_v53 = vld [vmem:[%s12019_s15 + $0x688] sm:$0xff] }
 0x306   : > { %3715 = vmatpush1.bf16.msra.mxu1 %v9270_v20  ;;  %4084 = vmatprep.subr.bf16.mxu0 %v9393_v39  ;;  %v1300_v20 = vld [vmem:[%s12019_s15 + $0x990] sm:$0xff]  ;;  %v9342_v30 = vcombine.low %v1203_v53, %v1207_v12  ;;  %v1235_v7 = vld [vmem:[%s12019_s15 + $0x788] sm:$0xff] }
 0x307   : > { %3716 = vmatprep.subr.bf16.mxu1 %v9279_v33  ;;  %v9441_v33 = vcombine.high %v1300_v20, %v1304_v1  ;;  %v1308_v39 = vld [vmem:[%s12019_s15 + $0x9d0] sm:$0xff] }
 0x308   : > { %4024 = vmatmul.mubr.bf16.vlgmr.msra.gmra.mrb[24].mxu0 %v12984_v27  ;;  %v9408_v27 = vcombine.low %v1268_v41, %v1272_v46  ;;  %v1324_v41 = vld [vmem:[%s12019_s15 + $0xa50] sm:$0xff] }
 0x309   : > { %3662 = vmatmul.mubr.bf16.gmra.mrb[28].mxu1 %v11343_v51  ;;  %4085 = vmatpush1.bf16.msra.mxu0 %v9392_v5  ;;  %v11350_v5 = vld [vmem:[#allocation2 + $0xf8] sm:$0xff]  ;;  %v1316_v51 = vld [vmem:[%s12019_s15 + $0xa10] sm:$0xff] }
 0x30a   : > { %3717 = vmatpush1.bf16.msra.mxu1 %v9278_v48  ;;  %3671 = vmatprep.mubr.bf16.mxu1 %v11344_v25  ;;  %v1312_v48 = vld [vmem:[%s12019_s15 + $0x9f0] sm:$0xff] }
 0x30b   : > { %3718 = vmatprep.subr.bf16.mxu1 %v9287_v29  ;;  %4033 = vmatprep.mubr.bf16.mxu0 %v12986_v4  ;;  %v9417_v4 = vcombine.high %v1276_v50, %v1280_v18  ;;  %v9334_v29 = vcombine.low %v1195_v26, %v1199_v14  ;;  %v9448_v25 = vcombine.low %v1308_v39, %v1312_v48  ;;  %v1328_v46 = vld [vmem:[%s12019_s15 + $0xa70] sm:$0xff] }
 0x30c   : > { %4086 = vmatprep.subr.bf16.mxu0 %v9401_v38  ;;  %v1320_v38 = vld [vmem:[%s12019_s15 + $0xa30] sm:$0xff] }
 0x30d   : > { %4087 = vmatpush1.bf16.msra.mxu0 %v9400_v0  ;;  %v9351_v0 = vcombine.high %v1211_v61, %v1215_v40  ;;  %v1336_v50 = vld [vmem:[%s12019_s15 + $0xab0] sm:$0xff] }
 0x30e   : > { %3719 = vmatpush1.bf16.msra.mxu1 %v9286_v3  ;;  %4088 = vmatprep.subr.bf16.mxu0 %v9409_v43  ;;  %v9343_v3 = vcombine.high %v1203_v53, %v1207_v12  ;;  %v1219_v43 = vld [vmem:[%s12019_s15 + $0x708] sm:$0xff]  ;;  %v11351_v18 = vld [vmem:[#allocation2 + $0xf0] sm:$0xff] }
 0x30f   : > { %3720 = vmatprep.subr.bf16.mxu1 %v9295_v60  ;;  %v9457_v60 = vcombine.high %v1316_v51, %v1320_v38  ;;  %v1368_v14 = vld [vmem:[%s12019_s15 + $0xbb0] sm:$0xff]  ;;  %v1259_v53 = vld [vmem:[%s12019_s15 + $0x848] sm:$0xff] }
 0x310   : > { %4034 = vmatmul.mubr.bf16.gmra.mrb[28].mxu0 %v12998_v55  ;;  %v9424_v55 = vcombine.low %v1284_v32, %v1288_v21  ;;  %v1344_v32 = vld [vmem:[%s12019_s15 + $0xaf0] sm:$0xff]  ;;  %v9473_v21 = vcombine.high %v1332_v15, %v1336_v50 }
 0x311   : > { %3672 = vmatmul.mubr.bf16.gmra.mrb[32].mxu1 %v11345_v31  ;;  %4089 = vmatpush1.bf16.msra.mxu0 %v9408_v27  ;;  %v1227_v31 = vld [vmem:[%s12019_s15 + $0x748] sm:$0xff]  ;;  %v1376_v12 = vld [vmem:[%s12019_s15 + $0xbf0] sm:$0xff] }
 0x312   : > { %3721 = vmatpush1.bf16.msra.mxu1 %v9294_v49  ;;  %3681 = vmatprep.mubr.bf16.mxu1 %v11346_v22  ;;  %v1223_v49 = vld [vmem:[%s12019_s15 + $0x728] sm:$0xff]  ;;  %v1340_v22 = vld [vmem:[%s12019_s15 + $0xad0] sm:$0xff] }
 0x313   : > { %3722 = vmatprep.subr.bf16.mxu1 %v9303_v28  ;;  %4043 = vmatprep.mubr.bf16.mxu0 %v13000_v37  ;;  %v9433_v37 = vcombine.high %v1292_v47, %v1296_v11  ;;  %v9350_v28 = vcombine.low %v1211_v61, %v1215_v40  ;;  %v9359_v27 = vcombine.high %v1219_v43, %v1223_v49  ;;  %v1243_v11 = vld [vmem:[%s12019_s15 + $0x7c8] sm:$0xff] }
 0x314   : > { %4090 = vmatprep.subr.bf16.mxu0 %v9417_v4  ;;  %v1231_v4 = vld [vmem:[%s12019_s15 + $0x768] sm:$0xff]  ;;  %v9481_v52 = vcombine.high %v1340_v22, %v1344_v32  ;;  %v9480_v54 = vcombine.low %v1340_v22, %v1344_v32  ;;  %v13188_v22 = vld [vmem:[#allocation2 + $0x58] sm:$0xff] }
 0x315   : > { %4091 = vmatpush1.bf16.msra.mxu0 %v9416_v2  ;;  %v9367_v9 = vcombine.high %v1227_v31, %v1231_v4  ;;  %v1239_v2 = vld [vmem:[%s12019_s15 + $0x7a8] sm:$0xff] }
 0x316   : > { %3723 = vmatpush1.bf16.msra.mxu1 %v9302_v63  ;;  %4092 = vmatprep.subr.bf16.mxu0 %v9425_v10  ;;  %v9464_v63 = vcombine.low %v1324_v41, %v1328_v46  ;;  %v1348_v10 = vld [vmem:[%s12019_s15 + $0xb10] sm:$0xff]  ;;  %v9375_v47 = vcombine.high %v1235_v7, %v1239_v2  ;;  %v9374_v26 = vcombine.low %v1235_v7, %v1239_v2  ;;  %v1271_v61 = vld [vmem:[%s12019_s15 + $0x8a8] sm:$0xff] }
 0x317   : > { %3724 = vmatprep.subr.bf16.mxu1 %v9311_v59  ;;  %v9358_v59 = vcombine.low %v1219_v43, %v1223_v49  ;;  %v11355_v40 = vld [vmem:[#allocation2 + $0x48] sm:$0xff] }
 0x318   : > { %4044 = vmatmul.mubr.bf16.gmra.mrb[32].mxu0 %v13014_v62  ;;  %v9440_v62 = vcombine.low %v1300_v20, %v1304_v1  ;;  %v1251_v20 = vld [vmem:[%s12019_s15 + $0x808] sm:$0xff] }
 0x319   : > { %3682 = vmatmul.mubr.bf16.gmra.mrb[36].mxu1 %v11347_v35  ;;  %4093 = vmatpush1.bf16.msra.mxu0 %v9424_v55  ;;  %v1356_v55 = vld [vmem:[%s12019_s15 + $0xb50] sm:$0xff]  ;;  %v1283_v49 = vld [vmem:[%s12019_s15 + $0x908] sm:$0xff] }
 0x31a   : > { %3725 = vmatpush1.bf16.msra.mxu1 %v9310_v17  ;;  %3691 = vmatprep.mubr.bf16.mxu1 %v11348_v23  ;;  %v1352_v17 = vld [vmem:[%s12019_s15 + $0xb30] sm:$0xff]  ;;  %v1303_v7 = vld [vmem:[%s12019_s15 + $0x9a8] sm:$0xff] }
 0x31b   : > { %3726 = vmatprep.subr.bf16.mxu1 %v9319_v36  ;;  %4053 = vmatprep.mubr.bf16.mxu0 %v13016_v6  ;;  %v9449_v6 = vcombine.high %v1308_v39, %v1312_v48  ;;  %v1247_v36 = vld [vmem:[%s12019_s15 + $0x7e8] sm:$0xff]  ;;  %v1360_v35 = vld [vmem:[%s12019_s15 + $0xb70] sm:$0xff]  ;;  %v9488_v1 = vcombine.low %v1348_v10, %v1352_v17 }
 0x31c   : > { %4094 = vmatprep.subr.bf16.mxu0 %v9433_v37  ;;  %v13162_v37 = vld [vmem:[#allocation2 + $0x28] sm:$0xff]  ;;  %v9383_v23 = vcombine.high %v1243_v11, %v1247_v36  ;;  %v9496_v48 = vcombine.low %v1356_v55, %v1360_v35 }
 0x31d   : > { %4095 = vmatpush1.bf16.msra.mxu0 %v9432_v45  ;;  %v9497_v45 = vcombine.high %v1356_v55, %v1360_v35  ;;  %v1263_v39 = vld [vmem:[%s12019_s15 + $0x868] sm:$0xff] }
 0x31e   : > { %3727 = vmatpush1.bf16.msra.mxu1 %v9318_v19  ;;  %4096 = vmatprep.subr.bf16.mxu0 %v9441_v33  ;;  %v9489_v19 = vcombine.high %v1348_v10, %v1352_v17  ;;  %v9382_v33 = vcombine.low %v1243_v11, %v1247_v36  ;;  %v10580_v32 = vld [vmem:[%s12027_s10 + $0x64] ss:$24 sps:$4 sm:$0xff]   ;;  %v10578_v2 = vld [vmem:[%s12027_s10 + $0x60] ss:$24 sps:$4 sm:$0xff]   ;;  %v10583_v10 = vld [vmem:[%s12027_s10 + $0x94] ss:$24 sps:$4 sm:$0xff]  }
 0x31f   : > { %3728 = vmatprep.subr.bf16.mxu1 %v9327_v24  ;;  %v1364_v24 = vld [vmem:[%s12019_s15 + $0xb90] sm:$0xff]  ;;  %v1307_v11 = vld [vmem:[%s12019_s15 + $0x9c8] sm:$0xff] }
 0x320   : > { %4054 = vmatmul.mubr.bf16.gmra.mrb[36].mxu0 %v13030_v44  ;;  %v9456_v44 = vcombine.low %v1316_v51, %v1320_v38  ;;  %v11354_v51 = vld [vmem:[#allocation2 + $0x10] sm:$0xff]  ;;  %v1311_v36 = vld [vmem:[%s12019_s15 + $0x9e8] sm:$0xff] }
 0x321   : > { %3692 = vmatmul.mubr.bf16.gmra.mrb[40].mxu1 %v11349_v56  ;;  %4097 = vmatpush1.bf16.msra.mxu0 %v9440_v62  ;;  %v9505_v62 = vcombine.high %v1364_v24, %v1368_v14  ;;  %v13202_v55 = vld [vmem:[#allocation2 + $0x88] sm:$0xff] }
 0x322   : > { %3729 = vmatpush1.bf16.msra.mxu1 %v9326_v58  ;;  %3701 = vmatprep.mubr.bf16.mxu1 %v11350_v5  ;;  %v9504_v5 = vcombine.low %v1364_v24, %v1368_v14  ;;  %v10586_v35 = vld [vmem:[%s12027_s10 + $0xc4] ss:$24 sps:$4 sm:$0xff]   ;;  %v10589_v24 = vld [vmem:[%s12027_s10 + $0xf4] ss:$24 sps:$4 sm:$0xff]   ;;  %v9446_v14 = vcombine.low %v1307_v11, %v1311_v36 }
 0x323   : > { %3730 = vmatprep.subr.bf16.mxu1 %v9335_v57  ;;  %4063 = vmatprep.mubr.bf16.mxu0 %v13032_v16  ;;  %v9465_v16 = vcombine.high %v1324_v41, %v1328_v46  ;;  %v1372_v57 = vld [vmem:[%s12019_s15 + $0xbd0] sm:$0xff]  ;;  %v1275_v41 = vld [vmem:[%s12019_s15 + $0x8c8] sm:$0xff] }
 0x324   : > { %4098 = vmatprep.subr.bf16.mxu0 %v9449_v6  ;;  %v9399_v6 = vcombine.high %v1259_v53, %v1263_v39  ;;  %v9513_v38 = vcombine.high %v1372_v57, %v1376_v12  ;;  %v1279_v46 = vld [vmem:[%s12019_s15 + $0x8e8] sm:$0xff] }
 0x325   : > { %4099 = vmatpush1.bf16.msra.mxu0 %v9448_v25  ;;  %v9415_v43 = vcombine.high %v1275_v41, %v1279_v46 }
 0x326   : > { %3731 = vmatpush1.bf16.msra.mxu1 %v9334_v29  ;;  %4100 = vmatprep.subr.bf16.mxu0 %v9457_v60  ;;  %v1267_v29 = vld [vmem:[%s12019_s15 + $0x888] sm:$0xff]  ;;  %v9512_v60 = vcombine.low %v1372_v57, %v1376_v12  ;;  %v13216_v57 = vld [vmem:[#allocation2 + $0xb8] sm:$0xff] }
 0x327   : > { %3732 = vmatprep.subr.bf16.mxu1 %v9343_v3  ;;  %v9398_v3 = vcombine.low %v1259_v53, %v1263_v39  ;;  %v9407_v25 = vcombine.high %v1267_v29, %v1271_v61  ;;  %v1323_v53 = vld [vmem:[%s12019_s15 + $0xa48] sm:$0xff] }
 0x328   : > { %4064 = vmatmul.mubr.bf16.gmra.mrb[40].mxu0 %v13046_v8  ;;  %v9472_v8 = vcombine.low %v1332_v15, %v1336_v50  ;;  %v10572_v15 = vld [vmem:[%s12027_s10] ss:$24 sps:$4 sm:$0xff]   ;;  %v11356_v50 = vld [vmem:[#allocation2 + $0x40] sm:$0xff]  ;;  %v10592_v12 = vld [vmem:[%s12027_s10 + $0x124] ss:$24 sps:$4 sm:$0xff]  }
 0x329   : > { %3702 = vmatmul.mubr.bf16.gmra.mrb[44].mxu1 %v11351_v18  ;;  %4101 = vmatpush1.bf16.msra.mxu0 %v9456_v44  ;;  %v1287_v44 = vld [vmem:[%s12019_s15 + $0x928] sm:$0xff]  ;;  %v10577_v18 = vld [vmem:[%s12027_s10 + $0x34] ss:$24 sps:$4 sm:$0xff]  }
 0x32a   : > { %3733 = vmatpush1.bf16.msra.mxu1 %v9342_v30  ;;  %3744 = vmatprep.mubr.bf16.mxu1 %v11352_v42  ;;  %v10574_v30 = vld [vmem:[%s12027_s10 + $0x4] ss:$24 sps:$4 sm:$0xff]   ;;  %v9423_v42 = vcombine.high %v1283_v49, %v1287_v44 }
 0x32b   : > { %3734 = vmatprep.subr.bf16.mxu1 %v9351_v0  ;;  %4073 = vmatprep.mubr.bf16.mxu0 %v13048_v13  ;;  %v9366_v13 = vcombine.low %v1227_v31, %v1231_v4  ;;  %v9406_v0 = vcombine.low %v1267_v29, %v1271_v61  ;;  %v1291_v31 = vld [vmem:[%s12019_s15 + $0x948] sm:$0xff] }
 0x32c   : > { %4102 = vmatprep.subr.bf16.mxu0 %v9465_v16  ;;  %v9414_v16 = vcombine.low %v1275_v41, %v1279_v46  ;;  %v1295_v4 = vld [vmem:[%s12019_s15 + $0x968] sm:$0xff] }
 0x32d   : > { %4103 = vmatpush1.bf16.msra.mxu0 %v9464_v63  ;;  %v10575_v63 = vld [vmem:[%s12027_s10 + $0x30] ss:$24 sps:$4 sm:$0xff]   ;;  %v9430_v17 = vcombine.low %v1291_v31, %v1295_v4  ;;  %v1327_v39 = vld [vmem:[%s12019_s15 + $0xa68] sm:$0xff] }
 0x32e   : > { %3735 = vmatpush1.bf16.msra.mxu1 %v9350_v28  ;;  %4104 = vmatprep.subr.bf16.mxu0 %v9473_v21  ;;  %v11357_v28 = vld [vmem:[#allocation2 + $0x78] sm:$0xff]  ;;  %v9422_v21 = vcombine.low %v1283_v49, %v1287_v44  ;;  %v1331_v61 = vld [vmem:[%s12019_s15 + $0xa88] sm:$0xff]  ;;  %v9462_v41 = vcombine.low %v1323_v53, %v1327_v39 }
 0x32f   : > { %3736 = vmatprep.subr.bf16.mxu1 %v9359_v27  ;;  %v13182_v27 = vld [vmem:[#allocation2 + $0x20] sm:$0xff]  ;;  %v11369_v46 = vld [vmem:[#allocation2 + $0x108] sm:$0xff] }
 0x330   : > { %4074 = vmatmul.mubr.bf16.gmra.mrb[44].mxu0 %v13062_v34  ;;  %v1255_v34 = vld [vmem:[%s12019_s15 + $0x828] sm:$0xff]  ;;  %v10593_v49 = vld [vmem:[%s12027_s10 + $0x150] ss:$24 sps:$4 sm:$0xff]  }
 0x331   : > { %4105 = vmatpush1.bf16.msra.mxu0 %v9472_v8  ;;  %4116 = vmatprep.mubr.bf16.mxu0 %v13162_v37  ;;  %v9391_v58 = vcombine.high %v1251_v20, %v1255_v34  ;;  %v9390_v56 = vcombine.low %v1251_v20, %v1255_v34  ;;  %v11360_v8 = vld [vmem:[#allocation2 + $0x70] sm:$0xff]  ;;  %v1319_v20 = vld [vmem:[%s12019_s15 + $0xa28] sm:$0xff] }
 0x332   : > { %3737 = vmatpush1.bf16.msra.mxu1 %v9358_v59  ;;  %4106 = vmatprep.subr.bf16.mxu0 %v9481_v52  ;;  %v9431_v59 = vcombine.high %v1291_v31, %v1295_v4  ;;  %v11361_v52 = vld [vmem:[#allocation2 + $0xa8] sm:$0xff] }
 0x333   : > { %3738 = vmatprep.subr.bf16.mxu1 %v9367_v9  ;;  %v1299_v9 = vld [vmem:[%s12019_s15 + $0x988] sm:$0xff] }
 0x334   : > { %v10584_v34 = vld [vmem:[%s12027_s10 + $0xc0] ss:$24 sps:$4 sm:$0xff]  }
 0x335   : > { %4107 = vmatpush1.bf16.msra.mxu0 %v9480_v54  ;;  %v10581_v54 = vld [vmem:[%s12027_s10 + $0x90] ss:$24 sps:$4 sm:$0xff]   ;;  %v13238_v44 = vld [vmem:[#allocation2 + $0xe8] sm:$0xff] }
 0x336   : > { %3739 = vmatpush1.bf16.msra.mxu1 %v9366_v13  ;;  %4108 = vmatprep.subr.bf16.mxu0 %v9489_v19  ;;  %v9439_v13 = vcombine.high %v1299_v9, %v1303_v7  ;;  %v9438_v19 = vcombine.low %v1299_v9, %v1303_v7  ;;  %v1351_v31 = vld [vmem:[%s12019_s15 + $0xb28] sm:$0xff] }
 0x337   : > { %3740 = vmatprep.subr.bf16.mxu1 %v9375_v47  ;;  %v13196_v47 = vld [vmem:[#allocation2 + $0x50] sm:$0xff] }
 0x338   : > { %v10596_v4 = vld [vmem:[%s12027_s10 + $0x180] ss:$24 sps:$4 sm:$0xff]  }
 0x339   : > { %4109 = vmatpush1.bf16.msra.mxu0 %v9488_v1  ;;  %v11364_v1 = vld [vmem:[#allocation2 + $0xa0] sm:$0xff] }
 0x33a   : > { %3741 = vmatpush1.bf16.msra.mxu1 %v9374_v26  ;;  %4110 = vmatprep.subr.bf16.mxu0 %v9497_v45  ;;  %v9447_v26 = vcombine.high %v1307_v11, %v1311_v36  ;;  %v11365_v45 = vld [vmem:[#allocation2 + $0xd8] sm:$0xff] }
 0x33b   : > { %3742 = vmatprep.subr.bf16.mxu1 %v9383_v23  ;;  %v1315_v23 = vld [vmem:[%s12019_s15 + $0xa08] sm:$0xff] }
 0x33d   : > { %4111 = vmatpush1.bf16.msra.mxu0 %v9496_v48  ;;  %v10587_v48 = vld [vmem:[%s12027_s10 + $0xf0] ss:$24 sps:$4 sm:$0xff]  }
 0x33e   : > { %3743 = vmatpush1.bf16.msra.mxu1 %v9382_v33  ;;  %4112 = vmatprep.subr.bf16.mxu0 %v9505_v62  ;;  %v9455_v33 = vcombine.high %v1315_v23, %v1319_v20  ;;  %v9454_v62 = vcombine.low %v1315_v23, %v1319_v20  ;;  %v10607_v20 = vld [vmem:[%s12027_s10 + $0x214] ss:$24 sps:$4 sm:$0xff]  }
 0x33f   : > { %3805 = vmatprep.subr.bf16.mxu1 %v9391_v58  ;;  %v13210_v58 = vld [vmem:[#allocation2 + $0x80] sm:$0xff] }
 0x341   : > { %3745 = vmatmul.mubr.bf16.vlgmr.msra.gmra.mrb[24].mxu1 %v11354_v51  ;;  %4113 = vmatpush1.bf16.msra.mxu0 %v9504_v5  ;;  %v1335_v5 = vld [vmem:[%s12019_s15 + $0xaa8] sm:$0xff] }
 0x342   : > { %3806 = vmatpush1.bf16.msra.mxu1 %v9390_v56  ;;  %3754 = vmatprep.mubr.bf16.mxu1 %v11355_v40  ;;  %v10590_v51 = vld [vmem:[%s12027_s10 + $0x120] ss:$24 sps:$4 sm:$0xff]   ;;  %v10595_v40 = vld [vmem:[%s12027_s10 + $0x154] ss:$24 sps:$4 sm:$0xff]  }
 0x343   : > { %3807 = vmatprep.subr.bf16.mxu1 %v9399_v6  ;;  %4114 = vmatprep.subr.bf16.mxu0 %v9513_v38  ;;  %v9463_v6 = vcombine.high %v1323_v53, %v1327_v39  ;;  %v10605_v53 = vld [vmem:[%s12027_s10 + $0x210] ss:$24 sps:$4 sm:$0xff]   ;;  %v10610_v39 = vld [vmem:[%s12027_s10 + $0x244] ss:$24 sps:$4 sm:$0xff]  }
 0x345   : > { %4115 = vmatpush1.bf16.msra.mxu0 %v9512_v60  ;;  %v9471_v60 = vcombine.high %v1331_v61, %v1335_v5 }
 0x346   : > { %3808 = vmatpush1.bf16.msra.mxu1 %v9398_v3  ;;  %7288 = vmatprep.subr.bf16.mxu0 %v10574_v30  ;;  %v11368_v3 = vld [vmem:[#allocation2 + $0xd0] sm:$0xff] }
 0x347   : > { %3809 = vmatprep.subr.bf16.mxu1 %v9407_v25  ;;  %v13232_v30 = vld [vmem:[#allocation2 + $0xb0] sm:$0xff] }
 0x348   : > { %4117 = vmatmul.mubr.bf16.vlgmr.msra.gmra.mrb[24].mxu0 %v13182_v27 }
 0x349   : > { %3755 = vmatmul.mubr.bf16.gmra.mrb[28].mxu1 %v11356_v50  ;;  %7289 = vmatpush1.bf16.msra.mxu0 %v10572_v15  ;;  %v10598_v15 = vld [vmem:[%s12027_s10 + $0x184] ss:$24 sps:$4 sm:$0xff]   ;;  %v9470_v50 = vcombine.low %v1331_v61, %v1335_v5  ;;  %v997_v61 = vld [vmem:[%s12019_s15 + $0x18] sm:$0xff] }
 0x34a   : > { %3810 = vmatpush1.bf16.msra.mxu1 %v9406_v0  ;;  %3764 = vmatprep.mubr.bf16.mxu1 %v11357_v28  ;;  %v1339_v0 = vld [vmem:[%s12019_s15 + $0xac8] sm:$0xff]  ;;  %v1001_v5 = vld [vmem:[%s12019_s15 + $0x38] sm:$0xff] }
 0x34b   : > { %3811 = vmatprep.subr.bf16.mxu1 %v9415_v43  ;;  %4126 = vmatprep.mubr.bf16.mxu0 %v13188_v22  ;;  %v1343_v43 = vld [vmem:[%s12019_s15 + $0xae8] sm:$0xff] }
 0x34c   : > { %7290 = vmatprep.subr.bf16.mxu0 %v10577_v18  ;;  %v9478_v9 = vcombine.low %v1339_v0, %v1343_v43 }
 0x34d   : > { %7291 = vmatpush1.bf16.msra.mxu0 %v10575_v63 }
 0x34e   : > { %3812 = vmatpush1.bf16.msra.mxu1 %v9414_v16  ;;  %7292 = vmatprep.subr.bf16.mxu0 %v10580_v32  ;;  %v9479_v16 = vcombine.high %v1339_v0, %v1343_v43  ;;  %v11372_v32 = vld [vmem:[#allocation2 + $0x100] sm:$0xff]  ;;  %v1005_v0 = vld [vmem:[%s12019_s15 + $0x58] sm:$0xff] }
 0x34f   : > { %3813 = vmatprep.subr.bf16.mxu1 %v9423_v42  ;;  %v1347_v42 = vld [vmem:[%s12019_s15 + $0xb08] sm:$0xff]  ;;  %v1009_v43 = vld [vmem:[%s12019_s15 + $0x78] sm:$0xff] }
 0x350   : > { %4127 = vmatmul.mubr.bf16.gmra.mrb[28].mxu0 %v13196_v47  ;;  %v9487_v7 = vcombine.high %v1347_v42, %v1351_v31 }
 0x351   : > { %3765 = vmatmul.mubr.bf16.gmra.mrb[32].mxu1 %v11360_v8  ;;  %7293 = vmatpush1.bf16.msra.mxu0 %v10578_v2  ;;  %v13255_v2 = vld [vmem:[#allocation2 + $0xe0] sm:$0xff]  ;;  %v1355_v8 = vld [vmem:[%s12019_s15 + $0xb48] sm:$0xff] }
 0x352   : > { %3814 = vmatpush1.bf16.msra.mxu1 %v9422_v21  ;;  %3774 = vmatprep.mubr.bf16.mxu1 %v11361_v52  ;;  %v10601_v21 = vld [vmem:[%s12027_s10 + $0x1b4] ss:$24 sps:$4 sm:$0xff]  }
 0x353   : > { %3815 = vmatprep.subr.bf16.mxu1 %v9431_v59  ;;  %4136 = vmatprep.mubr.bf16.mxu0 %v13202_v55  ;;  %v13261_v52 = vld [vmem:[#allocation2 + $0x118] sm:$0xff] }
 0x354   : > { %7294 = vmatprep.subr.bf16.mxu0 %v10583_v10  ;;  %v1359_v10 = vld [vmem:[%s12019_s15 + $0xb68] sm:$0xff] }
 0x355   : > { %7295 = vmatpush1.bf16.msra.mxu0 %v10581_v54  ;;  %v9495_v36 = vcombine.high %v1355_v8, %v1359_v10 }
 0x356   : > { %3816 = vmatpush1.bf16.msra.mxu1 %v9430_v17  ;;  %7296 = vmatprep.subr.bf16.mxu0 %v10586_v35  ;;  %v10599_v17 = vld [vmem:[%s12027_s10 + $0x1b0] ss:$24 sps:$4 sm:$0xff]   ;;  %v1363_v35 = vld [vmem:[%s12019_s15 + $0xb88] sm:$0xff] }
 0x357   : > { %3817 = vmatprep.subr.bf16.mxu1 %v9439_v13  ;;  %v9486_v13 = vcombine.low %v1347_v42, %v1351_v31  ;;  %v9147_v42 = vcombine.high %v1005_v0, %v1009_v43 }
 0x358   : > { %4137 = vmatmul.mubr.bf16.gmra.mrb[32].mxu0 %v13210_v58 }
 0x359   : > { %3775 = vmatmul.mubr.bf16.gmra.mrb[36].mxu1 %v11364_v1  ;;  %7297 = vmatpush1.bf16.msra.mxu0 %v10584_v34  ;;  %v9494_v1 = vcombine.low %v1355_v8, %v1359_v10  ;;  %v9146_v10 = vcombine.low %v1005_v0, %v1009_v43 }
 0x35a   : > { %3818 = vmatpush1.bf16.msra.mxu1 %v9438_v19  ;;  %3784 = vmatprep.mubr.bf16.mxu1 %v11365_v45  ;;  %v1367_v19 = vld [vmem:[%s12019_s15 + $0xba8] sm:$0xff] }
 0x35b   : > { %3819 = vmatprep.subr.bf16.mxu1 %v9447_v26  ;;  %4146 = vmatprep.mubr.bf16.mxu0 %v13216_v57  ;;  %v13220_v56 = vpop.f32.mrb[0].mxu0  ;;  %v10602_v26 = vld [vmem:[%s12027_s10 + $0x1e0] ss:$24 sps:$4 sm:$0xff]  }
 0x35c   : > { %7298 = vmatprep.subr.bf16.mxu0 %v10589_v24  ;;  %v13222_v29 = vpop.f32.mrb[1].mxu0  ;;  %v9503_v24 = vcombine.high %v1363_v35, %v1367_v19  ;;  %v1371_v45 = vld [vmem:[%s12019_s15 + $0xbc8] sm:$0xff] }
 0x35d   : > { %7299 = vmatpush1.bf16.msra.mxu0 %v10587_v48  ;;  %v13227_v38 = vpop.f32.mrb[2].mxu0  ;;  %v9502_v48 = vcombine.low %v1363_v35, %v1367_v19  ;;  %v1380_v35 = vlaneseq }
 0x35e   : > { %3820 = vmatpush1.bf16.msra.mxu1 %v9446_v14  ;;  %7300 = vmatprep.subr.bf16.mxu0 %v10592_v12  ;;  %v13230_v25 = vpop.f32.mrb[3].mxu0  ;;  %v13277_v14 = vld [vmem:[#allocation2 + $0x110] sm:$0xff] }
 0x35f   : > { %3821 = vmatprep.subr.bf16.mxu1 %v9455_v33  ;;  %v1375_v33 = vld [vmem:[%s12019_s15 + $0xbe8] sm:$0xff] }
 0x360   : > { %4147 = vmatmul.mubr.bf16.gmra.mrb[36].mxu0 %v13232_v30 }
 0x361   : > { %3785 = vmatmul.mubr.bf16.gmra.mrb[40].mxu1 %v11368_v3  ;;  %7301 = vmatpush1.bf16.msra.mxu0 %v10590_v51  ;;  %v10608_v51 = vld [vmem:[%s12027_s10 + $0x240] ss:$24 sps:$4 sm:$0xff]  }
 0x362   : > { %3822 = vmatpush1.bf16.msra.mxu1 %v9454_v62  ;;  %3794 = vmatprep.mubr.bf16.mxu1 %v11369_v46  ;;  %v9511_v62 = vcombine.high %v1371_v45, %v1375_v33  ;;  %v9510_v46 = vcombine.low %v1371_v45, %v1375_v33  ;;  %v13326_v45 = vshrl.u32 %v1380_v35, 7  ;;  %v1061_v35 = vld [vmem:[%s12019_s15 + $0x218] sm:$0xff] }
 0x363   : > { %3823 = vmatprep.subr.bf16.mxu1 %v9463_v6  ;;  %4156 = vmatprep.mubr.bf16.mxu0 %v13238_v44  ;;  %v13242_v18 = vpop.f32.mrb[4].mxu0 }
 0x364   : > { %7302 = vmatprep.subr.bf16.mxu0 %v10595_v40  ;;  %v13244_v28 = vpop.f32.mrb[5].mxu0  ;;  %v10613_v40 = vld [vmem:[%s12027_s10 + $0x274] ss:$24 sps:$4 sm:$0xff]   ;;  %15423 = vst [vmem:[#allocation63_spill] sm:$0xff] %v13326_v45 }
 0x365   : > { %7303 = vmatpush1.bf16.msra.mxu0 %v10593_v49  ;;  %v13249_v63 = vpop.f32.mrb[6].mxu0  ;;  %v10611_v49 = vld [vmem:[%s12027_s10 + $0x270] ss:$24 sps:$4 sm:$0xff]  }
 0x366   : > { %3824 = vmatpush1.bf16.msra.mxu1 %v9462_v41  ;;  %7304 = vmatprep.subr.bf16.mxu0 %v10598_v15  ;;  %v13252_v59 = vpop.f32.mrb[7].mxu0  ;;  %v10616_v15 = vld [vmem:[%s12027_s10 + $0x2a4] ss:$24 sps:$4 sm:$0xff]  }
 0x367   : > { %3825 = vmatprep.subr.bf16.mxu1 %v9471_v60  ;;  %v9139_v60 = vcombine.high %v997_v61, %v1001_v5 }
 0x368   : > { %4157 = vmatmul.mubr.bf16.gmra.mrb[40].mxu0 %v13255_v2 }
 0x369   : > { %3795 = vmatmul.mubr.bf16.gmra.mrb[44].mxu1 %v11372_v32  ;;  %7305 = vmatpush1.bf16.msra.mxu0 %v10596_v4  ;;  %v1013_v4 = vld [vmem:[%s12019_s15 + $0x98] sm:$0xff] }
 0x36a   : > { %3826 = vmatpush1.bf16.msra.mxu1 %v9470_v50  ;;  %3837 = vmatprep.mubr.bf16.mxu1 %v13162_v37  ;;  %v10604_v37 = vld [vmem:[%s12027_s10 + $0x1e4] ss:$24 sps:$4 sm:$0xff]   ;;  %v9138_v50 = vcombine.low %v997_v61, %v1001_v5  ;;  %v1017_v32 = vld [vmem:[%s12019_s15 + $0xb8] sm:$0xff]  ;;  %v15252_v61 = vsub.s32 0, %v13326_v45 }
 0x36b   : > { %3827 = vmatprep.subr.bf16.mxu1 %v9479_v16  ;;  %4166 = vmatprep.mubr.bf16.mxu0 %v13261_v52  ;;  %v13265_v11 = vpop.f32.mrb[8].mxu0 }
 0x36c   : > { %7306 = vmatprep.subr.bf16.mxu0 %v10601_v21  ;;  %v13267_v54 = vpop.f32.mrb[9].mxu0  ;;  %v10614_v21 = vld [vmem:[%s12027_s10 + $0x2a0] ss:$24 sps:$4 sm:$0xff]  }
 0x36d   : > { %7307 = vmatpush1.bf16.msra.mxu0 %v10599_v17  ;;  %v13272_v23 = vpop.f32.mrb[10].mxu0  ;;  %v9155_v17 = vcombine.high %v1013_v4, %v1017_v32 }
 0x36e   : > { %3828 = vmatpush1.bf16.msra.mxu1 %v9478_v9  ;;  %7308 = vmatprep.subr.bf16.mxu0 %v10604_v37  ;;  %v13275_v34 = vpop.f32.mrb[11].mxu0  ;;  %v1021_v37 = vld [vmem:[%s12019_s15 + $0xd8] sm:$0xff] }
 0x36f   : > { %3829 = vmatprep.subr.bf16.mxu1 %v9487_v7  ;;  %v10619_v7 = vld [vmem:[%s12027_s10 + $0x2d4] ss:$24 sps:$4 sm:$0xff]  }
 0x370   : > { %4167 = vmatmul.mubr.bf16.gmra.mrb[44].mxu0 %v13277_v14 }
 0x371   : > { %7309 = vmatpush1.bf16.msra.mxu0 %v10602_v26 }
 0x372   : > { %3830 = vmatpush1.bf16.msra.mxu1 %v9486_v13  ;;  %7310 = vmatprep.subr.bf16.mxu0 %v10607_v20  ;;  %v1025_v13 = vld [vmem:[%s12019_s15 + $0xf8] sm:$0xff] }
 0x373   : > { %3831 = vmatprep.subr.bf16.mxu1 %v9495_v36  ;;  %v13284_v12 = vpop.f32.mrb[12].mxu0  ;;  %v10617_v36 = vld [vmem:[%s12027_s10 + $0x2d0] ss:$24 sps:$4 sm:$0xff]   ;;  %v9163_v26 = vcombine.high %v1021_v37, %v1025_v13 }
 0x374   : > { %v13286_v6 = vpop.f32.mrb[13].mxu0 }
 0x375   : > { %7311 = vmatpush1.bf16.msra.mxu0 %v10605_v53  ;;  %v13291_v3 = vpop.f32.mrb[14].mxu0  ;;  %v9162_v53 = vcombine.low %v1021_v37, %v1025_v13 }
 0x376   : > { %3832 = vmatpush1.bf16.msra.mxu1 %v9494_v1  ;;  %7312 = vmatprep.subr.bf16.mxu0 %v10610_v39  ;;  %v13294_v41 = vpop.f32.mrb[15].mxu0  ;;  %v1033_v1 = vld [vmem:[%s12019_s15 + $0x138] sm:$0xff] }
 0x377   : > { %3833 = vmatprep.subr.bf16.mxu1 %v9503_v24 }
 0x379   : > { %7313 = vmatpush1.bf16.msra.mxu0 %v10608_v51  ;;  %v15251_v51 = vsub.s32 1, %v13326_v45 }
 0x37a   : > { %3834 = vmatpush1.bf16.msra.mxu1 %v9502_v48  ;;  %7314 = vmatprep.subr.bf16.mxu0 %v10613_v40  ;;  %v1037_v48 = vld [vmem:[%s12019_s15 + $0x158] sm:$0xff] }
 0x37b   : > { %3835 = vmatprep.subr.bf16.mxu1 %v9511_v62  ;;  %v13300_v16 = vpop.f32.mrb[16].mxu0  ;;  %v1041_v62 = vld [vmem:[%s12019_s15 + $0x178] sm:$0xff] }
 0x37c   : > { %v13302_v31 = vpop.f32.mrb[17].mxu0  ;;  %v9179_v40 = vcombine.high %v1037_v48, %v1041_v62  ;;  %v9178_v43 = vcombine.low %v1037_v48, %v1041_v62  ;;  %v1073_v62 = vld [vmem:[%s12019_s15 + $0x278] sm:$0xff] }
 0x37d   : > { %7315 = vmatpush1.bf16.msra.mxu0 %v10611_v49  ;;  %v13307_v9 = vpop.f32.mrb[18].mxu0 }
 0x37e   : > { %3836 = vmatpush1.bf16.msra.mxu1 %v9510_v46  ;;  %7316 = vmatprep.subr.bf16.mxu0 %v10616_v15  ;;  %v13311_v8 = vpop.f32.mrb[19].mxu0  ;;  %v1045_v46 = vld [vmem:[%s12019_s15 + $0x198] sm:$0xff] }
 0x37f   : > { %4177 = vmatprep.subr.bf16.mxu1 %v9139_v60  ;;  %v1049_v60 = vld [vmem:[%s12019_s15 + $0x1b8] sm:$0xff] }
 0x380   : > { %v9187_v49 = vcombine.high %v1045_v46, %v1049_v60 }
 0x381   : > { %3838 = vmatmul.mubr.bf16.vlgmr.msra.gmra.mrb[24].mxu1 %v13182_v27  ;;  %7317 = vmatpush1.bf16.msra.mxu0 %v10614_v21  ;;  %v9154_v27 = vcombine.low %v1013_v4, %v1017_v32 }
 0x382   : > { %4178 = vmatpush1.bf16.msra.mxu1 %v9138_v50  ;;  %3847 = vmatprep.mubr.bf16.mxu1 %v13188_v22  ;;  %v1029_v22 = vld [vmem:[%s12019_s15 + $0x118] sm:$0xff] }
 0x383   : > { %4179 = vmatprep.subr.bf16.mxu1 %v9147_v42  ;;  %7318 = vmatprep.subr.bf16.mxu0 %v10619_v7  ;;  %v13317_v19 = vpop.f32.mrb[20].mxu0  ;;  %v9171_v39 = vcombine.high %v1029_v22, %v1033_v1  ;;  %v9170_v5 = vcombine.low %v1029_v22, %v1033_v1  ;;  %v1053_v50 = vld [vmem:[%s12019_s15 + $0x1d8] sm:$0xff]  ;;  %v9186_v7 = vcombine.low %v1045_v46, %v1049_v60 }
 0x384   : > { %v13319_v20 = vpop.f32.mrb[21].mxu0  ;;  %v1057_v42 = vld [vmem:[%s12019_s15 + $0x1f8] sm:$0xff] }
 0x385   : > { %7319 = vmatpush1.bf16.msra.mxu0 %v10617_v36  ;;  %v13323_v24 = vpop.f32.mrb[22].mxu0  ;;  %v9195_v37 = vcombine.high %v1053_v50, %v1057_v42 }
 0x386   : > { %4180 = vmatpush1.bf16.msra.mxu1 %v9146_v10  ;;  %v13328_v33 = vpop.f32.mrb[23].mxu0 }
 0x387   : > { %4181 = vmatprep.subr.bf16.mxu1 %v9155_v17 }
 0x389   : > { %3848 = vmatmul.mubr.bf16.gmra.mrb[28].mxu1 %v13196_v47  ;;  %v1378_v47 = vld [vmem:[%s12025_s21] sm:$0xff] }
 0x38a   : > { %4182 = vmatpush1.bf16.msra.mxu1 %v9154_v27  ;;  %3857 = vmatprep.mubr.bf16.mxu1 %v13202_v55  ;;  %v13341_v55 = vrot.slane %v1378_v47, %v15252_v61  ;;  %v13345_v0 = vrot.slane %v1378_v47, %v15251_v51  ;;  %v1065_v27 = vld [vmem:[%s12019_s15 + $0x238] sm:$0xff] }
 0x38b   : > { %4183 = vmatprep.subr.bf16.mxu1 %v9163_v26 }
 0x38e   : > { %4184 = vmatpush1.bf16.msra.mxu1 %v9162_v53  ;;  %v9194_v53 = vcombine.low %v1053_v50, %v1057_v42  ;;  %v13386_v50 = vld [vmem:[%s12019_s15 + $0x2b8] sm:$0xff] }
 0x38f   : > { %4185 = vmatprep.subr.bf16.mxu1 %v9171_v39  ;;  %v9203_v39 = vcombine.high %v1061_v35, %v1065_v27 }
 0x391   : > { %3858 = vmatmul.mubr.bf16.gmra.mrb[32].mxu1 %v13210_v58 }
 0x392   : > { %4186 = vmatpush1.bf16.msra.mxu1 %v9170_v5  ;;  %3867 = vmatprep.mubr.bf16.mxu1 %v13216_v57 }
 0x393   : > { %4187 = vmatprep.subr.bf16.mxu1 %v9179_v40  ;;  %v9202_v40 = vcombine.low %v1061_v35, %v1065_v27  ;;  %v13422_v35 = vld [vmem:[%s12019_s15 + $0x378] sm:$0xff] }
 0x394   : > { %v3467_v15 = vpop.f32.mrb[0].mxu1 }
 0x395   : > { %v9908_v58 = vadd.f32 %v3467_v15, %v13341_v55  ;;  %v3469_v4 = vpop.f32.mrb[1].mxu1  ;;  %v13383_v15 = vld [vmem:[%s12019_s15 + $0x298] sm:$0xff] }
 0x396   : > { %v9910_v32 = vadd.f32 %v3469_v4, %v13345_v0  ;;  %v3471_v21 = vpop.f32.mrb[2].mxu1  ;;  %4188 = vmatpush1.bf16.msra.mxu1 %v9178_v43  ;;  %v13393_v4 = vld [vmem:[%s12019_s15 + $0x2d8] sm:$0xff] }
 0x397   : > { %v9912_v10 = vadd.f32 %v3471_v21, %v13341_v55  ;;  %v13354_v17 = vadd.f32 %v9908_v58, %v13220_v56  ;;  %v3473_v57 = vpop.f32.mrb[3].mxu1  ;;  %4189 = vmatprep.subr.bf16.mxu1 %v9187_v49 }
 0x398   : > { %v9914_v13 = vadd.f32 %v3473_v57, %v13345_v0  ;;  %v13358_v36 = vadd.f32 %v9910_v32, %v13222_v29  ;;  %v13396_v32 = vld [vmem:[%s12019_s15 + $0x2f8] sm:$0xff] }
 0x399   : > { %v4552_v26 = vmul.f32 0.70710677, %v13354_v17  ;;  %v13364_v22 = vadd.f32 %v9912_v10, %v13227_v38  ;;  %3868 = vmatmul.mubr.bf16.gmra.mrb[36].mxu1 %v13232_v30  ;;  %v1069_v30 = vld [vmem:[%s12019_s15 + $0x258] sm:$0xff] }
 0x39a   : > { %v4553_v56 = vmul.f32 0.70710677, %v13358_v36  ;;  %v13369_v1 = vadd.f32 %v9914_v13, %v13230_v25  ;;  %4190 = vmatpush1.bf16.msra.mxu1 %v9186_v7  ;;  %3877 = vmatprep.mubr.bf16.mxu1 %v13238_v44  ;;  %v9211_v49 = vcombine.high %v1069_v30, %v1073_v62  ;;  %v9210_v7 = vcombine.low %v1069_v30, %v1073_v62  ;;  %v13404_v10 = vld [vmem:[%s12019_s15 + $0x318] sm:$0xff] }
 0x39b   : > { %11148 = verf.f32 %v4552_v26  ;;  %v4560_v29 = vmul.f32 0.70710677, %v13364_v22  ;;  %4191 = vmatprep.subr.bf16.mxu1 %v9195_v37  ;;  %v13407_v57 = vld [vmem:[%s12019_s15 + $0x338] sm:$0xff] }
 0x39c   : > { %11150 = verf.f32 %v4553_v56  ;;  %v4561_v38 = vmul.f32 0.70710677, %v13369_v1  ;;  %v3477_v48 = vpop.f32.mrb[4].mxu1  ;;  %v13419_v13 = vld [vmem:[%s12019_s15 + $0x358] sm:$0xff] }
 0x39d   : > { %11152 = verf.f32 %v4560_v29  ;;  %v9916_v25 = vadd.f32 %v3477_v48, %v13341_v55  ;;  %v3479_v5 = vpop.f32.mrb[5].mxu1  ;;  %v13430_v26 = vld [vmem:[%s12019_s15 + $0x398] sm:$0xff] }
 0x39e   : > { %11154 = verf.f32 %v4561_v38  ;;  %v9918_v44 = vadd.f32 %v3479_v5, %v13345_v0  ;;  %v3481_v47 = vpop.f32.mrb[6].mxu1  ;;  %4192 = vmatpush1.bf16.msra.mxu1 %v9194_v53  ;;  %v13433_v56 = vld [vmem:[%s12019_s15 + $0x3b8] sm:$0xff]  ;;  %v9235_v38 = vcombine.high %v13404_v10, %v13407_v57  ;;  %v9243_v5 = vcombine.high %v13419_v13, %v13422_v35 }
 0x39f   : > { %v9920_v46 = vadd.f32 %v3481_v47, %v13341_v55  ;;  %v13380_v60 = vadd.f32 %v9916_v25, %v13242_v18  ;;  %v3483_v43 = vpop.f32.mrb[7].mxu1  ;;  %4193 = vmatprep.subr.bf16.mxu1 %v9203_v39  ;;  %v9234_v39 = vcombine.low %v13404_v10, %v13407_v57  ;;  %v9242_v25 = vcombine.low %v13419_v13, %v13422_v35  ;;  %v10631_v13 = vld [vmem:[%s12027_s10 + $0x394] ss:$24 sps:$4 sm:$0xff]  }
 0x3a0   : > { %v9922_v42 = vadd.f32 %v3483_v43, %v13345_v0  ;;  %v13390_v58 = vadd.f32 %v9918_v44, %v13244_v28  ;;  %v9251_v43 = vcombine.high %v13430_v26, %v13433_v56 }
 0x3a1   : > { %v4568_v18 = vmul.f32 0.70710677, %v13380_v60  ;;  %v13400_v21 = vadd.f32 %v9920_v46, %v13249_v63  ;;  %3878 = vmatmul.mubr.bf16.gmra.mrb[40].mxu1 %v13255_v2  ;;  %v9218_v63 = vcombine.low %v13383_v15, %v13386_v50  ;;  %v9219_v2 = vcombine.high %v13383_v15, %v13386_v50 }
 0x3a2   : > { %v4569_v28 = vmul.f32 0.70710677, %v13390_v58  ;;  %v13411_v37 = vadd.f32 %v9922_v42, %v13252_v59  ;;  %4194 = vmatpush1.bf16.msra.mxu1 %v9202_v40  ;;  %3887 = vmatprep.mubr.bf16.mxu1 %v13261_v52  ;;  %v9226_v59 = vcombine.low %v13393_v4, %v13396_v32  ;;  %v9227_v52 = vcombine.high %v13393_v4, %v13396_v32  ;;  %v10625_v4 = vld [vmem:[%s12027_s10 + $0x334] ss:$24 sps:$4 sm:$0xff]  }
 0x3a3   : > { %11156 = verf.f32 %v4568_v18  ;;  %v4576_v27 = vmul.f32 0.70710677, %v13400_v21  ;;  %4195 = vmatprep.subr.bf16.mxu1 %v9211_v49  ;;  %v4456_v15 = vmul.f32 0.5, %v13354_v17  ;;  %v4465_v17 = vmul.f32 0.5, %v13369_v1 }
 0x3a4   : > { %11158 = verf.f32 %v4569_v28  ;;  %v4577_v53 = vmul.f32 0.70710677, %v13411_v37  ;;  %v3487_v29 = vpop.f32.mrb[8].mxu1 }
 0x3a5   : > { %v11149_v48 = vpop.eup %11148  ;;  %11160 = verf.f32 %v4576_v27  ;;  %v9924_v30 = vadd.f32 %v3487_v29, %v13341_v55  ;;  %v3489_v62 = vpop.f32.mrb[9].mxu1 }
 0x3a6   : > { %v11151_v44 = vpop.eup %11150  ;;  %v4744_v47 = vadd.f32 1.0, %v11149_v48  ;;  %11162 = verf.f32 %v4577_v53  ;;  %v9926_v40 = vadd.f32 %v3489_v62, %v13345_v0  ;;  %v3491_v46 = vpop.f32.mrb[10].mxu1  ;;  %4196 = vmatpush1.bf16.msra.mxu1 %v9210_v7  ;;  %v4464_v53 = vmul.f32 0.5, %v13364_v22 }
 0x3a7   : > { %v11153_v49 = vpop.eup %11152  ;;  %v4745_v50 = vadd.f32 1.0, %v11151_v44  ;;  %v9928_v42 = vadd.f32 %v3491_v46, %v13341_v55  ;;  %v13451_v18 = vadd.f32 %v9924_v30, %v13265_v11  ;;  %v3493_v28 = vpop.f32.mrb[11].mxu1  ;;  %4197 = vmatprep.subr.bf16.mxu1 %v9219_v2  ;;  %v4457_v62 = vmul.f32 0.5, %v13358_v36 }
 0x3a8   : > { %v11155_v27 = vpop.eup %11154  ;;  %v4752_v29 = vadd.f32 1.0, %v11153_v49  ;;  %v9930_v7 = vadd.f32 %v3493_v28, %v13345_v0  ;;  %v13456_v48 = vadd.f32 %v9926_v40, %v13267_v54  ;;  %v4840_v2 = vmul.f32 %v4744_v47, %v4456_v15  ;;  %v11376_v54 = vld [vmem:[#allocation2 + $0x8] sm:$0xff] }
 0x3a9   : > { %v4753_v44 = vadd.f32 1.0, %v11155_v27  ;;  %v4584_v11 = vmul.f32 0.70710677, %v13451_v18  ;;  %3888 = vmatmul.mubr.bf16.gmra.mrb[44].mxu1 %v13277_v14  ;;  %v13464_v46 = vadd.f32 %v9928_v42, %v13272_v23  ;;  %v4841_v40 = vmul.f32 %v4745_v50, %v4457_v62  ;;  %v10622_v49 = vld [vmem:[%s12027_s10 + $0x304] ss:$24 sps:$4 sm:$0xff]  }
 0x3aa   : > { %v4848_v30 = vmul.f32 %v4752_v29, %v4464_v53  ;;  %v4585_v22 = vmul.f32 0.70710677, %v13456_v48  ;;  %4198 = vmatpush1.bf16.msra.mxu1 %v9218_v63  ;;  %4209 = vmatprep.mubr.bf16.mxu1 %v11376_v54  ;;  %v13467_v1 = vadd.f32 %v9930_v7, %v13275_v34  ;;  %v9250_v23 = vcombine.low %v13430_v26, %v13433_v56  ;;  %v10620_v27 = vld [vmem:[%s12027_s10 + $0x300] ss:$24 sps:$4 sm:$0xff]  }
 0x3ab   : > { %v4849_v36 = vmul.f32 %v4753_v44, %v4465_v17  ;;  %11164 = verf.f32 %v4584_v11  ;;  %4199 = vmatprep.subr.bf16.mxu1 %v9227_v52  ;;  %v4592_v47 = vmul.f32 0.70710677, %v13464_v46  ;;  %v4472_v50 = vmul.f32 0.5, %v13380_v60  ;;  %7381 = vmatprep.subr.bf16.mxu0 %v10622_v49  ;;  %v13487_v60 = vld [vmem:[%s12019_s15 + $0x3d8] sm:$0xff] }
 0x3ac   : > { %v13470_v14 = vpack.c.bf16 %v4848_v30, %v4840_v2  ;;  %11166 = verf.f32 %v4585_v22  ;;  %v3497_v15 = vpop.f32.mrb[12].mxu1  ;;  %v4593_v42 = vmul.f32 0.70710677, %v13467_v1  ;;  %v4473_v7 = vmul.f32 0.5, %v13390_v58  ;;  %v13490_v44 = vld [vmem:[%s12019_s15 + $0x3f8] sm:$0xff] }
 0x3ad   : > { %v11157_v63 = vpop.eup %11156  ;;  %v9932_v34 = vadd.f32 %v3497_v15, %v13341_v55  ;;  %v3499_v52 = vpop.f32.mrb[13].mxu1  ;;  %v13478_v28 = vpack.c.bf16 %v4849_v36, %v4841_v40  ;;  %11168 = verf.f32 %v4592_v47  ;;  %v4481_v36 = vmul.f32 0.5, %v13411_v37  ;;  %v13520_v37 = vld [vmem:[%s12019_s15 + $0x418] sm:$0xff] }
 0x3ae   : > { %v11159_v53 = vpop.eup %11158  ;;  %v4760_v29 = vadd.f32 1.0, %v11157_v63  ;;  %v9934_v62 = vadd.f32 %v3499_v52, %v13345_v0  ;;  %v3501_v17 = vpop.f32.mrb[14].mxu1  ;;  %4200 = vmatpush1.bf16.msra.mxu1 %v9226_v59  ;;  %11170 = verf.f32 %v4593_v42  ;;  %v4480_v59 = vmul.f32 0.5, %v13400_v21  ;;  %v10623_v21 = vld [vmem:[%s12027_s10 + $0x330] ss:$24 sps:$4 sm:$0xff]  }
 0x3af   : > { %v11161_v11 = vpop.eup %11160  ;;  %v4761_v2 = vadd.f32 1.0, %v11159_v53  ;;  %v9936_v30 = vadd.f32 %v3501_v17, %v13341_v55  ;;  %v13494_v22 = vadd.f32 %v9932_v34, %v13284_v12  ;;  %v3503_v58 = vpop.f32.mrb[15].mxu1  ;;  %7320 = vmatprep.mubr.bf16.mxu0 %v13478_v28  ;;  %4201 = vmatprep.subr.bf16.mxu1 %v9235_v38  ;;  %v9259_v38 = vcombine.high %v13487_v60, %v13490_v44  ;;  %v13523_v34 = vld [vmem:[%s12019_s15 + $0x438] sm:$0xff] }
 0x3b0   : > { %v11163_v32 = vpop.eup %11162  ;;  %v4768_v54 = vadd.f32 1.0, %v11161_v11  ;;  %v9938_v40 = vadd.f32 %v3503_v58, %v13345_v0  ;;  %v13504_v12 = vadd.f32 %v9934_v62, %v13286_v6  ;;  %7321 = vmatmul.mubr.bf16.vlgmr.msra.gmra.mrb[48].mxu0 %v13470_v14  ;;  %v4856_v15 = vmul.f32 %v4760_v29, %v4472_v50  ;;  %v10626_v11 = vld [vmem:[%s12027_s10 + $0x360] ss:$24 sps:$4 sm:$0xff]  }
 0x3b1   : > { %v4769_v49 = vadd.f32 1.0, %v11163_v32  ;;  %v4600_v47 = vmul.f32 0.70710677, %v13494_v22  ;;  %7382 = vmatpush1.bf16.msra.mxu0 %v10620_v27  ;;  %v13514_v6 = vadd.f32 %v9936_v30, %v13291_v3  ;;  %v4857_v52 = vmul.f32 %v4761_v2, %v4473_v7  ;;  %v10628_v3 = vld [vmem:[%s12027_s10 + $0x364] ss:$24 sps:$4 sm:$0xff]  }
 0x3b2   : > { %v4864_v63 = vmul.f32 %v4768_v54, %v4480_v59  ;;  %v4601_v42 = vmul.f32 0.70710677, %v13504_v12  ;;  %4202 = vmatpush1.bf16.msra.mxu1 %v9234_v39  ;;  %7383 = vmatprep.subr.bf16.mxu0 %v10625_v4  ;;  %v13526_v50 = vadd.f32 %v9938_v40, %v13294_v41  ;;  %v9258_v27 = vcombine.low %v13487_v60, %v13490_v44  ;;  %v13552_v59 = vld [vmem:[%s12019_s15 + $0x458] sm:$0xff]  ;;  %v10632_v60 = vld [vmem:[%s12027_s10 + $0x3c0] ss:$24 sps:$4 sm:$0xff]  }
 0x3b3   : > { %v4865_v53 = vmul.f32 %v4769_v49, %v4481_v36  ;;  %11172 = verf.f32 %v4600_v47  ;;  %4203 = vmatprep.subr.bf16.mxu1 %v9243_v5  ;;  %v4608_v10 = vmul.f32 0.70710677, %v13514_v6  ;;  %v9267_v5 = vcombine.high %v13520_v37, %v13523_v34  ;;  %v13555_v54 = vld [vmem:[%s12019_s15 + $0x478] sm:$0xff] }
 0x3b4   : > { %11174 = verf.f32 %v4601_v42  ;;  %v3507_v57 = vpop.f32.mrb[16].mxu1  ;;  %v13533_v39 = vpack.c.bf16 %v4864_v63, %v4856_v15  ;;  %v4609_v41 = vmul.f32 0.70710677, %v13526_v50  ;;  %v4488_v30 = vmul.f32 0.5, %v13451_v18 }
 0x3b5   : > { %v11165_v29 = vpop.eup %11164  ;;  %v9940_v7 = vadd.f32 %v3507_v57, %v13341_v55  ;;  %v3509_v62 = vpop.f32.mrb[17].mxu1  ;;  %v13539_v17 = vpack.c.bf16 %v4865_v53, %v4857_v52  ;;  %7384 = vmatpush1.bf16.msra.mxu0 %v10623_v21  ;;  %11176 = verf.f32 %v4608_v10  ;;  %v9266_v32 = vcombine.low %v13520_v37, %v13523_v34  ;;  %v1149_v34 = vld [vmem:[%s12019_s15 + $0x4d8] sm:$0xff] }
 0x3b6   : > { %v11167_v2 = vpop.eup %11166  ;;  %v9942_v58 = vadd.f32 %v3509_v62, %v13345_v0  ;;  %v3511_v4 = vpop.f32.mrb[18].mxu1  ;;  %4204 = vmatpush1.bf16.msra.mxu1 %v9242_v25  ;;  %7385 = vmatprep.subr.bf16.mxu0 %v10628_v3  ;;  %v4776_v40 = vadd.f32 1.0, %v11165_v29  ;;  %11178 = verf.f32 %v4609_v41  ;;  %v4489_v25 = vmul.f32 0.5, %v13456_v48  ;;  %v10629_v48 = vld [vmem:[%s12027_s10 + $0x390] ss:$24 sps:$4 sm:$0xff]  }
 0x3b7   : > { %v9944_v18 = vadd.f32 %v3511_v4, %v13341_v55  ;;  %v13559_v36 = vadd.f32 %v9940_v7, %v13300_v16  ;;  %v3513_v49 = vpop.f32.mrb[19].mxu1  ;;  %7330 = vmatprep.mubr.bf16.mxu0 %v13539_v17  ;;  %4205 = vmatprep.subr.bf16.mxu1 %v9251_v43  ;;  %v11169_v35 = vpop.eup %11168  ;;  %v4777_v47 = vadd.f32 1.0, %v11167_v2  ;;  %v4496_v63 = vmul.f32 0.5, %v13464_v46  ;;  %v13595_v41 = vld [vmem:[%s12019_s15 + $0x4b8] sm:$0xff] }
 0x3b8   : > { %v9946_v21 = vadd.f32 %v3513_v49, %v13345_v0  ;;  %v13569_v15 = vadd.f32 %v9942_v58, %v13302_v31  ;;  %7331 = vmatmul.mubr.bf16.gmra.mrb[52].mxu0 %v13533_v39  ;;  %v11171_v16 = vpop.eup %11170  ;;  %v4784_v42 = vadd.f32 1.0, %v11169_v35  ;;  %v9275_v43 = vcombine.high %v13552_v59, %v13555_v54 }
 0x3b9   : > { %v4616_v52 = vmul.f32 0.70710677, %v13559_v36  ;;  %7386 = vmatpush1.bf16.msra.mxu0 %v10626_v11  ;;  %v4497_v53 = vmul.f32 0.5, %v13467_v1  ;;  %v4785_v31 = vadd.f32 1.0, %v11171_v16  ;;  %v13580_v10 = vadd.f32 %v9944_v18, %v13307_v9  ;;  %v13592_v1 = vld [vmem:[%s12019_s15 + $0x498] sm:$0xff] }
 0x3ba   : > { %v4617_v3 = vmul.f32 0.70710677, %v13569_v15  ;;  %4206 = vmatpush1.bf16.msra.mxu1 %v9250_v23  ;;  %7387 = vmatprep.subr.bf16.mxu0 %v10631_v13  ;;  %v4872_v46 = vmul.f32 %v4776_v40, %v4488_v30  ;;  %v4880_v57 = vmul.f32 %v4784_v42, %v4496_v63  ;;  %v13586_v29 = vadd.f32 %v9946_v21, %v13311_v8  ;;  %v10634_v9 = vld [vmem:[%s12027_s10 + $0x3c4] ss:$24 sps:$4 sm:$0xff]  }
 0x3bb   : > { %11180 = verf.f32 %v4616_v52  ;;  %4207 = vmatprep.subr.bf16.mxu1 %v9259_v38  ;;  %v4873_v7 = vmul.f32 %v4777_v47, %v4489_v25  ;;  %v4881_v62 = vmul.f32 %v4785_v31, %v4497_v53  ;;  %v4624_v26 = vmul.f32 0.70710677, %v13580_v10 }
 0x3bc   : > { %11182 = verf.f32 %v4617_v3  ;;  %v3517_v56 = vpop.f32.mrb[20].mxu1  ;;  %v4625_v11 = vmul.f32 0.70710677, %v13586_v29  ;;  %v13601_v30 = vpack.c.bf16 %v4880_v57, %v4872_v46  ;;  %v9274_v38 = vcombine.low %v13552_v59, %v13555_v54 }
 0x3bd   : > { %v11173_v23 = vpop.eup %11172  ;;  %v9948_v8 = vadd.f32 %v3517_v56, %v13341_v55  ;;  %v3519_v2 = vpop.f32.mrb[21].mxu1  ;;  %7388 = vmatpush1.bf16.msra.mxu0 %v10629_v48  ;;  %11184 = verf.f32 %v4624_v26  ;;  %v13609_v18 = vpack.c.bf16 %v4881_v62, %v4873_v7  ;;  %v9283_v49 = vcombine.high %v13592_v1, %v13595_v41 }
 0x3be   : > { %v11175_v58 = vpop.eup %11174  ;;  %v9950_v4 = vadd.f32 %v3519_v2, %v13345_v0  ;;  %v3521_v40 = vpop.f32.mrb[22].mxu1  ;;  %4208 = vmatpush1.bf16.msra.mxu1 %v9258_v27  ;;  %7389 = vmatprep.subr.bf16.mxu0 %v10634_v9  ;;  %v4792_v13 = vadd.f32 1.0, %v11173_v23  ;;  %11186 = verf.f32 %v4625_v11  ;;  %v4504_v27 = vmul.f32 0.5, %v13494_v22  ;;  %v11377_v22 = vld [vmem:[#allocation2] sm:$0xff]  ;;  %v10643_v9 = vld [vmem:[%s12027_s10 + $0x424] ss:$24 sps:$4 sm:$0xff]  }
 0x3bf   : > { %v9952_v35 = vadd.f32 %v3521_v40, %v13341_v55  ;;  %v13615_v25 = vadd.f32 %v9948_v8, %v13317_v19  ;;  %v3523_v47 = vpop.f32.mrb[23].mxu1  ;;  %4270 = vmatprep.subr.bf16.mxu1 %v9267_v5  ;;  %v11177_v44 = vpop.eup %11176  ;;  %v4793_v21 = vadd.f32 1.0, %v11175_v58  ;;  %7340 = vmatprep.mubr.bf16.mxu0 %v13609_v18  ;;  %v10637_v55 = vld [vmem:[%s12027_s10 + $0x3f4] ss:$24 sps:$4 sm:$0xff]   ;;  %v4505_v42 = vmul.f32 0.5, %v13504_v12 }
 0x3c0   : > { %v9954_v16 = vadd.f32 %v3523_v47, %v13345_v0  ;;  %v13624_v63 = vadd.f32 %v9950_v4, %v13319_v20  ;;  %v11179_v19 = vpop.eup %11178  ;;  %v4512_v52 = vmul.f32 0.5, %v13514_v6  ;;  %v4800_v48 = vadd.f32 1.0, %v11177_v44  ;;  %7341 = vmatmul.mubr.bf16.gmra.mrb[56].mxu0 %v13601_v30  ;;  %v11378_v12 = vld [vmem:[#allocation2 + $0x38] sm:$0xff]  ;;  %v10641_v23 = vld [vmem:[%s12027_s10 + $0x420] ss:$24 sps:$4 sm:$0xff]  }
 0x3c1   : > { %v4632_v5 = vmul.f32 0.70710677, %v13615_v25  ;;  %4210 = vmatmul.mubr.bf16.vlgmr.msra.gmra.mrb[48].mxu1 %v11377_v22  ;;  %v4513_v0 = vmul.f32 0.5, %v13526_v50  ;;  %v4801_v20 = vadd.f32 1.0, %v11179_v19  ;;  %v13635_v31 = vadd.f32 %v9952_v35, %v13323_v24  ;;  %7390 = vmatpush1.bf16.msra.mxu0 %v10632_v60  ;;  %v10635_v24 = vld [vmem:[%s12027_s10 + $0x3f0] ss:$24 sps:$4 sm:$0xff]  }
 0x3c2   : > { %v4633_v53 = vmul.f32 0.70710677, %v13624_v63  ;;  %4271 = vmatpush1.bf16.msra.mxu1 %v9266_v32  ;;  %4219 = vmatprep.mubr.bf16.mxu1 %v11378_v12  ;;  %v4888_v6 = vmul.f32 %v4792_v13, %v4504_v27  ;;  %v4896_v3 = vmul.f32 %v4800_v48, %v4512_v52  ;;  %v13641_v50 = vadd.f32 %v9954_v16, %v13328_v33  ;;  %v1153_v32 = vld [vmem:[%s12019_s15 + $0x4f8] sm:$0xff]  ;;  %v11380_v44 = vld [vmem:[#allocation2 + $0x68] sm:$0xff] }
 0x3c3   : > { %11188 = verf.f32 %v4632_v5  ;;  %4272 = vmatprep.subr.bf16.mxu1 %v9275_v43  ;;  %v4889_v46 = vmul.f32 %v4793_v21, %v4505_v42  ;;  %v4897_v57 = vmul.f32 %v4801_v20, %v4513_v0  ;;  %v4640_v37 = vmul.f32 0.70710677, %v13635_v31  ;;  %7391 = vmatprep.subr.bf16.mxu0 %v10637_v55  ;;  %v1157_v2 = vld [vmem:[%s12019_s15 + $0x518] sm:$0xff] }
 0x3c4   : > { %11190 = verf.f32 %v4633_v53  ;;  %v4641_v33 = vmul.f32 0.70710677, %v13641_v50  ;;  %v13652_v62 = vpack.c.bf16 %v4896_v3, %v4888_v6  ;;  %v9282_v43 = vcombine.low %v13592_v1, %v13595_v41  ;;  %v1161_v58 = vld [vmem:[%s12019_s15 + $0x538] sm:$0xff]  ;;  %v11379_v41 = vld [vmem:[#allocation2 + $0x30] sm:$0xff] }
 0x3c5   : > { %v11181_v7 = vpop.eup %11180  ;;  %11192 = verf.f32 %v4640_v37  ;;  %v13654_v54 = vpack.c.bf16 %v4897_v57, %v4889_v46  ;;  %v9291_v56 = vcombine.high %v1149_v34, %v1153_v32  ;;  %7392 = vmatpush1.bf16.msra.mxu0 %v10635_v24  ;;  %v10649_v4 = vld [vmem:[%s12027_s10 + $0x454] ss:$24 sps:$4 sm:$0xff]   ;;  %v4520_v40 = vmul.f32 0.5, %v13559_v36  ;;  %v10647_v21 = vld [vmem:[%s12027_s10 + $0x450] ss:$24 sps:$4 sm:$0xff]  }
 0x3c6   : > { %v11183_v59 = vpop.eup %11182  ;;  %4273 = vmatpush1.bf16.msra.mxu1 %v9274_v38  ;;  %v4808_v26 = vadd.f32 1.0, %v11181_v7  ;;  %11194 = verf.f32 %v4641_v33  ;;  %7393 = vmatprep.subr.bf16.mxu0 %v10643_v9  ;;  %v4528_v13 = vmul.f32 0.5, %v13580_v10  ;;  %v4529_v35 = vmul.f32 0.5, %v13586_v29  ;;  %v1165_v19 = vld [vmem:[%s12019_s15 + $0x558] sm:$0xff]  ;;  %v10655_v29 = vld [vmem:[%s12027_s10 + $0x484] ss:$24 sps:$4 sm:$0xff]  }
 0x3c7   : > { %4274 = vmatprep.subr.bf16.mxu1 %v9283_v49  ;;  %v11185_v11 = vpop.eup %11184  ;;  %v4809_v8 = vadd.f32 1.0, %v11183_v59  ;;  %7350 = vmatprep.mubr.bf16.mxu0 %v13654_v54  ;;  %v4521_v49 = vmul.f32 0.5, %v13569_v15  ;;  %v9290_v60 = vcombine.low %v1149_v34, %v1153_v32  ;;  %v9299_v27 = vcombine.high %v1157_v2, %v1161_v58  ;;  %v1169_v15 = vld [vmem:[%s12019_s15 + $0x578] sm:$0xff]  ;;  %v10653_v53 = vld [vmem:[%s12027_s10 + $0x480] ss:$24 sps:$4 sm:$0xff]   ;;  %v11381_v9 = vld [vmem:[#allocation2 + $0x60] sm:$0xff] }
 0x3c8   : > { %v11187_v38 = vpop.eup %11186  ;;  %v4816_v1 = vadd.f32 1.0, %v11185_v11  ;;  %7351 = vmatmul.mubr.bf16.gmra.mrb[60].mxu0 %v13652_v62  ;;  %v4904_v36 = vmul.f32 %v4808_v26, %v4520_v40  ;;  %v9298_v22 = vcombine.low %v1157_v2, %v1161_v58  ;;  %v9307_v20 = vcombine.high %v1165_v19, %v1169_v15  ;;  %v1173_v3 = vld [vmem:[%s12019_s15 + $0x598] sm:$0xff]  ;;  %v10667_v2 = vld [vmem:[%s12027_s10 + $0x4e4] ss:$24 sps:$4 sm:$0xff]  }
 0x3c9   : > { %4220 = vmatmul.mubr.bf16.gmra.mrb[52].mxu1 %v11379_v41  ;;  %v4817_v47 = vadd.f32 1.0, %v11187_v38  ;;  %7394 = vmatpush1.bf16.msra.mxu0 %v10641_v23  ;;  %v4905_v16 = vmul.f32 %v4809_v8, %v4521_v49  ;;  %v1177_v24 = vld [vmem:[%s12019_s15 + $0x5b8] sm:$0xff]  ;;  %v4536_v37 = vmul.f32 0.5, %v13615_v25  ;;  %v4544_v34 = vmul.f32 0.5, %v13635_v31 }
 0x3ca   : > { %4275 = vmatpush1.bf16.msra.mxu1 %v9282_v43  ;;  %4229 = vmatprep.mubr.bf16.mxu1 %v11380_v44  ;;  %v4912_v10 = vmul.f32 %v4816_v1, %v4528_v13  ;;  %v10661_v46 = vld [vmem:[%s12027_s10 + $0x4b4] ss:$24 sps:$4 sm:$0xff]   ;;  %v4537_v7 = vmul.f32 0.5, %v13624_v63  ;;  %v4545_v33 = vmul.f32 0.5, %v13641_v50  ;;  %v9306_v43 = vcombine.low %v1165_v19, %v1169_v15  ;;  %v10659_v23 = vld [vmem:[%s12027_s10 + $0x4b0] ss:$24 sps:$4 sm:$0xff]  }
 0x3cb   : > { %4276 = vmatprep.subr.bf16.mxu1 %v9291_v56  ;;  %v4913_v55 = vmul.f32 %v4817_v47, %v4529_v35  ;;  %7395 = vmatprep.subr.bf16.mxu0 %v10649_v4  ;;  %v11382_v26 = vld [vmem:[#allocation2 + $0x98] sm:$0xff]  ;;  %v9315_v56 = vcombine.high %v1173_v3, %v1177_v24  ;;  %v9314_v38 = vcombine.low %v1173_v3, %v1177_v24  ;;  %v10665_v13 = vld [vmem:[%s12027_s10 + $0x4e0] ss:$24 sps:$4 sm:$0xff]   ;;  %v10691_v3 = vld [vmem:[%s12027_s10 + $0x5a4] ss:$24 sps:$4 sm:$0xff]  }
 0x3cc   : > { %v13672_v52 = vpack.c.bf16 %v4912_v10, %v4904_v36  ;;  %v1181_v8 = vld [vmem:[%s12019_s15 + $0x5d8] sm:$0xff]  ;;  %v11383_v35 = vld [vmem:[#allocation2 + $0x90] sm:$0xff] }
 0x3cd   : > { %v11189_v42 = vpop.eup %11188  ;;  %v13674_v5 = vpack.c.bf16 %v4913_v55, %v4905_v16  ;;  %7396 = vmatpush1.bf16.msra.mxu0 %v10647_v21  ;;  %v1185_v50 = vld [vmem:[%s12019_s15 + $0x5f8] sm:$0xff]  ;;  %v10679_v21 = vld [vmem:[%s12027_s10 + $0x544] ss:$24 sps:$4 sm:$0xff]   ;;  %v10677_v19 = vld [vmem:[%s12027_s10 + $0x540] ss:$24 sps:$4 sm:$0xff]  }
 0x3ce   : > { %v11191_v48 = vpop.eup %11190  ;;  %4277 = vmatpush1.bf16.msra.mxu1 %v9290_v60  ;;  %v4824_v0 = vadd.f32 1.0, %v11189_v42  ;;  %7397 = vmatprep.subr.bf16.mxu0 %v10655_v29  ;;  %v9323_v40 = vcombine.high %v1181_v8, %v1185_v50  ;;  %v1189_v1 = vld [vmem:[%s12019_s15 + $0x618] sm:$0xff]  ;;  %v9322_v47 = vcombine.low %v1181_v8, %v1185_v50  ;;  %v11384_v60 = vld [vmem:[#allocation2 + $0xc8] sm:$0xff] }
 0x3cf   : > { %4278 = vmatprep.subr.bf16.mxu1 %v9299_v27  ;;  %v11193_v12 = vpop.eup %11192  ;;  %v4825_v6 = vadd.f32 1.0, %v11191_v48  ;;  %7360 = vmatprep.mubr.bf16.mxu0 %v13674_v5  ;;  %v1193_v41 = vld [vmem:[%s12019_s15 + $0x638] sm:$0xff]  ;;  %v11385_v48 = vld [vmem:[#allocation2 + $0xc0] sm:$0xff] }
 0x3d0   : > { %v11195_v57 = vpop.eup %11194  ;;  %v4832_v32 = vadd.f32 1.0, %v11193_v12  ;;  %7361 = vmatmul.mubr.bf16.gmra.mrb[64].mxu0 %v13672_v52  ;;  %v4920_v25 = vmul.f32 %v4824_v0, %v4536_v37  ;;  %v10673_v49 = vld [vmem:[%s12027_s10 + $0x514] ss:$24 sps:$4 sm:$0xff]   ;;  %v9331_v44 = vcombine.high %v1189_v1, %v1193_v41  ;;  %v10671_v36 = vld [vmem:[%s12027_s10 + $0x510] ss:$24 sps:$4 sm:$0xff]   ;;  %v9330_v16 = vcombine.low %v1189_v1, %v1193_v41 }
 0x3d1   : > { %4230 = vmatmul.mubr.bf16.gmra.mrb[56].mxu1 %v11381_v9  ;;  %v4833_v59 = vadd.f32 1.0, %v11195_v57  ;;  %7398 = vmatpush1.bf16.msra.mxu0 %v10653_v53  ;;  %v4921_v11 = vmul.f32 %v4825_v6, %v4537_v7  ;;  %v1197_v10 = vld [vmem:[%s12019_s15 + $0x658] sm:$0xff]  ;;  %v10689_v57 = vld [vmem:[%s12027_s10 + $0x5a0] ss:$24 sps:$4 sm:$0xff]  }
 0x3d2   : > { %4279 = vmatpush1.bf16.msra.mxu1 %v9298_v22  ;;  %4239 = vmatprep.mubr.bf16.mxu1 %v11382_v26  ;;  %v4928_v31 = vmul.f32 %v4832_v32, %v4544_v34  ;;  %v1201_v27 = vld [vmem:[%s12019_s15 + $0x678] sm:$0xff]  ;;  %v11387_v9 = vld [vmem:[#allocation2 + $0xf0] sm:$0xff] }
 0x3d3   : > { %4280 = vmatprep.subr.bf16.mxu1 %v9307_v20  ;;  %v4929_v63 = vmul.f32 %v4833_v59, %v4545_v33  ;;  %7399 = vmatprep.subr.bf16.mxu0 %v10661_v46  ;;  %v9339_v55 = vcombine.high %v1197_v10, %v1201_v27  ;;  %v1205_v15 = vld [vmem:[%s12019_s15 + $0x698] sm:$0xff]  ;;  %v9338_v22 = vcombine.low %v1197_v10, %v1201_v27 }
 0x3d4   : > { %v13690_v58 = vpack.c.bf16 %v4928_v31, %v4920_v25  ;;  %v1209_v29 = vld [vmem:[%s12019_s15 + $0x6b8] sm:$0xff]  ;;  %v10703_v31 = vld [vmem:[%s12027_s10 + $0x604] ss:$24 sps:$4 sm:$0xff]  }
 0x3d5   : > { %v13692_v4 = vpack.c.bf16 %v4929_v63, %v4921_v11  ;;  %7400 = vmatpush1.bf16.msra.mxu0 %v10659_v23  ;;  %v10685_v42 = vld [vmem:[%s12027_s10 + $0x574] ss:$24 sps:$4 sm:$0xff]   ;;  %v9347_v20 = vcombine.high %v1205_v15, %v1209_v29  ;;  %v10683_v53 = vld [vmem:[%s12027_s10 + $0x570] ss:$24 sps:$4 sm:$0xff]   ;;  %v9346_v24 = vcombine.low %v1205_v15, %v1209_v29 }
 0x3d6   : > { %4281 = vmatpush1.bf16.msra.mxu1 %v9306_v43  ;;  %7401 = vmatprep.subr.bf16.mxu0 %v10667_v2  ;;  %v11386_v0 = vld [vmem:[#allocation2 + $0xf8] sm:$0xff] }
 0x3d7   : > { %4282 = vmatprep.subr.bf16.mxu1 %v9315_v56  ;;  %7370 = vmatprep.mubr.bf16.mxu0 %v13692_v4  ;;  %v1213_v12 = vld [vmem:[%s12019_s15 + $0x6d8] sm:$0xff] }
 0x3d8   : > { %7371 = vmatmul.mubr.bf16.gmra.mrb[68].mxu0 %v13690_v58  ;;  %v1217_v6 = vld [vmem:[%s12019_s15 + $0x6f8] sm:$0xff] }
 0x3d9   : > { %4240 = vmatmul.mubr.bf16.gmra.mrb[60].mxu1 %v11383_v35  ;;  %7402 = vmatpush1.bf16.msra.mxu0 %v10665_v13  ;;  %v9355_v46 = vcombine.high %v1213_v12, %v1217_v6  ;;  %v1221_v37 = vld [vmem:[%s12019_s15 + $0x718] sm:$0xff]  ;;  %v9354_v7 = vcombine.low %v1213_v12, %v1217_v6 }
 0x3da   : > { %4283 = vmatpush1.bf16.msra.mxu1 %v9314_v38  ;;  %4249 = vmatprep.mubr.bf16.mxu1 %v11384_v60  ;;  %v1225_v34 = vld [vmem:[%s12019_s15 + $0x738] sm:$0xff] }
 0x3db   : > { %4284 = vmatprep.subr.bf16.mxu1 %v9323_v40  ;;  %7403 = vmatprep.subr.bf16.mxu0 %v10673_v49  ;;  %v10697_v32 = vld [vmem:[%s12027_s10 + $0x5d4] ss:$24 sps:$4 sm:$0xff]   ;;  %v9363_v59 = vcombine.high %v1221_v37, %v1225_v34  ;;  %v10695_v43 = vld [vmem:[%s12027_s10 + $0x5d0] ss:$24 sps:$4 sm:$0xff]   ;;  %v9362_v56 = vcombine.low %v1221_v37, %v1225_v34 }
 0x3dc   : > { %v11388_v33 = vld [vmem:[#allocation2 + $0x18] sm:$0xff] }
 0x3dd   : > { %7404 = vmatpush1.bf16.msra.mxu0 %v10671_v36  ;;  %v1229_v26 = vld [vmem:[%s12019_s15 + $0x758] sm:$0xff] }
 0x3de   : > { %4285 = vmatpush1.bf16.msra.mxu1 %v9322_v47  ;;  %7405 = vmatprep.subr.bf16.mxu0 %v10679_v21  ;;  %v1233_v25 = vld [vmem:[%s12019_s15 + $0x778] sm:$0xff]  ;;  %v11389_v21 = vld [vmem:[#allocation2 + $0x10] sm:$0xff] }
 0x3df   : > { %4286 = vmatprep.subr.bf16.mxu1 %v9331_v44  ;;  %v9371_v23 = vcombine.high %v1229_v26, %v1233_v25  ;;  %v1237_v11 = vld [vmem:[%s12019_s15 + $0x798] sm:$0xff]  ;;  %v9370_v8 = vcombine.low %v1229_v26, %v1233_v25 }
 0x3e0   : > { %v1241_v63 = vld [vmem:[%s12019_s15 + $0x7b8] sm:$0xff] }
 0x3e1   : > { %4250 = vmatmul.mubr.bf16.gmra.mrb[64].mxu1 %v11385_v48  ;;  %7406 = vmatpush1.bf16.msra.mxu0 %v10677_v19  ;;  %v9379_v50 = vcombine.high %v1237_v11, %v1241_v63  ;;  %v1245_v2 = vld [vmem:[%s12019_s15 + $0x7d8] sm:$0xff]  ;;  %v9378_v40 = vcombine.low %v1237_v11, %v1241_v63  ;;  %v15247_v11 = vsub.s32 5, %v13326_v45  ;;  %v11395_v63 = vld [vmem:[#allocation2 + $0xa0] sm:$0xff] }
 0x3e2   : > { %4287 = vmatpush1.bf16.msra.mxu1 %v9330_v16  ;;  %4259 = vmatprep.mubr.bf16.mxu1 %v11386_v0  ;;  %v1249_v38 = vld [vmem:[%s12019_s15 + $0x7f8] sm:$0xff] }
 0x3e3   : > { %4288 = vmatprep.subr.bf16.mxu1 %v9339_v55  ;;  %7407 = vmatprep.subr.bf16.mxu0 %v10685_v42  ;;  %v9387_v13 = vcombine.high %v1245_v2, %v1249_v38  ;;  %v1253_v1 = vld [vmem:[%s12019_s15 + $0x818] sm:$0xff]  ;;  %v9386_v49 = vcombine.low %v1245_v2, %v1249_v38  ;;  %v11390_v55 = vld [vmem:[#allocation2 + $0x48] sm:$0xff] }
 0x3e4   : > { %v1257_v41 = vld [vmem:[%s12019_s15 + $0x838] sm:$0xff]  ;;  %v13745_v38 = vld [vmem:[%s12025_s21] sm:$0xff] }
 0x3e5   : > { %7408 = vmatpush1.bf16.msra.mxu0 %v10683_v53  ;;  %v9395_v35 = vcombine.high %v1253_v1, %v1257_v41  ;;  %v1261_v47 = vld [vmem:[%s12019_s15 + $0x858] sm:$0xff]  ;;  %v9394_v44 = vcombine.low %v1253_v1, %v1257_v41  ;;  %v13757_v41 = vrot.slane %v13745_v38, %v15247_v11 }
 0x3e6   : > { %4289 = vmatpush1.bf16.msra.mxu1 %v9338_v22  ;;  %7409 = vmatprep.subr.bf16.mxu0 %v10691_v3  ;;  %v1265_v60 = vld [vmem:[%s12019_s15 + $0x878] sm:$0xff] }
 0x3e7   : > { %4290 = vmatprep.subr.bf16.mxu1 %v9347_v20  ;;  %v9403_v36 = vcombine.high %v1261_v47, %v1265_v60  ;;  %v1269_v10 = vld [vmem:[%s12019_s15 + $0x898] sm:$0xff]  ;;  %v9402_v16 = vcombine.low %v1261_v47, %v1265_v60  ;;  %v11391_v20 = vld [vmem:[#allocation2 + $0x40] sm:$0xff] }
 0x3e8   : > { %v1273_v27 = vld [vmem:[%s12019_s15 + $0x8b8] sm:$0xff] }
 0x3e9   : > { %4260 = vmatmul.mubr.bf16.gmra.mrb[68].mxu1 %v11387_v9  ;;  %7410 = vmatpush1.bf16.msra.mxu0 %v10689_v57  ;;  %v9411_v19 = vcombine.high %v1269_v10, %v1273_v27  ;;  %v1277_v15 = vld [vmem:[%s12019_s15 + $0x8d8] sm:$0xff]  ;;  %v9410_v42 = vcombine.low %v1269_v10, %v1273_v27 }
 0x3ea   : > { %4291 = vmatpush1.bf16.msra.mxu1 %v9346_v24  ;;  %4302 = vmatprep.mubr.bf16.mxu1 %v11388_v33  ;;  %v1281_v29 = vld [vmem:[%s12019_s15 + $0x8f8] sm:$0xff] }
 0x3eb   : > { %4292 = vmatprep.subr.bf16.mxu1 %v9355_v46  ;;  %7411 = vmatprep.subr.bf16.mxu0 %v10697_v32  ;;  %v9419_v48 = vcombine.high %v1277_v15, %v1281_v29  ;;  %v1285_v22 = vld [vmem:[%s12019_s15 + $0x918] sm:$0xff]  ;;  %v9418_v53 = vcombine.low %v1277_v15, %v1281_v29  ;;  %v11393_v32 = vld [vmem:[#allocation2 + $0x70] sm:$0xff] }
 0x3ec   : > { %v1289_v0 = vld [vmem:[%s12019_s15 + $0x938] sm:$0xff] }
 0x3ed   : > { %7412 = vmatpush1.bf16.msra.mxu0 %v10695_v43  ;;  %v11392_v12 = vld [vmem:[#allocation2 + $0x78] sm:$0xff]  ;;  %v9427_v6 = vcombine.high %v1285_v22, %v1289_v0  ;;  %v9426_v46 = vcombine.low %v1285_v22, %v1289_v0 }
 0x3ee   : > { %4293 = vmatpush1.bf16.msra.mxu1 %v9354_v7  ;;  %7474 = vmatprep.subr.bf16.mxu0 %v10703_v31  ;;  %v1293_v3 = vld [vmem:[%s12019_s15 + $0x958] sm:$0xff]  ;;  %v11394_v7 = vld [vmem:[#allocation2 + $0xa8] sm:$0xff]  ;;  %v15248_v31 = vsub.s32 4, %v13326_v45 }
 0x3ef   : > { %4294 = vmatprep.subr.bf16.mxu1 %v9363_v59  ;;  %v1297_v24 = vld [vmem:[%s12019_s15 + $0x978] sm:$0xff] }
 0x3f0   : > { %v9435_v57 = vcombine.high %v1293_v3, %v1297_v24  ;;  %v1301_v37 = vld [vmem:[%s12019_s15 + $0x998] sm:$0xff]  ;;  %v9434_v9 = vcombine.low %v1293_v3, %v1297_v24 }
 0x3f1   : > { %v1305_v34 = vld [vmem:[%s12019_s15 + $0x9b8] sm:$0xff] }
 0x3f2   : > { %4295 = vmatpush1.bf16.msra.mxu1 %v9362_v56  ;;  %v9443_v33 = vcombine.high %v1301_v37, %v1305_v34  ;;  %v1309_v59 = vld [vmem:[%s12019_s15 + $0x9d8] sm:$0xff]  ;;  %v9442_v26 = vcombine.low %v1301_v37, %v1305_v34 }
 0x3f3   : > { %4296 = vmatprep.subr.bf16.mxu1 %v9371_v23  ;;  %v1313_v43 = vld [vmem:[%s12019_s15 + $0x9f8] sm:$0xff] }
 0x3f4   : > { %v9451_v25 = vcombine.high %v1309_v59, %v1313_v43  ;;  %v1317_v56 = vld [vmem:[%s12019_s15 + $0xa18] sm:$0xff] }
 0x3f5   : > { %v1321_v23 = vld [vmem:[%s12019_s15 + $0xa38] sm:$0xff] }
 0x3f6   : > { %4297 = vmatpush1.bf16.msra.mxu1 %v9370_v8  ;;  %v9450_v8 = vcombine.low %v1309_v59, %v1313_v43  ;;  %v9459_v2 = vcombine.high %v1317_v56, %v1321_v23  ;;  %v1329_v1 = vld [vmem:[%s12019_s15 + $0xa78] sm:$0xff] }
 0x3f7   : > { %4298 = vmatprep.subr.bf16.mxu1 %v9379_v50  ;;  %v11396_v50 = vld [vmem:[#allocation2 + $0xd8] sm:$0xff] }
 0x3f8   : > { %v1337_v10 = vld [vmem:[%s12019_s15 + $0xab8] sm:$0xff] }
 0x3f9   : > { %v1349_v34 = vld [vmem:[%s12019_s15 + $0xb18] sm:$0xff] }
 0x3fa   : > { %4299 = vmatpush1.bf16.msra.mxu1 %v9378_v40  ;;  %v13750_v40 = vrot.slane %v13745_v38, %v15248_v31 }
 0x3fb   : > { %4300 = vmatprep.subr.bf16.mxu1 %v9387_v13  ;;  %v1325_v13 = vld [vmem:[%s12019_s15 + $0xa58] sm:$0xff] }
 0x3fc   : > { %v9467_v47 = vcombine.high %v1325_v13, %v1329_v1  ;;  %v9466_v29 = vcombine.low %v1325_v13, %v1329_v1  ;;  %v1361_v13 = vld [vmem:[%s12019_s15 + $0xb78] sm:$0xff] }
 0x3fe   : > { %4301 = vmatpush1.bf16.msra.mxu1 %v9386_v49  ;;  %v9458_v49 = vcombine.low %v1317_v56, %v1321_v23  ;;  %v11401_v56 = vld [vmem:[#allocation2 + $0x28] sm:$0xff] }
 0x3ff   : > { %4363 = vmatprep.subr.bf16.mxu1 %v9395_v35 }
 0x401   : > { %4303 = vmatmul.mubr.bf16.vlgmr.msra.gmra.mrb[48].mxu1 %v11389_v21 }
 0x402   : > { %4364 = vmatpush1.bf16.msra.mxu1 %v9394_v44  ;;  %4312 = vmatprep.mubr.bf16.mxu1 %v11390_v55 }
 0x403   : > { %4365 = vmatprep.subr.bf16.mxu1 %v9403_v36  ;;  %v1333_v36 = vld [vmem:[%s12019_s15 + $0xa98] sm:$0xff] }
 0x404   : > { %v9475_v0 = vcombine.high %v1333_v36, %v1337_v10  ;;  %v9474_v3 = vcombine.low %v1333_v36, %v1337_v10 }
 0x406   : > { %4366 = vmatpush1.bf16.msra.mxu1 %v9402_v16  ;;  %v11398_v16 = vld [vmem:[#allocation2 + $0xd0] sm:$0xff] }
 0x407   : > { %4367 = vmatprep.subr.bf16.mxu1 %v9411_v19 }
 0x409   : > { %4313 = vmatmul.mubr.bf16.gmra.mrb[52].mxu1 %v11391_v20 }
 0x40a   : > { %4368 = vmatpush1.bf16.msra.mxu1 %v9410_v42  ;;  %4322 = vmatprep.mubr.bf16.mxu1 %v11392_v12  ;;  %v11399_v42 = vld [vmem:[#allocation2 + $0x108] sm:$0xff]  ;;  %v1345_v12 = vld [vmem:[%s12019_s15 + $0xaf8] sm:$0xff] }
 0x40b   : > { %4369 = vmatprep.subr.bf16.mxu1 %v9419_v48 }
 0x40e   : > { %4370 = vmatpush1.bf16.msra.mxu1 %v9418_v53  ;;  %v1341_v53 = vld [vmem:[%s12019_s15 + $0xad8] sm:$0xff] }
 0x40f   : > { %4371 = vmatprep.subr.bf16.mxu1 %v9427_v6 }
 0x411   : > { %4323 = vmatmul.mubr.bf16.gmra.mrb[56].mxu1 %v11393_v32  ;;  %v1353_v32 = vld [vmem:[%s12019_s15 + $0xb38] sm:$0xff] }
 0x412   : > { %4372 = vmatpush1.bf16.msra.mxu1 %v9426_v46  ;;  %4332 = vmatprep.mubr.bf16.mxu1 %v11394_v7  ;;  %v9483_v46 = vcombine.high %v1341_v53, %v1345_v12  ;;  %v9490_v36 = vcombine.low %v1349_v34, %v1353_v32 }
 0x413   : > { %4373 = vmatprep.subr.bf16.mxu1 %v9435_v57 }
 0x416   : > { %4374 = vmatpush1.bf16.msra.mxu1 %v9434_v9 }
 0x417   : > { %4375 = vmatprep.subr.bf16.mxu1 %v9443_v33  ;;  %v11400_v33 = vld [vmem:[#allocation2 + $0x100] sm:$0xff] }
 0x419   : > { %4333 = vmatmul.mubr.bf16.gmra.mrb[60].mxu1 %v11395_v63 }
 0x41a   : > { %4376 = vmatpush1.bf16.msra.mxu1 %v9442_v26  ;;  %4342 = vmatprep.mubr.bf16.mxu1 %v11396_v50 }
 0x41b   : > { %4377 = vmatprep.subr.bf16.mxu1 %v9451_v25  ;;  %v4118_v35 = vpop.f32.mrb[24].mxu0  ;;  %v9482_v25 = vcombine.low %v1341_v53, %v1345_v12 }
 0x41c   : > { %v9980_v60 = vadd.f32 %v4118_v35, %v13750_v40  ;;  %v4120_v44 = vpop.f32.mrb[25].mxu0 }
 0x41d   : > { %v9981_v27 = vadd.f32 %v4120_v44, %v13757_v41  ;;  %v4122_v21 = vpop.f32.mrb[26].mxu0 }
 0x41e   : > { %4378 = vmatpush1.bf16.msra.mxu1 %v9450_v8  ;;  %v4556_v55 = vmul.f32 0.70710677, %v9980_v60  ;;  %v9982_v19 = vadd.f32 %v4122_v21, %v13750_v40  ;;  %v4124_v15 = vpop.f32.mrb[27].mxu0  ;;  %v9491_v8 = vcombine.high %v1349_v34, %v1353_v32  ;;  %v4460_v1 = vmul.f32 0.5, %v9980_v60 }
 0x41f   : > { %4379 = vmatprep.subr.bf16.mxu1 %v9459_v2  ;;  %v4557_v48 = vmul.f32 0.70710677, %v9981_v27  ;;  %v9983_v22 = vadd.f32 %v4124_v15, %v13757_v41  ;;  %v1357_v2 = vld [vmem:[%s12019_s15 + $0xb58] sm:$0xff] }
 0x420   : > { %11196 = verf.f32 %v4556_v55  ;;  %v4564_v20 = vmul.f32 0.70710677, %v9982_v19  ;;  %v4468_v21 = vmul.f32 0.5, %v9982_v19  ;;  %v9499_v15 = vcombine.high %v1357_v2, %v1361_v13 }
 0x421   : > { %4343 = vmatmul.mubr.bf16.gmra.mrb[64].mxu1 %v11398_v16  ;;  %11198 = verf.f32 %v4557_v48  ;;  %v4565_v6 = vmul.f32 0.70710677, %v9983_v22  ;;  %v4469_v60 = vmul.f32 0.5, %v9983_v22 }
 0x422   : > { %4380 = vmatpush1.bf16.msra.mxu1 %v9458_v49  ;;  %4352 = vmatprep.mubr.bf16.mxu1 %v11399_v42  ;;  %11200 = verf.f32 %v4564_v20  ;;  %v1369_v20 = vld [vmem:[%s12019_s15 + $0xbb8] sm:$0xff] }
 0x423   : > { %4381 = vmatprep.subr.bf16.mxu1 %v9467_v47  ;;  %11202 = verf.f32 %v4565_v6  ;;  %v4128_v24 = vpop.f32.mrb[28].mxu0  ;;  %v4461_v47 = vmul.f32 0.5, %v9981_v27 }
 0x424   : > { %v13768_v57 = vadd.f32 %v4128_v24, %v13750_v40  ;;  %v4130_v37 = vpop.f32.mrb[29].mxu0 }
 0x425   : > { %v13773_v9 = vadd.f32 %v4130_v37, %v13757_v41  ;;  %v4132_v7 = vpop.f32.mrb[30].mxu0  ;;  %v9498_v37 = vcombine.low %v1357_v2, %v1361_v13 }
 0x426   : > { %4382 = vmatpush1.bf16.msra.mxu1 %v9466_v29  ;;  %v4572_v59 = vmul.f32 0.70710677, %v13768_v57  ;;  %v13777_v43 = vadd.f32 %v4132_v7, %v13750_v40  ;;  %v4134_v26 = vpop.f32.mrb[31].mxu0 }
 0x427   : > { %4383 = vmatprep.subr.bf16.mxu1 %v9475_v0  ;;  %v4573_v23 = vmul.f32 0.70710677, %v13773_v9  ;;  %v13781_v63 = vadd.f32 %v4134_v26, %v13757_v41  ;;  %v1365_v0 = vld [vmem:[%s12019_s15 + $0xb98] sm:$0xff] }
 0x428   : > { %11204 = verf.f32 %v4572_v59  ;;  %v4580_v50 = vmul.f32 0.70710677, %v13777_v43  ;;  %v1373_v59 = vld [vmem:[%s12019_s15 + $0xbd8] sm:$0xff]  ;;  %v9506_v13 = vcombine.low %v1365_v0, %v1369_v20 }
 0x429   : > { %4353 = vmatmul.mubr.bf16.gmra.mrb[68].mxu1 %v11400_v33  ;;  %11206 = verf.f32 %v4573_v23  ;;  %v4581_v49 = vmul.f32 0.70710677, %v13781_v63  ;;  %v9507_v33 = vcombine.high %v1365_v0, %v1369_v20  ;;  %v1377_v26 = vld [vmem:[%s12019_s15 + $0xbf8] sm:$0xff] }
 0x42a   : > { %4384 = vmatpush1.bf16.msra.mxu1 %v9474_v3  ;;  %4395 = vmatprep.mubr.bf16.mxu1 %v11401_v56  ;;  %v11197_v35 = vpop.eup %11196  ;;  %11208 = verf.f32 %v4580_v50 }
 0x42b   : > { %4385 = vmatprep.subr.bf16.mxu1 %v9483_v46  ;;  %v11199_v44 = vpop.eup %11198  ;;  %v4748_v10 = vadd.f32 1.0, %v11197_v35  ;;  %11210 = verf.f32 %v4581_v49  ;;  %v4138_v16 = vpop.f32.mrb[32].mxu0 }
 0x42c   : > { %v11201_v55 = vpop.eup %11200  ;;  %v4749_v29 = vadd.f32 1.0, %v11199_v44  ;;  %v13788_v42 = vadd.f32 %v4138_v16, %v13750_v40  ;;  %v4140_v48 = vpop.f32.mrb[33].mxu0  ;;  %v9515_v44 = vcombine.high %v1373_v59, %v1377_v26 }
 0x42d   : > { %v11203_v27 = vpop.eup %11202  ;;  %v4844_v53 = vmul.f32 %v4748_v10, %v4460_v1  ;;  %v4756_v12 = vadd.f32 1.0, %v11201_v55  ;;  %v13793_v19 = vadd.f32 %v4140_v48, %v13757_v41  ;;  %v4142_v6 = vpop.f32.mrb[34].mxu0  ;;  %v4477_v1 = vmul.f32 0.5, %v13773_v9 }
 0x42e   : > { %4386 = vmatpush1.bf16.msra.mxu1 %v9482_v25  ;;  %v4845_v3 = vmul.f32 %v4749_v29, %v4461_v47  ;;  %v4757_v24 = vadd.f32 1.0, %v11203_v27  ;;  %v4588_v46 = vmul.f32 0.70710677, %v13788_v42  ;;  %v4144_v22 = vpop.f32.mrb[35].mxu0  ;;  %v13798_v7 = vadd.f32 %v4142_v6, %v13750_v40 }
 0x42f   : > { %4387 = vmatprep.subr.bf16.mxu1 %v9491_v8  ;;  %v4852_v34 = vmul.f32 %v4756_v12, %v4468_v21  ;;  %v4589_v32 = vmul.f32 0.70710677, %v13793_v19  ;;  %v13803_v56 = vadd.f32 %v4144_v22, %v13757_v41  ;;  %v4476_v8 = vmul.f32 0.5, %v13768_v57 }
 0x430   : > { %v4853_v25 = vmul.f32 %v4757_v24, %v4469_v60  ;;  %11212 = verf.f32 %v4588_v46  ;;  %v4596_v50 = vmul.f32 0.70710677, %v13798_v7  ;;  %v4484_v10 = vmul.f32 0.5, %v13777_v43  ;;  %v10640_v46 = vld [vmem:[%s12027_s10 + $0xc] ss:$24 sps:$4 sm:$0xff]  }
 0x431   : > { %v13805_v23 = vpack.c.bf16 %v4852_v34, %v4844_v53  ;;  %11214 = verf.f32 %v4589_v32  ;;  %v4597_v49 = vmul.f32 0.70710677, %v13803_v56  ;;  %v4485_v55 = vmul.f32 0.5, %v13781_v63 }
 0x432   : > { %4388 = vmatpush1.bf16.msra.mxu1 %v9490_v36  ;;  %v11205_v2 = vpop.eup %11204  ;;  %v13811_v35 = vpack.c.bf16 %v4853_v25, %v4845_v3  ;;  %11216 = verf.f32 %v4596_v50  ;;  %v9514_v63 = vcombine.low %v1373_v59, %v1377_v26  ;;  %v4492_v59 = vmul.f32 0.5, %v13788_v42  ;;  %v10638_v50 = vld [vmem:[%s12027_s10 + $0x8] ss:$24 sps:$4 sm:$0xff]  }
 0x433   : > { %4389 = vmatprep.subr.bf16.mxu1 %v9499_v15  ;;  %v11207_v47 = vpop.eup %11206  ;;  %v4764_v36 = vadd.f32 1.0, %v11205_v2  ;;  %v4148_v21 = vpop.f32.mrb[36].mxu0  ;;  %11218 = verf.f32 %v4597_v49  ;;  %v10646_v49 = vld [vmem:[%s12027_s10 + $0x3c] ss:$24 sps:$4 sm:$0xff]  }
 0x434   : > { %v11209_v57 = vpop.eup %11208  ;;  %v4765_v16 = vadd.f32 1.0, %v11207_v47  ;;  %v13816_v9 = vadd.f32 %v4148_v21, %v13750_v40  ;;  %v4150_v15 = vpop.f32.mrb[37].mxu0  ;;  %v4501_v21 = vmul.f32 0.5, %v13803_v56 }
 0x435   : > { %v11211_v29 = vpop.eup %11210  ;;  %v4860_v60 = vmul.f32 %v4764_v36, %v4476_v8  ;;  %v4772_v48 = vadd.f32 1.0, %v11209_v57  ;;  %v13819_v27 = vadd.f32 %v4150_v15, %v13757_v41  ;;  %v4152_v43 = vpop.f32.mrb[38].mxu0 }
 0x436   : > { %4390 = vmatpush1.bf16.msra.mxu1 %v9498_v37  ;;  %v4861_v0 = vmul.f32 %v4765_v16, %v4477_v1  ;;  %v4773_v20 = vadd.f32 1.0, %v11211_v29  ;;  %v4604_v53 = vmul.f32 0.70710677, %v13816_v9  ;;  %v4154_v12 = vpop.f32.mrb[39].mxu0  ;;  %v13824_v24 = vadd.f32 %v4152_v43, %v13750_v40  ;;  %v11403_v43 = vld [vmem:[#allocation2 + $0x58] sm:$0xff] }
 0x437   : > { %4391 = vmatprep.subr.bf16.mxu1 %v9507_v33  ;;  %v4868_v6 = vmul.f32 %v4772_v48, %v4484_v10  ;;  %v4605_v3 = vmul.f32 0.70710677, %v13819_v27  ;;  %v13828_v37 = vadd.f32 %v4154_v12, %v13757_v41  ;;  %v10644_v48 = vld [vmem:[%s12027_s10 + $0x38] ss:$24 sps:$4 sm:$0xff]   ;;  %v10652_v12 = vld [vmem:[%s12027_s10 + $0x6c] ss:$24 sps:$4 sm:$0xff]  }
 0x438   : > { %v4869_v22 = vmul.f32 %v4773_v20, %v4485_v55  ;;  %11220 = verf.f32 %v4604_v53  ;;  %v4612_v34 = vmul.f32 0.70710677, %v13824_v24  ;;  %v11402_v55 = vld [vmem:[#allocation2 + $0x20] sm:$0xff] }
 0x439   : > { %11222 = verf.f32 %v4605_v3  ;;  %v13831_v32 = vpack.c.bf16 %v4868_v6, %v4860_v60  ;;  %v4613_v26 = vmul.f32 0.70710677, %v13828_v37 }
 0x43a   : > { %4392 = vmatpush1.bf16.msra.mxu1 %v9506_v13  ;;  %v11213_v33 = vpop.eup %11212  ;;  %v13835_v25 = vpack.c.bf16 %v4869_v22, %v4861_v0  ;;  %v4493_v13 = vmul.f32 0.5, %v13793_v19  ;;  %11224 = verf.f32 %v4612_v34  ;;  %v4508_v34 = vmul.f32 0.5, %v13816_v9 }
 0x43b   : > { %4393 = vmatprep.subr.bf16.mxu1 %v9515_v44  ;;  %15424 = vst [vmem:[#allocation64_spill] sm:$0xff] %v13831_v32  ;;  %v11215_v8 = vpop.eup %11214  ;;  %v4780_v2 = vadd.f32 1.0, %v11213_v33  ;;  %v4158_v1 = vpop.f32.mrb[40].mxu0  ;;  %v4500_v44 = vmul.f32 0.5, %v13798_v7  ;;  %11226 = verf.f32 %v4613_v26 }
 0x43c   : > { %v4781_v47 = vadd.f32 1.0, %v11215_v8  ;;  %v13842_v42 = vadd.f32 %v4158_v1, %v13750_v40  ;;  %v4160_v36 = vpop.f32.mrb[41].mxu0  ;;  %v11217_v10 = vpop.eup %11216  ;;  %v10650_v8 = vld [vmem:[%s12027_s10 + $0x68] ss:$24 sps:$4 sm:$0xff]  }
 0x43d   : > { %v13846_v57 = vadd.f32 %v4160_v36, %v13757_v41  ;;  %v4162_v19 = vpop.f32.mrb[42].mxu0  ;;  %v11219_v16 = vpop.eup %11218  ;;  %v4876_v15 = vmul.f32 %v4780_v2, %v4492_v59  ;;  %v4788_v29 = vadd.f32 1.0, %v11217_v10  ;;  %v4509_v2 = vmul.f32 0.5, %v13819_v27 }
 0x43e   : > { %4394 = vmatpush1.bf16.msra.mxu1 %v9514_v63  ;;  %v4620_v7 = vmul.f32 0.70710677, %v13842_v42  ;;  %v4164_v60 = vpop.f32.mrb[43].mxu0  ;;  %v4877_v0 = vmul.f32 %v4781_v47, %v4493_v13  ;;  %v4789_v20 = vadd.f32 1.0, %v11219_v16  ;;  %v13852_v53 = vadd.f32 %v4162_v19, %v13750_v40 }
 0x43f   : > { %7660 = vmatprep.subr.bf16.mxu1 %v10640_v46  ;;  %v4621_v56 = vmul.f32 0.70710677, %v13846_v57  ;;  %v4884_v63 = vmul.f32 %v4788_v29, %v4500_v44  ;;  %v13856_v6 = vadd.f32 %v4164_v60, %v13757_v41  ;;  %v4516_v44 = vmul.f32 0.5, %v13824_v24  ;;  %v10656_v60 = vld [vmem:[%s12027_s10 + $0x98] ss:$24 sps:$4 sm:$0xff]  }
 0x440   : > { %11228 = verf.f32 %v4620_v7  ;;  %v4885_v3 = vmul.f32 %v4789_v20, %v4501_v21  ;;  %v4628_v46 = vmul.f32 0.70710677, %v13852_v53  ;;  %v4517_v21 = vmul.f32 0.5, %v13828_v37 }
 0x441   : > { %4396 = vmatmul.mubr.bf16.vlgmr.msra.gmra.mrb[48].mxu1 %v11402_v55  ;;  %11230 = verf.f32 %v4621_v56  ;;  %v4629_v33 = vmul.f32 0.70710677, %v13856_v6  ;;  %v13861_v59 = vpack.c.bf16 %v4884_v63, %v4876_v15  ;;  %v11404_v55 = vld [vmem:[#allocation2 + $0x50] sm:$0xff] }
 0x442   : > { %7661 = vmatpush1.bf16.msra.mxu1 %v10638_v50  ;;  %4405 = vmatprep.mubr.bf16.mxu1 %v11403_v43  ;;  %v11221_v22 = vpop.eup %11220  ;;  %11232 = verf.f32 %v4628_v46  ;;  %v13865_v1 = vpack.c.bf16 %v4885_v3, %v4877_v0  ;;  %v10664_v56 = vld [vmem:[%s12027_s10 + $0xcc] ss:$24 sps:$4 sm:$0xff]   ;;  %v15250_v3 = vsub.s32 2, %v13326_v45 }
 0x443   : > { %7662 = vmatprep.subr.bf16.mxu1 %v10646_v49  ;;  %15425 = vst [vmem:[#allocation65_spill] sm:$0xff] %v13861_v59  ;;  %v11223_v26 = vpop.eup %11222  ;;  %v4796_v50 = vadd.f32 1.0, %v11221_v22  ;;  %v4168_v13 = vpop.f32.mrb[44].mxu0  ;;  %v10658_v49 = vld [vmem:[%s12027_s10 + $0x9c] ss:$24 sps:$4 sm:$0xff]   ;;  %11234 = verf.f32 %v4629_v33  ;;  %v15249_v33 = vsub.s32 3, %v13326_v45 }
 0x444   : > { %15426 = vst [vmem:[#allocation66_spill] sm:$0xff] %v13865_v1  ;;  %v4797_v47 = vadd.f32 1.0, %v11223_v26  ;;  %v13870_v9 = vadd.f32 %v4168_v13, %v13750_v40  ;;  %v4170_v36 = vpop.f32.mrb[45].mxu0  ;;  %v11225_v10 = vpop.eup %11224  ;;  %v4525_v13 = vmul.f32 0.5, %v13846_v57  ;;  %v13903_v57 = vrot.slane %v13745_v38, %v15250_v3  ;;  %v10727_v3 = vld [vmem:[%s12027_s10 + $0x6c4] ss:$24 sps:$4 sm:$0xff]  }
 0x445   : > { %v13874_v27 = vadd.f32 %v4170_v36, %v13757_v41  ;;  %v4172_v19 = vpop.f32.mrb[46].mxu0  ;;  %v11227_v16 = vpop.eup %11226  ;;  %v4892_v15 = vmul.f32 %v4796_v50, %v4508_v34  ;;  %v4804_v29 = vadd.f32 1.0, %v11225_v10  ;;  %v4532_v36 = vmul.f32 0.5, %v13852_v53 }
 0x446   : > { %7663 = vmatpush1.bf16.msra.mxu1 %v10644_v48  ;;  %v4636_v24 = vmul.f32 0.70710677, %v13870_v9  ;;  %v4174_v7 = vpop.f32.mrb[47].mxu0  ;;  %v11405_v48 = vld [vmem:[#allocation2 + $0x88] sm:$0xff]  ;;  %v4893_v43 = vmul.f32 %v4797_v47, %v4509_v2  ;;  %v4805_v0 = vadd.f32 1.0, %v11227_v16  ;;  %v13880_v20 = vadd.f32 %v4172_v19, %v13750_v40  ;;  %v11406_v19 = vld [vmem:[#allocation2 + $0x80] sm:$0xff] }
 0x447   : > { %7664 = vmatprep.subr.bf16.mxu1 %v10652_v12  ;;  %v4637_v37 = vmul.f32 0.70710677, %v13874_v27  ;;  %v4900_v12 = vmul.f32 %v4804_v29, %v4516_v44  ;;  %v13884_v63 = vadd.f32 %v4174_v7, %v13757_v41  ;;  %v4524_v40 = vmul.f32 0.5, %v13842_v42  ;;  %v10662_v41 = vld [vmem:[%s12027_s10 + $0xc8] ss:$24 sps:$4 sm:$0xff]  }
 0x448   : > { %11236 = verf.f32 %v4636_v24  ;;  %v4901_v46 = vmul.f32 %v4805_v0, %v4517_v21  ;;  %v4644_v22 = vmul.f32 0.70710677, %v13880_v20  ;;  %v10670_v47 = vld [vmem:[%s12027_s10 + $0xfc] ss:$24 sps:$4 sm:$0xff]   ;;  %v4533_v10 = vmul.f32 0.5, %v13856_v6  ;;  %v11407_v29 = vld [vmem:[#allocation2 + $0xb8] sm:$0xff] }
 0x449   : > { %4406 = vmatmul.mubr.bf16.gmra.mrb[52].mxu1 %v11404_v55  ;;  %11238 = verf.f32 %v4637_v37  ;;  %v4645_v26 = vmul.f32 0.70710677, %v13884_v63  ;;  %v13908_v53 = vrot.slane %v13745_v38, %v15249_v33  ;;  %v10676_v7 = vld [vmem:[%s12027_s10 + $0x12c] ss:$24 sps:$4 sm:$0xff]  }
 0x44a   : > { %7665 = vmatpush1.bf16.msra.mxu1 %v10650_v8  ;;  %4415 = vmatprep.mubr.bf16.mxu1 %v11405_v48  ;;  %v11229_v34 = vpop.eup %11228  ;;  %v13891_v8 = vpack.c.bf16 %v4900_v12, %v4892_v15  ;;  %11240 = verf.f32 %v4644_v22  ;;  %v10668_v15 = vld [vmem:[%s12027_s10 + $0xf8] ss:$24 sps:$4 sm:$0xff]   ;;  %v10674_v12 = vld [vmem:[%s12027_s10 + $0x128] ss:$24 sps:$4 sm:$0xff]  }
 0x44b   : > { %7666 = vmatprep.subr.bf16.mxu1 %v10658_v49  ;;  %v11231_v50 = vpop.eup %11230  ;;  %v4812_v2 = vadd.f32 1.0, %v11229_v34  ;;  %v13895_v49 = vpack.c.bf16 %v4901_v46, %v4893_v43  ;;  %11242 = verf.f32 %v4645_v26  ;;  %v4540_v26 = vmul.f32 0.5, %v13870_v9 }
 0x44c   : > { %15427 = vst [vmem:[#allocation67_spill] sm:$0xff] %v13891_v8  ;;  %v4813_v44 = vadd.f32 1.0, %v11231_v50  ;;  %v11233_v42 = vpop.eup %11232  ;;  %v4548_v9 = vmul.f32 0.5, %v13880_v20  ;;  %v10688_v20 = vld [vmem:[%s12027_s10 + $0x18c] ss:$24 sps:$4 sm:$0xff]  }
 0x44d   : > { %15428 = vst [vmem:[#allocation68_spill] sm:$0xff] %v13895_v49  ;;  %v11235_v21 = vpop.eup %11234  ;;  %v4908_v16 = vmul.f32 %v4812_v2, %v4524_v40  ;;  %v4820_v55 = vadd.f32 1.0, %v11233_v42  ;;  %v10682_v40 = vld [vmem:[%s12027_s10 + $0x15c] ss:$24 sps:$4 sm:$0xff]  }
 0x44e   : > { %7667 = vmatpush1.bf16.msra.mxu1 %v10656_v60  ;;  %v4909_v6 = vmul.f32 %v4813_v44, %v4525_v13  ;;  %v4821_v24 = vadd.f32 1.0, %v11235_v21  ;;  %v4541_v44 = vmul.f32 0.5, %v13874_v27 }
 0x44f   : > { %7668 = vmatprep.subr.bf16.mxu1 %v10664_v56  ;;  %v4916_v60 = vmul.f32 %v4820_v55, %v4532_v36  ;;  %v11408_v55 = vld [vmem:[#allocation2 + $0xb0] sm:$0xff] }
 0x450   : > { %v4917_v43 = vmul.f32 %v4821_v24, %v4533_v10 }
 0x451   : > { %4416 = vmatmul.mubr.bf16.gmra.mrb[56].mxu1 %v11406_v19  ;;  %v13916_v46 = vpack.c.bf16 %v4916_v60, %v4908_v16 }
 0x452   : > { %7669 = vmatpush1.bf16.msra.mxu1 %v10662_v41  ;;  %4425 = vmatprep.mubr.bf16.mxu1 %v11407_v29  ;;  %v11237_v0 = vpop.eup %11236  ;;  %v13923_v41 = vpack.c.bf16 %v4917_v43, %v4909_v6  ;;  %v10680_v29 = vld [vmem:[%s12027_s10 + $0x158] ss:$24 sps:$4 sm:$0xff]  }
 0x453   : > { %7670 = vmatprep.subr.bf16.mxu1 %v10670_v47  ;;  %15429 = vst [vmem:[#allocation69_spill] sm:$0xff] %v13916_v46  ;;  %v11239_v38 = vpop.eup %11238  ;;  %v4828_v50 = vadd.f32 1.0, %v11237_v0  ;;  %v11409_v6 = vld [vmem:[#allocation2 + $0xe8] sm:$0xff] }
 0x454   : > { %v3839_v48 = vpop.f32.mrb[24].mxu1  ;;  %15430 = vst [vmem:[#allocation70_spill] sm:$0xff] %v13923_v41  ;;  %v4829_v36 = vadd.f32 1.0, %v11239_v38  ;;  %v11241_v42 = vpop.eup %11240 }
 0x455   : > { %v13913_v37 = vadd.f32 %v3839_v48, %v13903_v57  ;;  %v3841_v56 = vpop.f32.mrb[25].mxu1  ;;  %v11243_v19 = vpop.eup %11242  ;;  %v4924_v24 = vmul.f32 %v4828_v50, %v4540_v26  ;;  %v10686_v26 = vld [vmem:[%s12027_s10 + $0x188] ss:$24 sps:$4 sm:$0xff]  }
 0x456   : > { %v13919_v22 = vadd.f32 %v3841_v56, %v13908_v53  ;;  %v3843_v34 = vpop.f32.mrb[26].mxu1  ;;  %7671 = vmatpush1.bf16.msra.mxu1 %v10668_v15  ;;  %v4549_v15 = vmul.f32 0.5, %v13884_v63  ;;  %v4925_v60 = vmul.f32 %v4829_v36, %v4541_v44  ;;  %v4837_v48 = vadd.f32 1.0, %v11243_v19  ;;  %v10694_v44 = vld [vmem:[%s12027_s10 + $0x1bc] ss:$24 sps:$4 sm:$0xff]  }
 0x457   : > { %v4554_v2 = vmul.f32 0.70710677, %v13913_v37  ;;  %v13927_v13 = vadd.f32 %v3843_v34, %v13903_v57  ;;  %v3845_v47 = vpop.f32.mrb[27].mxu1  ;;  %7672 = vmatprep.subr.bf16.mxu1 %v10676_v7  ;;  %v4836_v7 = vadd.f32 1.0, %v11241_v42  ;;  %v11410_v19 = vld [vmem:[#allocation2 + $0xe0] sm:$0xff] }
 0x458   : > { %v4555_v10 = vmul.f32 0.70710677, %v13919_v22  ;;  %v13932_v21 = vadd.f32 %v3845_v47, %v13908_v53 }
 0x459   : > { %11244 = verf.f32 %v4554_v2  ;;  %v4562_v16 = vmul.f32 0.70710677, %v13927_v13  ;;  %4426 = vmatmul.mubr.bf16.gmra.mrb[60].mxu1 %v11408_v55  ;;  %v4932_v0 = vmul.f32 %v4836_v7, %v4548_v9  ;;  %v10692_v55 = vld [vmem:[%s12027_s10 + $0x1b8] ss:$24 sps:$4 sm:$0xff]  }
 0x45a   : > { %11246 = verf.f32 %v4555_v10  ;;  %v4563_v27 = vmul.f32 0.70710677, %v13932_v21  ;;  %7673 = vmatpush1.bf16.msra.mxu1 %v10674_v12  ;;  %4435 = vmatprep.mubr.bf16.mxu1 %v11409_v6  ;;  %v4933_v12 = vmul.f32 %v4837_v48, %v4549_v15  ;;  %v11411_v15 = vld [vmem:[#allocation2 + $0x118] sm:$0xff] }
 0x45b   : > { %11248 = verf.f32 %v4562_v16  ;;  %7674 = vmatprep.subr.bf16.mxu1 %v10682_v40  ;;  %v13947_v50 = vpack.c.bf16 %v4932_v0, %v4924_v24  ;;  %v10698_v0 = vld [vmem:[%s12027_s10 + $0x1e8] ss:$24 sps:$4 sm:$0xff]  }
 0x45c   : > { %11250 = verf.f32 %v4563_v27  ;;  %v3849_v43 = vpop.f32.mrb[28].mxu1  ;;  %v13954_v36 = vpack.c.bf16 %v4933_v12, %v4925_v60  ;;  %v4458_v12 = vmul.f32 0.5, %v13913_v37 }
 0x45d   : > { %v13941_v63 = vadd.f32 %v3849_v43, %v13903_v57  ;;  %v3851_v56 = vpop.f32.mrb[29].mxu1  ;;  %15431 = vst [vmem:[#allocation71_spill] sm:$0xff] %v13947_v50 }
 0x45e   : > { %v13944_v38 = vadd.f32 %v3851_v56, %v13908_v53  ;;  %v3853_v34 = vpop.f32.mrb[30].mxu1  ;;  %7675 = vmatpush1.bf16.msra.mxu1 %v10680_v29  ;;  %15432 = vst [vmem:[#allocation72_spill] sm:$0xff] %v13954_v36  ;;  %v10700_v29 = vld [vmem:[%s12027_s10 + $0x1ec] ss:$24 sps:$4 sm:$0xff]  }
 0x45f   : > { %v4570_v40 = vmul.f32 0.70710677, %v13941_v63  ;;  %v13951_v2 = vadd.f32 %v3853_v34, %v13903_v57  ;;  %v3855_v47 = vpop.f32.mrb[31].mxu1  ;;  %7676 = vmatprep.subr.bf16.mxu1 %v10688_v20  ;;  %v4466_v34 = vmul.f32 0.5, %v13927_v13 }
 0x460   : > { %v4571_v42 = vmul.f32 0.70710677, %v13944_v38  ;;  %v13958_v10 = vadd.f32 %v3855_v47, %v13908_v53 }
 0x461   : > { %11252 = verf.f32 %v4570_v40  ;;  %v4578_v9 = vmul.f32 0.70710677, %v13951_v2  ;;  %4436 = vmatmul.mubr.bf16.gmra.mrb[64].mxu1 %v11410_v19 }
 0x462   : > { %11254 = verf.f32 %v4571_v42  ;;  %v4579_v16 = vmul.f32 0.70710677, %v13958_v10  ;;  %7677 = vmatpush1.bf16.msra.mxu1 %v10686_v26  ;;  %4445 = vmatprep.mubr.bf16.mxu1 %v11411_v15  ;;  %v4459_v42 = vmul.f32 0.5, %v13919_v22 }
 0x463   : > { %v11245_v27 = vpop.eup %11244  ;;  %11256 = verf.f32 %v4578_v9  ;;  %7678 = vmatprep.subr.bf16.mxu1 %v10694_v44  ;;  %v10706_v44 = vld [vmem:[%s12027_s10 + $0x21c] ss:$24 sps:$4 sm:$0xff]   ;;  %v4467_v9 = vmul.f32 0.5, %v13932_v21  ;;  %v11412_v21 = vld [vmem:[#allocation2 + $0x110] sm:$0xff] }
 0x464   : > { %v11247_v6 = vpop.eup %11246  ;;  %v4746_v24 = vadd.f32 1.0, %v11245_v27  ;;  %11258 = verf.f32 %v4579_v16  ;;  %v3859_v7 = vpop.f32.mrb[32].mxu1 }
 0x465   : > { %v11249_v20 = vpop.eup %11248  ;;  %v4747_v60 = vadd.f32 1.0, %v11247_v6  ;;  %v13965_v48 = vadd.f32 %v3859_v7, %v13903_v57  ;;  %v3861_v43 = vpop.f32.mrb[33].mxu1 }
 0x466   : > { %v11251_v56 = vpop.eup %11250  ;;  %v4754_v26 = vadd.f32 1.0, %v11249_v20  ;;  %v13971_v40 = vadd.f32 %v3861_v43, %v13908_v53  ;;  %v3863_v47 = vpop.f32.mrb[34].mxu1  ;;  %7679 = vmatpush1.bf16.msra.mxu1 %v10692_v55  ;;  %v4842_v37 = vmul.f32 %v4746_v24, %v4458_v12  ;;  %v10704_v24 = vld [vmem:[%s12027_s10 + $0x218] ss:$24 sps:$4 sm:$0xff]  }
 0x467   : > { %v4755_v19 = vadd.f32 1.0, %v11251_v56  ;;  %v4586_v16 = vmul.f32 0.70710677, %v13965_v48  ;;  %v3865_v15 = vpop.f32.mrb[35].mxu1  ;;  %7680 = vmatprep.subr.bf16.mxu1 %v10700_v29  ;;  %v13979_v6 = vadd.f32 %v3863_v47, %v13903_v57  ;;  %v4843_v55 = vmul.f32 %v4747_v60, %v4459_v42  ;;  %v10701_v12 = vld [vmem:[%s12027_s10 + $0x600] ss:$24 sps:$4 sm:$0xff]  }
 0x468   : > { %v4850_v27 = vmul.f32 %v4754_v26, %v4466_v34  ;;  %v4587_v13 = vmul.f32 0.70710677, %v13971_v40  ;;  %v13982_v22 = vadd.f32 %v3865_v15, %v13908_v53  ;;  %v10712_v34 = vld [vmem:[%s12027_s10 + $0x24c] ss:$24 sps:$4 sm:$0xff]  }
 0x469   : > { %v4851_v7 = vmul.f32 %v4755_v19, %v4467_v9  ;;  %11260 = verf.f32 %v4586_v16  ;;  %4446 = vmatmul.mubr.bf16.gmra.mrb[68].mxu1 %v11412_v21  ;;  %v4594_v29 = vmul.f32 0.70710677, %v13979_v6  ;;  %v10709_v9 = vld [vmem:[%s12027_s10 + $0x634] ss:$24 sps:$4 sm:$0xff]  }
 0x46a   : > { %v13984_v20 = vpack.c.bf16 %v4850_v27, %v4842_v37  ;;  %11262 = verf.f32 %v4587_v13  ;;  %7681 = vmatpush1.bf16.msra.mxu1 %v10698_v0  ;;  %7692 = vmatprep.mubr.bf16.mxu1 %v13478_v28  ;;  %v4595_v60 = vmul.f32 0.70710677, %v13982_v22  ;;  %v10707_v37 = vld [vmem:[%s12027_s10 + $0x630] ss:$24 sps:$4 sm:$0xff]  }
 0x46b   : > { %v11253_v43 = vpop.eup %11252  ;;  %v13990_v56 = vpack.c.bf16 %v4851_v7, %v4843_v55  ;;  %7682 = vmatprep.subr.bf16.mxu1 %v10706_v44  ;;  %11264 = verf.f32 %v4594_v29  ;;  %v10710_v27 = vld [vmem:[%s12027_s10 + $0x248] ss:$24 sps:$4 sm:$0xff]   ;;  %v4474_v44 = vmul.f32 0.5, %v13941_v63  ;;  %v4482_v55 = vmul.f32 0.5, %v13951_v2 }
 0x46c   : > { %v11255_v26 = vpop.eup %11254  ;;  %v4762_v47 = vadd.f32 1.0, %v11253_v43  ;;  %v3869_v42 = vpop.f32.mrb[36].mxu1  ;;  %11266 = verf.f32 %v4595_v60  ;;  %v10718_v43 = vld [vmem:[%s12027_s10 + $0x27c] ss:$24 sps:$4 sm:$0xff]   ;;  %v4475_v60 = vmul.f32 0.5, %v13944_v38 }
 0x46d   : > { %v11257_v19 = vpop.eup %11256  ;;  %v4763_v0 = vadd.f32 1.0, %v11255_v26  ;;  %v13996_v16 = vadd.f32 %v3869_v42, %v13903_v57  ;;  %v3871_v15 = vpop.f32.mrb[37].mxu1  ;;  %7413 = vmatprep.mubr.bf16.mxu0 %v13990_v56  ;;  %v4483_v26 = vmul.f32 0.5, %v13958_v10 }
 0x46e   : > { %v11259_v13 = vpop.eup %11258  ;;  %v4770_v7 = vadd.f32 1.0, %v11257_v19  ;;  %v14004_v21 = vadd.f32 %v3871_v15, %v13908_v53  ;;  %v3873_v29 = vpop.f32.mrb[38].mxu1  ;;  %7414 = vmatmul.mubr.bf16.vlgmr.msra.gmra.mrb[48].mxu0 %v13984_v20  ;;  %7683 = vmatpush1.bf16.msra.mxu1 %v10704_v24  ;;  %v4858_v2 = vmul.f32 %v4762_v47, %v4474_v44  ;;  %v10715_v24 = vld [vmem:[%s12027_s10 + $0x664] ss:$24 sps:$4 sm:$0xff]  }
 0x46f   : > { %v4771_v42 = vadd.f32 1.0, %v11259_v13  ;;  %v4602_v11 = vmul.f32 0.70710677, %v13996_v16  ;;  %7475 = vmatpush1.bf16.msra.mxu0 %v10701_v12  ;;  %v3875_v63 = vpop.f32.mrb[39].mxu1  ;;  %7684 = vmatprep.subr.bf16.mxu1 %v10712_v34  ;;  %v14013_v31 = vadd.f32 %v3873_v29, %v13903_v57  ;;  %v4859_v38 = vmul.f32 %v4763_v0, %v4475_v60  ;;  %v10716_v34 = vld [vmem:[%s12027_s10 + $0x278] ss:$24 sps:$4 sm:$0xff]  }
 0x470   : > { %v4866_v19 = vmul.f32 %v4770_v7, %v4482_v55  ;;  %v4603_v15 = vmul.f32 0.70710677, %v14004_v21  ;;  %7476 = vmatprep.subr.bf16.mxu0 %v10709_v9  ;;  %v14017_v13 = vadd.f32 %v3875_v63, %v13908_v53  ;;  %v10724_v0 = vld [vmem:[%s12027_s10 + $0x2ac] ss:$24 sps:$4 sm:$0xff]   ;;  %v10722_v63 = vld [vmem:[%s12027_s10 + $0x2a8] ss:$24 sps:$4 sm:$0xff]  }
 0x471   : > { %v4867_v10 = vmul.f32 %v4771_v42, %v4483_v26  ;;  %11268 = verf.f32 %v4602_v11  ;;  %v4610_v12 = vmul.f32 0.70710677, %v14013_v31  ;;  %v10713_v11 = vld [vmem:[%s12027_s10 + $0x660] ss:$24 sps:$4 sm:$0xff]  }
 0x472   : > { %11270 = verf.f32 %v4603_v15  ;;  %7685 = vmatpush1.bf16.msra.mxu1 %v10710_v27  ;;  %v14021_v47 = vpack.c.bf16 %v4866_v19, %v4858_v2  ;;  %v4611_v55 = vmul.f32 0.70710677, %v14017_v13  ;;  %v10721_v27 = vld [vmem:[%s12027_s10 + $0x694] ss:$24 sps:$4 sm:$0xff]  }
 0x473   : > { %v11261_v44 = vpop.eup %11260  ;;  %7477 = vmatpush1.bf16.msra.mxu0 %v10707_v37  ;;  %v14024_v9 = vpack.c.bf16 %v4867_v10, %v4859_v38  ;;  %7686 = vmatprep.subr.bf16.mxu1 %v10718_v43  ;;  %11272 = verf.f32 %v4610_v12  ;;  %v10719_v37 = vld [vmem:[%s12027_s10 + $0x690] ss:$24 sps:$4 sm:$0xff]   ;;  %v4490_v43 = vmul.f32 0.5, %v13965_v48  ;;  %v10730_v38 = vld [vmem:[%s12027_s10 + $0x2dc] ss:$24 sps:$4 sm:$0xff]   ;;  %v4491_v12 = vmul.f32 0.5, %v13971_v40 }
 0x474   : > { %v11263_v7 = vpop.eup %11262  ;;  %v3879_v29 = vpop.f32.mrb[40].mxu1  ;;  %7478 = vmatprep.subr.bf16.mxu0 %v10715_v24  ;;  %v4778_v60 = vadd.f32 1.0, %v11261_v44  ;;  %11274 = verf.f32 %v4611_v55  ;;  %v4498_v44 = vmul.f32 0.5, %v13979_v6 }
 0x475   : > { %v14030_v26 = vadd.f32 %v3879_v29, %v13903_v57  ;;  %v3881_v42 = vpop.f32.mrb[41].mxu1  ;;  %7423 = vmatprep.mubr.bf16.mxu0 %v14024_v9  ;;  %v11265_v2 = vpop.eup %11264  ;;  %v4779_v19 = vadd.f32 1.0, %v11263_v7  ;;  %v4499_v7 = vmul.f32 0.5, %v13982_v22 }
 0x476   : > { %v14037_v15 = vadd.f32 %v3881_v42, %v13908_v53  ;;  %v3883_v24 = vpop.f32.mrb[42].mxu1  ;;  %7424 = vmatmul.mubr.bf16.gmra.mrb[52].mxu0 %v14021_v47  ;;  %7687 = vmatpush1.bf16.msra.mxu1 %v10716_v34  ;;  %v11267_v10 = vpop.eup %11266  ;;  %v4786_v55 = vadd.f32 1.0, %v11265_v2  ;;  %v4874_v40 = vmul.f32 %v4778_v60, %v4490_v43  ;;  %v10736_v43 = vld [vmem:[%s12027_s10 + $0x30c] ss:$24 sps:$4 sm:$0xff]  }
 0x477   : > { %v4618_v29 = vmul.f32 0.70710677, %v14030_v26  ;;  %7479 = vmatpush1.bf16.msra.mxu0 %v10713_v11  ;;  %v3885_v48 = vpop.f32.mrb[43].mxu1  ;;  %7688 = vmatprep.subr.bf16.mxu1 %v10724_v0  ;;  %v4787_v42 = vadd.f32 1.0, %v11267_v10  ;;  %v14047_v34 = vadd.f32 %v3883_v24, %v13903_v57  ;;  %v4875_v11 = vmul.f32 %v4779_v19, %v4491_v12  ;;  %v10728_v10 = vld [vmem:[%s12027_s10 + $0x2d8] ss:$24 sps:$4 sm:$0xff]  }
 0x478   : > { %v4619_v33 = vmul.f32 0.70710677, %v14037_v15  ;;  %7480 = vmatprep.subr.bf16.mxu0 %v10721_v27  ;;  %v4882_v6 = vmul.f32 %v4786_v55, %v4498_v44  ;;  %v14051_v2 = vadd.f32 %v3885_v48, %v13908_v53  ;;  %v4506_v48 = vmul.f32 0.5, %v13996_v16 }
 0x479   : > { %11276 = verf.f32 %v4618_v29  ;;  %v4883_v0 = vmul.f32 %v4787_v42, %v4499_v7  ;;  %v4626_v22 = vmul.f32 0.70710677, %v14047_v34  ;;  %v10733_v29 = vld [vmem:[%s12027_s10 + $0x6f4] ss:$24 sps:$4 sm:$0xff]  }
 0x47a   : > { %11278 = verf.f32 %v4619_v33  ;;  %7689 = vmatpush1.bf16.msra.mxu1 %v10722_v63  ;;  %v4627_v27 = vmul.f32 0.70710677, %v14051_v2  ;;  %v14056_v60 = vpack.c.bf16 %v4882_v6, %v4874_v40  ;;  %v10725_v33 = vld [vmem:[%s12027_s10 + $0x6c0] ss:$24 sps:$4 sm:$0xff]   ;;  %v4507_v6 = vmul.f32 0.5, %v14004_v21 }
 0x47b   : > { %v11269_v51 = vpop.eup %11268  ;;  %7481 = vmatpush1.bf16.msra.mxu0 %v10719_v37  ;;  %7690 = vmatprep.subr.bf16.mxu1 %v10730_v38  ;;  %11280 = verf.f32 %v4626_v22  ;;  %v14059_v12 = vpack.c.bf16 %v4883_v0, %v4875_v11  ;;  %v10734_v37 = vld [vmem:[%s12027_s10 + $0x308] ss:$24 sps:$4 sm:$0xff]   ;;  %v4514_v11 = vmul.f32 0.5, %v14013_v31 }
 0x47c   : > { %v11271_v24 = vpop.eup %11270  ;;  %v3889_v19 = vpop.f32.mrb[44].mxu1  ;;  %7482 = vmatprep.subr.bf16.mxu0 %v10727_v3  ;;  %v4794_v63 = vadd.f32 1.0, %v11269_v51  ;;  %11282 = verf.f32 %v4627_v27  ;;  %v10742_v51 = vld [vmem:[%s12027_s10 + $0x33c] ss:$24 sps:$4 sm:$0xff]   ;;  %v4515_v27 = vmul.f32 0.5, %v14017_v13 }
 0x47d   : > { %v14063_v44 = vadd.f32 %v3889_v19, %v13903_v57  ;;  %v3891_v55 = vpop.f32.mrb[45].mxu1  ;;  %v11273_v38 = vpop.eup %11272  ;;  %v4795_v7 = vadd.f32 1.0, %v11271_v24  ;;  %7433 = vmatprep.mubr.bf16.mxu0 %v14059_v12  ;;  %v10731_v21 = vld [vmem:[%s12027_s10 + $0x6f0] ss:$24 sps:$4 sm:$0xff]   ;;  %v10739_v13 = vld [vmem:[%s12027_s10 + $0x724] ss:$24 sps:$4 sm:$0xff]  }
 0x47e   : > { %v14069_v42 = vadd.f32 %v3891_v55, %v13908_v53  ;;  %v3893_v40 = vpop.f32.mrb[46].mxu1  ;;  %7691 = vmatpush1.bf16.msra.mxu1 %v10728_v10  ;;  %v11275_v3 = vpop.eup %11274  ;;  %v4802_v0 = vadd.f32 1.0, %v11273_v38  ;;  %7434 = vmatmul.mubr.bf16.gmra.mrb[56].mxu0 %v14056_v60  ;;  %v4890_v31 = vmul.f32 %v4794_v63, %v4506_v48 }
 0x47f   : > { %v4634_v22 = vmul.f32 0.70710677, %v14063_v44  ;;  %v3895_v16 = vpop.f32.mrb[47].mxu1  ;;  %7753 = vmatprep.subr.bf16.mxu1 %v10736_v43  ;;  %v4803_v24 = vadd.f32 1.0, %v11275_v3  ;;  %v14080_v10 = vadd.f32 %v3893_v40, %v13903_v57  ;;  %7483 = vmatpush1.bf16.msra.mxu0 %v10725_v33  ;;  %v4891_v43 = vmul.f32 %v4795_v7, %v4507_v6  ;;  %v10740_v33 = vld [vmem:[%s12027_s10 + $0x338] ss:$24 sps:$4 sm:$0xff]  }
 0x480   : > { %v4635_v19 = vmul.f32 0.70710677, %v14069_v42  ;;  %v4898_v55 = vmul.f32 %v4802_v0, %v4514_v11  ;;  %v14084_v38 = vadd.f32 %v3895_v16, %v13908_v53  ;;  %7484 = vmatprep.subr.bf16.mxu0 %v10733_v29  ;;  %v10748_v29 = vld [vmem:[%s12027_s10 + $0x36c] ss:$24 sps:$4 sm:$0xff]   ;;  %v10737_v6 = vld [vmem:[%s12027_s10 + $0x720] ss:$24 sps:$4 sm:$0xff]  }
 0x481   : > { %11284 = verf.f32 %v4634_v22  ;;  %7693 = vmatmul.mubr.bf16.vlgmr.msra.gmra.mrb[72].mxu1 %v13470_v14  ;;  %v4899_v3 = vmul.f32 %v4803_v24, %v4515_v27  ;;  %v4642_v57 = vmul.f32 0.70710677, %v14080_v10  ;;  %v4522_v27 = vmul.f32 0.5, %v14030_v26  ;;  %v10751_v26 = vld [vmem:[%s12027_s10 + $0x784] ss:$24 sps:$4 sm:$0xff]  }
 0x482   : > { %11286 = verf.f32 %v4635_v19  ;;  %7702 = vmatprep.mubr.bf16.mxu1 %v13539_v17  ;;  %7754 = vmatpush1.bf16.msra.mxu1 %v10734_v37  ;;  %v4643_v48 = vmul.f32 0.70710677, %v14084_v38  ;;  %v14092_v53 = vpack.c.bf16 %v4898_v55, %v4890_v31  ;;  %v10745_v37 = vld [vmem:[%s12027_s10 + $0x754] ss:$24 sps:$4 sm:$0xff]   ;;  %v4530_v24 = vmul.f32 0.5, %v14047_v34 }
 0x483   : > { %v11277_v63 = vpop.eup %11276  ;;  %7755 = vmatprep.subr.bf16.mxu1 %v10742_v51  ;;  %11288 = verf.f32 %v4642_v57  ;;  %7485 = vmatpush1.bf16.msra.mxu0 %v10731_v21  ;;  %v14095_v7 = vpack.c.bf16 %v4899_v3, %v4891_v43  ;;  %v10746_v51 = vld [vmem:[%s12027_s10 + $0x368] ss:$24 sps:$4 sm:$0xff]   ;;  %v10754_v21 = vld [vmem:[%s12027_s10 + $0x39c] ss:$24 sps:$4 sm:$0xff]   ;;  %v4523_v31 = vmul.f32 0.5, %v14037_v15  ;;  %v4531_v55 = vmul.f32 0.5, %v14051_v2 }
 0x484   : > { %v11279_v40 = vpop.eup %11278  ;;  %v4810_v11 = vadd.f32 1.0, %v11277_v63  ;;  %11290 = verf.f32 %v4643_v48  ;;  %7486 = vmatprep.subr.bf16.mxu0 %v10739_v13  ;;  %v10743_v43 = vld [vmem:[%s12027_s10 + $0x750] ss:$24 sps:$4 sm:$0xff]   ;;  %v10760_v48 = vld [vmem:[%s12027_s10 + $0x3cc] ss:$24 sps:$4 sm:$0xff]  }
 0x485   : > { %v11281_v0 = vpop.eup %11280  ;;  %v4811_v22 = vadd.f32 1.0, %v11279_v40  ;;  %7443 = vmatprep.mubr.bf16.mxu0 %v14095_v7  ;;  %v10752_v15 = vld [vmem:[%s12027_s10 + $0x398] ss:$24 sps:$4 sm:$0xff]  }
 0x486   : > { %7756 = vmatpush1.bf16.msra.mxu1 %v10740_v33  ;;  %v11283_v16 = vpop.eup %11282  ;;  %v4818_v19 = vadd.f32 1.0, %v11281_v0  ;;  %7444 = vmatmul.mubr.bf16.gmra.mrb[60].mxu0 %v14092_v53  ;;  %v4906_v3 = vmul.f32 %v4810_v11, %v4522_v27  ;;  %v4538_v27 = vmul.f32 0.5, %v14063_v44  ;;  %v10763_v44 = vld [vmem:[%s12027_s10 + $0x7e4] ss:$24 sps:$4 sm:$0xff]  }
 0x487   : > { %7757 = vmatprep.subr.bf16.mxu1 %v10748_v29  ;;  %v4819_v13 = vadd.f32 1.0, %v11283_v16  ;;  %7487 = vmatpush1.bf16.msra.mxu0 %v10737_v6  ;;  %v4907_v34 = vmul.f32 %v4811_v22, %v4523_v31  ;;  %v10749_v6 = vld [vmem:[%s12027_s10 + $0x780] ss:$24 sps:$4 sm:$0xff]   ;;  %v4539_v31 = vmul.f32 0.5, %v14069_v42 }
 0x488   : > { %v4914_v57 = vmul.f32 %v4818_v19, %v4530_v24  ;;  %7488 = vmatprep.subr.bf16.mxu0 %v10745_v37  ;;  %v10757_v37 = vld [vmem:[%s12027_s10 + $0x7b4] ss:$24 sps:$4 sm:$0xff]   ;;  %v4546_v24 = vmul.f32 0.5, %v14080_v10  ;;  %v10764_v42 = vld [vmem:[%s12027_s10 + $0x3f8] ss:$24 sps:$4 sm:$0xff]  }
 0x489   : > { %7703 = vmatmul.mubr.bf16.gmra.mrb[76].mxu1 %v13533_v39  ;;  %v4915_v33 = vmul.f32 %v4819_v13, %v4531_v55  ;;  %v4547_v55 = vmul.f32 0.5, %v14084_v38 }
 0x48a   : > { %7712 = vmatprep.mubr.bf16.mxu1 %v13609_v18  ;;  %7758 = vmatpush1.bf16.msra.mxu1 %v10746_v51  ;;  %v14112_v63 = vpack.c.bf16 %v4914_v57, %v4906_v3  ;;  %v10758_v51 = vld [vmem:[%s12027_s10 + $0x3c8] ss:$24 sps:$4 sm:$0xff]  }
 0x48b   : > { %v11285_v2 = vpop.eup %11284  ;;  %7759 = vmatprep.subr.bf16.mxu1 %v10754_v21  ;;  %7489 = vmatpush1.bf16.msra.mxu0 %v10743_v43  ;;  %v14115_v40 = vpack.c.bf16 %v4915_v33, %v4907_v34  ;;  %v10766_v21 = vld [vmem:[%s12027_s10 + $0x3fc] ss:$24 sps:$4 sm:$0xff]   ;;  %v10755_v43 = vld [vmem:[%s12027_s10 + $0x7b0] ss:$24 sps:$4 sm:$0xff]   ;;  %v10772_v34 = vld [vmem:[%s12027_s10 + $0x42c] ss:$24 sps:$4 sm:$0xff]  }
 0x48c   : > { %v11287_v29 = vpop.eup %11286  ;;  %v4826_v11 = vadd.f32 1.0, %v11285_v2  ;;  %7490 = vmatprep.subr.bf16.mxu0 %v10751_v26  ;;  %v10769_v2 = vld [vmem:[%s12027_s10 + $0x814] ss:$24 sps:$4 sm:$0xff]  }
 0x48d   : > { %v11289_v0 = vpop.eup %11288  ;;  %v4827_v22 = vadd.f32 1.0, %v11287_v29  ;;  %7453 = vmatprep.mubr.bf16.mxu0 %v14115_v40  ;;  %v10778_v29 = vld [vmem:[%s12027_s10 + $0x45c] ss:$24 sps:$4 sm:$0xff]  }
 0x48e   : > { %7760 = vmatpush1.bf16.msra.mxu1 %v10752_v15  ;;  %v11291_v16 = vpop.eup %11290  ;;  %v4834_v19 = vadd.f32 1.0, %v11289_v0  ;;  %7454 = vmatmul.mubr.bf16.gmra.mrb[64].mxu0 %v14112_v63  ;;  %v4922_v3 = vmul.f32 %v4826_v11, %v4538_v27  ;;  %v10761_v15 = vld [vmem:[%s12027_s10 + $0x7e0] ss:$24 sps:$4 sm:$0xff]   ;;  %v10775_v11 = vld [vmem:[%s12027_s10 + $0x844] ss:$24 sps:$4 sm:$0xff]  }
 0x48f   : > { %7761 = vmatprep.subr.bf16.mxu1 %v10760_v48  ;;  %v4835_v13 = vadd.f32 1.0, %v11291_v16  ;;  %7491 = vmatpush1.bf16.msra.mxu0 %v10749_v6  ;;  %v4923_v10 = vmul.f32 %v4827_v22, %v4539_v31  ;;  %v10770_v48 = vld [vmem:[%s12027_s10 + $0x428] ss:$24 sps:$4 sm:$0xff]   ;;  %v10784_v0 = vld [vmem:[%s12027_s10 + $0x48c] ss:$24 sps:$4 sm:$0xff]  }
 0x490   : > { %v4930_v57 = vmul.f32 %v4834_v19, %v4546_v24  ;;  %7492 = vmatprep.subr.bf16.mxu0 %v10757_v37  ;;  %v10767_v6 = vld [vmem:[%s12027_s10 + $0x810] ss:$24 sps:$4 sm:$0xff]   ;;  %v10773_v22 = vld [vmem:[%s12027_s10 + $0x840] ss:$24 sps:$4 sm:$0xff]   ;;  %v10790_v27 = vld [vmem:[%s12027_s10 + $0x4bc] ss:$24 sps:$4 sm:$0xff]  }
 0x491   : > { %7713 = vmatmul.mubr.bf16.gmra.mrb[80].mxu1 %v13601_v30  ;;  %v4931_v26 = vmul.f32 %v4835_v13, %v4547_v55  ;;  %v10776_v37 = vld [vmem:[%s12027_s10 + $0x458] ss:$24 sps:$4 sm:$0xff]   ;;  %v10782_v16 = vld [vmem:[%s12027_s10 + $0x488] ss:$24 sps:$4 sm:$0xff]   ;;  %v10787_v19 = vld [vmem:[%s12027_s10 + $0x8a4] ss:$24 sps:$4 sm:$0xff]  }
 0x492   : > { %7722 = vmatprep.mubr.bf16.mxu1 %v13654_v54  ;;  %7762 = vmatpush1.bf16.msra.mxu1 %v10758_v51  ;;  %v14132_v38 = vpack.c.bf16 %v4930_v57, %v4922_v3  ;;  %v10781_v51 = vld [vmem:[%s12027_s10 + $0x874] ss:$24 sps:$4 sm:$0xff]   ;;  %v10779_v24 = vld [vmem:[%s12027_s10 + $0x870] ss:$24 sps:$4 sm:$0xff]   ;;  %v10785_v55 = vld [vmem:[%s12027_s10 + $0x8a0] ss:$24 sps:$4 sm:$0xff]  }
 0x493   : > { %7763 = vmatprep.subr.bf16.mxu1 %v10766_v21  ;;  %7493 = vmatpush1.bf16.msra.mxu0 %v10755_v43  ;;  %v14135_v33 = vpack.c.bf16 %v4931_v26, %v4923_v10  ;;  %v10788_v21 = vld [vmem:[%s12027_s10 + $0x4b8] ss:$24 sps:$4 sm:$0xff]   ;;  %v10796_v31 = vld [vmem:[%s12027_s10 + $0x4ec] ss:$24 sps:$4 sm:$0xff]   ;;  %v10794_v43 = vld [vmem:[%s12027_s10 + $0x4e8] ss:$24 sps:$4 sm:$0xff]  }
 0x494   : > { %7494 = vmatprep.subr.bf16.mxu0 %v10763_v44  ;;  %v10793_v13 = vld [vmem:[%s12027_s10 + $0x8d4] ss:$24 sps:$4 sm:$0xff]   ;;  %v10791_v57 = vld [vmem:[%s12027_s10 + $0x8d0] ss:$24 sps:$4 sm:$0xff]   ;;  %v10847_v44 = vld [vmem:[%s12027_s10 + $0x904] ss:$24 sps:$4 sm:$0xff]  }
 0x495   : > { %7463 = vmatprep.mubr.bf16.mxu0 %v14135_v33  ;;  %v10799_v3 = vld [vmem:[%s12027_s10 + $0x51c] ss:$24 sps:$4 sm:$0xff]   ;;  %v10797_v10 = vld [vmem:[%s12027_s10 + $0x518] ss:$24 sps:$4 sm:$0xff]   ;;  %v10802_v26 = vld [vmem:[%s12027_s10 + $0x54c] ss:$24 sps:$4 sm:$0xff]  }
 0x496   : > { %7764 = vmatpush1.bf16.msra.mxu1 %v10764_v42  ;;  %7464 = vmatmul.mubr.bf16.gmra.mrb[68].mxu0 %v14132_v38  ;;  %v10845_v42 = vld [vmem:[%s12027_s10 + $0x900] ss:$24 sps:$4 sm:$0xff]  }
 0x497   : > { %7765 = vmatprep.subr.bf16.mxu1 %v10772_v34  ;;  %7495 = vmatpush1.bf16.msra.mxu0 %v10761_v15  ;;  %v10853_v34 = vld [vmem:[%s12027_s10 + $0x934] ss:$24 sps:$4 sm:$0xff]   ;;  %v10800_v15 = vld [vmem:[%s12027_s10 + $0x548] ss:$24 sps:$4 sm:$0xff]  }
 0x498   : > { %7506 = vmatprep.mubr.bf16.mxu0 %v13811_v35  ;;  %7496 = vmatprep.subr.bf16.mxu0 %v10769_v2  ;;  %v10805_v2 = vld [vmem:[%s12027_s10 + $0x57c] ss:$24 sps:$4 sm:$0xff]  }
 0x499   : > { %7723 = vmatmul.mubr.bf16.gmra.mrb[84].mxu1 %v13652_v62 }
 0x49a   : > { %7732 = vmatprep.mubr.bf16.mxu1 %v13674_v5  ;;  %7766 = vmatpush1.bf16.msra.mxu1 %v10770_v48  ;;  %v10851_v48 = vld [vmem:[%s12027_s10 + $0x930] ss:$24 sps:$4 sm:$0xff]  }
 0x49b   : > { %7767 = vmatprep.subr.bf16.mxu1 %v10778_v29  ;;  %7497 = vmatpush1.bf16.msra.mxu0 %v10767_v6  ;;  %v10859_v29 = vld [vmem:[%s12027_s10 + $0x964] ss:$24 sps:$4 sm:$0xff]   ;;  %v10803_v6 = vld [vmem:[%s12027_s10 + $0x578] ss:$24 sps:$4 sm:$0xff]  }
 0x49c   : > { %7498 = vmatprep.subr.bf16.mxu0 %v10775_v11  ;;  %v10808_v11 = vld [vmem:[%s12027_s10 + $0x5ac] ss:$24 sps:$4 sm:$0xff]  }
 0x49e   : > { %7768 = vmatpush1.bf16.msra.mxu1 %v10776_v37  ;;  %v10857_v37 = vld [vmem:[%s12027_s10 + $0x960] ss:$24 sps:$4 sm:$0xff]  }
 0x49f   : > { %7769 = vmatprep.subr.bf16.mxu1 %v10784_v0  ;;  %7499 = vmatpush1.bf16.msra.mxu0 %v10773_v22  ;;  %v10865_v0 = vld [vmem:[%s12027_s10 + $0x994] ss:$24 sps:$4 sm:$0xff]   ;;  %v10806_v22 = vld [vmem:[%s12027_s10 + $0x5a8] ss:$24 sps:$4 sm:$0xff]  }
 0x4a0   : > { %7500 = vmatprep.subr.bf16.mxu0 %v10781_v51  ;;  %v10811_v51 = vld [vmem:[%s12027_s10 + $0x5dc] ss:$24 sps:$4 sm:$0xff]  }
 0x4a1   : > { %7733 = vmatmul.mubr.bf16.gmra.mrb[88].mxu1 %v13672_v52 }
 0x4a2   : > { %7742 = vmatprep.mubr.bf16.mxu1 %v13692_v4  ;;  %7770 = vmatpush1.bf16.msra.mxu1 %v10782_v16  ;;  %v10863_v16 = vld [vmem:[%s12027_s10 + $0x990] ss:$24 sps:$4 sm:$0xff]  }
 0x4a3   : > { %7771 = vmatprep.subr.bf16.mxu1 %v10790_v27  ;;  %7501 = vmatpush1.bf16.msra.mxu0 %v10779_v24  ;;  %v10871_v27 = vld [vmem:[%s12027_s10 + $0x9c4] ss:$24 sps:$4 sm:$0xff]   ;;  %v10809_v24 = vld [vmem:[%s12027_s10 + $0x5d8] ss:$24 sps:$4 sm:$0xff]  }
 0x4a4   : > { %7502 = vmatprep.subr.bf16.mxu0 %v10787_v19  ;;  %v10814_v19 = vld [vmem:[%s12027_s10 + $0x60c] ss:$24 sps:$4 sm:$0xff]  }
 0x4a6   : > { %7772 = vmatpush1.bf16.msra.mxu1 %v10788_v21  ;;  %v10869_v21 = vld [vmem:[%s12027_s10 + $0x9c0] ss:$24 sps:$4 sm:$0xff]  }
 0x4a7   : > { %7773 = vmatprep.subr.bf16.mxu1 %v10796_v31  ;;  %7503 = vmatpush1.bf16.msra.mxu0 %v10785_v55  ;;  %v10877_v31 = vld [vmem:[%s12027_s10 + $0x9f4] ss:$24 sps:$4 sm:$0xff]   ;;  %v10812_v55 = vld [vmem:[%s12027_s10 + $0x608] ss:$24 sps:$4 sm:$0xff]  }
 0x4a8   : > { %7504 = vmatprep.subr.bf16.mxu0 %v10793_v13  ;;  %v10817_v13 = vld [vmem:[%s12027_s10 + $0x63c] ss:$24 sps:$4 sm:$0xff]  }
 0x4a9   : > { %7743 = vmatmul.mubr.bf16.gmra.mrb[92].mxu1 %v13690_v58 }
 0x4aa   : > { %7774 = vmatpush1.bf16.msra.mxu1 %v10794_v43  ;;  %7785 = vmatprep.mubr.bf16.mxu1 %v13990_v56  ;;  %v10875_v43 = vld [vmem:[%s12027_s10 + $0x9f0] ss:$24 sps:$4 sm:$0xff]  }
 0x4ab   : > { %7775 = vmatprep.subr.bf16.mxu1 %v10799_v3  ;;  %7505 = vmatpush1.bf16.msra.mxu0 %v10791_v57  ;;  %v10883_v3 = vld [vmem:[%s12027_s10 + $0xa24] ss:$24 sps:$4 sm:$0xff]   ;;  %v10815_v57 = vld [vmem:[%s12027_s10 + $0x638] ss:$24 sps:$4 sm:$0xff]  }
 0x4ac   : > { %7567 = vmatprep.subr.bf16.mxu0 %v10847_v44  ;;  %v10820_v44 = vld [vmem:[%s12027_s10 + $0x66c] ss:$24 sps:$4 sm:$0xff]  }
 0x4ae   : > { %7776 = vmatpush1.bf16.msra.mxu1 %v10797_v10  ;;  %7507 = vmatmul.mubr.bf16.vlgmr.msra.gmra.mrb[48].mxu0 %v13805_v23  ;;  %v10881_v10 = vld [vmem:[%s12027_s10 + $0xa20] ss:$24 sps:$4 sm:$0xff]  }
 0x4af   : > { %7777 = vmatprep.subr.bf16.mxu1 %v10802_v26  ;;  %7516 = vmatprep.mubr.bf16.mxu0 %v13835_v25  ;;  %v10889_v26 = vld [vmem:[%s12027_s10 + $0xa54] ss:$24 sps:$4 sm:$0xff]  }
 0x4b0   : > { %7568 = vmatpush1.bf16.msra.mxu0 %v10845_v42  ;;  %v10818_v42 = vld [vmem:[%s12027_s10 + $0x668] ss:$24 sps:$4 sm:$0xff]  }
 0x4b1   : > { %7569 = vmatprep.subr.bf16.mxu0 %v10853_v34  ;;  %v10823_v34 = vld [vmem:[%s12027_s10 + $0x69c] ss:$24 sps:$4 sm:$0xff]  }
 0x4b2   : > { %7778 = vmatpush1.bf16.msra.mxu1 %v10800_v15  ;;  %v10887_v15 = vld [vmem:[%s12027_s10 + $0xa50] ss:$24 sps:$4 sm:$0xff]  }
 0x4b3   : > { %7779 = vmatprep.subr.bf16.mxu1 %v10805_v2  ;;  %v10895_v2 = vld [vmem:[%s12027_s10 + $0xa84] ss:$24 sps:$4 sm:$0xff]  }
 0x4b4   : > { %7570 = vmatpush1.bf16.msra.mxu0 %v10851_v48  ;;  %v10821_v48 = vld [vmem:[%s12027_s10 + $0x698] ss:$24 sps:$4 sm:$0xff]  }
 0x4b5   : > { %7571 = vmatprep.subr.bf16.mxu0 %v10859_v29  ;;  %v10826_v29 = vld [vmem:[%s12027_s10 + $0x6cc] ss:$24 sps:$4 sm:$0xff]  }
 0x4b6   : > { %7780 = vmatpush1.bf16.msra.mxu1 %v10803_v6  ;;  %7517 = vmatmul.mubr.bf16.gmra.mrb[52].mxu0 %v13831_v32  ;;  %v10893_v6 = vld [vmem:[%s12027_s10 + $0xa80] ss:$24 sps:$4 sm:$0xff]  }
 0x4b7   : > { %7781 = vmatprep.subr.bf16.mxu1 %v10808_v11  ;;  %7526 = vmatprep.mubr.bf16.mxu0 %v13865_v1  ;;  %v10901_v11 = vld [vmem:[%s12027_s10 + $0xab4] ss:$24 sps:$4 sm:$0xff]  }
 0x4b8   : > { %7572 = vmatpush1.bf16.msra.mxu0 %v10857_v37  ;;  %v10824_v37 = vld [vmem:[%s12027_s10 + $0x6c8] ss:$24 sps:$4 sm:$0xff]  }
 0x4b9   : > { %7573 = vmatprep.subr.bf16.mxu0 %v10865_v0  ;;  %v10829_v0 = vld [vmem:[%s12027_s10 + $0x6fc] ss:$24 sps:$4 sm:$0xff]  }
 0x4ba   : > { %7782 = vmatpush1.bf16.msra.mxu1 %v10806_v22  ;;  %v10899_v22 = vld [vmem:[%s12027_s10 + $0xab0] ss:$24 sps:$4 sm:$0xff]  }
 0x4bb   : > { %7783 = vmatprep.subr.bf16.mxu1 %v10811_v51  ;;  %v10907_v51 = vld [vmem:[%s12027_s10 + $0xae4] ss:$24 sps:$4 sm:$0xff]  }
 0x4bc   : > { %7574 = vmatpush1.bf16.msra.mxu0 %v10863_v16  ;;  %v10827_v16 = vld [vmem:[%s12027_s10 + $0x6f8] ss:$24 sps:$4 sm:$0xff]  }
 0x4bd   : > { %7575 = vmatprep.subr.bf16.mxu0 %v10871_v27  ;;  %v10832_v27 = vld [vmem:[%s12027_s10 + $0x72c] ss:$24 sps:$4 sm:$0xff]  }
 0x4be   : > { %7784 = vmatpush1.bf16.msra.mxu1 %v10809_v24  ;;  %7527 = vmatmul.mubr.bf16.gmra.mrb[56].mxu0 %v13861_v59  ;;  %v10905_v24 = vld [vmem:[%s12027_s10 + $0xae0] ss:$24 sps:$4 sm:$0xff]  }
 0x4bf   : > { %7846 = vmatprep.subr.bf16.mxu1 %v10814_v19  ;;  %7536 = vmatprep.mubr.bf16.mxu0 %v13895_v49  ;;  %v10913_v19 = vld [vmem:[%s12027_s10 + $0xb14] ss:$24 sps:$4 sm:$0xff]  }
 0x4c0   : > { %7576 = vmatpush1.bf16.msra.mxu0 %v10869_v21  ;;  %v10830_v21 = vld [vmem:[%s12027_s10 + $0x728] ss:$24 sps:$4 sm:$0xff]  }
 0x4c1   : > { %7786 = vmatmul.mubr.bf16.vlgmr.msra.gmra.mrb[72].mxu1 %v13984_v20  ;;  %7577 = vmatprep.subr.bf16.mxu0 %v10877_v31  ;;  %v10835_v31 = vld [vmem:[%s12027_s10 + $0x75c] ss:$24 sps:$4 sm:$0xff]  }
 0x4c2   : > { %7795 = vmatprep.mubr.bf16.mxu1 %v14024_v9  ;;  %7847 = vmatpush1.bf16.msra.mxu1 %v10812_v55  ;;  %v10911_v55 = vld [vmem:[%s12027_s10 + $0xb10] ss:$24 sps:$4 sm:$0xff]  }
 0x4c3   : > { %7848 = vmatprep.subr.bf16.mxu1 %v10817_v13  ;;  %v10919_v13 = vld [vmem:[%s12027_s10 + $0xb44] ss:$24 sps:$4 sm:$0xff]  }
 0x4c4   : > { %7578 = vmatpush1.bf16.msra.mxu0 %v10875_v43  ;;  %v10833_v43 = vld [vmem:[%s12027_s10 + $0x758] ss:$24 sps:$4 sm:$0xff]  }
 0x4c5   : > { %7579 = vmatprep.subr.bf16.mxu0 %v10883_v3  ;;  %v10838_v3 = vld [vmem:[%s12027_s10 + $0x78c] ss:$24 sps:$4 sm:$0xff]  }
 0x4c6   : > { %7849 = vmatpush1.bf16.msra.mxu1 %v10815_v57  ;;  %7537 = vmatmul.mubr.bf16.gmra.mrb[60].mxu0 %v13891_v8  ;;  %v10917_v57 = vld [vmem:[%s12027_s10 + $0xb40] ss:$24 sps:$4 sm:$0xff]  }
 0x4c7   : > { %7850 = vmatprep.subr.bf16.mxu1 %v10820_v44  ;;  %7546 = vmatprep.mubr.bf16.mxu0 %v13923_v41  ;;  %v10925_v44 = vld [vmem:[%s12027_s10 + $0xb74] ss:$24 sps:$4 sm:$0xff]  }
 0x4c8   : > { %7580 = vmatpush1.bf16.msra.mxu0 %v10881_v10  ;;  %v10836_v10 = vld [vmem:[%s12027_s10 + $0x788] ss:$24 sps:$4 sm:$0xff]  }
 0x4c9   : > { %7796 = vmatmul.mubr.bf16.gmra.mrb[76].mxu1 %v14021_v47  ;;  %7581 = vmatprep.subr.bf16.mxu0 %v10889_v26  ;;  %v10841_v26 = vld [vmem:[%s12027_s10 + $0x7bc] ss:$24 sps:$4 sm:$0xff]  }
 0x4ca   : > { %7805 = vmatprep.mubr.bf16.mxu1 %v14059_v12  ;;  %7851 = vmatpush1.bf16.msra.mxu1 %v10818_v42  ;;  %v10923_v42 = vld [vmem:[%s12027_s10 + $0xb70] ss:$24 sps:$4 sm:$0xff]  }
 0x4cb   : > { %7852 = vmatprep.subr.bf16.mxu1 %v10823_v34  ;;  %v10931_v34 = vld [vmem:[%s12027_s10 + $0xba4] ss:$24 sps:$4 sm:$0xff]  }
 0x4cc   : > { %7582 = vmatpush1.bf16.msra.mxu0 %v10887_v15  ;;  %v10839_v15 = vld [vmem:[%s12027_s10 + $0x7b8] ss:$24 sps:$4 sm:$0xff]  }
 0x4cd   : > { %7583 = vmatprep.subr.bf16.mxu0 %v10895_v2  ;;  %v10844_v2 = vld [vmem:[%s12027_s10 + $0x7ec] ss:$24 sps:$4 sm:$0xff]  }
 0x4ce   : > { %7853 = vmatpush1.bf16.msra.mxu1 %v10821_v48  ;;  %7547 = vmatmul.mubr.bf16.gmra.mrb[64].mxu0 %v13916_v46  ;;  %v10929_v48 = vld [vmem:[%s12027_s10 + $0xba0] ss:$24 sps:$4 sm:$0xff]  }
 0x4cf   : > { %7854 = vmatprep.subr.bf16.mxu1 %v10826_v29  ;;  %7556 = vmatprep.mubr.bf16.mxu0 %v13954_v36  ;;  %v10937_v29 = vld [vmem:[%s12027_s10 + $0xbd4] ss:$24 sps:$4 sm:$0xff]  }
 0x4d0   : > { %7584 = vmatpush1.bf16.msra.mxu0 %v10893_v6  ;;  %v10842_v6 = vld [vmem:[%s12027_s10 + $0x7e8] ss:$24 sps:$4 sm:$0xff]  }
 0x4d1   : > { %7806 = vmatmul.mubr.bf16.gmra.mrb[80].mxu1 %v14056_v60  ;;  %7585 = vmatprep.subr.bf16.mxu0 %v10901_v11  ;;  %v10850_v11 = vld [vmem:[%s12027_s10 + $0x81c] ss:$24 sps:$4 sm:$0xff]  }
 0x4d2   : > { %7815 = vmatprep.mubr.bf16.mxu1 %v14095_v7  ;;  %7855 = vmatpush1.bf16.msra.mxu1 %v10824_v37  ;;  %v10935_v37 = vld [vmem:[%s12027_s10 + $0xbd0] ss:$24 sps:$4 sm:$0xff]  }
 0x4d3   : > { %7856 = vmatprep.subr.bf16.mxu1 %v10829_v0  ;;  %v10946_v0 = vld [vmem:[%s12027_s10 + $0x14] ss:$24 sps:$4 sm:$0xff]  }
 0x4d4   : > { %7586 = vmatpush1.bf16.msra.mxu0 %v10899_v22  ;;  %v10848_v22 = vld [vmem:[%s12027_s10 + $0x818] ss:$24 sps:$4 sm:$0xff]  }
 0x4d5   : > { %7587 = vmatprep.subr.bf16.mxu0 %v10907_v51  ;;  %v10856_v51 = vld [vmem:[%s12027_s10 + $0x84c] ss:$24 sps:$4 sm:$0xff]  }
 0x4d6   : > { %7857 = vmatpush1.bf16.msra.mxu1 %v10827_v16  ;;  %7557 = vmatmul.mubr.bf16.gmra.mrb[68].mxu0 %v13947_v50  ;;  %v10854_v16 = vld [vmem:[%s12027_s10 + $0x848] ss:$24 sps:$4 sm:$0xff]  }
 0x4d7   : > { %7858 = vmatprep.subr.bf16.mxu1 %v10832_v27  ;;  %v10862_v27 = vld [vmem:[%s12027_s10 + $0x87c] ss:$24 sps:$4 sm:$0xff]  }
 0x4d8   : > { %7588 = vmatpush1.bf16.msra.mxu0 %v10905_v24  ;;  %v10860_v24 = vld [vmem:[%s12027_s10 + $0x878] ss:$24 sps:$4 sm:$0xff]  }
 0x4d9   : > { %7816 = vmatmul.mubr.bf16.gmra.mrb[84].mxu1 %v14092_v53  ;;  %7589 = vmatprep.subr.bf16.mxu0 %v10913_v19  ;;  %v10868_v19 = vld [vmem:[%s12027_s10 + $0x8ac] ss:$24 sps:$4 sm:$0xff]  }
 0x4da   : > { %7825 = vmatprep.mubr.bf16.mxu1 %v14115_v40  ;;  %7859 = vmatpush1.bf16.msra.mxu1 %v10830_v21  ;;  %v10866_v21 = vld [vmem:[%s12027_s10 + $0x8a8] ss:$24 sps:$4 sm:$0xff]  }
 0x4db   : > { %7860 = vmatprep.subr.bf16.mxu1 %v10835_v31  ;;  %v10874_v31 = vld [vmem:[%s12027_s10 + $0x8dc] ss:$24 sps:$4 sm:$0xff]  }
 0x4dc   : > { %7590 = vmatpush1.bf16.msra.mxu0 %v10911_v55  ;;  %v10872_v55 = vld [vmem:[%s12027_s10 + $0x8d8] ss:$24 sps:$4 sm:$0xff]  }
 0x4dd   : > { %7591 = vmatprep.subr.bf16.mxu0 %v10919_v13  ;;  %v10880_v13 = vld [vmem:[%s12027_s10 + $0x90c] ss:$24 sps:$4 sm:$0xff]  }
 0x4de   : > { %7861 = vmatpush1.bf16.msra.mxu1 %v10833_v43  ;;  %v10878_v43 = vld [vmem:[%s12027_s10 + $0x908] ss:$24 sps:$4 sm:$0xff]  }
 0x4df   : > { %7862 = vmatprep.subr.bf16.mxu1 %v10838_v3  ;;  %v10886_v3 = vld [vmem:[%s12027_s10 + $0x93c] ss:$24 sps:$4 sm:$0xff]  }
 0x4e0   : > { %7592 = vmatpush1.bf16.msra.mxu0 %v10917_v57  ;;  %v10884_v57 = vld [vmem:[%s12027_s10 + $0x938] ss:$24 sps:$4 sm:$0xff]  }
 0x4e1   : > { %7826 = vmatmul.mubr.bf16.gmra.mrb[88].mxu1 %v14112_v63  ;;  %7593 = vmatprep.subr.bf16.mxu0 %v10925_v44  ;;  %v10892_v44 = vld [vmem:[%s12027_s10 + $0x96c] ss:$24 sps:$4 sm:$0xff]  }
 0x4e2   : > { %7835 = vmatprep.mubr.bf16.mxu1 %v14135_v33  ;;  %7863 = vmatpush1.bf16.msra.mxu1 %v10836_v10  ;;  %v10890_v10 = vld [vmem:[%s12027_s10 + $0x968] ss:$24 sps:$4 sm:$0xff]  }
 0x4e3   : > { %7864 = vmatprep.subr.bf16.mxu1 %v10841_v26  ;;  %v10898_v26 = vld [vmem:[%s12027_s10 + $0x99c] ss:$24 sps:$4 sm:$0xff]  }
 0x4e4   : > { %7594 = vmatpush1.bf16.msra.mxu0 %v10923_v42  ;;  %v10896_v42 = vld [vmem:[%s12027_s10 + $0x998] ss:$24 sps:$4 sm:$0xff]  }
 0x4e5   : > { %7595 = vmatprep.subr.bf16.mxu0 %v10931_v34  ;;  %v10904_v34 = vld [vmem:[%s12027_s10 + $0x9cc] ss:$24 sps:$4 sm:$0xff]  }
 0x4e6   : > { %7865 = vmatpush1.bf16.msra.mxu1 %v10839_v15  ;;  %v1406_v15 = vsub.s32 6, %v13326_v45 }
 0x4e7   : > { %7866 = vmatprep.subr.bf16.mxu1 %v10844_v2  ;;  %v10902_v2 = vld [vmem:[%s12027_s10 + $0x9c8] ss:$24 sps:$4 sm:$0xff]  }
 0x4e8   : > { %7596 = vmatpush1.bf16.msra.mxu0 %v10929_v48  ;;  %v1410_v48 = vsub.s32 7, %v13326_v45 }
 0x4e9   : > { %7836 = vmatmul.mubr.bf16.gmra.mrb[92].mxu1 %v14132_v38  ;;  %7597 = vmatprep.subr.bf16.mxu0 %v10937_v29  ;;  %v10910_v29 = vld [vmem:[%s12027_s10 + $0x9fc] ss:$24 sps:$4 sm:$0xff]  }
 0x4ea   : > { %7867 = vmatpush1.bf16.msra.mxu1 %v10842_v6  ;;  %7878 = vmatprep.mubr.bf16.mxu1 %v13811_v35  ;;  %v11413_v6 = vld [vmem:[%s12025_s21] sm:$0xff] }
 0x4eb   : > { %7868 = vmatprep.subr.bf16.mxu1 %v10850_v11  ;;  %v14283_v11 = vrot.slane %v11413_v6, %v1406_v15 }
 0x4ec   : > { %7598 = vmatpush1.bf16.msra.mxu0 %v10935_v37  ;;  %v14286_v37 = vrot.slane %v11413_v6, %v1410_v48  ;;  %v10926_v6 = vld [vmem:[%s12027_s10 + $0xa88] ss:$24 sps:$4 sm:$0xff]  }
 0x4ed   : > { %8032 = vmatprep.subr.bf16.mxu0 %v10946_v0  ;;  %v10908_v0 = vld [vmem:[%s12027_s10 + $0x9f8] ss:$24 sps:$4 sm:$0xff]  }
 0x4ee   : > { %7869 = vmatpush1.bf16.msra.mxu1 %v10848_v22  ;;  %v10916_v22 = vld [vmem:[%s12027_s10 + $0xa2c] ss:$24 sps:$4 sm:$0xff]  }
 0x4ef   : > { %7870 = vmatprep.subr.bf16.mxu1 %v10856_v51 }
 0x4f2   : > { %7871 = vmatpush1.bf16.msra.mxu1 %v10854_v16 }
 0x4f3   : > { %7872 = vmatprep.subr.bf16.mxu1 %v10862_v27 }
 0x4f6   : > { %7873 = vmatpush1.bf16.msra.mxu1 %v10860_v24 }
 0x4f7   : > { %7874 = vmatprep.subr.bf16.mxu1 %v10868_v19 }
 0x4fa   : > { %7875 = vmatpush1.bf16.msra.mxu1 %v10866_v21  ;;  %v10914_v21 = vld [vmem:[%s12027_s10 + $0xa28] ss:$24 sps:$4 sm:$0xff]  }
 0x4fb   : > { %7876 = vmatprep.subr.bf16.mxu1 %v10874_v31 }
 0x4fe   : > { %7877 = vmatpush1.bf16.msra.mxu1 %v10872_v55 }
 0x4ff   : > { %7939 = vmatprep.subr.bf16.mxu1 %v10880_v13 }
 0x501   : > { %7879 = vmatmul.mubr.bf16.vlgmr.msra.gmra.mrb[72].mxu1 %v13805_v23 }
 0x502   : > { %7888 = vmatprep.mubr.bf16.mxu1 %v13835_v25  ;;  %7940 = vmatpush1.bf16.msra.mxu1 %v10878_v43  ;;  %v10922_v43 = vld [vmem:[%s12027_s10 + $0xa5c] ss:$24 sps:$4 sm:$0xff]  }
 0x503   : > { %7941 = vmatprep.subr.bf16.mxu1 %v10886_v3 }
 0x506   : > { %7942 = vmatpush1.bf16.msra.mxu1 %v10884_v57 }
 0x507   : > { %7943 = vmatprep.subr.bf16.mxu1 %v10892_v44 }
 0x509   : > { %7889 = vmatmul.mubr.bf16.gmra.mrb[76].mxu1 %v13831_v32 }
 0x50a   : > { %7898 = vmatprep.mubr.bf16.mxu1 %v13865_v1  ;;  %7944 = vmatpush1.bf16.msra.mxu1 %v10890_v10  ;;  %v10970_v1 = vld [vmem:[%s12027_s10 + $0xd4] ss:$24 sps:$4 sm:$0xff]  }
 0x50b   : > { %7945 = vmatprep.subr.bf16.mxu1 %v10898_v26  ;;  %v10920_v26 = vld [vmem:[%s12027_s10 + $0xa58] ss:$24 sps:$4 sm:$0xff]  }
 0x50e   : > { %7946 = vmatpush1.bf16.msra.mxu1 %v10896_v42  ;;  %v10928_v42 = vld [vmem:[%s12027_s10 + $0xa8c] ss:$24 sps:$4 sm:$0xff]  }
 0x50f   : > { %7947 = vmatprep.subr.bf16.mxu1 %v10904_v34 }
 0x511   : > { %7899 = vmatmul.mubr.bf16.gmra.mrb[80].mxu1 %v13861_v59 }
 0x512   : > { %7908 = vmatprep.mubr.bf16.mxu1 %v13895_v49  ;;  %7948 = vmatpush1.bf16.msra.mxu1 %v10902_v2 }
 0x513   : > { %7949 = vmatprep.subr.bf16.mxu1 %v10910_v29 }
 0x514   : > { %v4397_v51 = vpop.f32.mrb[48].mxu1 }
 0x515   : > { %v10004_v16 = vadd.f32 %v4397_v51, %v14283_v11  ;;  %v4399_v27 = vpop.f32.mrb[49].mxu1 }
 0x516   : > { %v14292_v24 = vadd.f32 %v4399_v27, %v14286_v37  ;;  %v4401_v19 = vpop.f32.mrb[50].mxu1  ;;  %7950 = vmatpush1.bf16.msra.mxu1 %v10908_v0  ;;  %v10934_v27 = vld [vmem:[%s12027_s10 + $0xabc] ss:$24 sps:$4 sm:$0xff]  }
 0x517   : > { %v4558_v31 = vmul.f32 0.70710677, %v10004_v16  ;;  %v10006_v55 = vadd.f32 %v4401_v19, %v14283_v11  ;;  %v4403_v13 = vpop.f32.mrb[51].mxu1  ;;  %7951 = vmatprep.subr.bf16.mxu1 %v10916_v22  ;;  %v4462_v61 = vmul.f32 0.5, %v10004_v16 }
 0x518   : > { %v4559_v3 = vmul.f32 0.70710677, %v14292_v24  ;;  %v10007_v57 = vadd.f32 %v4403_v13, %v14286_v37 }
 0x519   : > { %11292 = verf.f32 %v4558_v31  ;;  %v4566_v44 = vmul.f32 0.70710677, %v10006_v55  ;;  %7909 = vmatmul.mubr.bf16.gmra.mrb[84].mxu1 %v13891_v8 }
 0x51a   : > { %11294 = verf.f32 %v4559_v3  ;;  %v4567_v10 = vmul.f32 0.70710677, %v10007_v57  ;;  %7918 = vmatprep.mubr.bf16.mxu1 %v13923_v41  ;;  %7952 = vmatpush1.bf16.msra.mxu1 %v10914_v21 }
 0x51b   : > { %11296 = verf.f32 %v4566_v44  ;;  %7953 = vmatprep.subr.bf16.mxu1 %v10922_v43  ;;  %v10932_v43 = vld [vmem:[%s12027_s10 + $0xab8] ss:$24 sps:$4 sm:$0xff]   ;;  %v10940_v44 = vld [vmem:[%s12027_s10 + $0xaec] ss:$24 sps:$4 sm:$0xff]  }
 0x51c   : > { %11298 = verf.f32 %v4567_v10  ;;  %v4407_v34 = vpop.f32.mrb[52].mxu1 }
 0x51d   : > { %v14304_v15 = vadd.f32 %v4407_v34, %v14283_v11  ;;  %v4409_v2 = vpop.f32.mrb[53].mxu1 }
 0x51e   : > { %v14307_v48 = vadd.f32 %v4409_v2, %v14286_v37  ;;  %v4411_v29 = vpop.f32.mrb[54].mxu1  ;;  %7954 = vmatpush1.bf16.msra.mxu1 %v10920_v26 }
 0x51f   : > { %v4574_v0 = vmul.f32 0.70710677, %v14304_v15  ;;  %v14312_v22 = vadd.f32 %v4411_v29, %v14283_v11  ;;  %v4413_v51 = vpop.f32.mrb[55].mxu1  ;;  %7955 = vmatprep.subr.bf16.mxu1 %v10928_v42 }
 0x520   : > { %v4575_v19 = vmul.f32 0.70710677, %v14307_v48  ;;  %v14317_v21 = vadd.f32 %v4413_v51, %v14286_v37  ;;  %v10938_v51 = vld [vmem:[%s12027_s10 + $0xae8] ss:$24 sps:$4 sm:$0xff]  }
 0x521   : > { %11300 = verf.f32 %v4574_v0  ;;  %v4582_v31 = vmul.f32 0.70710677, %v14312_v22  ;;  %7919 = vmatmul.mubr.bf16.gmra.mrb[88].mxu1 %v13916_v46 }
 0x522   : > { %11302 = verf.f32 %v4575_v19  ;;  %v4583_v13 = vmul.f32 0.70710677, %v14317_v21  ;;  %7928 = vmatprep.mubr.bf16.mxu1 %v13954_v36  ;;  %7956 = vmatpush1.bf16.msra.mxu1 %v10926_v6  ;;  %v4470_v6 = vmul.f32 0.5, %v10006_v55  ;;  %v10943_v36 = vld [vmem:[%s12027_s10 + $0xb1c] ss:$24 sps:$4 sm:$0xff]  }
 0x523   : > { %v11293_v3 = vpop.eup %11292  ;;  %11304 = verf.f32 %v4582_v31  ;;  %7957 = vmatprep.subr.bf16.mxu1 %v10934_v27 }
 0x524   : > { %v11295_v10 = vpop.eup %11294  ;;  %v4750_v26 = vadd.f32 1.0, %v11293_v3  ;;  %11306 = verf.f32 %v4583_v13  ;;  %v4417_v42 = vpop.f32.mrb[56].mxu1  ;;  %v4463_v13 = vmul.f32 0.5, %v14292_v24  ;;  %v4471_v3 = vmul.f32 0.5, %v10007_v57 }
 0x525   : > { %v11297_v34 = vpop.eup %11296  ;;  %v4751_v2 = vadd.f32 1.0, %v11295_v10  ;;  %v14326_v29 = vadd.f32 %v4417_v42, %v14283_v11  ;;  %v4419_v0 = vpop.f32.mrb[57].mxu1 }
 0x526   : > { %v11299_v19 = vpop.eup %11298  ;;  %v4758_v45 = vadd.f32 1.0, %v11297_v34  ;;  %v14330_v31 = vadd.f32 %v4419_v0, %v14286_v37  ;;  %v4421_v27 = vpop.f32.mrb[58].mxu1  ;;  %7958 = vmatpush1.bf16.msra.mxu1 %v10932_v43  ;;  %v4846_v41 = vmul.f32 %v4750_v26, %v4462_v61  ;;  %v10941_v61 = vld [vmem:[%s12027_s10 + $0xb18] ss:$24 sps:$4 sm:$0xff]  }
 0x527   : > { %v4759_v46 = vadd.f32 1.0, %v11299_v19  ;;  %v4590_v10 = vmul.f32 0.70710677, %v14326_v29  ;;  %v4423_v42 = vpop.f32.mrb[59].mxu1  ;;  %7959 = vmatprep.subr.bf16.mxu1 %v10940_v44  ;;  %v14337_v55 = vadd.f32 %v4421_v27, %v14283_v11  ;;  %v4847_v43 = vmul.f32 %v4751_v2, %v4463_v13  ;;  %v10949_v2 = vld [vmem:[%s12027_s10 + $0xb4c] ss:$24 sps:$4 sm:$0xff]  }
 0x528   : > { %v4854_v8 = vmul.f32 %v4758_v45, %v4470_v6  ;;  %v4591_v16 = vmul.f32 0.70710677, %v14330_v31  ;;  %v14340_v24 = vadd.f32 %v4423_v42, %v14286_v37 }
 0x529   : > { %v4855_v34 = vmul.f32 %v4759_v46, %v4471_v3  ;;  %11308 = verf.f32 %v4590_v10  ;;  %7929 = vmatmul.mubr.bf16.gmra.mrb[92].mxu1 %v13947_v50  ;;  %v4598_v45 = vmul.f32 0.70710677, %v14337_v55  ;;  %v10944_v46 = vld [vmem:[%s12027_s10 + $0x10] ss:$24 sps:$4 sm:$0xff]   ;;  %v10950_v10 = vld [vmem:[%s12027_s10 + $0x40] ss:$24 sps:$4 sm:$0xff]  }
 0x52a   : > { %v14343_v57 = vpack.c.bf16 %v4854_v8, %v4846_v41  ;;  %11310 = verf.f32 %v4591_v16  ;;  %7960 = vmatpush1.bf16.msra.mxu1 %v10938_v51  ;;  %v4599_v26 = vmul.f32 0.70710677, %v14340_v24  ;;  %v10952_v41 = vld [vmem:[%s12027_s10 + $0x44] ss:$24 sps:$4 sm:$0xff]   ;;  %v4478_v16 = vmul.f32 0.5, %v14304_v15 }
 0x52b   : > { %v11301_v44 = vpop.eup %11300  ;;  %v14348_v0 = vpack.c.bf16 %v4855_v34, %v4847_v43  ;;  %7961 = vmatprep.subr.bf16.mxu1 %v10943_v36  ;;  %11312 = verf.f32 %v4598_v45  ;;  %v10947_v36 = vld [vmem:[%s12027_s10 + $0xb48] ss:$24 sps:$4 sm:$0xff]   ;;  %v4486_v43 = vmul.f32 0.5, %v14312_v22 }
 0x52c   : > { %v11303_v19 = vpop.eup %11302  ;;  %v4766_v6 = vadd.f32 1.0, %v11301_v44  ;;  %v4427_v8 = vpop.f32.mrb[60].mxu1  ;;  %11314 = verf.f32 %v4599_v26  ;;  %v10955_v26 = vld [vmem:[%s12027_s10 + $0xb7c] ss:$24 sps:$4 sm:$0xff]  }
 0x52d   : > { %15433 = vst [vmem:[#allocation73_spill] sm:$0xff] %v14348_v0  ;;  %v11305_v27 = vpop.eup %11304  ;;  %v4767_v13 = vadd.f32 1.0, %v11303_v19  ;;  %v14354_v51 = vadd.f32 %v4427_v8, %v14283_v11  ;;  %v4429_v3 = vpop.f32.mrb[61].mxu1  ;;  %7599 = vmatprep.mubr.bf16.mxu0 %v14348_v0  ;;  %7971 = vmatprep.mubr.bf16.mxu1 %v14348_v0  ;;  %v4479_v19 = vmul.f32 0.5, %v14307_v48  ;;  %v4487_v8 = vmul.f32 0.5, %v14317_v21 }
 0x52e   : > { %v11307_v42 = vpop.eup %11306  ;;  %v4774_v34 = vadd.f32 1.0, %v11305_v27  ;;  %v14363_v45 = vadd.f32 %v4429_v3, %v14286_v37  ;;  %v4431_v44 = vpop.f32.mrb[62].mxu1  ;;  %7600 = vmatmul.mubr.bf16.vlgmr.msra.gmra.mrb[48].mxu0 %v14343_v57  ;;  %7962 = vmatpush1.bf16.msra.mxu1 %v10941_v61  ;;  %v4862_v22 = vmul.f32 %v4766_v6, %v4478_v16  ;;  %v10958_v61 = vld [vmem:[%s12027_s10 + $0x74] ss:$24 sps:$4 sm:$0xff]  }
 0x52f   : > { %v4775_v0 = vadd.f32 1.0, %v11307_v42  ;;  %v4606_v50 = vmul.f32 0.70710677, %v14354_v51  ;;  %8033 = vmatpush1.bf16.msra.mxu0 %v10944_v46  ;;  %v4433_v15 = vpop.f32.mrb[63].mxu1  ;;  %7963 = vmatprep.subr.bf16.mxu1 %v10949_v2  ;;  %v14372_v49 = vadd.f32 %v4431_v44, %v14283_v11  ;;  %v4863_v48 = vmul.f32 %v4767_v13, %v4479_v19  ;;  %v10953_v2 = vld [vmem:[%s12027_s10 + $0xb78] ss:$24 sps:$4 sm:$0xff]  }
 0x530   : > { %v4870_v27 = vmul.f32 %v4774_v34, %v4486_v43  ;;  %v4607_v3 = vmul.f32 0.70710677, %v14363_v45  ;;  %8034 = vmatprep.subr.bf16.mxu0 %v10952_v41  ;;  %v14376_v42 = vadd.f32 %v4433_v15, %v14286_v37  ;;  %v10962_v15 = vld [vmem:[%s12027_s10 + $0xa0] ss:$24 sps:$4 sm:$0xff]  }
 0x531   : > { %v4871_v21 = vmul.f32 %v4775_v0, %v4487_v8  ;;  %11316 = verf.f32 %v4606_v50  ;;  %v4614_v46 = vmul.f32 0.70710677, %v14372_v49  ;;  %v10956_v50 = vld [vmem:[%s12027_s10 + $0x70] ss:$24 sps:$4 sm:$0xff]   ;;  %v10961_v0 = vld [vmem:[%s12027_s10 + $0xbac] ss:$24 sps:$4 sm:$0xff]  }
 0x532   : > { %11318 = verf.f32 %v4607_v3  ;;  %7964 = vmatpush1.bf16.msra.mxu1 %v10947_v36  ;;  %v14380_v6 = vpack.c.bf16 %v4870_v27, %v4862_v22  ;;  %v4615_v41 = vmul.f32 0.70710677, %v14376_v42  ;;  %v10964_v36 = vld [vmem:[%s12027_s10 + $0xa4] ss:$24 sps:$4 sm:$0xff]  }
 0x533   : > { %v11309_v16 = vpop.eup %11308  ;;  %8035 = vmatpush1.bf16.msra.mxu0 %v10950_v10  ;;  %v14383_v13 = vpack.c.bf16 %v4871_v21, %v4863_v48  ;;  %7965 = vmatprep.subr.bf16.mxu1 %v10955_v26  ;;  %11320 = verf.f32 %v4614_v46  ;;  %v10959_v10 = vld [vmem:[%s12027_s10 + $0xba8] ss:$24 sps:$4 sm:$0xff]   ;;  %v4494_v26 = vmul.f32 0.5, %v14326_v29  ;;  %v10967_v48 = vld [vmem:[%s12027_s10 + $0xbdc] ss:$24 sps:$4 sm:$0xff]   ;;  %v4495_v46 = vmul.f32 0.5, %v14330_v31 }
 0x534   : > { %v11311_v43 = vpop.eup %11310  ;;  %v4437_v34 = vpop.f32.mrb[64].mxu1  ;;  %8036 = vmatprep.subr.bf16.mxu0 %v10958_v61  ;;  %v4782_v44 = vadd.f32 1.0, %v11309_v16  ;;  %11322 = verf.f32 %v4615_v41  ;;  %v4502_v16 = vmul.f32 0.5, %v14337_v55 }
 0x535   : > { %v14389_v19 = vadd.f32 %v4437_v34, %v14283_v11  ;;  %v4439_v8 = vpop.f32.mrb[65].mxu1  ;;  %7609 = vmatprep.mubr.bf16.mxu0 %v14383_v13  ;;  %v11313_v22 = vpop.eup %11312  ;;  %v4783_v27 = vadd.f32 1.0, %v11311_v43  ;;  %v4503_v43 = vmul.f32 0.5, %v14340_v24 }
 0x536   : > { %v14396_v3 = vadd.f32 %v4439_v8, %v14286_v37  ;;  %v4441_v61 = vpop.f32.mrb[66].mxu1  ;;  %7610 = vmatmul.mubr.bf16.gmra.mrb[52].mxu0 %v14380_v6  ;;  %7966 = vmatpush1.bf16.msra.mxu1 %v10953_v2  ;;  %v11315_v21 = vpop.eup %11314  ;;  %v4790_v41 = vadd.f32 1.0, %v11313_v22  ;;  %v4878_v31 = vmul.f32 %v4782_v44, %v4494_v26  ;;  %v10965_v22 = vld [vmem:[%s12027_s10 + $0xbd8] ss:$24 sps:$4 sm:$0xff]  }
 0x537   : > { %v4622_v34 = vmul.f32 0.70710677, %v14389_v19  ;;  %8037 = vmatpush1.bf16.msra.mxu0 %v10956_v50  ;;  %v4443_v29 = vpop.f32.mrb[67].mxu1  ;;  %7967 = vmatprep.subr.bf16.mxu1 %v10961_v0  ;;  %v4791_v8 = vadd.f32 1.0, %v11315_v21  ;;  %v14406_v2 = vadd.f32 %v4441_v61, %v14283_v11  ;;  %v4879_v50 = vmul.f32 %v4783_v27, %v4495_v46  ;;  %v10968_v27 = vld [vmem:[%s12027_s10 + $0xd0] ss:$24 sps:$4 sm:$0xff]  }
 0x538   : > { %v4623_v59 = vmul.f32 0.70710677, %v14396_v3  ;;  %8038 = vmatprep.subr.bf16.mxu0 %v10964_v36  ;;  %v4886_v32 = vmul.f32 %v4790_v41, %v4502_v16  ;;  %v14410_v55 = vadd.f32 %v4443_v29, %v14286_v37  ;;  %v10973_v41 = vld [vmem:[%s12027_s10 + $0x104] ss:$24 sps:$4 sm:$0xff]  }
 0x539   : > { %11324 = verf.f32 %v4622_v34  ;;  %v4887_v0 = vmul.f32 %v4791_v8, %v4503_v43  ;;  %v4630_v24 = vmul.f32 0.70710677, %v14406_v2  ;;  %v4511_v43 = vmul.f32 0.5, %v14363_v45 }
 0x53a   : > { %11326 = verf.f32 %v4623_v59  ;;  %7968 = vmatpush1.bf16.msra.mxu1 %v10959_v10  ;;  %v4631_v61 = vmul.f32 0.70710677, %v14410_v55  ;;  %v14415_v36 = vpack.c.bf16 %v4886_v32, %v4878_v31  ;;  %v4518_v8 = vmul.f32 0.5, %v14372_v49 }
 0x53b   : > { %v11317_v21 = vpop.eup %11316  ;;  %8039 = vmatpush1.bf16.msra.mxu0 %v10962_v15  ;;  %7969 = vmatprep.subr.bf16.mxu1 %v10967_v48  ;;  %11328 = verf.f32 %v4630_v24  ;;  %v14417_v16 = vpack.c.bf16 %v4887_v0, %v4879_v50  ;;  %v4510_v15 = vmul.f32 0.5, %v14354_v51  ;;  %v4519_v0 = vmul.f32 0.5, %v14376_v42 }
 0x53c   : > { %v11319_v44 = vpop.eup %11318  ;;  %v4447_v26 = vpop.f32.mrb[68].mxu1  ;;  %8040 = vmatprep.subr.bf16.mxu0 %v10970_v1  ;;  %v4798_v59 = vadd.f32 1.0, %v11317_v21  ;;  %11330 = verf.f32 %v4631_v61 }
 0x53d   : > { %v14421_v10 = vadd.f32 %v4447_v26, %v14283_v11  ;;  %v4449_v46 = vpop.f32.mrb[69].mxu1  ;;  %v11321_v34 = vpop.eup %11320  ;;  %v4799_v48 = vadd.f32 1.0, %v11319_v44  ;;  %7619 = vmatprep.mubr.bf16.mxu0 %v14417_v16  ;;  %v10976_v26 = vld [vmem:[%s12027_s10 + $0x134] ss:$24 sps:$4 sm:$0xff]  }
 0x53e   : > { %v14426_v32 = vadd.f32 %v4449_v46, %v14286_v37  ;;  %v4451_v29 = vpop.f32.mrb[70].mxu1  ;;  %7970 = vmatpush1.bf16.msra.mxu1 %v10965_v22  ;;  %v11323_v1 = vpop.eup %11322  ;;  %v4806_v31 = vadd.f32 1.0, %v11321_v34  ;;  %7620 = vmatmul.mubr.bf16.gmra.mrb[56].mxu0 %v14415_v36  ;;  %v10971_v22 = vld [vmem:[%s12027_s10 + $0x100] ss:$24 sps:$4 sm:$0xff]   ;;  %v4894_v44 = vmul.f32 %v4798_v59, %v4510_v15  ;;  %v10974_v15 = vld [vmem:[%s12027_s10 + $0x130] ss:$24 sps:$4 sm:$0xff]  }
 0x53f   : > { %v4638_v50 = vmul.f32 0.70710677, %v14421_v10  ;;  %v4453_v51 = vpop.f32.mrb[71].mxu1  ;;  %v4807_v24 = vadd.f32 1.0, %v11323_v1  ;;  %v10026_v61 = vadd.f32 %v4451_v29, %v14283_v11  ;;  %8041 = vmatpush1.bf16.msra.mxu0 %v10968_v27  ;;  %v4895_v46 = vmul.f32 %v4799_v48, %v4511_v43 }
 0x540   : > { %v4639_v21 = vmul.f32 0.70710677, %v14426_v32  ;;  %v4902_v45 = vmul.f32 %v4806_v31, %v4518_v8  ;;  %v10027_v49 = vadd.f32 %v4453_v51, %v14286_v37  ;;  %8042 = vmatprep.subr.bf16.mxu0 %v10973_v41  ;;  %v10979_v41 = vld [vmem:[%s12027_s10 + $0x164] ss:$24 sps:$4 sm:$0xff]   ;;  %v4526_v31 = vmul.f32 0.5, %v14389_v19 }
 0x541   : > { %11332 = verf.f32 %v4638_v50  ;;  %7972 = vmatmul.mubr.bf16.vlgmr.msra.gmra.mrb[72].mxu1 %v14343_v57  ;;  %v4903_v42 = vmul.f32 %v4807_v24, %v4519_v0  ;;  %v4646_v34 = vmul.f32 0.70710677, %v10026_v61  ;;  %v4534_v50 = vmul.f32 0.5, %v14406_v2  ;;  %v10982_v19 = vld [vmem:[%s12027_s10 + $0x194] ss:$24 sps:$4 sm:$0xff]  }
 0x542   : > { %11334 = verf.f32 %v4639_v21  ;;  %7981 = vmatprep.mubr.bf16.mxu1 %v14383_v13  ;;  %v4647_v27 = vmul.f32 0.70710677, %v10027_v49  ;;  %v14441_v29 = vpack.c.bf16 %v4902_v45, %v4894_v44  ;;  %v4527_v0 = vmul.f32 0.5, %v14396_v3 }
 0x543   : > { %v11325_v11 = vpop.eup %11324  ;;  %11336 = verf.f32 %v4646_v34  ;;  %8043 = vmatpush1.bf16.msra.mxu0 %v10971_v22  ;;  %v14443_v37 = vpack.c.bf16 %v4903_v42, %v4895_v46  ;;  %v4535_v24 = vmul.f32 0.5, %v14410_v55  ;;  %v10977_v22 = vld [vmem:[%s12027_s10 + $0x160] ss:$24 sps:$4 sm:$0xff]   ;;  %v10980_v34 = vld [vmem:[%s12027_s10 + $0x190] ss:$24 sps:$4 sm:$0xff]  }
 0x544   : > { %v11327_v59 = vpop.eup %11326  ;;  %v4814_v1 = vadd.f32 1.0, %v11325_v11  ;;  %11338 = verf.f32 %v4647_v27  ;;  %8044 = vmatprep.subr.bf16.mxu0 %v10976_v26  ;;  %v10985_v27 = vld [vmem:[%s12027_s10 + $0x1c4] ss:$24 sps:$4 sm:$0xff]  }
 0x545   : > { %v11329_v48 = vpop.eup %11328  ;;  %v4815_v43 = vadd.f32 1.0, %v11327_v59  ;;  %7629 = vmatprep.mubr.bf16.mxu0 %v14443_v37 }
 0x546   : > { %v11331_v8 = vpop.eup %11330  ;;  %v4822_v51 = vadd.f32 1.0, %v11329_v48  ;;  %7630 = vmatmul.mubr.bf16.gmra.mrb[60].mxu0 %v14441_v29  ;;  %v4910_v44 = vmul.f32 %v4814_v1, %v4526_v31  ;;  %v4550_v48 = vmul.f32 0.5, %v10026_v61  ;;  %v4551_v31 = vmul.f32 0.5, %v10027_v49  ;;  %v10986_v49 = vld [vmem:[%s12027_s10 + $0x1f0] ss:$24 sps:$4 sm:$0xff]  }
 0x547   : > { %v4823_v21 = vadd.f32 1.0, %v11331_v8  ;;  %8045 = vmatpush1.bf16.msra.mxu0 %v10974_v15  ;;  %v4911_v26 = vmul.f32 %v4815_v43, %v4527_v0  ;;  %v4543_v8 = vmul.f32 0.5, %v14426_v32 }
 0x548   : > { %v4918_v45 = vmul.f32 %v4822_v51, %v4534_v50  ;;  %8046 = vmatprep.subr.bf16.mxu0 %v10979_v41  ;;  %v4542_v41 = vmul.f32 0.5, %v14421_v10  ;;  %v10983_v51 = vld [vmem:[%s12027_s10 + $0x1c0] ss:$24 sps:$4 sm:$0xff]  }
 0x549   : > { %7982 = vmatmul.mubr.bf16.gmra.mrb[76].mxu1 %v14380_v6  ;;  %v4919_v2 = vmul.f32 %v4823_v21, %v4535_v24  ;;  %v10988_v21 = vld [vmem:[%s12027_s10 + $0x1f4] ss:$24 sps:$4 sm:$0xff]  }
 0x54a   : > { %7991 = vmatprep.mubr.bf16.mxu1 %v14417_v16  ;;  %v14457_v42 = vpack.c.bf16 %v4918_v45, %v4910_v44  ;;  %v10991_v44 = vld [vmem:[%s12027_s10 + $0x224] ss:$24 sps:$4 sm:$0xff]   ;;  %v10989_v45 = vld [vmem:[%s12027_s10 + $0x220] ss:$24 sps:$4 sm:$0xff]  }
 0x54b   : > { %v11333_v46 = vpop.eup %11332  ;;  %8047 = vmatpush1.bf16.msra.mxu0 %v10977_v22  ;;  %v14459_v55 = vpack.c.bf16 %v4919_v2, %v4911_v26  ;;  %v10992_v26 = vld [vmem:[%s12027_s10 + $0x250] ss:$24 sps:$4 sm:$0xff]   ;;  %v10997_v2 = vld [vmem:[%s12027_s10 + $0x284] ss:$24 sps:$4 sm:$0xff]  }
 0x54c   : > { %v11335_v3 = vpop.eup %11334  ;;  %v4830_v11 = vadd.f32 1.0, %v11333_v46  ;;  %8048 = vmatprep.subr.bf16.mxu0 %v10982_v19  ;;  %v10994_v19 = vld [vmem:[%s12027_s10 + $0x254] ss:$24 sps:$4 sm:$0xff]   ;;  %v10995_v46 = vld [vmem:[%s12027_s10 + $0x280] ss:$24 sps:$4 sm:$0xff]  }
 0x54d   : > { %v11337_v59 = vpop.eup %11336  ;;  %v4831_v15 = vadd.f32 1.0, %v11335_v3  ;;  %7639 = vmatprep.mubr.bf16.mxu0 %v14459_v55  ;;  %v10998_v3 = vld [vmem:[%s12027_s10 + $0x2b0] ss:$24 sps:$4 sm:$0xff]  }
 0x54e   : > { %v11339_v1 = vpop.eup %11338  ;;  %v4838_v43 = vadd.f32 1.0, %v11337_v59  ;;  %7640 = vmatmul.mubr.bf16.gmra.mrb[64].mxu0 %v14457_v42  ;;  %v4926_v0 = vmul.f32 %v4830_v11, %v4542_v41  ;;  %v11001_v11 = vld [vmem:[%s12027_s10 + $0x2e0] ss:$24 sps:$4 sm:$0xff]   ;;  %v11004_v59 = vld [vmem:[%s12027_s10 + $0x310] ss:$24 sps:$4 sm:$0xff]  }
 0x54f   : > { %v4839_v50 = vadd.f32 1.0, %v11339_v1  ;;  %8049 = vmatpush1.bf16.msra.mxu0 %v10980_v34  ;;  %v4927_v10 = vmul.f32 %v4831_v15, %v4543_v8  ;;  %v11003_v34 = vld [vmem:[%s12027_s10 + $0x2e4] ss:$24 sps:$4 sm:$0xff]   ;;  %v11007_v1 = vld [vmem:[%s12027_s10 + $0x340] ss:$24 sps:$4 sm:$0xff]  }
 0x550   : > { %v4934_v24 = vmul.f32 %v4838_v43, %v4550_v48  ;;  %8050 = vmatprep.subr.bf16.mxu0 %v10985_v27  ;;  %v11006_v27 = vld [vmem:[%s12027_s10 + $0x314] ss:$24 sps:$4 sm:$0xff]   ;;  %v11009_v15 = vld [vmem:[%s12027_s10 + $0x344] ss:$24 sps:$4 sm:$0xff]   ;;  %v11010_v48 = vld [vmem:[%s12027_s10 + $0x370] ss:$24 sps:$4 sm:$0xff]  }
 0x551   : > { %7992 = vmatmul.mubr.bf16.gmra.mrb[80].mxu1 %v14415_v36  ;;  %v4935_v61 = vmul.f32 %v4839_v50, %v4551_v31  ;;  %v11012_v41 = vld [vmem:[%s12027_s10 + $0x374] ss:$24 sps:$4 sm:$0xff]   ;;  %v11015_v43 = vld [vmem:[%s12027_s10 + $0x3a4] ss:$24 sps:$4 sm:$0xff]   ;;  %v11016_v8 = vld [vmem:[%s12027_s10 + $0x3d0] ss:$24 sps:$4 sm:$0xff]  }
 0x552   : > { %8001 = vmatprep.mubr.bf16.mxu1 %v14443_v37  ;;  %v14471_v22 = vpack.c.bf16 %v4934_v24, %v4926_v0  ;;  %v11021_v31 = vld [vmem:[%s12027_s10 + $0x404] ss:$24 sps:$4 sm:$0xff]   ;;  %v11022_v50 = vld [vmem:[%s12027_s10 + $0x430] ss:$24 sps:$4 sm:$0xff]  }
 0x553   : > { %8051 = vmatpush1.bf16.msra.mxu0 %v10983_v51  ;;  %v14473_v32 = vpack.c.bf16 %v4935_v61, %v4927_v10  ;;  %v11027_v51 = vld [vmem:[%s12027_s10 + $0x464] ss:$24 sps:$4 sm:$0xff]   ;;  %v11028_v0 = vld [vmem:[%s12027_s10 + $0x490] ss:$24 sps:$4 sm:$0xff]  }
 0x554   : > { %8052 = vmatprep.subr.bf16.mxu0 %v10988_v21  ;;  %v11033_v24 = vld [vmem:[%s12027_s10 + $0x4c4] ss:$24 sps:$4 sm:$0xff]   ;;  %v11034_v21 = vld [vmem:[%s12027_s10 + $0x4f0] ss:$24 sps:$4 sm:$0xff]  }
 0x555   : > { %7649 = vmatprep.mubr.bf16.mxu0 %v14473_v32  ;;  %v11039_v10 = vld [vmem:[%s12027_s10 + $0x524] ss:$24 sps:$4 sm:$0xff]   ;;  %v11040_v61 = vld [vmem:[%s12027_s10 + $0x550] ss:$24 sps:$4 sm:$0xff]  }
 0x556   : > { %7650 = vmatmul.mubr.bf16.gmra.mrb[68].mxu0 %v14471_v22 }
 0x557   : > { %8053 = vmatpush1.bf16.msra.mxu0 %v10986_v49  ;;  %8064 = vmatprep.mubr.bf16.mxu0 %v13478_v28  ;;  %v11000_v28 = vld [vmem:[%s12027_s10 + $0x2b4] ss:$24 sps:$4 sm:$0xff]   ;;  %v11045_v49 = vld [vmem:[%s12027_s10 + $0x584] ss:$24 sps:$4 sm:$0xff]  }
 0x558   : > { %8054 = vmatprep.subr.bf16.mxu0 %v10991_v44  ;;  %v11043_v44 = vld [vmem:[%s12027_s10 + $0x580] ss:$24 sps:$4 sm:$0xff]  }
 0x559   : > { %8002 = vmatmul.mubr.bf16.gmra.mrb[84].mxu1 %v14441_v29 }
 0x55a   : > { %8011 = vmatprep.mubr.bf16.mxu1 %v14459_v55 }
 0x55b   : > { %8055 = vmatpush1.bf16.msra.mxu0 %v10989_v45  ;;  %v11048_v45 = vld [vmem:[%s12027_s10 + $0x5b4] ss:$24 sps:$4 sm:$0xff]  }
 0x55c   : > { %8056 = vmatprep.subr.bf16.mxu0 %v10994_v19  ;;  %v11049_v19 = vld [vmem:[%s12027_s10 + $0x5e0] ss:$24 sps:$4 sm:$0xff]  }
 0x55f   : > { %8057 = vmatpush1.bf16.msra.mxu0 %v10992_v26  ;;  %v11054_v26 = vld [vmem:[%s12027_s10 + $0x614] ss:$24 sps:$4 sm:$0xff]  }
 0x560   : > { %8058 = vmatprep.subr.bf16.mxu0 %v10997_v2  ;;  %v11052_v2 = vld [vmem:[%s12027_s10 + $0x610] ss:$24 sps:$4 sm:$0xff]  }
 0x561   : > { %8012 = vmatmul.mubr.bf16.gmra.mrb[88].mxu1 %v14457_v42 }
 0x562   : > { %8021 = vmatprep.mubr.bf16.mxu1 %v14473_v32 }
 0x563   : > { %8059 = vmatpush1.bf16.msra.mxu0 %v10995_v46  ;;  %v11057_v46 = vld [vmem:[%s12027_s10 + $0x644] ss:$24 sps:$4 sm:$0xff]  }
 0x564   : > { %8060 = vmatprep.subr.bf16.mxu0 %v11000_v28  ;;  %v11055_v28 = vld [vmem:[%s12027_s10 + $0x640] ss:$24 sps:$4 sm:$0xff]  }
 0x567   : > { %8061 = vmatpush1.bf16.msra.mxu0 %v10998_v3  ;;  %v11060_v3 = vld [vmem:[%s12027_s10 + $0x674] ss:$24 sps:$4 sm:$0xff]  }
 0x568   : > { %8062 = vmatprep.subr.bf16.mxu0 %v11003_v34  ;;  %v11058_v34 = vld [vmem:[%s12027_s10 + $0x670] ss:$24 sps:$4 sm:$0xff]  }
 0x569   : > { %8022 = vmatmul.mubr.bf16.gmra.mrb[92].mxu1 %v14471_v22 }
 0x56b   : > { %8063 = vmatpush1.bf16.msra.mxu0 %v11001_v11  ;;  %v11063_v11 = vld [vmem:[%s12027_s10 + $0x6a4] ss:$24 sps:$4 sm:$0xff]  }
 0x56c   : > { %8125 = vmatprep.subr.bf16.mxu0 %v11006_v27  ;;  %v11064_v27 = vld [vmem:[%s12027_s10 + $0x6d0] ss:$24 sps:$4 sm:$0xff]  }
 0x56e   : > { %8065 = vmatmul.mubr.bf16.vlgmr.msra.gmra.mrb[72].mxu0 %v13470_v14  ;;  %v11013_v14 = vld [vmem:[%s12027_s10 + $0x3a0] ss:$24 sps:$4 sm:$0xff]  }
 0x56f   : > { %8074 = vmatprep.mubr.bf16.mxu0 %v13539_v17  ;;  %8126 = vmatpush1.bf16.msra.mxu0 %v11004_v59  ;;  %v11018_v17 = vld [vmem:[%s12027_s10 + $0x3d4] ss:$24 sps:$4 sm:$0xff]   ;;  %v11069_v59 = vld [vmem:[%s12027_s10 + $0x704] ss:$24 sps:$4 sm:$0xff]  }
 0x570   : > { %8127 = vmatprep.subr.bf16.mxu0 %v11009_v15  ;;  %v11070_v15 = vld [vmem:[%s12027_s10 + $0x730] ss:$24 sps:$4 sm:$0xff]  }
 0x573   : > { %8128 = vmatpush1.bf16.msra.mxu0 %v11007_v1  ;;  %v11075_v1 = vld [vmem:[%s12027_s10 + $0x764] ss:$24 sps:$4 sm:$0xff]  }
 0x574   : > { %8129 = vmatprep.subr.bf16.mxu0 %v11012_v41  ;;  %v11076_v41 = vld [vmem:[%s12027_s10 + $0x790] ss:$24 sps:$4 sm:$0xff]  }
 0x576   : > { %8075 = vmatmul.mubr.bf16.gmra.mrb[76].mxu0 %v13533_v39  ;;  %v11019_v39 = vld [vmem:[%s12027_s10 + $0x400] ss:$24 sps:$4 sm:$0xff]  }
 0x577   : > { %8084 = vmatprep.mubr.bf16.mxu0 %v13609_v18  ;;  %8130 = vmatpush1.bf16.msra.mxu0 %v11010_v48  ;;  %v11024_v18 = vld [vmem:[%s12027_s10 + $0x434] ss:$24 sps:$4 sm:$0xff]   ;;  %v11081_v48 = vld [vmem:[%s12027_s10 + $0x7c4] ss:$24 sps:$4 sm:$0xff]  }
 0x578   : > { %8131 = vmatprep.subr.bf16.mxu0 %v11015_v43  ;;  %v11082_v43 = vld [vmem:[%s12027_s10 + $0x7f0] ss:$24 sps:$4 sm:$0xff]  }
 0x57b   : > { %8132 = vmatpush1.bf16.msra.mxu0 %v11013_v14  ;;  %v11087_v14 = vld [vmem:[%s12027_s10 + $0x824] ss:$24 sps:$4 sm:$0xff]  }
 0x57c   : > { %8133 = vmatprep.subr.bf16.mxu0 %v11018_v17  ;;  %v11088_v17 = vld [vmem:[%s12027_s10 + $0x850] ss:$24 sps:$4 sm:$0xff]  }
 0x57e   : > { %8085 = vmatmul.mubr.bf16.gmra.mrb[80].mxu0 %v13601_v30  ;;  %v11025_v30 = vld [vmem:[%s12027_s10 + $0x460] ss:$24 sps:$4 sm:$0xff]  }
 0x57f   : > { %8094 = vmatprep.mubr.bf16.mxu0 %v13654_v54  ;;  %8134 = vmatpush1.bf16.msra.mxu0 %v11016_v8  ;;  %v11030_v54 = vld [vmem:[%s12027_s10 + $0x494] ss:$24 sps:$4 sm:$0xff]   ;;  %v11093_v8 = vld [vmem:[%s12027_s10 + $0x884] ss:$24 sps:$4 sm:$0xff]  }
 0x580   : > { %8135 = vmatprep.subr.bf16.mxu0 %v11021_v31  ;;  %v11091_v31 = vld [vmem:[%s12027_s10 + $0x880] ss:$24 sps:$4 sm:$0xff]  }
 0x583   : > { %8136 = vmatpush1.bf16.msra.mxu0 %v11019_v39  ;;  %v11096_v39 = vld [vmem:[%s12027_s10 + $0x8b4] ss:$24 sps:$4 sm:$0xff]  }
 0x584   : > { %8137 = vmatprep.subr.bf16.mxu0 %v11024_v18  ;;  %v11097_v18 = vld [vmem:[%s12027_s10 + $0x8e0] ss:$24 sps:$4 sm:$0xff]  }
 0x586   : > { %8095 = vmatmul.mubr.bf16.gmra.mrb[84].mxu0 %v13652_v62  ;;  %v11031_v62 = vld [vmem:[%s12027_s10 + $0x4c0] ss:$24 sps:$4 sm:$0xff]  }
 0x587   : > { %8104 = vmatprep.mubr.bf16.mxu0 %v13674_v5  ;;  %8138 = vmatpush1.bf16.msra.mxu0 %v11022_v50  ;;  %v11036_v5 = vld [vmem:[%s12027_s10 + $0x4f4] ss:$24 sps:$4 sm:$0xff]  }
 0x588   : > { %8139 = vmatprep.subr.bf16.mxu0 %v11027_v51  ;;  %v11102_v50 = vld [vmem:[%s12027_s10 + $0x914] ss:$24 sps:$4 sm:$0xff]   ;;  %v11100_v51 = vld [vmem:[%s12027_s10 + $0x910] ss:$24 sps:$4 sm:$0xff]  }
 0x58b   : > { %8140 = vmatpush1.bf16.msra.mxu0 %v11025_v30  ;;  %v11105_v30 = vld [vmem:[%s12027_s10 + $0x944] ss:$24 sps:$4 sm:$0xff]  }
 0x58c   : > { %8141 = vmatprep.subr.bf16.mxu0 %v11030_v54  ;;  %v11103_v54 = vld [vmem:[%s12027_s10 + $0x940] ss:$24 sps:$4 sm:$0xff]  }
 0x58e   : > { %8105 = vmatmul.mubr.bf16.gmra.mrb[88].mxu0 %v13672_v52  ;;  %v11037_v52 = vld [vmem:[%s12027_s10 + $0x520] ss:$24 sps:$4 sm:$0xff]  }
 0x58f   : > { %8114 = vmatprep.mubr.bf16.mxu0 %v13692_v4  ;;  %8142 = vmatpush1.bf16.msra.mxu0 %v11028_v0  ;;  %v11042_v4 = vld [vmem:[%s12027_s10 + $0x554] ss:$24 sps:$4 sm:$0xff]  }
 0x590   : > { %8143 = vmatprep.subr.bf16.mxu0 %v11033_v24  ;;  %v11108_v0 = vld [vmem:[%s12027_s10 + $0x974] ss:$24 sps:$4 sm:$0xff]   ;;  %v11106_v24 = vld [vmem:[%s12027_s10 + $0x970] ss:$24 sps:$4 sm:$0xff]  }
 0x593   : > { %8144 = vmatpush1.bf16.msra.mxu0 %v11031_v62  ;;  %v11111_v62 = vld [vmem:[%s12027_s10 + $0x9a4] ss:$24 sps:$4 sm:$0xff]  }
 0x594   : > { %8145 = vmatprep.subr.bf16.mxu0 %v11036_v5  ;;  %v15434_v5 = vld [vmem:[#allocation64_spill] sm:$0xff] }
 0x596   : > { %8115 = vmatmul.mubr.bf16.gmra.mrb[92].mxu0 %v13690_v58  ;;  %v11046_v58 = vld [vmem:[%s12027_s10 + $0x5b0] ss:$24 sps:$4 sm:$0xff]  }
 0x597   : > { %8146 = vmatpush1.bf16.msra.mxu0 %v11034_v21  ;;  %8157 = vmatprep.mubr.bf16.mxu0 %v13990_v56  ;;  %v11051_v56 = vld [vmem:[%s12027_s10 + $0x5e4] ss:$24 sps:$4 sm:$0xff]  }
 0x598   : > { %8147 = vmatprep.subr.bf16.mxu0 %v11039_v10  ;;  %v15435_v21 = vld [vmem:[#allocation66_spill] sm:$0xff]  ;;  %v11112_v10 = vld [vmem:[%s12027_s10 + $0x9d0] ss:$24 sps:$4 sm:$0xff]  }
 0x59b   : > { %8148 = vmatpush1.bf16.msra.mxu0 %v11037_v52  ;;  %v11117_v52 = vld [vmem:[%s12027_s10 + $0xa04] ss:$24 sps:$4 sm:$0xff]  }
 0x59c   : > { %8149 = vmatprep.subr.bf16.mxu0 %v11042_v4  ;;  %v15436_v4 = vld [vmem:[#allocation65_spill] sm:$0xff] }
 0x59f   : > { %8150 = vmatpush1.bf16.msra.mxu0 %v11040_v61  ;;  %v15437_v61 = vld [vmem:[#allocation68_spill] sm:$0xff] }
 0x5a0   : > { %8151 = vmatprep.subr.bf16.mxu0 %v11045_v49  ;;  %v11115_v49 = vld [vmem:[%s12027_s10 + $0xa00] ss:$24 sps:$4 sm:$0xff]  }
 0x5a3   : > { %8152 = vmatpush1.bf16.msra.mxu0 %v11043_v44 }
 0x5a4   : > { %8153 = vmatprep.subr.bf16.mxu0 %v11048_v45  ;;  %v11120_v45 = vld [vmem:[%s12027_s10 + $0xa34] ss:$24 sps:$4 sm:$0xff]  }
 0x5a7   : > { %8154 = vmatpush1.bf16.msra.mxu0 %v11046_v58 }
 0x5a8   : > { %8155 = vmatprep.subr.bf16.mxu0 %v11051_v56 }
 0x5ab   : > { %8156 = vmatpush1.bf16.msra.mxu0 %v11049_v19 }
 0x5ac   : > { %8218 = vmatprep.subr.bf16.mxu0 %v11054_v26  ;;  %v11118_v26 = vld [vmem:[%s12027_s10 + $0xa30] ss:$24 sps:$4 sm:$0xff]  }
 0x5ae   : > { %8158 = vmatmul.mubr.bf16.vlgmr.msra.gmra.mrb[72].mxu0 %v13984_v20  ;;  %v11061_v20 = vld [vmem:[%s12027_s10 + $0x6a0] ss:$24 sps:$4 sm:$0xff]  }
 0x5af   : > { %8167 = vmatprep.mubr.bf16.mxu0 %v14024_v9  ;;  %8219 = vmatpush1.bf16.msra.mxu0 %v11052_v2  ;;  %v11066_v9 = vld [vmem:[%s12027_s10 + $0x6d4] ss:$24 sps:$4 sm:$0xff]   ;;  %v11123_v2 = vld [vmem:[%s12027_s10 + $0xa64] ss:$24 sps:$4 sm:$0xff]  }
 0x5b0   : > { %8220 = vmatprep.subr.bf16.mxu0 %v11057_v46  ;;  %v15438_v46 = vld [vmem:[#allocation67_spill] sm:$0xff] }
 0x5b3   : > { %8221 = vmatpush1.bf16.msra.mxu0 %v11055_v28  ;;  %v15439_v28 = vld [vmem:[#allocation70_spill] sm:$0xff] }
 0x5b4   : > { %8222 = vmatprep.subr.bf16.mxu0 %v11060_v3  ;;  %v11121_v3 = vld [vmem:[%s12027_s10 + $0xa60] ss:$24 sps:$4 sm:$0xff]  }
 0x5b6   : > { %8168 = vmatmul.mubr.bf16.gmra.mrb[76].mxu0 %v14021_v47  ;;  %v11067_v47 = vld [vmem:[%s12027_s10 + $0x700] ss:$24 sps:$4 sm:$0xff]  }
 0x5b7   : > { %8177 = vmatprep.mubr.bf16.mxu0 %v14059_v12  ;;  %8223 = vmatpush1.bf16.msra.mxu0 %v11058_v34  ;;  %v11072_v12 = vld [vmem:[%s12027_s10 + $0x734] ss:$24 sps:$4 sm:$0xff]  }
 0x5b8   : > { %8224 = vmatprep.subr.bf16.mxu0 %v11063_v11  ;;  %v11126_v11 = vld [vmem:[%s12027_s10 + $0xa94] ss:$24 sps:$4 sm:$0xff]  }
 0x5bb   : > { %8225 = vmatpush1.bf16.msra.mxu0 %v11061_v20 }
 0x5bc   : > { %8226 = vmatprep.subr.bf16.mxu0 %v11066_v9 }
 0x5be   : > { %8178 = vmatmul.mubr.bf16.gmra.mrb[80].mxu0 %v14056_v60  ;;  %v11073_v60 = vld [vmem:[%s12027_s10 + $0x760] ss:$24 sps:$4 sm:$0xff]  }
 0x5bf   : > { %8187 = vmatprep.mubr.bf16.mxu0 %v14095_v7  ;;  %8227 = vmatpush1.bf16.msra.mxu0 %v11064_v27  ;;  %v11078_v7 = vld [vmem:[%s12027_s10 + $0x794] ss:$24 sps:$4 sm:$0xff]  }
 0x5c0   : > { %8228 = vmatprep.subr.bf16.mxu0 %v11069_v59  ;;  %v11124_v59 = vld [vmem:[%s12027_s10 + $0xa90] ss:$24 sps:$4 sm:$0xff]  }
 0x5c3   : > { %8229 = vmatpush1.bf16.msra.mxu0 %v11067_v47  ;;  %v11129_v47 = vld [vmem:[%s12027_s10 + $0xac4] ss:$24 sps:$4 sm:$0xff]  }
 0x5c4   : > { %8230 = vmatprep.subr.bf16.mxu0 %v11072_v12  ;;  %v15440_v12 = vld [vmem:[#allocation69_spill] sm:$0xff] }
 0x5c6   : > { %8188 = vmatmul.mubr.bf16.gmra.mrb[84].mxu0 %v14092_v53  ;;  %v11079_v53 = vld [vmem:[%s12027_s10 + $0x7c0] ss:$24 sps:$4 sm:$0xff]  }
 0x5c7   : > { %8197 = vmatprep.mubr.bf16.mxu0 %v14115_v40  ;;  %8231 = vmatpush1.bf16.msra.mxu0 %v11070_v15  ;;  %v11084_v40 = vld [vmem:[%s12027_s10 + $0x7f4] ss:$24 sps:$4 sm:$0xff]  }
 0x5c8   : > { %8232 = vmatprep.subr.bf16.mxu0 %v11075_v1  ;;  %v15441_v15 = vld [vmem:[#allocation72_spill] sm:$0xff]  ;;  %v11127_v1 = vld [vmem:[%s12027_s10 + $0xac0] ss:$24 sps:$4 sm:$0xff]  }
 0x5cb   : > { %8233 = vmatpush1.bf16.msra.mxu0 %v11073_v60  ;;  %v11132_v60 = vld [vmem:[%s12027_s10 + $0xaf4] ss:$24 sps:$4 sm:$0xff]  }
 0x5cc   : > { %8234 = vmatprep.subr.bf16.mxu0 %v11078_v7 }
 0x5ce   : > { %8198 = vmatmul.mubr.bf16.gmra.mrb[88].mxu0 %v14112_v63  ;;  %v11085_v63 = vld [vmem:[%s12027_s10 + $0x820] ss:$24 sps:$4 sm:$0xff]  }
 0x5cf   : > { %8207 = vmatprep.mubr.bf16.mxu0 %v14135_v33  ;;  %8235 = vmatpush1.bf16.msra.mxu0 %v11076_v41  ;;  %v11090_v33 = vld [vmem:[%s12027_s10 + $0x854] ss:$24 sps:$4 sm:$0xff]  }
 0x5d0   : > { %8236 = vmatprep.subr.bf16.mxu0 %v11081_v48 }
 0x5d3   : > { %8237 = vmatpush1.bf16.msra.mxu0 %v11079_v53 }
 0x5d4   : > { %8238 = vmatprep.subr.bf16.mxu0 %v11084_v40  ;;  %v11130_v40 = vld [vmem:[%s12027_s10 + $0xaf0] ss:$24 sps:$4 sm:$0xff]  }
 0x5d6   : > { %8208 = vmatmul.mubr.bf16.gmra.mrb[92].mxu0 %v14132_v38  ;;  %v11094_v38 = vld [vmem:[%s12027_s10 + $0x8b0] ss:$24 sps:$4 sm:$0xff]  }
 0x5d7   : > { %8239 = vmatpush1.bf16.msra.mxu0 %v11082_v43  ;;  %8250 = vmatprep.mubr.bf16.mxu0 %v13811_v35  ;;  %v11099_v35 = vld [vmem:[%s12027_s10 + $0x8e4] ss:$24 sps:$4 sm:$0xff]  }
 0x5d8   : > { %8240 = vmatprep.subr.bf16.mxu0 %v11087_v14 }
 0x5db   : > { %8241 = vmatpush1.bf16.msra.mxu0 %v11085_v63  ;;  %v11135_v63 = vld [vmem:[%s12027_s10 + $0xb24] ss:$24 sps:$4 sm:$0xff]  }
 0x5dc   : > { %8242 = vmatprep.subr.bf16.mxu0 %v11090_v33 }
 0x5df   : > { %8243 = vmatpush1.bf16.msra.mxu0 %v11088_v17  ;;  %v15442_v17 = vld [vmem:[#allocation71_spill] sm:$0xff] }
 0x5e0   : > { %8244 = vmatprep.subr.bf16.mxu0 %v11093_v8 }
 0x5e3   : > { %8245 = vmatpush1.bf16.msra.mxu0 %v11091_v31  ;;  %v15443_v31 = vld [vmem:[#allocation73_spill] sm:$0xff] }
 0x5e4   : > { %8246 = vmatprep.subr.bf16.mxu0 %v11096_v39  ;;  %v11133_v39 = vld [vmem:[%s12027_s10 + $0xb20] ss:$24 sps:$4 sm:$0xff]  }
 0x5e7   : > { %8247 = vmatpush1.bf16.msra.mxu0 %v11094_v38  ;;  %v11138_v38 = vld [vmem:[%s12027_s10 + $0xb54] ss:$24 sps:$4 sm:$0xff]  }
 0x5e8   : > { %8248 = vmatprep.subr.bf16.mxu0 %v11099_v35 }
 0x5eb   : > { %8249 = vmatpush1.bf16.msra.mxu0 %v11097_v18 }
 0x5ec   : > { %8311 = vmatprep.subr.bf16.mxu0 %v11102_v50 }
 0x5ee   : > { %8251 = vmatmul.mubr.bf16.vlgmr.msra.gmra.mrb[72].mxu0 %v13805_v23  ;;  %v11109_v23 = vld [vmem:[%s12027_s10 + $0x9a0] ss:$24 sps:$4 sm:$0xff]  }
 0x5ef   : > { %8260 = vmatprep.mubr.bf16.mxu0 %v13835_v25  ;;  %8312 = vmatpush1.bf16.msra.mxu0 %v11100_v51  ;;  %v11114_v25 = vld [vmem:[%s12027_s10 + $0x9d4] ss:$24 sps:$4 sm:$0xff]  }
 0x5f0   : > { %8313 = vmatprep.subr.bf16.mxu0 %v11105_v30  ;;  %v11136_v30 = vld [vmem:[%s12027_s10 + $0xb50] ss:$24 sps:$4 sm:$0xff]  }
 0x5f3   : > { %8314 = vmatpush1.bf16.msra.mxu0 %v11103_v54 }
 0x5f4   : > { %8315 = vmatprep.subr.bf16.mxu0 %v11108_v0 }
 0x5f6   : > { %8261 = vmatmul.mubr.bf16.gmra.mrb[76].mxu0 %v15434_v5 }
 0x5f7   : > { %8270 = vmatprep.mubr.bf16.mxu0 %v15435_v21  ;;  %8316 = vmatpush1.bf16.msra.mxu0 %v11106_v24  ;;  %v11141_v24 = vld [vmem:[%s12027_s10 + $0xb84] ss:$24 sps:$4 sm:$0xff]   ;;  %v11139_v21 = vld [vmem:[%s12027_s10 + $0xb80] ss:$24 sps:$4 sm:$0xff]  }
 0x5f8   : > { %8317 = vmatprep.subr.bf16.mxu0 %v11111_v62 }
 0x5fb   : > { %8318 = vmatpush1.bf16.msra.mxu0 %v11109_v23  ;;  %v11144_v23 = vld [vmem:[%s12027_s10 + $0xbb4] ss:$24 sps:$4 sm:$0xff]  }
 0x5fc   : > { %8319 = vmatprep.subr.bf16.mxu0 %v11114_v25 }
 0x5fe   : > { %8271 = vmatmul.mubr.bf16.gmra.mrb[80].mxu0 %v15436_v4 }
 0x5ff   : > { %8280 = vmatprep.mubr.bf16.mxu0 %v15437_v61  ;;  %8320 = vmatpush1.bf16.msra.mxu0 %v11112_v10  ;;  %v11142_v61 = vld [vmem:[%s12027_s10 + $0xbb0] ss:$24 sps:$4 sm:$0xff]  }
 0x600   : > { %8321 = vmatprep.subr.bf16.mxu0 %v11117_v52 }
 0x601   : > { %v14600_v44 = vpop.f32.mrb[48].mxu0 }
 0x602   : > { %v14603_v58 = vpop.f32.mrb[49].mxu0  ;;  %8407 = vst [vmem:[#allocation3] sm:$0xff] (!%p9131_p12), %v14600_v44 }
 0x603   : > { %v14605_v56 = vpop.f32.mrb[50].mxu0  ;;  %8322 = vmatpush1.bf16.msra.mxu0 %v11115_v49  ;;  %8408 = vst [vmem:[#allocation3 + $0x8] sm:$0xff] (!%p9131_p12), %v14603_v58 }
 0x604   : > { %v14607_v19 = vpop.f32.mrb[51].mxu0  ;;  %8323 = vmatprep.subr.bf16.mxu0 %v11120_v45  ;;  %8413 = vst [vmem:[#allocation3 + $0x30] sm:$0xff] (!%p9131_p12), %v14605_v56 }
 0x605   : > { %8414 = vst [vmem:[#allocation3 + $0x38] sm:$0xff] (!%p9131_p12), %v14607_v19 }
 0x606   : > { %8281 = vmatmul.mubr.bf16.gmra.mrb[84].mxu0 %v15438_v46 }
 0x607   : > { %8290 = vmatprep.mubr.bf16.mxu0 %v15439_v28  ;;  %8324 = vmatpush1.bf16.msra.mxu0 %v11118_v26  ;;  %v11147_v26 = vld [vmem:[%s12027_s10 + $0xbe4] ss:$24 sps:$4 sm:$0xff]   ;;  %v11145_v28 = vld [vmem:[%s12027_s10 + $0xbe0] ss:$24 sps:$4 sm:$0xff]  }
 0x608   : > { %8325 = vmatprep.subr.bf16.mxu0 %v11123_v2 }
 0x609   : > { %v14614_v34 = vpop.f32.mrb[52].mxu0 }
 0x60a   : > { %v14617_v20 = vpop.f32.mrb[53].mxu0  ;;  %8419 = vst [vmem:[#allocation3 + $0x60] sm:$0xff] (!%p9131_p12), %v14614_v34 }
 0x60b   : > { %v14619_v9 = vpop.f32.mrb[54].mxu0  ;;  %8326 = vmatpush1.bf16.msra.mxu0 %v11121_v3  ;;  %8420 = vst [vmem:[#allocation3 + $0x68] sm:$0xff] (!%p9131_p12), %v14617_v20 }
 0x60c   : > { %v14621_v27 = vpop.f32.mrb[55].mxu0  ;;  %8327 = vmatprep.subr.bf16.mxu0 %v11126_v11  ;;  %8425 = vst [vmem:[#allocation3 + $0x90] sm:$0xff] (!%p9131_p12), %v14619_v9 }
 0x60d   : > { %8426 = vst [vmem:[#allocation3 + $0x98] sm:$0xff] (!%p9131_p12), %v14621_v27 }
 0x60e   : > { %8291 = vmatmul.mubr.bf16.gmra.mrb[88].mxu0 %v15440_v12 }
 0x60f   : > { %8300 = vmatprep.mubr.bf16.mxu0 %v15441_v15  ;;  %8328 = vmatpush1.bf16.msra.mxu0 %v11124_v59 }
 0x610   : > { %8329 = vmatprep.subr.bf16.mxu0 %v11129_v47 }
 0x611   : > { %v14629_v7 = vpop.f32.mrb[56].mxu0 }
 0x612   : > { %v14631_v41 = vpop.f32.mrb[57].mxu0  ;;  %8431 = vst [vmem:[#allocation3 + $0xc0] sm:$0xff] (!%p9131_p12), %v14629_v7 }
 0x613   : > { %8330 = vmatpush1.bf16.msra.mxu0 %v11127_v1  ;;  %v14633_v48 = vpop.f32.mrb[58].mxu0  ;;  %8432 = vst [vmem:[#allocation3 + $0xc8] sm:$0xff] (!%p9131_p12), %v14631_v41 }
 0x614   : > { %v14635_v53 = vpop.f32.mrb[72].mxu1  ;;  %v14638_v43 = vpop.f32.mrb[59].mxu0  ;;  %8331 = vmatprep.subr.bf16.mxu0 %v11132_v60  ;;  %8437 = vst [vmem:[#allocation3 + $0xf0] sm:$0xff] (!%p9131_p12), %v14633_v48 }
 0x615   : > { %v14640_v14 = vpop.f32.mrb[73].mxu1  ;;  %8409 = vst [vmem:[#allocation3 + $0x10] sm:$0xff] (!%p9131_p12), %v14635_v53  ;;  %8438 = vst [vmem:[#allocation3 + $0xf8] sm:$0xff] (!%p9131_p12), %v14638_v43 }
 0x616   : > { %v14643_v33 = vpop.f32.mrb[74].mxu1  ;;  %8301 = vmatmul.mubr.bf16.gmra.mrb[92].mxu0 %v15442_v17  ;;  %8410 = vst [vmem:[#allocation3 + $0x18] sm:$0xff] (!%p9131_p12), %v14640_v14 }
 0x617   : > { %v14646_v8 = vpop.f32.mrb[75].mxu1  ;;  %8332 = vmatpush1.bf16.msra.mxu0 %v11130_v40  ;;  %8343 = vmatprep.mubr.bf16.mxu0 %v15443_v31  ;;  %8415 = vst [vmem:[#allocation3 + $0x40] sm:$0xff] (!%p9131_p12), %v14643_v33 }
 0x618   : > { %8333 = vmatprep.subr.bf16.mxu0 %v11135_v63  ;;  %8416 = vst [vmem:[#allocation3 + $0x48] sm:$0xff] (!%p9131_p12), %v14646_v8 }
 0x619   : > { %v14651_v35 = vpop.f32.mrb[60].mxu0 }
 0x61a   : > { %v14653_v18 = vpop.f32.mrb[61].mxu0  ;;  %8443 = vst [vmem:[#allocation3 + $0x120] sm:$0xff] (!%p9131_p12), %v14651_v35 }
 0x61b   : > { %8334 = vmatpush1.bf16.msra.mxu0 %v11133_v39  ;;  %v14655_v50 = vpop.f32.mrb[62].mxu0  ;;  %8444 = vst [vmem:[#allocation3 + $0x128] sm:$0xff] (!%p9131_p12), %v14653_v18 }
 0x61c   : > { %v14657_v51 = vpop.f32.mrb[76].mxu1  ;;  %v14660_v54 = vpop.f32.mrb[63].mxu0  ;;  %8335 = vmatprep.subr.bf16.mxu0 %v11138_v38  ;;  %8449 = vst [vmem:[#allocation3 + $0x150] sm:$0xff] (!%p9131_p12), %v14655_v50 }
 0x61d   : > { %v14662_v0 = vpop.f32.mrb[77].mxu1  ;;  %8421 = vst [vmem:[#allocation3 + $0x70] sm:$0xff] (!%p9131_p12), %v14657_v51  ;;  %8450 = vst [vmem:[#allocation3 + $0x158] sm:$0xff] (!%p9131_p12), %v14660_v54 }
 0x61e   : > { %v14665_v62 = vpop.f32.mrb[78].mxu1  ;;  %8422 = vst [vmem:[#allocation3 + $0x78] sm:$0xff] (!%p9131_p12), %v14662_v0 }
 0x61f   : > { %v14667_v5 = vpop.f32.mrb[79].mxu1  ;;  %8336 = vmatpush1.bf16.msra.mxu0 %v11136_v30  ;;  %8427 = vst [vmem:[#allocation3 + $0xa0] sm:$0xff] (!%p9131_p12), %v14665_v62 }
 0x620   : > { %8337 = vmatprep.subr.bf16.mxu0 %v11141_v24  ;;  %8428 = vst [vmem:[#allocation3 + $0xa8] sm:$0xff] (!%p9131_p12), %v14667_v5 }
 0x621   : > { %v14671_v25 = vpop.f32.mrb[64].mxu0 }
 0x622   : > { %v14673_v10 = vpop.f32.mrb[65].mxu0  ;;  %8455 = vst [vmem:[#allocation3 + $0x180] sm:$0xff] (!%p9131_p12), %v14671_v25 }
 0x623   : > { %15444 = vst [vmem:[#allocation64_spill] sm:$0xff] %v14673_v10  ;;  %8338 = vmatpush1.bf16.msra.mxu0 %v11139_v21  ;;  %v14675_v52 = vpop.f32.mrb[66].mxu0  ;;  %8456 = vst [vmem:[#allocation3 + $0x188] sm:$0xff] (!%p9131_p12), %v14673_v10 }
 0x624   : > { %15445 = vst [vmem:[#allocation66_spill] sm:$0xff] %v14675_v52  ;;  %v14677_v4 = vpop.f32.mrb[80].mxu1  ;;  %v14680_v49 = vpop.f32.mrb[67].mxu0  ;;  %8339 = vmatprep.subr.bf16.mxu0 %v11144_v23  ;;  %8461 = vst [vmem:[#allocation3 + $0x1b0] sm:$0xff] (!%p9131_p12), %v14675_v52 }
 0x625   : > { %15446 = vst [vmem:[#allocation65_spill] sm:$0xff] %v14680_v49  ;;  %v14682_v45 = vpop.f32.mrb[81].mxu1  ;;  %8433 = vst [vmem:[#allocation3 + $0xd0] sm:$0xff] (!%p9131_p12), %v14677_v4 }
 0x626   : > { %v14685_v2 = vpop.f32.mrb[82].mxu1  ;;  %8434 = vst [vmem:[#allocation3 + $0xd8] sm:$0xff] (!%p9131_p12), %v14682_v45  ;;  %8462 = vst [vmem:[#allocation3 + $0x1b8] sm:$0xff] (!%p9131_p12), %v14680_v49 }
 0x627   : > { %v14687_v46 = vpop.f32.mrb[83].mxu1  ;;  %8340 = vmatpush1.bf16.msra.mxu0 %v11142_v61  ;;  %8439 = vst [vmem:[#allocation3 + $0x100] sm:$0xff] (!%p9131_p12), %v14685_v2 }
 0x628   : > { %8341 = vmatprep.subr.bf16.mxu0 %v11147_v26  ;;  %8440 = vst [vmem:[#allocation3 + $0x108] sm:$0xff] (!%p9131_p12), %v14687_v46 }
 0x629   : > { %v14690_v3 = vpop.f32.mrb[68].mxu0 }
 0x62a   : > { %15447 = vst [vmem:[#allocation68_spill] sm:$0xff] %v14690_v3  ;;  %v14692_v11 = vpop.f32.mrb[69].mxu0 }
 0x62b   : > { %15448 = vst [vmem:[#allocation67_spill] sm:$0xff] %v14692_v11  ;;  %8342 = vmatpush1.bf16.msra.mxu0 %v11145_v28  ;;  %v14694_v59 = vpop.f32.mrb[70].mxu0 }
 0x62c   : > { %15449 = vst [vmem:[#allocation70_spill] sm:$0xff] %v14694_v59  ;;  %v14696_v47 = vpop.f32.mrb[84].mxu1  ;;  %v14698_v12 = vpop.f32.mrb[71].mxu0 }
 0x62d   : > { %15450 = vst [vmem:[#allocation69_spill] sm:$0xff] %v14698_v12  ;;  %v14700_v15 = vpop.f32.mrb[85].mxu1  ;;  %8445 = vst [vmem:[#allocation3 + $0x130] sm:$0xff] (!%p9131_p12), %v14696_v47 }
 0x62e   : > { %v14702_v1 = vpop.f32.mrb[86].mxu1  ;;  %8344 = vmatmul.mubr.bf16.vlgmr.msra.gmra.mrb[72].mxu0 %v14343_v57  ;;  %8446 = vst [vmem:[#allocation3 + $0x138] sm:$0xff] (!%p9131_p12), %v14700_v15 }
 0x62f   : > { %v14705_v60 = vpop.f32.mrb[87].mxu1  ;;  %8353 = vmatprep.mubr.bf16.mxu0 %v14383_v13  ;;  %8451 = vst [vmem:[#allocation3 + $0x160] sm:$0xff] (!%p9131_p12), %v14702_v1 }
 0x630   : > { %8452 = vst [vmem:[#allocation3 + $0x168] sm:$0xff] (!%p9131_p12), %v14705_v60 }
 0x631   : > { %v15467_v10 = vld [vmem:[#allocation68_spill] sm:$0xff] (!%p9131_p12) }
 0x632   : > { %8467 = vst [vmem:[#allocation3 + $0x1e0] sm:$0xff] (!%p9131_p12), %v15467_v10 }
 0x633   : > { %v15471_v49 = vld [vmem:[#allocation70_spill] sm:$0xff] (!%p9131_p12) }
 0x634   : > { %v14708_v40 = vpop.f32.mrb[88].mxu1  ;;  %8473 = vst [vmem:[#allocation3 + $0x210] sm:$0xff] (!%p9131_p12), %v15471_v49 }
 0x635   : > { %15451 = vst [vmem:[#allocation72_spill] sm:$0xff] %v14708_v40  ;;  %v14710_v63 = vpop.f32.mrb[89].mxu1  ;;  %8457 = vst [vmem:[#allocation3 + $0x190] sm:$0xff] (!%p9131_p12), %v14708_v40  ;;  %v15468_v40 = vld [vmem:[#allocation67_spill] sm:$0xff] (!%p9131_p12) }
 0x636   : > { %15452 = vst [vmem:[#allocation71_spill] sm:$0xff] %v14710_v63  ;;  %v14712_v17 = vpop.f32.mrb[90].mxu1  ;;  %8354 = vmatmul.mubr.bf16.gmra.mrb[76].mxu0 %v14380_v6  ;;  %8458 = vst [vmem:[#allocation3 + $0x198] sm:$0xff] (!%p9131_p12), %v14710_v63 }
 0x637   : > { %15453 = vst [vmem:[#allocation73_spill] sm:$0xff] %v14712_v17  ;;  %v14715_v31 = vpop.f32.mrb[91].mxu1  ;;  %8363 = vmatprep.mubr.bf16.mxu0 %v14417_v16  ;;  %8463 = vst [vmem:[#allocation3 + $0x1c0] sm:$0xff] (!%p9131_p12), %v14712_v17  ;;  %v15472_v17 = vld [vmem:[#allocation69_spill] sm:$0xff] (!%p9131_p12) }
 0x638   : > { %15454 = vst [vmem:[#allocation74_spill] sm:$0xff] %v14715_v31  ;;  %8464 = vst [vmem:[#allocation3 + $0x1c8] sm:$0xff] (!%p9131_p12), %v14715_v31 }
 0x639   : > { %8468 = vst [vmem:[#allocation3 + $0x1e8] sm:$0xff] (!%p9131_p12), %v15468_v40  ;;  %8474 = vst [vmem:[#allocation3 + $0x218] sm:$0xff] (!%p9131_p12), %v15472_v17 }
 0x63c   : > { %v14718_v39 = vpop.f32.mrb[92].mxu1 }
 0x63d   : > { %15455 = vst [vmem:[#allocation75_spill] sm:$0xff] %v14718_v39  ;;  %v14720_v38 = vpop.f32.mrb[93].mxu1 }
 0x63e   : > { %15456 = vst [vmem:[#allocation76_spill] sm:$0xff] %v14720_v38  ;;  %v14722_v57 = vpop.f32.mrb[94].mxu1  ;;  %8364 = vmatmul.mubr.bf16.gmra.mrb[80].mxu0 %v14415_v36 }
 0x63f   : > { %15457 = vst [vmem:[#allocation77_spill] sm:$0xff] %v14722_v57  ;;  %v14725_v13 = vpop.f32.mrb[95].mxu1  ;;  %8373 = vmatprep.mubr.bf16.mxu0 %v14443_v37 }
 0x640   : > { %15458 = vst [vmem:[#allocation78_spill] sm:$0xff] %v14725_v13 }
 0x644   : > { %v15469_v63 = vld [vmem:[#allocation75_spill] sm:$0xff] (!%p9131_p12) }
 0x645   : > { %8469 = vst [vmem:[#allocation3 + $0x1f0] sm:$0xff] (!%p9131_p12), %v15469_v63 }
 0x646   : > { %8374 = vmatmul.mubr.bf16.gmra.mrb[84].mxu0 %v14441_v29  ;;  %v15473_v31 = vld [vmem:[#allocation77_spill] sm:$0xff] (!%p9131_p12) }
 0x647   : > { %8383 = vmatprep.mubr.bf16.mxu0 %v14459_v55  ;;  %8475 = vst [vmem:[#allocation3 + $0x220] sm:$0xff] (!%p9131_p12), %v15473_v31 }
 0x64e   : > { %8384 = vmatmul.mubr.bf16.gmra.mrb[88].mxu0 %v14457_v42 }
 0x64f   : > { %8393 = vmatprep.mubr.bf16.mxu0 %v14473_v32 }
 0x656   : > { %8394 = vmatmul.mubr.bf16.gmra.mrb[92].mxu0 %v14471_v22 }
 0x701   : > { %v14733_v6 = vpop.f32.mrb[72].mxu0 }
 0x702   : > { %v14735_v16 = vpop.f32.mrb[73].mxu0  ;;  %8411 = vst [vmem:[#allocation3 + $0x20] sm:$0xff] (!%p9131_p12), %v14733_v6 }
 0x703   : > { %v14737_v30 = vpop.f32.mrb[74].mxu0  ;;  %8412 = vst [vmem:[#allocation3 + $0x28] sm:$0xff] (!%p9131_p12), %v14735_v16 }
 0x704   : > { %v14739_v36 = vpop.f32.mrb[75].mxu0  ;;  %8417 = vst [vmem:[#allocation3 + $0x50] sm:$0xff] (!%p9131_p12), %v14737_v30 }
 0x705   : > { %8418 = vst [vmem:[#allocation3 + $0x58] sm:$0xff] (!%p9131_p12), %v14739_v36 }
 0x709   : > { %v14741_v24 = vpop.f32.mrb[76].mxu0 }
 0x70a   : > { %v14743_v37 = vpop.f32.mrb[77].mxu0  ;;  %8423 = vst [vmem:[#allocation3 + $0x80] sm:$0xff] (!%p9131_p12), %v14741_v24 }
 0x70b   : > { %v14745_v29 = vpop.f32.mrb[78].mxu0  ;;  %8424 = vst [vmem:[#allocation3 + $0x88] sm:$0xff] (!%p9131_p12), %v14743_v37 }
 0x70c   : > { %v14747_v55 = vpop.f32.mrb[79].mxu0  ;;  %8429 = vst [vmem:[#allocation3 + $0xb0] sm:$0xff] (!%p9131_p12), %v14745_v29 }
 0x70d   : > { %8430 = vst [vmem:[#allocation3 + $0xb8] sm:$0xff] (!%p9131_p12), %v14747_v55 }
 0x711   : > { %v14749_v42 = vpop.f32.mrb[80].mxu0 }
 0x712   : > { %v14751_v32 = vpop.f32.mrb[81].mxu0  ;;  %8435 = vst [vmem:[#allocation3 + $0xe0] sm:$0xff] (!%p9131_p12), %v14749_v42 }
 0x713   : > { %v14753_v22 = vpop.f32.mrb[82].mxu0  ;;  %8436 = vst [vmem:[#allocation3 + $0xe8] sm:$0xff] (!%p9131_p12), %v14751_v32 }
 0x714   : > { %v14755_v21 = vpop.f32.mrb[83].mxu0  ;;  %8441 = vst [vmem:[#allocation3 + $0x110] sm:$0xff] (!%p9131_p12), %v14753_v22 }
 0x715   : > { %8442 = vst [vmem:[#allocation3 + $0x118] sm:$0xff] (!%p9131_p12), %v14755_v21 }
 0x719   : > { %v14757_v23 = vpop.f32.mrb[84].mxu0 }
 0x71a   : > { %v14759_v61 = vpop.f32.mrb[85].mxu0  ;;  %8447 = vst [vmem:[#allocation3 + $0x140] sm:$0xff] (!%p9131_p12), %v14757_v23 }
 0x71b   : > { %v14761_v26 = vpop.f32.mrb[86].mxu0  ;;  %8448 = vst [vmem:[#allocation3 + $0x148] sm:$0xff] (!%p9131_p12), %v14759_v61 }
 0x71c   : > { %v14763_v28 = vpop.f32.mrb[87].mxu0  ;;  %8453 = vst [vmem:[#allocation3 + $0x170] sm:$0xff] (!%p9131_p12), %v14761_v26 }
 0x71d   : > { %8454 = vst [vmem:[#allocation3 + $0x178] sm:$0xff] (!%p9131_p12), %v14763_v28 }
 0x721   : > { %v14765_v13 = vpop.f32.mrb[88].mxu0 }
 0x722   : > { %15459 = vst [vmem:[#allocation79_spill] sm:$0xff] %v14765_v13  ;;  %v14767_v57 = vpop.f32.mrb[89].mxu0  ;;  %8459 = vst [vmem:[#allocation3 + $0x1a0] sm:$0xff] (!%p9131_p12), %v14765_v13  ;;  %v15470_v13 = vld [vmem:[#allocation76_spill] sm:$0xff] (!%p9131_p12) }
 0x723   : > { %15460 = vst [vmem:[#allocation80_spill] sm:$0xff] %v14767_v57  ;;  %v14769_v12 = vpop.f32.mrb[90].mxu0  ;;  %8460 = vst [vmem:[#allocation3 + $0x1a8] sm:$0xff] (!%p9131_p12), %v14767_v57 }
 0x724   : > { %15461 = vst [vmem:[#allocation81_spill] sm:$0xff] %v14769_v12  ;;  %v14771_v59 = vpop.f32.mrb[91].mxu0  ;;  %8465 = vst [vmem:[#allocation3 + $0x1d0] sm:$0xff] (!%p9131_p12), %v14769_v12  ;;  %v15474_v12 = vld [vmem:[#allocation78_spill] sm:$0xff] (!%p9131_p12) }
 0x725   : > { %15462 = vst [vmem:[#allocation82_spill] sm:$0xff] %v14771_v59  ;;  %8466 = vst [vmem:[#allocation3 + $0x1d8] sm:$0xff] (!%p9131_p12), %v14771_v59 }
 0x726   : > { %8470 = vst [vmem:[#allocation3 + $0x1f8] sm:$0xff] (!%p9131_p12), %v15470_v13  ;;  %8476 = vst [vmem:[#allocation3 + $0x228] sm:$0xff] (!%p9131_p12), %v15474_v12 }
 0x727   : > { %8406 = sbr.rel (%p9131_p12) target bundleno = 1838 (0x72e), region = 64 }
 0x729   : > { %v14773_v38 = vpop.f32.mrb[92].mxu0 }
 0x72a   : > { %15463 = vst [vmem:[#allocation83_spill] sm:$0xff] %v14773_v38  ;;  %v14775_v39 = vpop.f32.mrb[93].mxu0  ;;  %8471 = vst [vmem:[#allocation3 + $0x200] sm:$0xff] (!%p9131_p12), %v14773_v38 }
 0x72b   : > { %15464 = vst [vmem:[#allocation84_spill] sm:$0xff] %v14775_v39  ;;  %v14777_v11 = vpop.f32.mrb[94].mxu0  ;;  %8472 = vst [vmem:[#allocation3 + $0x208] sm:$0xff] (!%p9131_p12), %v14775_v39 }
 0x72c   : > { %15465 = vst [vmem:[#allocation85_spill] sm:$0xff] %v14777_v11  ;;  %v14779_v3 = vpop.f32.mrb[95].mxu0  ;;  %8477 = vst [vmem:[#allocation3 + $0x230] sm:$0xff] (!%p9131_p12), %v14777_v11 }
 0x72d   : > { %15466 = vst [vmem:[#allocation86_spill] sm:$0xff] %v14779_v3  ;;  %8478 = vst [vmem:[#allocation3 + $0x238] sm:$0xff] (!%p9131_p12), %v14779_v3 }
 0x72e PF: > { %p9901_p13 = scmp.eq.s32.totalorder %s11648_s24, 0 }
 0x72f   : > { %v8483_v10 = vld [vmem:[#allocation3] sm:$0xff] (!%p9901_p13)  ;;  %v8484_v40 = vld [vmem:[#allocation3 + $0x8] sm:$0xff] (!%p9901_p13)  ;;  %v8485_v63 = vld [vmem:[#allocation3 + $0x10] sm:$0xff] (!%p9901_p13) }
 0x730   : > { %8482 = sbr.rel (%p9901_p13) target bundleno = 1884 (0x75c), region = 68  ;;  %v8555_v13 = vadd.f32 (!%p9901_p13), %v8483_v10, %v14600_v44  ;;  %v8556_v49 = vadd.f32 (!%p9901_p13), %v8484_v40, %v14603_v58  ;;  %v8557_v17 = vadd.f32 (!%p9901_p13), %v8485_v63, %v14635_v53  ;;  %v8486_v31 = vld [vmem:[#allocation3 + $0x18] sm:$0xff] (!%p9901_p13)  ;;  %v8487_v39 = vld [vmem:[#allocation3 + $0x20] sm:$0xff] (!%p9901_p13)  ;;  %v8488_v12 = vld [vmem:[#allocation3 + $0x28] sm:$0xff] (!%p9901_p13) }
 0x731   : > { %v8558_v11 = vadd.f32 (!%p9901_p13), %v8486_v31, %v14640_v14  ;;  %v8559_v3 = vadd.f32 (!%p9901_p13), %v8487_v39, %v14733_v6  ;;  %v8560_v38 = vadd.f32 (!%p9901_p13), %v8488_v12, %v14735_v16  ;;  %v8489_v59 = vld [vmem:[#allocation3 + $0x30] sm:$0xff] (!%p9901_p13)  ;;  %v8490_v52 = vld [vmem:[#allocation3 + $0x38] sm:$0xff] (!%p9901_p13)  ;;  %v8491_v57 = vld [vmem:[#allocation3 + $0x40] sm:$0xff] (!%p9901_p13) }
 0x732   : > { %8627 = vst [vmem:[#allocation3] sm:$0xff] (!%p9901_p13), %v8555_v13  ;;  %8628 = vst [vmem:[#allocation3 + $0x8] sm:$0xff] (!%p9901_p13), %v8556_v49  ;;  %v8561_v44 = vadd.f32 (!%p9901_p13), %v8489_v59, %v14605_v56  ;;  %v8562_v58 = vadd.f32 (!%p9901_p13), %v8490_v52, %v14607_v19  ;;  %v8563_v53 = vadd.f32 (!%p9901_p13), %v8491_v57, %v14643_v33  ;;  %v8492_v10 = vld [vmem:[#allocation3 + $0x48] sm:$0xff] (!%p9901_p13)  ;;  %v8493_v40 = vld [vmem:[#allocation3 + $0x50] sm:$0xff] (!%p9901_p13) }
 0x733   : > { %8629 = vst [vmem:[#allocation3 + $0x10] sm:$0xff] (!%p9901_p13), %v8557_v17  ;;  %v8494_v63 = vld [vmem:[#allocation3 + $0x58] sm:$0xff] (!%p9901_p13)  ;;  %8630 = vst [vmem:[#allocation3 + $0x18] sm:$0xff] (!%p9901_p13), %v8558_v11  ;;  %v8564_v14 = vadd.f32 (!%p9901_p13), %v8492_v10, %v14646_v8  ;;  %v8565_v39 = vadd.f32 (!%p9901_p13), %v8493_v40, %v14737_v30  ;;  %v8495_v16 = vld [vmem:[#allocation3 + $0x60] sm:$0xff] (!%p9901_p13) }
 0x734   : > { %8631 = vst [vmem:[#allocation3 + $0x20] sm:$0xff] (!%p9901_p13), %v8559_v3  ;;  %8632 = vst [vmem:[#allocation3 + $0x28] sm:$0xff] (!%p9901_p13), %v8560_v38  ;;  %v8566_v6 = vadd.f32 (!%p9901_p13), %v8494_v63, %v14739_v36  ;;  %v8496_v13 = vld [vmem:[#allocation3 + $0x68] sm:$0xff] (!%p9901_p13)  ;;  %v8497_v49 = vld [vmem:[#allocation3 + $0x70] sm:$0xff] (!%p9901_p13)  ;;  %v8567_v56 = vadd.f32 (!%p9901_p13), %v8495_v16, %v14614_v34 }
 0x735   : > { %8633 = vst [vmem:[#allocation3 + $0x30] sm:$0xff] (!%p9901_p13), %v8561_v44  ;;  %8634 = vst [vmem:[#allocation3 + $0x38] sm:$0xff] (!%p9901_p13), %v8562_v58  ;;  %v8568_v19 = vadd.f32 (!%p9901_p13), %v8496_v13, %v14617_v20  ;;  %v8569_v33 = vadd.f32 (!%p9901_p13), %v8497_v49, %v14657_v51  ;;  %v8498_v52 = vld [vmem:[#allocation3 + $0x78] sm:$0xff] (!%p9901_p13)  ;;  %v8499_v3 = vld [vmem:[#allocation3 + $0x80] sm:$0xff] (!%p9901_p13) }
 0x736   : > { %8635 = vst [vmem:[#allocation3 + $0x40] sm:$0xff] (!%p9901_p13), %v8563_v53  ;;  %v8500_v11 = vld [vmem:[#allocation3 + $0x88] sm:$0xff] (!%p9901_p13)  ;;  %8636 = vst [vmem:[#allocation3 + $0x48] sm:$0xff] (!%p9901_p13), %v8564_v14  ;;  %v8570_v8 = vadd.f32 (!%p9901_p13), %v8498_v52, %v14662_v0  ;;  %v8571_v59 = vadd.f32 (!%p9901_p13), %v8499_v3, %v14741_v24  ;;  %v8501_v57 = vld [vmem:[#allocation3 + $0x90] sm:$0xff] (!%p9901_p13) }
 0x737   : > { %8637 = vst [vmem:[#allocation3 + $0x50] sm:$0xff] %v8565_v39  ;;  %8638 = vst [vmem:[#allocation3 + $0x58] sm:$0xff] %v8566_v6  ;;  %v8572_v38 = vadd.f32 %v8500_v11, %v14743_v37  ;;  %v8502_v30 = vld [vmem:[#allocation3 + $0x98] sm:$0xff]  ;;  %v8503_v36 = vld [vmem:[#allocation3 + $0xa0] sm:$0xff]  ;;  %v8573_v34 = vadd.f32 %v8501_v57, %v14619_v9 }
 0x738   : > { %8639 = vst [vmem:[#allocation3 + $0x60] sm:$0xff] %v8567_v56  ;;  %8640 = vst [vmem:[#allocation3 + $0x68] sm:$0xff] %v8568_v19  ;;  %v8574_v20 = vadd.f32 %v8502_v30, %v14621_v27  ;;  %v8575_v51 = vadd.f32 %v8503_v36, %v14665_v62  ;;  %v8504_v17 = vld [vmem:[#allocation3 + $0xa8] sm:$0xff]  ;;  %v8505_v31 = vld [vmem:[#allocation3 + $0xb0] sm:$0xff] }
 0x739   : > { %8641 = vst [vmem:[#allocation3 + $0x70] sm:$0xff] %v8569_v33  ;;  %v8506_v12 = vld [vmem:[#allocation3 + $0xb8] sm:$0xff]  ;;  %8642 = vst [vmem:[#allocation3 + $0x78] sm:$0xff] %v8570_v8  ;;  %v8576_v0 = vadd.f32 %v8504_v17, %v14667_v5  ;;  %v8577_v24 = vadd.f32 %v8505_v31, %v14745_v29  ;;  %v8507_v44 = vld [vmem:[#allocation3 + $0xc0] sm:$0xff] }
 0x73a   : > { %8643 = vst [vmem:[#allocation3 + $0x80] sm:$0xff] %v8571_v59  ;;  %8644 = vst [vmem:[#allocation3 + $0x88] sm:$0xff] %v8572_v38  ;;  %v8578_v37 = vadd.f32 %v8506_v12, %v14747_v55  ;;  %v8508_v58 = vld [vmem:[#allocation3 + $0xc8] sm:$0xff]  ;;  %v8509_v53 = vld [vmem:[#allocation3 + $0xd0] sm:$0xff]  ;;  %v8579_v9 = vadd.f32 %v8507_v44, %v14629_v7 }
 0x73b   : > { %8645 = vst [vmem:[#allocation3 + $0x90] sm:$0xff] %v8573_v34  ;;  %8646 = vst [vmem:[#allocation3 + $0x98] sm:$0xff] %v8574_v20  ;;  %v8580_v27 = vadd.f32 %v8508_v58, %v14631_v41  ;;  %v8581_v62 = vadd.f32 %v8509_v53, %v14677_v4  ;;  %v8510_v10 = vld [vmem:[#allocation3 + $0xd8] sm:$0xff]  ;;  %v8511_v40 = vld [vmem:[#allocation3 + $0xe0] sm:$0xff] }
 0x73c   : > { %8647 = vst [vmem:[#allocation3 + $0xa0] sm:$0xff] %v8575_v51  ;;  %v8512_v63 = vld [vmem:[#allocation3 + $0xe8] sm:$0xff]  ;;  %8648 = vst [vmem:[#allocation3 + $0xa8] sm:$0xff] %v8576_v0  ;;  %v8582_v5 = vadd.f32 %v8510_v10, %v14682_v45  ;;  %v8583_v29 = vadd.f32 %v8511_v40, %v14749_v42  ;;  %v8513_v14 = vld [vmem:[#allocation3 + $0xf0] sm:$0xff] }
 0x73d   : > { %8649 = vst [vmem:[#allocation3 + $0xb0] sm:$0xff] %v8577_v24  ;;  %8650 = vst [vmem:[#allocation3 + $0xb8] sm:$0xff] %v8578_v37  ;;  %v8584_v55 = vadd.f32 %v8512_v63, %v14751_v32  ;;  %v8514_v39 = vld [vmem:[#allocation3 + $0xf8] sm:$0xff]  ;;  %v8515_v6 = vld [vmem:[#allocation3 + $0x100] sm:$0xff]  ;;  %v8585_v7 = vadd.f32 %v8513_v14, %v14633_v48 }
 0x73e   : > { %8651 = vst [vmem:[#allocation3 + $0xc0] sm:$0xff] %v8579_v9  ;;  %8652 = vst [vmem:[#allocation3 + $0xc8] sm:$0xff] %v8580_v27  ;;  %v8586_v41 = vadd.f32 %v8514_v39, %v14638_v43  ;;  %v8587_v4 = vadd.f32 %v8515_v6, %v14685_v2  ;;  %v8516_v16 = vld [vmem:[#allocation3 + $0x108] sm:$0xff]  ;;  %v8517_v13 = vld [vmem:[#allocation3 + $0x110] sm:$0xff] }
 0x73f   : > { %8653 = vst [vmem:[#allocation3 + $0xd0] sm:$0xff] %v8581_v62  ;;  %v8518_v49 = vld [vmem:[#allocation3 + $0x118] sm:$0xff]  ;;  %8654 = vst [vmem:[#allocation3 + $0xd8] sm:$0xff] %v8582_v5  ;;  %v8588_v45 = vadd.f32 %v8516_v16, %v14687_v46  ;;  %v8589_v42 = vadd.f32 %v8517_v13, %v14753_v22  ;;  %v8519_v56 = vld [vmem:[#allocation3 + $0x120] sm:$0xff] }
 0x740   : > { %8655 = vst [vmem:[#allocation3 + $0xe0] sm:$0xff] %v8583_v29  ;;  %8656 = vst [vmem:[#allocation3 + $0xe8] sm:$0xff] %v8584_v55  ;;  %v8590_v32 = vadd.f32 %v8518_v49, %v14755_v21  ;;  %v8520_v19 = vld [vmem:[#allocation3 + $0x128] sm:$0xff]  ;;  %v8521_v33 = vld [vmem:[#allocation3 + $0x130] sm:$0xff]  ;;  %v8591_v48 = vadd.f32 %v8519_v56, %v14651_v35 }
 0x741   : > { %8657 = vst [vmem:[#allocation3 + $0xf0] sm:$0xff] %v8585_v7  ;;  %8658 = vst [vmem:[#allocation3 + $0xf8] sm:$0xff] %v8586_v41  ;;  %v8592_v43 = vadd.f32 %v8520_v19, %v14653_v18  ;;  %v8593_v2 = vadd.f32 %v8521_v33, %v14696_v47  ;;  %v8522_v52 = vld [vmem:[#allocation3 + $0x138] sm:$0xff]  ;;  %v8523_v3 = vld [vmem:[#allocation3 + $0x140] sm:$0xff] }
 0x742   : > { %8659 = vst [vmem:[#allocation3 + $0x100] sm:$0xff] %v8587_v4  ;;  %v8524_v11 = vld [vmem:[#allocation3 + $0x148] sm:$0xff]  ;;  %8660 = vst [vmem:[#allocation3 + $0x108] sm:$0xff] %v8588_v45  ;;  %v8594_v46 = vadd.f32 %v8522_v52, %v14700_v15  ;;  %v8595_v22 = vadd.f32 %v8523_v3, %v14757_v23  ;;  %v8525_v8 = vld [vmem:[#allocation3 + $0x150] sm:$0xff] }
 0x743   : > { %8661 = vst [vmem:[#allocation3 + $0x110] sm:$0xff] %v8589_v42  ;;  %8662 = vst [vmem:[#allocation3 + $0x118] sm:$0xff] %v8590_v32  ;;  %v8596_v21 = vadd.f32 %v8524_v11, %v14759_v61  ;;  %v8526_v59 = vld [vmem:[#allocation3 + $0x158] sm:$0xff]  ;;  %v8527_v38 = vld [vmem:[#allocation3 + $0x160] sm:$0xff]  ;;  %v8597_v35 = vadd.f32 %v8525_v8, %v14655_v50 }
 0x744   : > { %8663 = vst [vmem:[#allocation3 + $0x120] sm:$0xff] %v8591_v48  ;;  %8664 = vst [vmem:[#allocation3 + $0x128] sm:$0xff] %v8592_v43  ;;  %v8598_v18 = vadd.f32 %v8526_v59, %v14660_v54  ;;  %v8599_v47 = vadd.f32 %v8527_v38, %v14702_v1  ;;  %v8528_v57 = vld [vmem:[#allocation3 + $0x168] sm:$0xff]  ;;  %v8529_v30 = vld [vmem:[#allocation3 + $0x170] sm:$0xff] }
 0x745   : > { %8665 = vst [vmem:[#allocation3 + $0x130] sm:$0xff] %v8593_v2  ;;  %v8530_v36 = vld [vmem:[#allocation3 + $0x178] sm:$0xff]  ;;  %8666 = vst [vmem:[#allocation3 + $0x138] sm:$0xff] %v8594_v46  ;;  %v8600_v15 = vadd.f32 %v8528_v57, %v14705_v60  ;;  %v8601_v23 = vadd.f32 %v8529_v30, %v14761_v26  ;;  %v8531_v34 = vld [vmem:[#allocation3 + $0x180] sm:$0xff] }
 0x746   : > { %8667 = vst [vmem:[#allocation3 + $0x140] sm:$0xff] %v8595_v22  ;;  %8668 = vst [vmem:[#allocation3 + $0x148] sm:$0xff] %v8596_v21  ;;  %v8602_v61 = vadd.f32 %v8530_v36, %v14763_v28  ;;  %v8532_v20 = vld [vmem:[#allocation3 + $0x188] sm:$0xff]  ;;  %v8533_v51 = vld [vmem:[#allocation3 + $0x190] sm:$0xff]  ;;  %v8603_v50 = vadd.f32 %v8531_v34, %v14671_v25 }
 0x747   : > { %8669 = vst [vmem:[#allocation3 + $0x150] sm:$0xff] %v8597_v35  ;;  %8670 = vst [vmem:[#allocation3 + $0x158] sm:$0xff] %v8598_v18  ;;  %v15475_v54 = vld [vmem:[#allocation64_spill] sm:$0xff]  ;;  %v8535_v0 = vld [vmem:[#allocation3 + $0x1a0] sm:$0xff] }
 0x748   : > { %8671 = vst [vmem:[#allocation3 + $0x160] sm:$0xff] %v8599_v47  ;;  %v8604_v1 = vadd.f32 %v8532_v20, %v15475_v54  ;;  %v15476_v17 = vld [vmem:[#allocation72_spill] sm:$0xff]  ;;  %v8536_v24 = vld [vmem:[#allocation3 + $0x1a8] sm:$0xff]  ;;  %8672 = vst [vmem:[#allocation3 + $0x168] sm:$0xff] %v8600_v15 }
 0x749   : > { %v8605_v31 = vadd.f32 %v8533_v51, %v15476_v17  ;;  %v8534_v12 = vld [vmem:[#allocation3 + $0x198] sm:$0xff]  ;;  %8673 = vst [vmem:[#allocation3 + $0x170] sm:$0xff] %v8601_v23  ;;  %8674 = vst [vmem:[#allocation3 + $0x178] sm:$0xff] %v8602_v61  ;;  %v15477_v60 = vld [vmem:[#allocation71_spill] sm:$0xff] }
 0x74a   : > { %v8606_v26 = vadd.f32 %v8534_v12, %v15477_v60  ;;  %v15478_v28 = vld [vmem:[#allocation79_spill] sm:$0xff]  ;;  %v15479_v44 = vld [vmem:[#allocation80_spill] sm:$0xff]  ;;  %v8539_v27 = vld [vmem:[#allocation3 + $0x1c0] sm:$0xff]  ;;  %8675 = vst [vmem:[#allocation3 + $0x180] sm:$0xff] %v8603_v50 }
 0x74b   : > { %v8607_v37 = vadd.f32 %v8535_v0, %v15478_v28  ;;  %v8608_v58 = vadd.f32 %v8536_v24, %v15479_v44  ;;  %v8537_v53 = vld [vmem:[#allocation3 + $0x1b0] sm:$0xff]  ;;  %v8538_v9 = vld [vmem:[#allocation3 + $0x1b8] sm:$0xff]  ;;  %8676 = vst [vmem:[#allocation3 + $0x188] sm:$0xff] %v8604_v1  ;;  %8677 = vst [vmem:[#allocation3 + $0x190] sm:$0xff] %v8605_v31 }
 0x74c   : > { %v15480_v25 = vld [vmem:[#allocation66_spill] sm:$0xff]  ;;  %v15481_v10 = vld [vmem:[#allocation65_spill] sm:$0xff]  ;;  %v8541_v55 = vld [vmem:[#allocation3 + $0x1d0] sm:$0xff]  ;;  %8678 = vst [vmem:[#allocation3 + $0x198] sm:$0xff] %v8606_v26 }
 0x74d   : > { %v8609_v62 = vadd.f32 %v8537_v53, %v15480_v25  ;;  %v8610_v40 = vadd.f32 %v8538_v9, %v15481_v10  ;;  %v15482_v63 = vld [vmem:[#allocation73_spill] sm:$0xff]  ;;  %v8540_v29 = vld [vmem:[#allocation3 + $0x1c8] sm:$0xff]  ;;  %v8542_v14 = vld [vmem:[#allocation3 + $0x1d8] sm:$0xff]  ;;  %8679 = vst [vmem:[#allocation3 + $0x1a0] sm:$0xff] %v8607_v37 }
 0x74e   : > { %v8611_v5 = vadd.f32 %v8539_v27, %v15482_v63  ;;  %8680 = vst [vmem:[#allocation3 + $0x1a8] sm:$0xff] %v8608_v58  ;;  %v15483_v39 = vld [vmem:[#allocation74_spill] sm:$0xff]  ;;  %v15484_v7 = vld [vmem:[#allocation81_spill] sm:$0xff]  ;;  %v8545_v45 = vld [vmem:[#allocation3 + $0x1f0] sm:$0xff] }
 0x74f   : > { %v8612_v6 = vadd.f32 %v8540_v29, %v15483_v39  ;;  %v8613_v41 = vadd.f32 %v8541_v55, %v15484_v7  ;;  %v15485_v4 = vld [vmem:[#allocation82_spill] sm:$0xff]  ;;  %v8543_v13 = vld [vmem:[#allocation3 + $0x1e0] sm:$0xff]  ;;  %8681 = vst [vmem:[#allocation3 + $0x1b0] sm:$0xff] %v8609_v62  ;;  %8682 = vst [vmem:[#allocation3 + $0x1b8] sm:$0xff] %v8610_v40 }
 0x750   : > { %v8614_v16 = vadd.f32 %v8542_v14, %v15485_v4  ;;  %v8544_v49 = vld [vmem:[#allocation3 + $0x1e8] sm:$0xff]  ;;  %8683 = vst [vmem:[#allocation3 + $0x1c0] sm:$0xff] %v8611_v5  ;;  %v15486_v42 = vld [vmem:[#allocation68_spill] sm:$0xff]  ;;  %v15487_v56 = vld [vmem:[#allocation67_spill] sm:$0xff] }
 0x751   : > { %v8615_v32 = vadd.f32 %v8543_v13, %v15486_v42  ;;  %v8616_v19 = vadd.f32 %v8544_v49, %v15487_v56  ;;  %v15488_v33 = vld [vmem:[#allocation75_spill] sm:$0xff]  ;;  %v8546_v43 = vld [vmem:[#allocation3 + $0x1f8] sm:$0xff]  ;;  %v8547_v2 = vld [vmem:[#allocation3 + $0x200] sm:$0xff]  ;;  %8684 = vst [vmem:[#allocation3 + $0x1c8] sm:$0xff] %v8612_v6 }
 0x752   : > { %v8617_v48 = vadd.f32 %v8545_v45, %v15488_v33  ;;  %v8548_v52 = vld [vmem:[#allocation3 + $0x208] sm:$0xff]  ;;  %8685 = vst [vmem:[#allocation3 + $0x1d0] sm:$0xff] %v8613_v41  ;;  %8686 = vst [vmem:[#allocation3 + $0x1d8] sm:$0xff] %v8614_v16  ;;  %v15489_v3 = vld [vmem:[#allocation76_spill] sm:$0xff] }
 0x753   : > { %v8618_v11 = vadd.f32 %v8546_v43, %v15489_v3  ;;  %v15490_v46 = vld [vmem:[#allocation83_spill] sm:$0xff]  ;;  %v15491_v21 = vld [vmem:[#allocation84_spill] sm:$0xff]  ;;  %v8551_v35 = vld [vmem:[#allocation3 + $0x220] sm:$0xff]  ;;  %8687 = vst [vmem:[#allocation3 + $0x1e0] sm:$0xff] %v8615_v32 }
 0x754   : > { %v8619_v22 = vadd.f32 %v8547_v2, %v15490_v46  ;;  %v8620_v8 = vadd.f32 %v8548_v52, %v15491_v21  ;;  %v8549_v59 = vld [vmem:[#allocation3 + $0x210] sm:$0xff]  ;;  %v8550_v38 = vld [vmem:[#allocation3 + $0x218] sm:$0xff]  ;;  %8688 = vst [vmem:[#allocation3 + $0x1e8] sm:$0xff] %v8616_v19  ;;  %8689 = vst [vmem:[#allocation3 + $0x1f0] sm:$0xff] %v8617_v48 }
 0x755   : > { %v15492_v18 = vld [vmem:[#allocation70_spill] sm:$0xff]  ;;  %v15493_v57 = vld [vmem:[#allocation69_spill] sm:$0xff]  ;;  %v8553_v61 = vld [vmem:[#allocation3 + $0x230] sm:$0xff]  ;;  %8690 = vst [vmem:[#allocation3 + $0x1f8] sm:$0xff] %v8618_v11 }
 0x756   : > { %v8621_v47 = vadd.f32 %v8549_v59, %v15492_v18  ;;  %v8622_v30 = vadd.f32 %v8550_v38, %v15493_v57  ;;  %v15494_v36 = vld [vmem:[#allocation77_spill] sm:$0xff]  ;;  %v8552_v23 = vld [vmem:[#allocation3 + $0x228] sm:$0xff]  ;;  %v8554_v34 = vld [vmem:[#allocation3 + $0x238] sm:$0xff]  ;;  %8691 = vst [vmem:[#allocation3 + $0x200] sm:$0xff] %v8619_v22 }
 0x757   : > { %v8623_v15 = vadd.f32 %v8551_v35, %v15494_v36  ;;  %8692 = vst [vmem:[#allocation3 + $0x208] sm:$0xff] %v8620_v8  ;;  %v15495_v20 = vld [vmem:[#allocation78_spill] sm:$0xff]  ;;  %v15496_v50 = vld [vmem:[#allocation85_spill] sm:$0xff] }
 0x758   : > { %v8624_v51 = vadd.f32 %v8552_v23, %v15495_v20  ;;  %v8625_v54 = vadd.f32 %v8553_v61, %v15496_v50  ;;  %v15497_v1 = vld [vmem:[#allocation86_spill] sm:$0xff]  ;;  %8693 = vst [vmem:[#allocation3 + $0x210] sm:$0xff] %v8621_v47  ;;  %8694 = vst [vmem:[#allocation3 + $0x218] sm:$0xff] %v8622_v30 }
 0x759   : > { %v8626_v17 = vadd.f32 %v8554_v34, %v15497_v1  ;;  %8695 = vst [vmem:[#allocation3 + $0x220] sm:$0xff] %v8623_v15 }
 0x75a   : > { %8696 = vst [vmem:[#allocation3 + $0x228] sm:$0xff] %v8624_v51  ;;  %8697 = vst [vmem:[#allocation3 + $0x230] sm:$0xff] %v8625_v54 }
 0x75b   : > { %8698 = vst [vmem:[#allocation3 + $0x238] sm:$0xff] %v8626_v17 }
 0x75c PF: > { %p9902_p9 = scmp.ne.s32.totalorder %s11648_s24, 2 }
 0x75d   : > { %v8775_v12 = vld [vmem:[%s15174_s4] sm:$0x3f] (!%p9902_p9)  ;;  %v15498_v24 = vld [vmem:[#allocation63_spill] sm:$0xff] (!%p9902_p9)  ;;  %v8716_v33 = vld [vmem:[#allocation3 + $0x68] sm:$0xff] (!%p9902_p9) }
 0x75e   : > { %8702 = sbr.rel (%p9902_p9) target bundleno = 1928 (0x788), region = 72  ;;  %v8703_v31 = vld [vmem:[#allocation3] sm:$0xff] (!%p9902_p9)  ;;  %v8704_v0 = vld [vmem:[#allocation3 + $0x8] sm:$0xff] (!%p9902_p9)  ;;  %v15499_v60 = vsub.s32 (!%p9902_p9), 0, %v15498_v24  ;;  %v15500_v28 = vsub.s32 (!%p9902_p9), 1, %v15498_v24  ;;  %v15501_v58 = vsub.s32 (!%p9902_p9), 2, %v15498_v24 }
 0x75f   : > { %v8705_v44 = vld [vmem:[#allocation3 + $0x10] sm:$0xff] (!%p9902_p9)  ;;  %v8706_v9 = vld [vmem:[#allocation3 + $0x18] sm:$0xff] (!%p9902_p9)  ;;  %v15502_v27 = vsub.s32 (!%p9902_p9), 3, %v15498_v24  ;;  %v15503_v10 = vsub.s32 (!%p9902_p9), 4, %v15498_v24  ;;  %v15504_v5 = vsub.s32 (!%p9902_p9), 5, %v15498_v24  ;;  %v8715_v19 = vld [vmem:[#allocation3 + $0x60] sm:$0xff] (!%p9902_p9) }
 0x760   : > { %v14934_v26 = vrot.slane (!%p9902_p9), %v8775_v12, %v15499_v60  ;;  %v14938_v37 = vrot.slane (!%p9902_p9), %v8775_v12, %v15500_v28  ;;  %v14942_v53 = vrot.slane (!%p9902_p9), %v8775_v12, %v15501_v58  ;;  %v8707_v62 = vld [vmem:[#allocation3 + $0x20] sm:$0xff] (!%p9902_p9)  ;;  %v8708_v63 = vld [vmem:[#allocation3 + $0x28] sm:$0xff] (!%p9902_p9)  ;;  %v8717_v3 = vld [vmem:[#allocation3 + $0x70] sm:$0xff] (!%p9902_p9) }
 0x761   : > { %v14946_v25 = vrot.slane (!%p9902_p9), %v8775_v12, %v15502_v27  ;;  %v14950_v40 = vrot.slane (!%p9902_p9), %v8775_v12, %v15503_v10  ;;  %v14954_v29 = vrot.slane (!%p9902_p9), %v8775_v12, %v15504_v5  ;;  %v8709_v55 = vld [vmem:[#allocation3 + $0x30] sm:$0xff] (!%p9902_p9)  ;;  %v8710_v14 = vld [vmem:[#allocation3 + $0x38] sm:$0xff] (!%p9902_p9)  ;;  %v8719_v46 = vld [vmem:[#allocation3 + $0x80] sm:$0xff] (!%p9902_p9) }
 0x762   : > { %v8807_v39 = vadd.f32 (!%p9902_p9), %v14934_v26, %v8703_v31  ;;  %v8808_v6 = vadd.f32 (!%p9902_p9), %v14938_v37, %v8704_v0  ;;  %v8809_v7 = vadd.f32 (!%p9902_p9), %v14942_v53, %v8705_v44  ;;  %v8711_v4 = vld [vmem:[#allocation3 + $0x40] sm:$0xff] (!%p9902_p9)  ;;  %v8712_v16 = vld [vmem:[#allocation3 + $0x48] sm:$0xff] (!%p9902_p9)  ;;  %v8813_v42 = vadd.f32 (!%p9902_p9), %v14934_v26, %v8709_v55  ;;  %v8718_v11 = vld [vmem:[#allocation3 + $0x78] sm:$0xff] (!%p9902_p9) }
 0x763   : > { %v8810_v41 = vadd.f32 (!%p9902_p9), %v14946_v25, %v8706_v9  ;;  %v8713_v13 = vld [vmem:[#allocation3 + $0x50] sm:$0xff] (!%p9902_p9)  ;;  %v8811_v49 = vadd.f32 (!%p9902_p9), %v14950_v40, %v8707_v62  ;;  %v8812_v45 = vadd.f32 (!%p9902_p9), %v14954_v29, %v8708_v63  ;;  %v8814_v32 = vadd.f32 (!%p9902_p9), %v14938_v37, %v8710_v14  ;;  %v8714_v56 = vld [vmem:[#allocation3 + $0x58] sm:$0xff] (!%p9902_p9)  ;;  %v8720_v38 = vld [vmem:[#allocation3 + $0x88] sm:$0xff] (!%p9902_p9) }
 0x764   : > { %8879 = vst [vmem:[%s12033_s29] sm:$0xff] (!%p9902_p9), %v8807_v39  ;;  %8880 = vst [vmem:[%s12033_s29 + $0x8] sm:$0xff] (!%p9902_p9), %v8808_v6  ;;  %v8815_v48 = vadd.f32 (!%p9902_p9), %v14942_v53, %v8711_v4  ;;  %v8816_v43 = vadd.f32 (!%p9902_p9), %v14946_v25, %v8712_v16  ;;  %v8817_v2 = vadd.f32 (!%p9902_p9), %v14950_v40, %v8713_v13  ;;  %v8721_v35 = vld [vmem:[#allocation3 + $0x90] sm:$0xff] (!%p9902_p9)  ;;  %v8722_v18 = vld [vmem:[#allocation3 + $0x98] sm:$0xff] (!%p9902_p9) }
 0x765   : > { %8881 = vst [vmem:[%s12033_s29 + $0x10] sm:$0xff] %v8809_v7  ;;  %8882 = vst [vmem:[%s12033_s29 + $0x18] sm:$0xff] %v8810_v41  ;;  %v8818_v52 = vadd.f32 %v14954_v29, %v8714_v56  ;;  %v8819_v22 = vadd.f32 %v14934_v26, %v8715_v19  ;;  %v8820_v21 = vadd.f32 %v14938_v37, %v8716_v33  ;;  %v8723_v15 = vld [vmem:[#allocation3 + $0xa0] sm:$0xff]  ;;  %v8724_v23 = vld [vmem:[#allocation3 + $0xa8] sm:$0xff] }
 0x766   : > { %8883 = vst [vmem:[%s12033_s29 + $0x20] sm:$0xff] %v8811_v49  ;;  %8884 = vst [vmem:[%s12033_s29 + $0x28] sm:$0xff] %v8812_v45  ;;  %v8821_v8 = vadd.f32 %v14942_v53, %v8717_v3  ;;  %v8822_v59 = vadd.f32 %v14946_v25, %v8718_v11  ;;  %v8823_v47 = vadd.f32 %v14950_v40, %v8719_v46  ;;  %v8725_v61 = vld [vmem:[#allocation3 + $0xb0] sm:$0xff]  ;;  %v8726_v50 = vld [vmem:[#allocation3 + $0xb8] sm:$0xff] }
 0x767   : > { %8885 = vst [vmem:[%s12033_s29 + $0x30] sm:$0xff] %v8813_v42  ;;  %8886 = vst [vmem:[%s12033_s29 + $0x38] sm:$0xff] %v8814_v32  ;;  %v8824_v57 = vadd.f32 %v14954_v29, %v8720_v38  ;;  %v8825_v30 = vadd.f32 %v14934_v26, %v8721_v35  ;;  %v8826_v36 = vadd.f32 %v14938_v37, %v8722_v18  ;;  %v8727_v54 = vld [vmem:[#allocation3 + $0xc0] sm:$0xff]  ;;  %v8728_v1 = vld [vmem:[#allocation3 + $0xc8] sm:$0xff] }
 0x768   : > { %8887 = vst [vmem:[%s12033_s29 + $0x40] sm:$0xff] %v8815_v48  ;;  %8888 = vst [vmem:[%s12033_s29 + $0x48] sm:$0xff] %v8816_v43  ;;  %v8827_v34 = vadd.f32 %v14942_v53, %v8723_v15  ;;  %v8828_v20 = vadd.f32 %v14946_v25, %v8724_v23  ;;  %v8829_v51 = vadd.f32 %v14950_v40, %v8725_v61  ;;  %v8729_v0 = vld [vmem:[#allocation3 + $0xd0] sm:$0xff]  ;;  %v8730_v24 = vld [vmem:[#allocation3 + $0xd8] sm:$0xff] }
 0x769   : > { %8889 = vst [vmem:[%s12033_s29 + $0x50] sm:$0xff] %v8817_v2  ;;  %8890 = vst [vmem:[%s12033_s29 + $0x58] sm:$0xff] %v8818_v52  ;;  %v8830_v17 = vadd.f32 %v14954_v29, %v8726_v50  ;;  %v8831_v31 = vadd.f32 %v14934_v26, %v8727_v54  ;;  %v8832_v12 = vadd.f32 %v14938_v37, %v8728_v1  ;;  %v8731_v60 = vld [vmem:[#allocation3 + $0xe0] sm:$0xff]  ;;  %v8732_v9 = vld [vmem:[#allocation3 + $0xe8] sm:$0xff] }
 0x76a   : > { %8891 = vst [vmem:[%s12033_s29 + $0x60] sm:$0xff] %v8819_v22  ;;  %8892 = vst [vmem:[%s12033_s29 + $0x68] sm:$0xff] %v8820_v21  ;;  %v8833_v28 = vadd.f32 %v14942_v53, %v8729_v0  ;;  %v8834_v44 = vadd.f32 %v14946_v25, %v8730_v24  ;;  %v8835_v58 = vadd.f32 %v14950_v40, %v8731_v60  ;;  %v8733_v27 = vld [vmem:[#allocation3 + $0xf0] sm:$0xff]  ;;  %v8734_v62 = vld [vmem:[#allocation3 + $0xf8] sm:$0xff] }
 0x76b   : > { %8893 = vst [vmem:[%s12033_s29 + $0x70] sm:$0xff] %v8821_v8  ;;  %8894 = vst [vmem:[%s12033_s29 + $0x78] sm:$0xff] %v8822_v59  ;;  %v8836_v10 = vadd.f32 %v14954_v29, %v8732_v9  ;;  %v8837_v63 = vadd.f32 %v14934_v26, %v8733_v27  ;;  %v8838_v5 = vadd.f32 %v14938_v37, %v8734_v62  ;;  %v8735_v55 = vld [vmem:[#allocation3 + $0x100] sm:$0xff]  ;;  %v8736_v14 = vld [vmem:[#allocation3 + $0x108] sm:$0xff] }
 0x76c   : > { %8895 = vst [vmem:[%s12033_s29 + $0x80] sm:$0xff] %v8823_v47  ;;  %8896 = vst [vmem:[%s12033_s29 + $0x88] sm:$0xff] %v8824_v57  ;;  %v8737_v39 = vld [vmem:[#allocation3 + $0x110] sm:$0xff]  ;;  %v8839_v6 = vadd.f32 %v14942_v53, %v8735_v55  ;;  %v8840_v7 = vadd.f32 %v14946_v25, %v8736_v14  ;;  %v8738_v4 = vld [vmem:[#allocation3 + $0x118] sm:$0xff] }
 0x76d   : > { %8897 = vst [vmem:[%s12033_s29 + $0x90] sm:$0xff] %v8825_v30  ;;  %8898 = vst [vmem:[%s12033_s29 + $0x98] sm:$0xff] %v8826_v36  ;;  %v8841_v41 = vadd.f32 %v14950_v40, %v8737_v39  ;;  %v8739_v16 = vld [vmem:[#allocation3 + $0x120] sm:$0xff]  ;;  %v8740_v13 = vld [vmem:[#allocation3 + $0x128] sm:$0xff]  ;;  %v8842_v49 = vadd.f32 %v14954_v29, %v8738_v4 }
 0x76e   : > { %8899 = vst [vmem:[%s12033_s29 + $0xa0] sm:$0xff] %v8827_v34  ;;  %8900 = vst [vmem:[%s12033_s29 + $0xa8] sm:$0xff] %v8828_v20  ;;  %v8843_v45 = vadd.f32 %v14934_v26, %v8739_v16  ;;  %v8844_v42 = vadd.f32 %v14938_v37, %v8740_v13  ;;  %v8741_v32 = vld [vmem:[#allocation3 + $0x130] sm:$0xff]  ;;  %v8742_v56 = vld [vmem:[#allocation3 + $0x138] sm:$0xff] }
 0x76f   : > { %8901 = vst [vmem:[%s12033_s29 + $0xb0] sm:$0xff] %v8829_v51  ;;  %8902 = vst [vmem:[%s12033_s29 + $0xb8] sm:$0xff] %v8830_v17  ;;  %v8743_v19 = vld [vmem:[#allocation3 + $0x140] sm:$0xff]  ;;  %v8845_v33 = vadd.f32 %v14942_v53, %v8741_v32  ;;  %v8846_v48 = vadd.f32 %v14946_v25, %v8742_v56  ;;  %v8744_v2 = vld [vmem:[#allocation3 + $0x148] sm:$0xff] }
 0x770   : > { %8903 = vst [vmem:[%s12033_s29 + $0xc0] sm:$0xff] %v8831_v31  ;;  %8904 = vst [vmem:[%s12033_s29 + $0xc8] sm:$0xff] %v8832_v12  ;;  %v8847_v43 = vadd.f32 %v14950_v40, %v8743_v19  ;;  %v8745_v52 = vld [vmem:[#allocation3 + $0x150] sm:$0xff]  ;;  %v8746_v3 = vld [vmem:[#allocation3 + $0x158] sm:$0xff]  ;;  %v8848_v11 = vadd.f32 %v14954_v29, %v8744_v2 }
 0x771   : > { %8905 = vst [vmem:[%s12033_s29 + $0xd0] sm:$0xff] %v8833_v28  ;;  %8906 = vst [vmem:[%s12033_s29 + $0xd8] sm:$0xff] %v8834_v44  ;;  %v8849_v46 = vadd.f32 %v14934_v26, %v8745_v52  ;;  %v8850_v22 = vadd.f32 %v14938_v37, %v8746_v3  ;;  %v8747_v21 = vld [vmem:[#allocation3 + $0x160] sm:$0xff]  ;;  %v8748_v8 = vld [vmem:[#allocation3 + $0x168] sm:$0xff] }
 0x772   : > { %8907 = vst [vmem:[%s12033_s29 + $0xe0] sm:$0xff] %v8835_v58  ;;  %8908 = vst [vmem:[%s12033_s29 + $0xe8] sm:$0xff] %v8836_v10  ;;  %v8749_v59 = vld [vmem:[#allocation3 + $0x170] sm:$0xff]  ;;  %v8851_v38 = vadd.f32 %v14942_v53, %v8747_v21  ;;  %v8852_v35 = vadd.f32 %v14946_v25, %v8748_v8  ;;  %v8750_v47 = vld [vmem:[#allocation3 + $0x178] sm:$0xff] }
 0x773   : > { %8909 = vst [vmem:[%s12033_s29 + $0xf0] sm:$0xff] %v8837_v63  ;;  %8910 = vst [vmem:[%s12033_s29 + $0xf8] sm:$0xff] %v8838_v5  ;;  %v8853_v18 = vadd.f32 %v14950_v40, %v8749_v59  ;;  %v8751_v57 = vld [vmem:[#allocation3 + $0x180] sm:$0xff]  ;;  %v8752_v30 = vld [vmem:[#allocation3 + $0x188] sm:$0xff]  ;;  %v8854_v36 = vadd.f32 %v14954_v29, %v8750_v47 }
 0x774   : > { %8911 = vst [vmem:[%s12033_s29 + $0x100] sm:$0xff] %v8839_v6  ;;  %8912 = vst [vmem:[%s12033_s29 + $0x108] sm:$0xff] %v8840_v7  ;;  %v8855_v15 = vadd.f32 %v14934_v26, %v8751_v57  ;;  %v8856_v23 = vadd.f32 %v14938_v37, %v8752_v30  ;;  %v8753_v61 = vld [vmem:[#allocation3 + $0x190] sm:$0xff]  ;;  %v8754_v34 = vld [vmem:[#allocation3 + $0x198] sm:$0xff] }
 0x775   : > { %8913 = vst [vmem:[%s12033_s29 + $0x110] sm:$0xff] %v8841_v41  ;;  %8914 = vst [vmem:[%s12033_s29 + $0x118] sm:$0xff] %v8842_v49  ;;  %v8755_v20 = vld [vmem:[#allocation3 + $0x1a0] sm:$0xff]  ;;  %v8857_v51 = vadd.f32 %v14942_v53, %v8753_v61  ;;  %v8858_v50 = vadd.f32 %v14946_v25, %v8754_v34  ;;  %v8756_v1 = vld [vmem:[#allocation3 + $0x1a8] sm:$0xff] }
 0x776   : > { %8915 = vst [vmem:[%s12033_s29 + $0x120] sm:$0xff] %v8843_v45  ;;  %8916 = vst [vmem:[%s12033_s29 + $0x128] sm:$0xff] %v8844_v42  ;;  %v8859_v54 = vadd.f32 %v14950_v40, %v8755_v20  ;;  %v8757_v17 = vld [vmem:[#allocation3 + $0x1b0] sm:$0xff]  ;;  %v8758_v31 = vld [vmem:[#allocation3 + $0x1b8] sm:$0xff]  ;;  %v8860_v12 = vadd.f32 %v14954_v29, %v8756_v1 }
 0x777   : > { %8917 = vst [vmem:[%s12033_s29 + $0x130] sm:$0xff] %v8845_v33  ;;  %8918 = vst [vmem:[%s12033_s29 + $0x138] sm:$0xff] %v8846_v48  ;;  %v8861_v0 = vadd.f32 %v14934_v26, %v8757_v17  ;;  %v8862_v24 = vadd.f32 %v14938_v37, %v8758_v31  ;;  %v8759_v60 = vld [vmem:[#allocation3 + $0x1c0] sm:$0xff]  ;;  %v8760_v28 = vld [vmem:[#allocation3 + $0x1c8] sm:$0xff] }
 0x778   : > { %8919 = vst [vmem:[%s12033_s29 + $0x140] sm:$0xff] %v8847_v43  ;;  %8920 = vst [vmem:[%s12033_s29 + $0x148] sm:$0xff] %v8848_v11  ;;  %v8761_v44 = vld [vmem:[#allocation3 + $0x1d0] sm:$0xff]  ;;  %v8863_v58 = vadd.f32 %v14942_v53, %v8759_v60  ;;  %v8864_v9 = vadd.f32 %v14946_v25, %v8760_v28  ;;  %v8762_v62 = vld [vmem:[#allocation3 + $0x1d8] sm:$0xff] }
 0x779   : > { %8921 = vst [vmem:[%s12033_s29 + $0x150] sm:$0xff] %v8849_v46  ;;  %8922 = vst [vmem:[%s12033_s29 + $0x158] sm:$0xff] %v8850_v22  ;;  %v8865_v27 = vadd.f32 %v14950_v40, %v8761_v44  ;;  %v8763_v10 = vld [vmem:[#allocation3 + $0x1e0] sm:$0xff]  ;;  %v8764_v63 = vld [vmem:[#allocation3 + $0x1e8] sm:$0xff]  ;;  %v8866_v5 = vadd.f32 %v14954_v29, %v8762_v62 }
 0x77a   : > { %8923 = vst [vmem:[%s12033_s29 + $0x160] sm:$0xff] %v8851_v38  ;;  %8924 = vst [vmem:[%s12033_s29 + $0x168] sm:$0xff] %v8852_v35  ;;  %v8867_v55 = vadd.f32 %v14934_v26, %v8763_v10  ;;  %v8868_v14 = vadd.f32 %v14938_v37, %v8764_v63  ;;  %v8765_v39 = vld [vmem:[#allocation3 + $0x1f0] sm:$0xff]  ;;  %v8766_v6 = vld [vmem:[#allocation3 + $0x1f8] sm:$0xff] }
 0x77b   : > { %8925 = vst [vmem:[%s12033_s29 + $0x170] sm:$0xff] %v8853_v18  ;;  %8926 = vst [vmem:[%s12033_s29 + $0x178] sm:$0xff] %v8854_v36  ;;  %v8767_v7 = vld [vmem:[#allocation3 + $0x200] sm:$0xff]  ;;  %v8869_v41 = vadd.f32 %v14942_v53, %v8765_v39  ;;  %v8870_v4 = vadd.f32 %v14946_v25, %v8766_v6  ;;  %v8768_v13 = vld [vmem:[#allocation3 + $0x208] sm:$0xff] }
 0x77c   : > { %8927 = vst [vmem:[%s12033_s29 + $0x180] sm:$0xff] %v8855_v15  ;;  %8928 = vst [vmem:[%s12033_s29 + $0x188] sm:$0xff] %v8856_v23  ;;  %v8871_v16 = vadd.f32 %v14950_v40, %v8767_v7  ;;  %v8769_v49 = vld [vmem:[#allocation3 + $0x210] sm:$0xff]  ;;  %v8770_v45 = vld [vmem:[#allocation3 + $0x218] sm:$0xff]  ;;  %v8872_v42 = vadd.f32 %v14954_v29, %v8768_v13 }
 0x77d   : > { %8929 = vst [vmem:[%s12033_s29 + $0x190] sm:$0xff] %v8857_v51  ;;  %8930 = vst [vmem:[%s12033_s29 + $0x198] sm:$0xff] %v8858_v50  ;;  %v8873_v32 = vadd.f32 %v14934_v26, %v8769_v49  ;;  %v8874_v56 = vadd.f32 %v14938_v37, %v8770_v45  ;;  %v8771_v19 = vld [vmem:[#allocation3 + $0x220] sm:$0xff]  ;;  %v8772_v33 = vld [vmem:[#allocation3 + $0x228] sm:$0xff] }
 0x77e   : > { %8931 = vst [vmem:[%s12033_s29 + $0x1a0] sm:$0xff] %v8859_v54  ;;  %8932 = vst [vmem:[%s12033_s29 + $0x1a8] sm:$0xff] %v8860_v12  ;;  %v8773_v48 = vld [vmem:[#allocation3 + $0x230] sm:$0xff]  ;;  %v8875_v43 = vadd.f32 %v14942_v53, %v8771_v19  ;;  %v8876_v2 = vadd.f32 %v14946_v25, %v8772_v33  ;;  %v8774_v3 = vld [vmem:[#allocation3 + $0x238] sm:$0xff] }
 0x77f   : > { %8933 = vst [vmem:[%s12033_s29 + $0x1b0] sm:$0xff] %v8861_v0  ;;  %8934 = vst [vmem:[%s12033_s29 + $0x1b8] sm:$0xff] %v8862_v24  ;;  %v8877_v52 = vadd.f32 %v14950_v40, %v8773_v48  ;;  %v8878_v26 = vadd.f32 %v14954_v29, %v8774_v3 }
 0x780   : > { %8935 = vst [vmem:[%s12033_s29 + $0x1c0] sm:$0xff] %v8863_v58  ;;  %8936 = vst [vmem:[%s12033_s29 + $0x1c8] sm:$0xff] %v8864_v9 }
 0x781   : > { %8937 = vst [vmem:[%s12033_s29 + $0x1d0] sm:$0xff] %v8865_v27  ;;  %8938 = vst [vmem:[%s12033_s29 + $0x1d8] sm:$0xff] %v8866_v5 }
 0x782   : > { %8939 = vst [vmem:[%s12033_s29 + $0x1e0] sm:$0xff] %v8867_v55  ;;  %8940 = vst [vmem:[%s12033_s29 + $0x1e8] sm:$0xff] %v8868_v14 }
 0x783   : > { %8941 = vst [vmem:[%s12033_s29 + $0x1f0] sm:$0xff] %v8869_v41  ;;  %8942 = vst [vmem:[%s12033_s29 + $0x1f8] sm:$0xff] %v8870_v4 }
 0x784   : > { %8943 = vst [vmem:[%s12033_s29 + $0x200] sm:$0xff] %v8871_v16  ;;  %8944 = vst [vmem:[%s12033_s29 + $0x208] sm:$0xff] %v8872_v42 }
 0x785   : > { %8945 = vst [vmem:[%s12033_s29 + $0x210] sm:$0xff] %v8873_v32  ;;  %8946 = vst [vmem:[%s12033_s29 + $0x218] sm:$0xff] %v8874_v56 }
 0x786   : > { %8947 = vst [vmem:[%s12033_s29 + $0x220] sm:$0xff] %v8875_v43  ;;  %8948 = vst [vmem:[%s12033_s29 + $0x228] sm:$0xff] %v8876_v2 }
 0x787   : > { %8949 = vst [vmem:[%s12033_s29 + $0x230] sm:$0xff] %v8877_v52  ;;  %8950 = vst [vmem:[%s12033_s29 + $0x238] sm:$0xff] %v8878_v26 }
 0x788 PF: > { %s15505_s24 = sld [smem:[#allocation20_spill]]  ;;  %s8966_s0 = sshll.u32 %s12033_s29, 4  ;;  %s15102_s0 = int_to_ptr.vmem [resolvable:$true] %s8966_s0 }
 0x789   : > { %s15506_s25 = sld [smem:[#allocation89_spill]]  ;;  %s8952_s7 = scalar_lea.sflag [#allocation6], %s12007_s13 }
 0x78a   : > { %s11534_s20 = scalar_lea.vmem %s15102_s0, 9216  ;;  %p15508_p7 = scmp.ne.s32.totalorder %s15303_s12, 0 }
 0x78b   : > { %p11535_p4 = scmp.ne.s32.totalorder %s15102_s0, %s11534_s20  ;;  %s11677_s9 = smov [#allocation12]  }
 0x78c   : > { %s11538_s16 = sshll.u32 %s11677_s9, 4  ;;  %s11539_s16 = int_to_ptr.vmem [resolvable:$false] %s11538_s16 }
 0x78d   : > { %p11536_p2 = pnand %p11535_p4, %p15508_p7  ;;  %s11540_s8 = scalar_lea.vmem %s11539_s16, 18432 }
 0x78e   : > { %s10449_s14 = smul.u32 9216, %s15505_s24  ;;  %p11541_p1 = scmp.lt.s32.totalorder %s15102_s0, %s11539_s16 }
 0x78f   : > { %s15507_s1 = smov %s15506_s25  ;;  %p11537_p0 = pneg %p11536_p2 }
 0x790   : > { %s15107_s27 = scalar_lea.hbm %s15506_s25, %s10449_s14  ;;  %p11542_p8 = scmp.lt.s32.totalorder %s11540_s8, %s11534_s20 }
 0x792   : > { %p11543_p6 = por %p11542_p8, %p11541_p1 }
 0x794   : > { %p11544_p3 = pnand %p11543_p6, %p11537_p0 }
 0x796   : > { %11547 = shalt.err (!%p11544_p3)
}
 0x797   : > { %s11548_s23 = scalar_lea.hbm %s15107_s27, 9216  ;;  %s11552_s21 = scalar_lea.hbm %s15507_s1, 36864 }
 0x798   : > { %p11549_p10 = scmp.ne.s32.totalorder %s15107_s27, %s11548_s23  ;;  %p11553_p12 = scmp.lt.u32.totalorder %s15107_s27, %s15507_s1 }
 0x799   : > { %p11554_p13 = scmp.lt.u32.totalorder %s11552_s21, %s11548_s23  ;;  %p11556_p4 = scmp.lt.u32.totalorder %s11548_s23, %s15107_s27 }
 0x79a   : > { %p11550_p11 = pnand %p11549_p10, %p15508_p7 }
 0x79b   : > { %p11555_p9 = por %p11554_p13, %p11553_p12 }
 0x79c   : > { %p11551_p5 = pneg %p11550_p11 }
 0x79d   : > { %p11557_p2 = por %p11556_p4, %p11555_p9 }
 0x79f   : > { %p11558_p0 = pnand %p11557_p2, %p11551_p5 }
 0x7a1   : > { %11561 = shalt.err (!%p11558_p0)
}
 0x7a2   : > { %s11678_s29 = smov 768   ;;  %s11679_s6 = smov 48  }
 0x7a3   : > { %10428 = dma.vmem_to_hbm [thread:$0]  (%p15508_p7), %s15102_s0, 9216, %s15107_s27, %s8952_s7, %s11678_s29, %s11678_s29, %s11679_s6  }
 0x7a4 PF: > { %s15509_s11 = sld [smem:[#allocation18_spill]]  ;;  %s15510_s24 = sld [smem:[#allocation26_spill]] }
 0x7a5   : > { %p10450_p1 = scmp.ge.s32.totalorder %s11664_s28, 2 }
 0x7aa   : > { %s8981_s14 = sand.u32 1, %s15509_s11   ;;  %p15511_p8 = scmp.ne.s32.totalorder %s15510_s24, 0 }
 0x7ab   : > { %s8982_s17 = scalar_lea.sflag [#allocation6], %s8981_s14 }
 0x7ac   : > { %p10444_p6 = pnand %p10450_p1, %p15511_p8 }
 0x7ae   : > { %11619 = dma.done.wait (!%p10444_p6), %s8982_s17, 9216  }
 0x7af   : > { %11621 = vsyncadd (!%p10444_p6), %s8982_s17, 4294958080  ;;  %s27_s28 = sadd.s32 1, %s11664_s28   ;;  %s15512_s25 = sld [smem:[#allocation17_spill]] }
 0x7b0   : > { %p24_p3 = scmp.ge.s32.totalorder %s27_s28, 14   ;;  %s15513_s20 = sld [smem:[#allocation23_spill]] }
 0x7b1   : > { %s15514_s12 = sld [smem:[#allocation19_spill]]  ;;  %s15515_s23 = sld [smem:[#allocation25_spill]] }
 0x7b2   : > { %s15516_s13 = sld [smem:[#allocation21_spill]]  ;;  %s15517_s0 = sld [smem:[#allocation22_spill]] }
 0x7b3   : > { %s15518_s27 = sld [smem:[#allocation24_spill]]  ;;  %s15519_s18 = smov %s11628_s19 }
 0x7b4   : > { %s15521_s21 = smov %s11640_s22  ;;  %s15523_s24 = smov %s11656_s26 }
 0x7b5   : > { %s15520_s19 = smov %s15512_s25  ;;  %26 = sbr.rel (!%p24_p3) target bundleno = 17 (0x11), region = 138 }
 0x7b7   : > { %s15522_s22 = smov %s15514_s12 }
 0x7b8   : > { %s15524_s25 = smov %s15516_s13  ;;  %s15525_s26 = smov %s15517_s0 }
 0x7bc   :  { %8987 = vsyncpa [#allocation5], 1 }
 0x7bd   :  { %8989 = vsyncpa [#allocation5 + $0x1], 1 }
 0x7be   :  { %8990 = vsyncpa [#allocation8], 1 }
 0x7bf   :  { %8992 = vsyncpa [#allocation8 + $0x1], 1 }
 0x7c0   :  { %8993 = vsyncpa [#allocation11], 1 }
 0x7c1   :  { %8995 = vsyncpa [#allocation11 + $0x1], 1 }
 0x7c2   :  { %8996 = vsyncpa [#allocation6], 1 }
 0x7c3   :  { %8998 = vsyncpa [#allocation6 + $0x1], 1 }

</bundles_post_ra>
